<compile_context>
chip_gen: v6e
topology: v6e:2x2x1
jax: 0.10.0
libtpu: 0.0.40
codegen_flags: <defaults>
</compile_context>

<pallas_src>
import jax
import jax.numpy as jnp
from jax import lax
from jax.experimental import pallas as pl
from jax.experimental.pallas import tpu as pltpu


_VMEM = pl.BlockSpec(memory_space=pltpu.MemorySpace.VMEM)


# ------------------------------ fused kernel ------------------------------- #

def _make_fused_classifier_kernel(num_layers, S, B, H):
    """Builds the fused kernel for `num_layers` bidirectional GRU layers."""
    f32 = jnp.float32
    SB = S * B

    def kernel(*refs):
        # -------- unpack refs (inputs..., output, scratch...) --------------
        tok_ref, scale_ref, emb_ref, masks_ref = refs[0:4]
        p = 4
        layer_refs = []
        for l in range(num_layers):
            n = 4 if l == 0 else 5
            layer_refs.append(refs[p:p + n])
            p += n
        fcw_f_ref, fcw_b_ref, fcb_ref = refs[p:p + 3]
        p += 3
        logits_ref = refs[p]
        gi_scr = refs[p + 1]     # (6, S, B, H)  hoisted input projections
        h_scr = refs[p + 2]      # (2, S, B, H)  per-direction hidden states

        V, _ = emb_ref.shape

        # -------- embedding gather (one-hot matmul) fused with mask scale ---
        iota = lax.broadcasted_iota(jnp.int32, (SB, V), 1)
        onehot = (tok_ref[...] == iota).astype(f32)
        x_flat = jnp.dot(onehot, emb_ref[...],
                         preferred_element_type=f32) * scale_ref[...]   # (S*B, E)

        # -------- stacked bidirectional GRU layers --------------------------
        for l in range(num_layers):
            if l == 0:
                w_i_ref, w_h_ref, b_gi_ref, b_hn_ref = layer_refs[l]
                # Hoisted input projection: one batched matmul per (dir, gate).
                for dg in range(6):
                    gi = (jnp.dot(x_flat, w_i_ref[dg],
                                  preferred_element_type=f32)
                          + b_gi_ref[dg])
                    gi_scr[dg] = gi.reshape(S, B, H)
            else:
                wif_ref, wib_ref, w_h_ref, b_gi_ref, b_hn_ref = layer_refs[l]
                fwd_flat = h_scr[0].reshape(SB, H)
                bwd_flat = h_scr[1].reshape(SB, H)
                for dg in range(6):
                    gi = (jnp.dot(fwd_flat, wif_ref[dg],
                                  preferred_element_type=f32)
                          + jnp.dot(bwd_flat, wib_ref[dg],
                                    preferred_element_type=f32)
                          + b_gi_ref[dg])
                    gi_scr[dg] = gi.reshape(S, B, H)

            # Loop-invariant recurrent weights / biases, hoisted once.
            wh = [w_h_ref[k] for k in range(6)]               # 6 x (H, H)
            bhn_f = jnp.broadcast_to(b_hn_ref[0], (B, H))
            bhn_b = jnp.broadcast_to(b_hn_ref[1], (B, H))

            def step(t, carry, wh=wh, bhn_f=bhn_f, bhn_b=bhn_b):
                h_f, h_b = carry
                tb = S - 1 - t

                # forward direction, gates [r | z | n]
                ghr = jnp.dot(h_f, wh[0], preferred_element_type=f32)
                ghz = jnp.dot(h_f, wh[1], preferred_element_type=f32)
                ghn = jnp.dot(h_f, wh[2], preferred_element_type=f32) + bhn_f
                r = jax.nn.sigmoid(gi_scr[0, t] + ghr)
                z = jax.nn.sigmoid(gi_scr[1, t] + ghz)
                n = jnp.tanh(gi_scr[2, t] + r * ghn)
                h_f_new = (1.0 - z) * n + z * h_f
                h_scr[0, t] = h_f_new

                # backward direction (independent chain -> overlaps with fwd)
                ghr_b = jnp.dot(h_b, wh[3], preferred_element_type=f32)
                ghz_b = jnp.dot(h_b, wh[4], preferred_element_type=f32)
                ghn_b = jnp.dot(h_b, wh[5], preferred_element_type=f32) + bhn_b
                rb = jax.nn.sigmoid(gi_scr[3, tb] + ghr_b)
                zb = jax.nn.sigmoid(gi_scr[4, tb] + ghz_b)
                nb = jnp.tanh(gi_scr[5, tb] + rb * ghn_b)
                h_b_new = (1.0 - zb) * nb + zb * h_b
                h_scr[1, tb] = h_b_new

                return (h_f_new, h_b_new)

            h0 = jnp.zeros((B, H), f32)
            lax.fori_loop(0, S, step, (h0, h0), unroll=True)

        # -------- masked max-pool over time + final linear -------------------
        mask = masks_ref[...] > 0.0                              # (S, B, 1) bool
        neg = f32(-1e6)
        pooled_f = jnp.max(jnp.where(mask, h_scr[0], neg), axis=0)   # (B, H)
        pooled_b = jnp.max(jnp.where(mask, h_scr[1], neg), axis=0)   # (B, H)
        # Dropout is identity at inference.
        logits_ref[...] = (
            jnp.dot(pooled_f, fcw_f_ref[...], preferred_element_type=f32)
            + jnp.dot(pooled_b, fcw_b_ref[...], preferred_element_type=f32)
            + fcb_ref[...])

    return kernel


# ------------------------------- wrapper ------------------------------------ #

def _split_gates(w, H):
    # w: (D, 3H), gate order [r | z | n]  ->  (3, D, H)
    return jnp.stack([w[:, 0:H], w[:, H:2 * H], w[:, 2 * H:3 * H]], axis=0)


def _pack_layer(lp, H):
    """Pack one layer's params into direction-major, gate-major refs."""
    w_i = jnp.concatenate([_split_gates(lp["w_if"], H),
                           _split_gates(lp["w_ib"], H)], axis=0)       # (6, D, H)
    w_h = jnp.concatenate([_split_gates(lp["w_hf"], H),
                           _split_gates(lp["w_hb"], H)], axis=0)       # (6, H, H)

    def fold_b(bi, bh):
        # r, z: fold the recurrent bias into the (hoisted) input projection.
        # n   : only the input bias (b_hn stays inside r * (h @ w_hn + b_hn)).
        return jnp.stack([bi[:, 0:H] + bh[:, 0:H],
                          bi[:, H:2 * H] + bh[:, H:2 * H],
                          bi[:, 2 * H:3 * H]], axis=0)                 # (3, 1, H)

    b_gi = jnp.concatenate([fold_b(lp["b_if"], lp["b_hf"]),
                            fold_b(lp["b_ib"], lp["b_hb"])], axis=0)   # (6, 1, H)
    b_hn = jnp.stack([lp["b_hf"][:, 2 * H:3 * H],
                      lp["b_hb"][:, 2 * H:3 * H]], axis=0)             # (2, 1, H)
    return w_i, w_h, b_gi, b_hn


def classifier_forward(params, inputs, masks, z=None):
    """Pallas equivalent of Classifier.forward(inputs, masks, z) (inference)."""
    emb = params["embedding"].astype(jnp.float32)
    B, S = inputs.shape
    V, E = emb.shape
    L = len(params["gru_layers"])
    H = params["gru_layers"][0]["w_hf"].shape[0]
    C = params["fc_w"].shape[1]

    scale = masks if z is None else masks * z
    # Cheap XLA-side layout plumbing: time-major, flattened token/scale vectors.
    tok_flat = jnp.transpose(inputs).reshape(S * B, 1).astype(jnp.int32)
    scale_flat = jnp.transpose(scale).reshape(S * B, 1).astype(jnp.float32)
    masks_tm = jnp.transpose(masks).astype(jnp.float32)[:, :, None]    # (S, B, 1)

    args = [tok_flat, scale_flat, emb, masks_tm]
    for l, lp in enumerate(params["gru_layers"]):
        w_i, w_h, b_gi, b_hn = _pack_layer(lp, H)
        if l == 0:
            args += [w_i, w_h, b_gi, b_hn]
        else:
            # Split the (2H -> 3H) input weights into forward/backward halves
            # so the previous layer never has to concatenate its directions.
            args += [w_i[:, :H, :], w_i[:, H:, :], w_h, b_gi, b_hn]

    fc_w = params["fc_w"].astype(jnp.float32)
    fc_b = params["fc_b"].astype(jnp.float32)
    args += [fc_w[:H, :], fc_w[H:, :], fc_b]

    kernel = _make_fused_classifier_kernel(L, S, B, H)
    return pl.pallas_call(
        kernel,
        out_shape=jax.ShapeDtypeStruct((B, C), jnp.float32),
        in_specs=[_VMEM] * len(args),
        out_specs=_VMEM,
        scratch_shapes=[
            pltpu.VMEM((6, S, B, H), jnp.float32),   # hoisted input projections
            pltpu.VMEM((2, S, B, H), jnp.float32),   # per-direction hidden states
        ],
    )(*args)


# --------------------------- pure-JAX reference ---------------------------- #

def _gru_cell_ref(x_t, h, wi, wh, bi, bh):
    H = wh.shape[0]
    gi = x_t @ wi + bi
    gh = h @ wh + bh
    r = jax.nn.sigmoid(gi[:, 0:H] + gh[:, 0:H])
    z = jax.nn.sigmoid(gi[:, H:2 * H] + gh[:, H:2 * H])
    n = jnp.tanh(gi[:, 2 * H:3 * H] + r * gh[:, 2 * H:3 * H])
    return (1.0 - z) * n + z * h


def _bigru_layer_ref(x_tm, lp):
    S, B, _ = x_tm.shape
    H = lp["w_hf"].shape[0]

    def run(wi, wh, bi, bh, xs):
        def step(h, x_t):
            h_new = _gru_cell_ref(x_t, h, wi, wh, bi, bh)
            return h_new, h_new
        _, ys = jax.lax.scan(step, jnp.zeros((B, H), jnp.float32), xs)
        return ys

    fwd = run(lp["w_if"], lp["w_hf"], lp["b_if"], lp["b_hf"], x_tm)
    bwd = run(lp["w_ib"], lp["w_hb"], lp["b_ib"], lp["b_hb"], x_tm[::-1])[::-1]
    return jnp.concatenate([fwd, bwd], axis=-1)


def classifier_forward_ref(params, inputs, masks, z=None):
    emb = params["embedding"][inputs]                                  # (B, S, E)
    scale = masks if z is None else masks * z
    x = emb * scale[..., None]
    x_tm = jnp.transpose(x, (1, 0, 2))                                 # (S, B, E)
    for lp in params["gru_layers"]:
        x_tm = _bigru_layer_ref(x_tm, lp)
    m_tm = jnp.transpose(masks)[:, :, None]                            # (S, B, 1)
    y = x_tm * m_tm + (1.0 - m_tm) * (-1e6)
    pooled = jnp.max(y, axis=0)                                        # (B, 2H)
    return pooled @ params["fc_w"] + params["fc_b"][0]


# --------------------------------- test ------------------------------------ #

if __name__ == "__main__":
    key = jax.random.PRNGKey(0)
    B, S = 2, 8            # batch, seq_length
    V, E = 32, 16          # vocab_size, embedding_dim
    HID, L, C = 32, 2, 4   # hidden_dim, num_layers, num_class
    H = HID // 2           # per-direction hidden

    ks = jax.random.split(key, 6)
    tokens = jax.random.randint(ks[0], (B, S), 0, V, dtype=jnp.int32)
    lengths = jnp.array([S, 5])
    masks = (jnp.arange(S)[None, :] < lengths[:, None]).astype(jnp.float32)

    def w(kk, shape, scale=0.2):
        return jax.random.normal(kk, shape, dtype=jnp.float32) * scale

    layer_keys = jax.random.split(ks[1], L)
    gru_layers = []
    D = E
    for layer in range(L):
        lk = jax.random.split(layer_keys[layer], 8)
        gru_layers.append(dict(
            w_if=w(lk[0], (D, 3 * H)), w_hf=w(lk[1], (H, 3 * H)),
            b_if=w(lk[2], (1, 3 * H), 0.1), b_hf=w(lk[3], (1, 3 * H), 0.1),
            w_ib=w(lk[4], (D, 3 * H)), w_hb=w(lk[5], (H, 3 * H)),
            b_ib=w(lk[6], (1, 3 * H), 0.1), b_hb=w(lk[7], (1, 3 * H), 0.1),
        ))
        D = 2 * H

    params = dict(
        embedding=w(ks[2], (V, E), 0.5),
        gru_layers=gru_layers,
        fc_w=w(ks[3], (2 * H, C)),
        fc_b=w(ks[4], (1, C), 0.1),
    )

    logits = jax.block_until_ready(classifier_forward(params, tokens, masks))
    ref = classifier_forward_ref(params, tokens, masks)

    assert logits.shape == (B, C) and logits.dtype == jnp.float32
    max_err = float(jnp.max(jnp.abs(logits - ref)))
    assert bool(jnp.allclose(logits, ref, atol=1e-2, rtol=1e-2)), f"max abs err {max_err}"

    print("KERNEL_OK")
</pallas_src>

<mosaic_0001>
module attributes {stable_mosaic.version = 11 : i64} {
  func.func @kernel(%arg0: memref<16x1xi32, #tpu.memory_space<vmem>>, %arg1: memref<16x1xf32, #tpu.memory_space<vmem>>, %arg2: memref<32x16xf32, #tpu.memory_space<vmem>>, %arg3: memref<8x2x1xf32, #tpu.memory_space<vmem>>, %arg4: memref<6x16x16xf32, #tpu.memory_space<vmem>>, %arg5: memref<6x16x16xf32, #tpu.memory_space<vmem>>, %arg6: memref<6x1x16xf32, #tpu.memory_space<vmem>>, %arg7: memref<2x1x16xf32, #tpu.memory_space<vmem>>, %arg8: memref<6x16x16xf32, #tpu.memory_space<vmem>>, %arg9: memref<6x16x16xf32, #tpu.memory_space<vmem>>, %arg10: memref<6x16x16xf32, #tpu.memory_space<vmem>>, %arg11: memref<6x1x16xf32, #tpu.memory_space<vmem>>, %arg12: memref<2x1x16xf32, #tpu.memory_space<vmem>>, %arg13: memref<16x4xf32, #tpu.memory_space<vmem>>, %arg14: memref<16x4xf32, #tpu.memory_space<vmem>>, %arg15: memref<1x4xf32, #tpu.memory_space<vmem>>, %arg16: memref<2x4xf32, #tpu.memory_space<vmem>>, %arg17: memref<6x8x2x16xf32, #tpu.memory_space<vmem>>, %arg18: memref<2x8x2x16xf32, #tpu.memory_space<vmem>>) attributes {dimension_semantics = [], scalar_prefetch = 0 : i64, scratch_operands = 2 : i64, tpu.core_type = #tpu.core_type<tc>} {
    %0 = tpu.iota {dimensions = array<i32: 1>} : vector<16x32xi32>
    %c0 = arith.constant 0 : index
    %c0_0 = arith.constant 0 : index
    %1 = vector.load %arg0[%c0, %c0_0] : memref<16x1xi32, #tpu.memory_space<vmem>>, vector<16x1xi32>
    %2 = vector.broadcast %1 : vector<16x1xi32> to vector<16x32xi32>
    %3 = arith.cmpi eq, %2, %0 : vector<16x32xi32>
    %4 = arith.extui %3 : vector<16x32xi1> to vector<16x32xi32>
    %5 = arith.sitofp %4 : vector<16x32xi32> to vector<16x32xf32>
    %c0_1 = arith.constant 0 : index
    %c0_2 = arith.constant 0 : index
    %6 = vector.load %arg2[%c0_1, %c0_2] : memref<32x16xf32, #tpu.memory_space<vmem>>, vector<32x16xf32>
    %cst = arith.constant dense<0.000000e+00> : vector<16x16xf32>
    %7 = tpu.matmul %5, %6, %cst {dimension_numbers = #tpu.dot_dimension_numbers<[1], [0], [0], [1], [0, 0, 1, 1], [], []>} : vector<16x32xf32>, vector<32x16xf32>, vector<16x16xf32> -> vector<16x16xf32>
    %c0_3 = arith.constant 0 : index
    %c0_4 = arith.constant 0 : index
    %8 = vector.load %arg1[%c0_3, %c0_4] : memref<16x1xf32, #tpu.memory_space<vmem>>, vector<16x1xf32>
    %9 = vector.broadcast %8 : vector<16x1xf32> to vector<16x16xf32>
    %10 = arith.mulf %7, %9 : vector<16x16xf32>
    %c0_5 = arith.constant 0 : index
    %c0_6 = arith.constant 0 : index
    %c0_7 = arith.constant 0 : index
    %11 = vector.load %arg4[%c0_5, %c0_6, %c0_7] : memref<6x16x16xf32, #tpu.memory_space<vmem>>, vector<1x16x16xf32>
    %12 = vector.shape_cast %11 : vector<1x16x16xf32> to vector<16x16xf32>
    %cst_8 = arith.constant dense<0.000000e+00> : vector<16x16xf32>
    %13 = tpu.matmul %10, %12, %cst_8 {dimension_numbers = #tpu.dot_dimension_numbers<[1], [0], [0], [1], [0, 0, 1, 1], [], []>} : vector<16x16xf32>, vector<16x16xf32>, vector<16x16xf32> -> vector<16x16xf32>
    %c0_9 = arith.constant 0 : index
    %c0_10 = arith.constant 0 : index
    %c0_11 = arith.constant 0 : index
    %14 = vector.load %arg6[%c0_9, %c0_10, %c0_11] : memref<6x1x16xf32, #tpu.memory_space<vmem>>, vector<1x1x16xf32>
    %15 = vector.shape_cast %14 : vector<1x1x16xf32> to vector<1x16xf32>
    %16 = vector.broadcast %15 : vector<1x16xf32> to vector<16x16xf32>
    %17 = arith.addf %13, %16 : vector<16x16xf32>
    %18 = vector.shape_cast %17 : vector<16x16xf32> to vector<8x2x16xf32>
    %c0_12 = arith.constant 0 : index
    %c0_13 = arith.constant 0 : index
    %c0_14 = arith.constant 0 : index
    %c0_15 = arith.constant 0 : index
    %19 = vector.load %arg17[%c0_12, %c0_13, %c0_14, %c0_15] : memref<6x8x2x16xf32, #tpu.memory_space<vmem>>, vector<1x8x2x16xf32>
    %20 = vector.shape_cast %19 : vector<1x8x2x16xf32> to vector<8x2x16xf32>
    %21 = vector.shape_cast %18 : vector<8x2x16xf32> to vector<1x8x2x16xf32>
    tpu.vector_store %arg17[%c0_12, %c0_13, %c0_14, %c0_15], %21 {strides = array<i32>} : memref<6x8x2x16xf32, #tpu.memory_space<vmem>>, vector<1x8x2x16xf32>,
    %c1 = arith.constant 1 : index
    %c0_16 = arith.constant 0 : index
    %c0_17 = arith.constant 0 : index
    %22 = vector.load %arg4[%c1, %c0_16, %c0_17] : memref<6x16x16xf32, #tpu.memory_space<vmem>>, vector<1x16x16xf32>
    %23 = vector.shape_cast %22 : vector<1x16x16xf32> to vector<16x16xf32>
    %cst_18 = arith.constant dense<0.000000e+00> : vector<16x16xf32>
    %24 = tpu.matmul %10, %23, %cst_18 {dimension_numbers = #tpu.dot_dimension_numbers<[1], [0], [0], [1], [0, 0, 1, 1], [], []>} : vector<16x16xf32>, vector<16x16xf32>, vector<16x16xf32> -> vector<16x16xf32>
    %c1_19 = arith.constant 1 : index
    %c0_20 = arith.constant 0 : index
    %c0_21 = arith.constant 0 : index
    %25 = vector.load %arg6[%c1_19, %c0_20, %c0_21] : memref<6x1x16xf32, #tpu.memory_space<vmem>>, vector<1x1x16xf32>
    %26 = vector.shape_cast %25 : vector<1x1x16xf32> to vector<1x16xf32>
    %27 = vector.broadcast %26 : vector<1x16xf32> to vector<16x16xf32>
    %28 = arith.addf %24, %27 : vector<16x16xf32>
    %29 = vector.shape_cast %28 : vector<16x16xf32> to vector<8x2x16xf32>
    %c1_22 = arith.constant 1 : index
    %c0_23 = arith.constant 0 : index
    %c0_24 = arith.constant 0 : index
    %c0_25 = arith.constant 0 : index
    %30 = vector.load %arg17[%c1_22, %c0_23, %c0_24, %c0_25] : memref<6x8x2x16xf32, #tpu.memory_space<vmem>>, vector<1x8x2x16xf32>
    %31 = vector.shape_cast %30 : vector<1x8x2x16xf32> to vector<8x2x16xf32>
    %32 = vector.shape_cast %29 : vector<8x2x16xf32> to vector<1x8x2x16xf32>
    tpu.vector_store %arg17[%c1_22, %c0_23, %c0_24, %c0_25], %32 {strides = array<i32>} : memref<6x8x2x16xf32, #tpu.memory_space<vmem>>, vector<1x8x2x16xf32>,
    %c2 = arith.constant 2 : index
    %c0_26 = arith.constant 0 : index
    %c0_27 = arith.constant 0 : index
    %33 = vector.load %arg4[%c2, %c0_26, %c0_27] : memref<6x16x16xf32, #tpu.memory_space<vmem>>, vector<1x16x16xf32>
    %34 = vector.shape_cast %33 : vector<1x16x16xf32> to vector<16x16xf32>
    %cst_28 = arith.constant dense<0.000000e+00> : vector<16x16xf32>
    %35 = tpu.matmul %10, %34, %cst_28 {dimension_numbers = #tpu.dot_dimension_numbers<[1], [0], [0], [1], [0, 0, 1, 1], [], []>} : vector<16x16xf32>, vector<16x16xf32>, vector<16x16xf32> -> vector<16x16xf32>
    %c2_29 = arith.constant 2 : index
    %c0_30 = arith.constant 0 : index
    %c0_31 = arith.constant 0 : index
    %36 = vector.load %arg6[%c2_29, %c0_30, %c0_31] : memref<6x1x16xf32, #tpu.memory_space<vmem>>, vector<1x1x16xf32>
    %37 = vector.shape_cast %36 : vector<1x1x16xf32> to vector<1x16xf32>
    %38 = vector.broadcast %37 : vector<1x16xf32> to vector<16x16xf32>
    %39 = arith.addf %35, %38 : vector<16x16xf32>
    %40 = vector.shape_cast %39 : vector<16x16xf32> to vector<8x2x16xf32>
    %c2_32 = arith.constant 2 : index
    %c0_33 = arith.constant 0 : index
    %c0_34 = arith.constant 0 : index
    %c0_35 = arith.constant 0 : index
    %41 = vector.load %arg17[%c2_32, %c0_33, %c0_34, %c0_35] : memref<6x8x2x16xf32, #tpu.memory_space<vmem>>, vector<1x8x2x16xf32>
    %42 = vector.shape_cast %41 : vector<1x8x2x16xf32> to vector<8x2x16xf32>
    %43 = vector.shape_cast %40 : vector<8x2x16xf32> to vector<1x8x2x16xf32>
    tpu.vector_store %arg17[%c2_32, %c0_33, %c0_34, %c0_35], %43 {strides = array<i32>} : memref<6x8x2x16xf32, #tpu.memory_space<vmem>>, vector<1x8x2x16xf32>,
    %c3 = arith.constant 3 : index
    %c0_36 = arith.constant 0 : index
    %c0_37 = arith.constant 0 : index
    %44 = vector.load %arg4[%c3, %c0_36, %c0_37] : memref<6x16x16xf32, #tpu.memory_space<vmem>>, vector<1x16x16xf32>
    %45 = vector.shape_cast %44 : vector<1x16x16xf32> to vector<16x16xf32>
    %cst_38 = arith.constant dense<0.000000e+00> : vector<16x16xf32>
    %46 = tpu.matmul %10, %45, %cst_38 {dimension_numbers = #tpu.dot_dimension_numbers<[1], [0], [0], [1], [0, 0, 1, 1], [], []>} : vector<16x16xf32>, vector<16x16xf32>, vector<16x16xf32> -> vector<16x16xf32>
    %c3_39 = arith.constant 3 : index
    %c0_40 = arith.constant 0 : index
    %c0_41 = arith.constant 0 : index
    %47 = vector.load %arg6[%c3_39, %c0_40, %c0_41] : memref<6x1x16xf32, #tpu.memory_space<vmem>>, vector<1x1x16xf32>
    %48 = vector.shape_cast %47 : vector<1x1x16xf32> to vector<1x16xf32>
    %49 = vector.broadcast %48 : vector<1x16xf32> to vector<16x16xf32>
    %50 = arith.addf %46, %49 : vector<16x16xf32>
    %51 = vector.shape_cast %50 : vector<16x16xf32> to vector<8x2x16xf32>
    %c3_42 = arith.constant 3 : index
    %c0_43 = arith.constant 0 : index
    %c0_44 = arith.constant 0 : index
    %c0_45 = arith.constant 0 : index
    %52 = vector.load %arg17[%c3_42, %c0_43, %c0_44, %c0_45] : memref<6x8x2x16xf32, #tpu.memory_space<vmem>>, vector<1x8x2x16xf32>
    %53 = vector.shape_cast %52 : vector<1x8x2x16xf32> to vector<8x2x16xf32>
    %54 = vector.shape_cast %51 : vector<8x2x16xf32> to vector<1x8x2x16xf32>
    tpu.vector_store %arg17[%c3_42, %c0_43, %c0_44, %c0_45], %54 {strides = array<i32>} : memref<6x8x2x16xf32, #tpu.memory_space<vmem>>, vector<1x8x2x16xf32>,
    %c4 = arith.constant 4 : index
    %c0_46 = arith.constant 0 : index
    %c0_47 = arith.constant 0 : index
    %55 = vector.load %arg4[%c4, %c0_46, %c0_47] : memref<6x16x16xf32, #tpu.memory_space<vmem>>, vector<1x16x16xf32>
    %56 = vector.shape_cast %55 : vector<1x16x16xf32> to vector<16x16xf32>
    %cst_48 = arith.constant dense<0.000000e+00> : vector<16x16xf32>
    %57 = tpu.matmul %10, %56, %cst_48 {dimension_numbers = #tpu.dot_dimension_numbers<[1], [0], [0], [1], [0, 0, 1, 1], [], []>} : vector<16x16xf32>, vector<16x16xf32>, vector<16x16xf32> -> vector<16x16xf32>
    %c4_49 = arith.constant 4 : index
    %c0_50 = arith.constant 0 : index
    %c0_51 = arith.constant 0 : index
    %58 = vector.load %arg6[%c4_49, %c0_50, %c0_51] : memref<6x1x16xf32, #tpu.memory_space<vmem>>, vector<1x1x16xf32>
    %59 = vector.shape_cast %58 : vector<1x1x16xf32> to vector<1x16xf32>
    %60 = vector.broadcast %59 : vector<1x16xf32> to vector<16x16xf32>
    %61 = arith.addf %57, %60 : vector<16x16xf32>
    %62 = vector.shape_cast %61 : vector<16x16xf32> to vector<8x2x16xf32>
    %c4_52 = arith.constant 4 : index
    %c0_53 = arith.constant 0 : index
    %c0_54 = arith.constant 0 : index
    %c0_55 = arith.constant 0 : index
    %63 = vector.load %arg17[%c4_52, %c0_53, %c0_54, %c0_55] : memref<6x8x2x16xf32, #tpu.memory_space<vmem>>, vector<1x8x2x16xf32>
    %64 = vector.shape_cast %63 : vector<1x8x2x16xf32> to vector<8x2x16xf32>
    %65 = vector.shape_cast %62 : vector<8x2x16xf32> to vector<1x8x2x16xf32>
    tpu.vector_store %arg17[%c4_52, %c0_53, %c0_54, %c0_55], %65 {strides = array<i32>} : memref<6x8x2x16xf32, #tpu.memory_space<vmem>>, vector<1x8x2x16xf32>,
    %c5 = arith.constant 5 : index
    %c0_56 = arith.constant 0 : index
    %c0_57 = arith.constant 0 : index
    %66 = vector.load %arg4[%c5, %c0_56, %c0_57] : memref<6x16x16xf32, #tpu.memory_space<vmem>>, vector<1x16x16xf32>
    %67 = vector.shape_cast %66 : vector<1x16x16xf32> to vector<16x16xf32>
    %cst_58 = arith.constant dense<0.000000e+00> : vector<16x16xf32>
    %68 = tpu.matmul %10, %67, %cst_58 {dimension_numbers = #tpu.dot_dimension_numbers<[1], [0], [0], [1], [0, 0, 1, 1], [], []>} : vector<16x16xf32>, vector<16x16xf32>, vector<16x16xf32> -> vector<16x16xf32>
    %c5_59 = arith.constant 5 : index
    %c0_60 = arith.constant 0 : index
    %c0_61 = arith.constant 0 : index
    %69 = vector.load %arg6[%c5_59, %c0_60, %c0_61] : memref<6x1x16xf32, #tpu.memory_space<vmem>>, vector<1x1x16xf32>
    %70 = vector.shape_cast %69 : vector<1x1x16xf32> to vector<1x16xf32>
    %71 = vector.broadcast %70 : vector<1x16xf32> to vector<16x16xf32>
    %72 = arith.addf %68, %71 : vector<16x16xf32>
    %73 = vector.shape_cast %72 : vector<16x16xf32> to vector<8x2x16xf32>
    %c5_62 = arith.constant 5 : index
    %c0_63 = arith.constant 0 : index
    %c0_64 = arith.constant 0 : index
    %c0_65 = arith.constant 0 : index
    %74 = vector.load %arg17[%c5_62, %c0_63, %c0_64, %c0_65] : memref<6x8x2x16xf32, #tpu.memory_space<vmem>>, vector<1x8x2x16xf32>
    %75 = vector.shape_cast %74 : vector<1x8x2x16xf32> to vector<8x2x16xf32>
    %76 = vector.shape_cast %73 : vector<8x2x16xf32> to vector<1x8x2x16xf32>
    tpu.vector_store %arg17[%c5_62, %c0_63, %c0_64, %c0_65], %76 {strides = array<i32>} : memref<6x8x2x16xf32, #tpu.memory_space<vmem>>, vector<1x8x2x16xf32>,
    %c0_66 = arith.constant 0 : index
    %c0_67 = arith.constant 0 : index
    %c0_68 = arith.constant 0 : index
    %77 = vector.load %arg5[%c0_66, %c0_67, %c0_68] : memref<6x16x16xf32, #tpu.memory_space<vmem>>, vector<1x16x16xf32>
    %78 = vector.shape_cast %77 : vector<1x16x16xf32> to vector<16x16xf32>
    %c1_69 = arith.constant 1 : index
    %c0_70 = arith.constant 0 : index
    %c0_71 = arith.constant 0 : index
    %79 = vector.load %arg5[%c1_69, %c0_70, %c0_71] : memref<6x16x16xf32, #tpu.memory_space<vmem>>, vector<1x16x16xf32>
    %80 = vector.shape_cast %79 : vector<1x16x16xf32> to vector<16x16xf32>
    %c2_72 = arith.constant 2 : index
    %c0_73 = arith.constant 0 : index
    %c0_74 = arith.constant 0 : index
    %81 = vector.load %arg5[%c2_72, %c0_73, %c0_74] : memref<6x16x16xf32, #tpu.memory_space<vmem>>, vector<1x16x16xf32>
    %82 = vector.shape_cast %81 : vector<1x16x16xf32> to vector<16x16xf32>
    %c3_75 = arith.constant 3 : index
    %c0_76 = arith.constant 0 : index
    %c0_77 = arith.constant 0 : index
    %83 = vector.load %arg5[%c3_75, %c0_76, %c0_77] : memref<6x16x16xf32, #tpu.memory_space<vmem>>, vector<1x16x16xf32>
    %84 = vector.shape_cast %83 : vector<1x16x16xf32> to vector<16x16xf32>
    %c4_78 = arith.constant 4 : index
    %c0_79 = arith.constant 0 : index
    %c0_80 = arith.constant 0 : index
    %85 = vector.load %arg5[%c4_78, %c0_79, %c0_80] : memref<6x16x16xf32, #tpu.memory_space<vmem>>, vector<1x16x16xf32>
    %86 = vector.shape_cast %85 : vector<1x16x16xf32> to vector<16x16xf32>
    %c5_81 = arith.constant 5 : index
    %c0_82 = arith.constant 0 : index
    %c0_83 = arith.constant 0 : index
    %87 = vector.load %arg5[%c5_81, %c0_82, %c0_83] : memref<6x16x16xf32, #tpu.memory_space<vmem>>, vector<1x16x16xf32>
    %88 = vector.shape_cast %87 : vector<1x16x16xf32> to vector<16x16xf32>
    %c0_84 = arith.constant 0 : index
    %c0_85 = arith.constant 0 : index
    %c0_86 = arith.constant 0 : index
    %89 = vector.load %arg7[%c0_84, %c0_85, %c0_86] : memref<2x1x16xf32, #tpu.memory_space<vmem>>, vector<1x1x16xf32>
    %90 = vector.shape_cast %89 : vector<1x1x16xf32> to vector<1x16xf32>
    %91 = vector.shape_cast %90 : vector<1x16xf32> to vector<1x16xf32>
    %92 = vector.broadcast %91 : vector<1x16xf32> to vector<2x16xf32>
    %c1_87 = arith.constant 1 : index
    %c0_88 = arith.constant 0 : index
    %c0_89 = arith.constant 0 : index
    %93 = vector.load %arg7[%c1_87, %c0_88, %c0_89] : memref<2x1x16xf32, #tpu.memory_space<vmem>>, vector<1x1x16xf32>
    %94 = vector.shape_cast %93 : vector<1x1x16xf32> to vector<1x16xf32>
    %95 = vector.shape_cast %94 : vector<1x16xf32> to vector<1x16xf32>
    %96 = vector.broadcast %95 : vector<1x16xf32> to vector<2x16xf32>
    %cst_90 = arith.constant 0.000000e+00 : f32
    %97 = vector.broadcast %cst_90 : f32 to vector<2x16xf32>
    %c0_i32 = arith.constant 0 : i32
    %c7_i32 = arith.constant 7 : i32
    %98 = arith.subi %c7_i32, %c0_i32 : i32
    %cst_91 = arith.constant dense<0.000000e+00> : vector<2x16xf32>
    %99 = tpu.matmul %97, %78, %cst_91 {dimension_numbers = #tpu.dot_dimension_numbers<[1], [0], [0], [1], [0, 0, 1, 1], [], []>} : vector<2x16xf32>, vector<16x16xf32>, vector<2x16xf32> -> vector<2x16xf32>
    %cst_92 = arith.constant dense<0.000000e+00> : vector<2x16xf32>
    %100 = tpu.matmul %97, %80, %cst_92 {dimension_numbers = #tpu.dot_dimension_numbers<[1], [0], [0], [1], [0, 0, 1, 1], [], []>} : vector<2x16xf32>, vector<16x16xf32>, vector<2x16xf32> -> vector<2x16xf32>
    %cst_93 = arith.constant dense<0.000000e+00> : vector<2x16xf32>
    %101 = tpu.matmul %97, %82, %cst_93 {dimension_numbers = #tpu.dot_dimension_numbers<[1], [0], [0], [1], [0, 0, 1, 1], [], []>} : vector<2x16xf32>, vector<16x16xf32>, vector<2x16xf32> -> vector<2x16xf32>
    %102 = arith.addf %101, %92 : vector<2x16xf32>
    %c0_94 = arith.constant 0 : index
    %103 = arith.index_cast %c0_i32 : i32 to index
    %c0_95 = arith.constant 0 : index
    %c0_96 = arith.constant 0 : index
    %104 = vector.load %arg17[%c0_94, %103, %c0_95, %c0_96] : memref<6x8x2x16xf32, #tpu.memory_space<vmem>>, vector<1x1x2x16xf32>
    %105 = vector.shape_cast %104 : vector<1x1x2x16xf32> to vector<2x16xf32>
    %106 = arith.addf %105, %99 : vector<2x16xf32>
    %107 = arith.negf %106 : vector<2x16xf32>
    %108 = math.exp %107 : vector<2x16xf32>
    %cst_97 = arith.constant 1.000000e+00 : f32
    %109 = vector.broadcast %cst_97 : f32 to vector<2x16xf32>
    %110 = arith.addf %109, %108 : vector<2x16xf32>
    %111 = arith.divf %109, %110 : vector<2x16xf32>
    %c1_98 = arith.constant 1 : index
    %112 = arith.index_cast %c0_i32 : i32 to index
    %c0_99 = arith.constant 0 : index
    %c0_100 = arith.constant 0 : index
    %113 = vector.load %arg17[%c1_98, %112, %c0_99, %c0_100] : memref<6x8x2x16xf32, #tpu.memory_space<vmem>>, vector<1x1x2x16xf32>
    %114 = vector.shape_cast %113 : vector<1x1x2x16xf32> to vector<2x16xf32>
    %115 = arith.addf %114, %100 : vector<2x16xf32>
    %116 = arith.negf %115 : vector<2x16xf32>
    %117 = math.exp %116 : vector<2x16xf32>
    %cst_101 = arith.constant 1.000000e+00 : f32
    %118 = vector.broadcast %cst_101 : f32 to vector<2x16xf32>
    %119 = arith.addf %118, %117 : vector<2x16xf32>
    %120 = arith.divf %118, %119 : vector<2x16xf32>
    %c2_102 = arith.constant 2 : index
    %121 = arith.index_cast %c0_i32 : i32 to index
    %c0_103 = arith.constant 0 : index
    %c0_104 = arith.constant 0 : index
    %122 = vector.load %arg17[%c2_102, %121, %c0_103, %c0_104] : memref<6x8x2x16xf32, #tpu.memory_space<vmem>>, vector<1x1x2x16xf32>
    %123 = vector.shape_cast %122 : vector<1x1x2x16xf32> to vector<2x16xf32>
    %124 = arith.mulf %111, %102 : vector<2x16xf32>
    %125 = arith.addf %123, %124 : vector<2x16xf32>
    %126 = math.tanh %125 : vector<2x16xf32>
    %cst_105 = arith.constant 1.000000e+00 : f32
    %127 = vector.broadcast %cst_105 : f32 to vector<2x16xf32>
    %128 = arith.subf %127, %120 : vector<2x16xf32>
    %129 = arith.mulf %128, %126 : vector<2x16xf32>
    %130 = arith.mulf %120, %97 : vector<2x16xf32>
    %131 = arith.addf %129, %130 : vector<2x16xf32>
    %c0_106 = arith.constant 0 : index
    %132 = arith.index_cast %c0_i32 : i32 to index
    %c0_107 = arith.constant 0 : index
    %c0_108 = arith.constant 0 : index
    %133 = vector.load %arg18[%c0_106, %132, %c0_107, %c0_108] : memref<2x8x2x16xf32, #tpu.memory_space<vmem>>, vector<1x1x2x16xf32>
    %134 = vector.shape_cast %133 : vector<1x1x2x16xf32> to vector<2x16xf32>
    %135 = vector.shape_cast %131 : vector<2x16xf32> to vector<1x1x2x16xf32>
    tpu.vector_store %arg18[%c0_106, %132, %c0_107, %c0_108], %135 {strides = array<i32>} : memref<2x8x2x16xf32, #tpu.memory_space<vmem>>, vector<1x1x2x16xf32>,
    %cst_109 = arith.constant dense<0.000000e+00> : vector<2x16xf32>
    %136 = tpu.matmul %97, %84, %cst_109 {dimension_numbers = #tpu.dot_dimension_numbers<[1], [0], [0], [1], [0, 0, 1, 1], [], []>} : vector<2x16xf32>, vector<16x16xf32>, vector<2x16xf32> -> vector<2x16xf32>
    %cst_110 = arith.constant dense<0.000000e+00> : vector<2x16xf32>
    %137 = tpu.matmul %97, %86, %cst_110 {dimension_numbers = #tpu.dot_dimension_numbers<[1], [0], [0], [1], [0, 0, 1, 1], [], []>} : vector<2x16xf32>, vector<16x16xf32>, vector<2x16xf32> -> vector<2x16xf32>
    %cst_111 = arith.constant dense<0.000000e+00> : vector<2x16xf32>
    %138 = tpu.matmul %97, %88, %cst_111 {dimension_numbers = #tpu.dot_dimension_numbers<[1], [0], [0], [1], [0, 0, 1, 1], [], []>} : vector<2x16xf32>, vector<16x16xf32>, vector<2x16xf32> -> vector<2x16xf32>
    %139 = arith.addf %138, %96 : vector<2x16xf32>
    %c3_112 = arith.constant 3 : index
    %140 = arith.index_cast %98 : i32 to index
    %c0_113 = arith.constant 0 : index
    %c0_114 = arith.constant 0 : index
    %141 = vector.load %arg17[%c3_112, %140, %c0_113, %c0_114] : memref<6x8x2x16xf32, #tpu.memory_space<vmem>>, vector<1x1x2x16xf32>
    %142 = vector.shape_cast %141 : vector<1x1x2x16xf32> to vector<2x16xf32>
    %143 = arith.addf %142, %136 : vector<2x16xf32>
    %144 = arith.negf %143 : vector<2x16xf32>
    %145 = math.exp %144 : vector<2x16xf32>
    %cst_115 = arith.constant 1.000000e+00 : f32
    %146 = vector.broadcast %cst_115 : f32 to vector<2x16xf32>
    %147 = arith.addf %146, %145 : vector<2x16xf32>
    %148 = arith.divf %146, %147 : vector<2x16xf32>
    %c4_116 = arith.constant 4 : index
    %149 = arith.index_cast %98 : i32 to index
    %c0_117 = arith.constant 0 : index
    %c0_118 = arith.constant 0 : index
    %150 = vector.load %arg17[%c4_116, %149, %c0_117, %c0_118] : memref<6x8x2x16xf32, #tpu.memory_space<vmem>>, vector<1x1x2x16xf32>
    %151 = vector.shape_cast %150 : vector<1x1x2x16xf32> to vector<2x16xf32>
    %152 = arith.addf %151, %137 : vector<2x16xf32>
    %153 = arith.negf %152 : vector<2x16xf32>
    %154 = math.exp %153 : vector<2x16xf32>
    %cst_119 = arith.constant 1.000000e+00 : f32
    %155 = vector.broadcast %cst_119 : f32 to vector<2x16xf32>
    %156 = arith.addf %155, %154 : vector<2x16xf32>
    %157 = arith.divf %155, %156 : vector<2x16xf32>
    %c5_120 = arith.constant 5 : index
    %158 = arith.index_cast %98 : i32 to index
    %c0_121 = arith.constant 0 : index
    %c0_122 = arith.constant 0 : index
    %159 = vector.load %arg17[%c5_120, %158, %c0_121, %c0_122] : memref<6x8x2x16xf32, #tpu.memory_space<vmem>>, vector<1x1x2x16xf32>
    %160 = vector.shape_cast %159 : vector<1x1x2x16xf32> to vector<2x16xf32>
    %161 = arith.mulf %148, %139 : vector<2x16xf32>
    %162 = arith.addf %160, %161 : vector<2x16xf32>
    %163 = math.tanh %162 : vector<2x16xf32>
    %cst_123 = arith.constant 1.000000e+00 : f32
    %164 = vector.broadcast %cst_123 : f32 to vector<2x16xf32>
    %165 = arith.subf %164, %157 : vector<2x16xf32>
    %166 = arith.mulf %165, %163 : vector<2x16xf32>
    %167 = arith.mulf %157, %97 : vector<2x16xf32>
    %168 = arith.addf %166, %167 : vector<2x16xf32>
    %c1_124 = arith.constant 1 : index
    %169 = arith.index_cast %98 : i32 to index
    %c0_125 = arith.constant 0 : index
    %c0_126 = arith.constant 0 : index
    %170 = vector.load %arg18[%c1_124, %169, %c0_125, %c0_126] : memref<2x8x2x16xf32, #tpu.memory_space<vmem>>, vector<1x1x2x16xf32>
    %171 = vector.shape_cast %170 : vector<1x1x2x16xf32> to vector<2x16xf32>
    %172 = vector.shape_cast %168 : vector<2x16xf32> to vector<1x1x2x16xf32>
    tpu.vector_store %arg18[%c1_124, %169, %c0_125, %c0_126], %172 {strides = array<i32>} : memref<2x8x2x16xf32, #tpu.memory_space<vmem>>, vector<1x1x2x16xf32>,
    %c1_i32 = arith.constant 1 : i32
    %c7_i32_127 = arith.constant 7 : i32
    %173 = arith.subi %c7_i32_127, %c1_i32 : i32
    %cst_128 = arith.constant dense<0.000000e+00> : vector<2x16xf32>
    %174 = tpu.matmul %131, %78, %cst_128 {dimension_numbers = #tpu.dot_dimension_numbers<[1], [0], [0], [1], [0, 0, 1, 1], [], []>} : vector<2x16xf32>, vector<16x16xf32>, vector<2x16xf32> -> vector<2x16xf32>
    %cst_129 = arith.constant dense<0.000000e+00> : vector<2x16xf32>
    %175 = tpu.matmul %131, %80, %cst_129 {dimension_numbers = #tpu.dot_dimension_numbers<[1], [0], [0], [1], [0, 0, 1, 1], [], []>} : vector<2x16xf32>, vector<16x16xf32>, vector<2x16xf32> -> vector<2x16xf32>
    %cst_130 = arith.constant dense<0.000000e+00> : vector<2x16xf32>
    %176 = tpu.matmul %131, %82, %cst_130 {dimension_numbers = #tpu.dot_dimension_numbers<[1], [0], [0], [1], [0, 0, 1, 1], [], []>} : vector<2x16xf32>, vector<16x16xf32>, vector<2x16xf32> -> vector<2x16xf32>
    %177 = arith.addf %176, %92 : vector<2x16xf32>
    %c0_131 = arith.constant 0 : index
    %178 = arith.index_cast %c1_i32 : i32 to index
    %c0_132 = arith.constant 0 : index
    %c0_133 = arith.constant 0 : index
    %179 = vector.load %arg17[%c0_131, %178, %c0_132, %c0_133] : memref<6x8x2x16xf32, #tpu.memory_space<vmem>>, vector<1x1x2x16xf32>
    %180 = vector.shape_cast %179 : vector<1x1x2x16xf32> to vector<2x16xf32>
    %181 = arith.addf %180, %174 : vector<2x16xf32>
    %182 = arith.negf %181 : vector<2x16xf32>
    %183 = math.exp %182 : vector<2x16xf32>
    %cst_134 = arith.constant 1.000000e+00 : f32
    %184 = vector.broadcast %cst_134 : f32 to vector<2x16xf32>
    %185 = arith.addf %184, %183 : vector<2x16xf32>
    %186 = arith.divf %184, %185 : vector<2x16xf32>
    %c1_135 = arith.constant 1 : index
    %187 = arith.index_cast %c1_i32 : i32 to index
    %c0_136 = arith.constant 0 : index
    %c0_137 = arith.constant 0 : index
    %188 = vector.load %arg17[%c1_135, %187, %c0_136, %c0_137] : memref<6x8x2x16xf32, #tpu.memory_space<vmem>>, vector<1x1x2x16xf32>
    %189 = vector.shape_cast %188 : vector<1x1x2x16xf32> to vector<2x16xf32>
    %190 = arith.addf %189, %175 : vector<2x16xf32>
    %191 = arith.negf %190 : vector<2x16xf32>
    %192 = math.exp %191 : vector<2x16xf32>
    %cst_138 = arith.constant 1.000000e+00 : f32
    %193 = vector.broadcast %cst_138 : f32 to vector<2x16xf32>
    %194 = arith.addf %193, %192 : vector<2x16xf32>
    %195 = arith.divf %193, %194 : vector<2x16xf32>
    %c2_139 = arith.constant 2 : index
    %196 = arith.index_cast %c1_i32 : i32 to index
    %c0_140 = arith.constant 0 : index
    %c0_141 = arith.constant 0 : index
    %197 = vector.load %arg17[%c2_139, %196, %c0_140, %c0_141] : memref<6x8x2x16xf32, #tpu.memory_space<vmem>>, vector<1x1x2x16xf32>
    %198 = vector.shape_cast %197 : vector<1x1x2x16xf32> to vector<2x16xf32>
    %199 = arith.mulf %186, %177 : vector<2x16xf32>
    %200 = arith.addf %198, %199 : vector<2x16xf32>
    %201 = math.tanh %200 : vector<2x16xf32>
    %cst_142 = arith.constant 1.000000e+00 : f32
    %202 = vector.broadcast %cst_142 : f32 to vector<2x16xf32>
    %203 = arith.subf %202, %195 : vector<2x16xf32>
    %204 = arith.mulf %203, %201 : vector<2x16xf32>
    %205 = arith.mulf %195, %131 : vector<2x16xf32>
    %206 = arith.addf %204, %205 : vector<2x16xf32>
    %c0_143 = arith.constant 0 : index
    %207 = arith.index_cast %c1_i32 : i32 to index
    %c0_144 = arith.constant 0 : index
    %c0_145 = arith.constant 0 : index
    %208 = vector.load %arg18[%c0_143, %207, %c0_144, %c0_145] : memref<2x8x2x16xf32, #tpu.memory_space<vmem>>, vector<1x1x2x16xf32>
    %209 = vector.shape_cast %208 : vector<1x1x2x16xf32> to vector<2x16xf32>
    %210 = vector.shape_cast %206 : vector<2x16xf32> to vector<1x1x2x16xf32>
    tpu.vector_store %arg18[%c0_143, %207, %c0_144, %c0_145], %210 {strides = array<i32>} : memref<2x8x2x16xf32, #tpu.memory_space<vmem>>, vector<1x1x2x16xf32>,
    %cst_146 = arith.constant dense<0.000000e+00> : vector<2x16xf32>
    %211 = tpu.matmul %168, %84, %cst_146 {dimension_numbers = #tpu.dot_dimension_numbers<[1], [0], [0], [1], [0, 0, 1, 1], [], []>} : vector<2x16xf32>, vector<16x16xf32>, vector<2x16xf32> -> vector<2x16xf32>
    %cst_147 = arith.constant dense<0.000000e+00> : vector<2x16xf32>
    %212 = tpu.matmul %168, %86, %cst_147 {dimension_numbers = #tpu.dot_dimension_numbers<[1], [0], [0], [1], [0, 0, 1, 1], [], []>} : vector<2x16xf32>, vector<16x16xf32>, vector<2x16xf32> -> vector<2x16xf32>
    %cst_148 = arith.constant dense<0.000000e+00> : vector<2x16xf32>
    %213 = tpu.matmul %168, %88, %cst_148 {dimension_numbers = #tpu.dot_dimension_numbers<[1], [0], [0], [1], [0, 0, 1, 1], [], []>} : vector<2x16xf32>, vector<16x16xf32>, vector<2x16xf32> -> vector<2x16xf32>
    %214 = arith.addf %213, %96 : vector<2x16xf32>
    %c3_149 = arith.constant 3 : index
    %215 = arith.index_cast %173 : i32 to index
    %c0_150 = arith.constant 0 : index
    %c0_151 = arith.constant 0 : index
    %216 = vector.load %arg17[%c3_149, %215, %c0_150, %c0_151] : memref<6x8x2x16xf32, #tpu.memory_space<vmem>>, vector<1x1x2x16xf32>
    %217 = vector.shape_cast %216 : vector<1x1x2x16xf32> to vector<2x16xf32>
    %218 = arith.addf %217, %211 : vector<2x16xf32>
    %219 = arith.negf %218 : vector<2x16xf32>
    %220 = math.exp %219 : vector<2x16xf32>
    %cst_152 = arith.constant 1.000000e+00 : f32
    %221 = vector.broadcast %cst_152 : f32 to vector<2x16xf32>
    %222 = arith.addf %221, %220 : vector<2x16xf32>
    %223 = arith.divf %221, %222 : vector<2x16xf32>
    %c4_153 = arith.constant 4 : index
    %224 = arith.index_cast %173 : i32 to index
    %c0_154 = arith.constant 0 : index
    %c0_155 = arith.constant 0 : index
    %225 = vector.load %arg17[%c4_153, %224, %c0_154, %c0_155] : memref<6x8x2x16xf32, #tpu.memory_space<vmem>>, vector<1x1x2x16xf32>
    %226 = vector.shape_cast %225 : vector<1x1x2x16xf32> to vector<2x16xf32>
    %227 = arith.addf %226, %212 : vector<2x16xf32>
    %228 = arith.negf %227 : vector<2x16xf32>
    %229 = math.exp %228 : vector<2x16xf32>
    %cst_156 = arith.constant 1.000000e+00 : f32
    %230 = vector.broadcast %cst_156 : f32 to vector<2x16xf32>
    %231 = arith.addf %230, %229 : vector<2x16xf32>
    %232 = arith.divf %230, %231 : vector<2x16xf32>
    %c5_157 = arith.constant 5 : index
    %233 = arith.index_cast %173 : i32 to index
    %c0_158 = arith.constant 0 : index
    %c0_159 = arith.constant 0 : index
    %234 = vector.load %arg17[%c5_157, %233, %c0_158, %c0_159] : memref<6x8x2x16xf32, #tpu.memory_space<vmem>>, vector<1x1x2x16xf32>
    %235 = vector.shape_cast %234 : vector<1x1x2x16xf32> to vector<2x16xf32>
    %236 = arith.mulf %223, %214 : vector<2x16xf32>
    %237 = arith.addf %235, %236 : vector<2x16xf32>
    %238 = math.tanh %237 : vector<2x16xf32>
    %cst_160 = arith.constant 1.000000e+00 : f32
    %239 = vector.broadcast %cst_160 : f32 to vector<2x16xf32>
    %240 = arith.subf %239, %232 : vector<2x16xf32>
    %241 = arith.mulf %240, %238 : vector<2x16xf32>
    %242 = arith.mulf %232, %168 : vector<2x16xf32>
    %243 = arith.addf %241, %242 : vector<2x16xf32>
    %c1_161 = arith.constant 1 : index
    %244 = arith.index_cast %173 : i32 to index
    %c0_162 = arith.constant 0 : index
    %c0_163 = arith.constant 0 : index
    %245 = vector.load %arg18[%c1_161, %244, %c0_162, %c0_163] : memref<2x8x2x16xf32, #tpu.memory_space<vmem>>, vector<1x1x2x16xf32>
    %246 = vector.shape_cast %245 : vector<1x1x2x16xf32> to vector<2x16xf32>
    %247 = vector.shape_cast %243 : vector<2x16xf32> to vector<1x1x2x16xf32>
    tpu.vector_store %arg18[%c1_161, %244, %c0_162, %c0_163], %247 {strides = array<i32>} : memref<2x8x2x16xf32, #tpu.memory_space<vmem>>, vector<1x1x2x16xf32>,
    %c2_i32 = arith.constant 2 : i32
    %c7_i32_164 = arith.constant 7 : i32
    %248 = arith.subi %c7_i32_164, %c2_i32 : i32
    %cst_165 = arith.constant dense<0.000000e+00> : vector<2x16xf32>
    %249 = tpu.matmul %206, %78, %cst_165 {dimension_numbers = #tpu.dot_dimension_numbers<[1], [0], [0], [1], [0, 0, 1, 1], [], []>} : vector<2x16xf32>, vector<16x16xf32>, vector<2x16xf32> -> vector<2x16xf32>
    %cst_166 = arith.constant dense<0.000000e+00> : vector<2x16xf32>
    %250 = tpu.matmul %206, %80, %cst_166 {dimension_numbers = #tpu.dot_dimension_numbers<[1], [0], [0], [1], [0, 0, 1, 1], [], []>} : vector<2x16xf32>, vector<16x16xf32>, vector<2x16xf32> -> vector<2x16xf32>
    %cst_167 = arith.constant dense<0.000000e+00> : vector<2x16xf32>
    %251 = tpu.matmul %206, %82, %cst_167 {dimension_numbers = #tpu.dot_dimension_numbers<[1], [0], [0], [1], [0, 0, 1, 1], [], []>} : vector<2x16xf32>, vector<16x16xf32>, vector<2x16xf32> -> vector<2x16xf32>
    %252 = arith.addf %251, %92 : vector<2x16xf32>
    %c0_168 = arith.constant 0 : index
    %253 = arith.index_cast %c2_i32 : i32 to index
    %c0_169 = arith.constant 0 : index
    %c0_170 = arith.constant 0 : index
    %254 = vector.load %arg17[%c0_168, %253, %c0_169, %c0_170] : memref<6x8x2x16xf32, #tpu.memory_space<vmem>>, vector<1x1x2x16xf32>
    %255 = vector.shape_cast %254 : vector<1x1x2x16xf32> to vector<2x16xf32>
    %256 = arith.addf %255, %249 : vector<2x16xf32>
    %257 = arith.negf %256 : vector<2x16xf32>
    %258 = math.exp %257 : vector<2x16xf32>
    %cst_171 = arith.constant 1.000000e+00 : f32
    %259 = vector.broadcast %cst_171 : f32 to vector<2x16xf32>
    %260 = arith.addf %259, %258 : vector<2x16xf32>
    %261 = arith.divf %259, %260 : vector<2x16xf32>
    %c1_172 = arith.constant 1 : index
    %262 = arith.index_cast %c2_i32 : i32 to index
    %c0_173 = arith.constant 0 : index
    %c0_174 = arith.constant 0 : index
    %263 = vector.load %arg17[%c1_172, %262, %c0_173, %c0_174] : memref<6x8x2x16xf32, #tpu.memory_space<vmem>>, vector<1x1x2x16xf32>
    %264 = vector.shape_cast %263 : vector<1x1x2x16xf32> to vector<2x16xf32>
    %265 = arith.addf %264, %250 : vector<2x16xf32>
    %266 = arith.negf %265 : vector<2x16xf32>
    %267 = math.exp %266 : vector<2x16xf32>
    %cst_175 = arith.constant 1.000000e+00 : f32
    %268 = vector.broadcast %cst_175 : f32 to vector<2x16xf32>
    %269 = arith.addf %268, %267 : vector<2x16xf32>
    %270 = arith.divf %268, %269 : vector<2x16xf32>
    %c2_176 = arith.constant 2 : index
    %271 = arith.index_cast %c2_i32 : i32 to index
    %c0_177 = arith.constant 0 : index
    %c0_178 = arith.constant 0 : index
    %272 = vector.load %arg17[%c2_176, %271, %c0_177, %c0_178] : memref<6x8x2x16xf32, #tpu.memory_space<vmem>>, vector<1x1x2x16xf32>
    %273 = vector.shape_cast %272 : vector<1x1x2x16xf32> to vector<2x16xf32>
    %274 = arith.mulf %261, %252 : vector<2x16xf32>
    %275 = arith.addf %273, %274 : vector<2x16xf32>
    %276 = math.tanh %275 : vector<2x16xf32>
    %cst_179 = arith.constant 1.000000e+00 : f32
    %277 = vector.broadcast %cst_179 : f32 to vector<2x16xf32>
    %278 = arith.subf %277, %270 : vector<2x16xf32>
    %279 = arith.mulf %278, %276 : vector<2x16xf32>
    %280 = arith.mulf %270, %206 : vector<2x16xf32>
    %281 = arith.addf %279, %280 : vector<2x16xf32>
    %c0_180 = arith.constant 0 : index
    %282 = arith.index_cast %c2_i32 : i32 to index
    %c0_181 = arith.constant 0 : index
    %c0_182 = arith.constant 0 : index
    %283 = vector.load %arg18[%c0_180, %282, %c0_181, %c0_182] : memref<2x8x2x16xf32, #tpu.memory_space<vmem>>, vector<1x1x2x16xf32>
    %284 = vector.shape_cast %283 : vector<1x1x2x16xf32> to vector<2x16xf32>
    %285 = vector.shape_cast %281 : vector<2x16xf32> to vector<1x1x2x16xf32>
    tpu.vector_store %arg18[%c0_180, %282, %c0_181, %c0_182], %285 {strides = array<i32>} : memref<2x8x2x16xf32, #tpu.memory_space<vmem>>, vector<1x1x2x16xf32>,
    %cst_183 = arith.constant dense<0.000000e+00> : vector<2x16xf32>
    %286 = tpu.matmul %243, %84, %cst_183 {dimension_numbers = #tpu.dot_dimension_numbers<[1], [0], [0], [1], [0, 0, 1, 1], [], []>} : vector<2x16xf32>, vector<16x16xf32>, vector<2x16xf32> -> vector<2x16xf32>
    %cst_184 = arith.constant dense<0.000000e+00> : vector<2x16xf32>
    %287 = tpu.matmul %243, %86, %cst_184 {dimension_numbers = #tpu.dot_dimension_numbers<[1], [0], [0], [1], [0, 0, 1, 1], [], []>} : vector<2x16xf32>, vector<16x16xf32>, vector<2x16xf32> -> vector<2x16xf32>
    %cst_185 = arith.constant dense<0.000000e+00> : vector<2x16xf32>
    %288 = tpu.matmul %243, %88, %cst_185 {dimension_numbers = #tpu.dot_dimension_numbers<[1], [0], [0], [1], [0, 0, 1, 1], [], []>} : vector<2x16xf32>, vector<16x16xf32>, vector<2x16xf32> -> vector<2x16xf32>
    %289 = arith.addf %288, %96 : vector<2x16xf32>
    %c3_186 = arith.constant 3 : index
    %290 = arith.index_cast %248 : i32 to index
    %c0_187 = arith.constant 0 : index
    %c0_188 = arith.constant 0 : index
    %291 = vector.load %arg17[%c3_186, %290, %c0_187, %c0_188] : memref<6x8x2x16xf32, #tpu.memory_space<vmem>>, vector<1x1x2x16xf32>
    %292 = vector.shape_cast %291 : vector<1x1x2x16xf32> to vector<2x16xf32>
    %293 = arith.addf %292, %286 : vector<2x16xf32>
    %294 = arith.negf %293 : vector<2x16xf32>
    %295 = math.exp %294 : vector<2x16xf32>
    %cst_189 = arith.constant 1.000000e+00 : f32
    %296 = vector.broadcast %cst_189 : f32 to vector<2x16xf32>
    %297 = arith.addf %296, %295 : vector<2x16xf32>
    %298 = arith.divf %296, %297 : vector<2x16xf32>
    %c4_190 = arith.constant 4 : index
    %299 = arith.index_cast %248 : i32 to index
    %c0_191 = arith.constant 0 : index
    %c0_192 = arith.constant 0 : index
    %300 = vector.load %arg17[%c4_190, %299, %c0_191, %c0_192] : memref<6x8x2x16xf32, #tpu.memory_space<vmem>>, vector<1x1x2x16xf32>
    %301 = vector.shape_cast %300 : vector<1x1x2x16xf32> to vector<2x16xf32>
    %302 = arith.addf %301, %287 : vector<2x16xf32>
    %303 = arith.negf %302 : vector<2x16xf32>
    %304 = math.exp %303 : vector<2x16xf32>
    %cst_193 = arith.constant 1.000000e+00 : f32
    %305 = vector.broadcast %cst_193 : f32 to vector<2x16xf32>
    %306 = arith.addf %305, %304 : vector<2x16xf32>
    %307 = arith.divf %305, %306 : vector<2x16xf32>
    %c5_194 = arith.constant 5 : index
    %308 = arith.index_cast %248 : i32 to index
    %c0_195 = arith.constant 0 : index
    %c0_196 = arith.constant 0 : index
    %309 = vector.load %arg17[%c5_194, %308, %c0_195, %c0_196] : memref<6x8x2x16xf32, #tpu.memory_space<vmem>>, vector<1x1x2x16xf32>
    %310 = vector.shape_cast %309 : vector<1x1x2x16xf32> to vector<2x16xf32>
    %311 = arith.mulf %298, %289 : vector<2x16xf32>
    %312 = arith.addf %310, %311 : vector<2x16xf32>
    %313 = math.tanh %312 : vector<2x16xf32>
    %cst_197 = arith.constant 1.000000e+00 : f32
    %314 = vector.broadcast %cst_197 : f32 to vector<2x16xf32>
    %315 = arith.subf %314, %307 : vector<2x16xf32>
    %316 = arith.mulf %315, %313 : vector<2x16xf32>
    %317 = arith.mulf %307, %243 : vector<2x16xf32>
    %318 = arith.addf %316, %317 : vector<2x16xf32>
    %c1_198 = arith.constant 1 : index
    %319 = arith.index_cast %248 : i32 to index
    %c0_199 = arith.constant 0 : index
    %c0_200 = arith.constant 0 : index
    %320 = vector.load %arg18[%c1_198, %319, %c0_199, %c0_200] : memref<2x8x2x16xf32, #tpu.memory_space<vmem>>, vector<1x1x2x16xf32>
    %321 = vector.shape_cast %320 : vector<1x1x2x16xf32> to vector<2x16xf32>
    %322 = vector.shape_cast %318 : vector<2x16xf32> to vector<1x1x2x16xf32>
    tpu.vector_store %arg18[%c1_198, %319, %c0_199, %c0_200], %322 {strides = array<i32>} : memref<2x8x2x16xf32, #tpu.memory_space<vmem>>, vector<1x1x2x16xf32>,
    %c3_i32 = arith.constant 3 : i32
    %c7_i32_201 = arith.constant 7 : i32
    %323 = arith.subi %c7_i32_201, %c3_i32 : i32
    %cst_202 = arith.constant dense<0.000000e+00> : vector<2x16xf32>
    %324 = tpu.matmul %281, %78, %cst_202 {dimension_numbers = #tpu.dot_dimension_numbers<[1], [0], [0], [1], [0, 0, 1, 1], [], []>} : vector<2x16xf32>, vector<16x16xf32>, vector<2x16xf32> -> vector<2x16xf32>
    %cst_203 = arith.constant dense<0.000000e+00> : vector<2x16xf32>
    %325 = tpu.matmul %281, %80, %cst_203 {dimension_numbers = #tpu.dot_dimension_numbers<[1], [0], [0], [1], [0, 0, 1, 1], [], []>} : vector<2x16xf32>, vector<16x16xf32>, vector<2x16xf32> -> vector<2x16xf32>
    %cst_204 = arith.constant dense<0.000000e+00> : vector<2x16xf32>
    %326 = tpu.matmul %281, %82, %cst_204 {dimension_numbers = #tpu.dot_dimension_numbers<[1], [0], [0], [1], [0, 0, 1, 1], [], []>} : vector<2x16xf32>, vector<16x16xf32>, vector<2x16xf32> -> vector<2x16xf32>
    %327 = arith.addf %326, %92 : vector<2x16xf32>
    %c0_205 = arith.constant 0 : index
    %328 = arith.index_cast %c3_i32 : i32 to index
    %c0_206 = arith.constant 0 : index
    %c0_207 = arith.constant 0 : index
    %329 = vector.load %arg17[%c0_205, %328, %c0_206, %c0_207] : memref<6x8x2x16xf32, #tpu.memory_space<vmem>>, vector<1x1x2x16xf32>
    %330 = vector.shape_cast %329 : vector<1x1x2x16xf32> to vector<2x16xf32>
    %331 = arith.addf %330, %324 : vector<2x16xf32>
    %332 = arith.negf %331 : vector<2x16xf32>
    %333 = math.exp %332 : vector<2x16xf32>
    %cst_208 = arith.constant 1.000000e+00 : f32
    %334 = vector.broadcast %cst_208 : f32 to vector<2x16xf32>
    %335 = arith.addf %334, %333 : vector<2x16xf32>
    %336 = arith.divf %334, %335 : vector<2x16xf32>
    %c1_209 = arith.constant 1 : index
    %337 = arith.index_cast %c3_i32 : i32 to index
    %c0_210 = arith.constant 0 : index
    %c0_211 = arith.constant 0 : index
    %338 = vector.load %arg17[%c1_209, %337, %c0_210, %c0_211] : memref<6x8x2x16xf32, #tpu.memory_space<vmem>>, vector<1x1x2x16xf32>
    %339 = vector.shape_cast %338 : vector<1x1x2x16xf32> to vector<2x16xf32>
    %340 = arith.addf %339, %325 : vector<2x16xf32>
    %341 = arith.negf %340 : vector<2x16xf32>
    %342 = math.exp %341 : vector<2x16xf32>
    %cst_212 = arith.constant 1.000000e+00 : f32
    %343 = vector.broadcast %cst_212 : f32 to vector<2x16xf32>
    %344 = arith.addf %343, %342 : vector<2x16xf32>
    %345 = arith.divf %343, %344 : vector<2x16xf32>
    %c2_213 = arith.constant 2 : index
    %346 = arith.index_cast %c3_i32 : i32 to index
    %c0_214 = arith.constant 0 : index
    %c0_215 = arith.constant 0 : index
    %347 = vector.load %arg17[%c2_213, %346, %c0_214, %c0_215] : memref<6x8x2x16xf32, #tpu.memory_space<vmem>>, vector<1x1x2x16xf32>
    %348 = vector.shape_cast %347 : vector<1x1x2x16xf32> to vector<2x16xf32>
    %349 = arith.mulf %336, %327 : vector<2x16xf32>
    %350 = arith.addf %348, %349 : vector<2x16xf32>
    %351 = math.tanh %350 : vector<2x16xf32>
    %cst_216 = arith.constant 1.000000e+00 : f32
    %352 = vector.broadcast %cst_216 : f32 to vector<2x16xf32>
    %353 = arith.subf %352, %345 : vector<2x16xf32>
    %354 = arith.mulf %353, %351 : vector<2x16xf32>
    %355 = arith.mulf %345, %281 : vector<2x16xf32>
    %356 = arith.addf %354, %355 : vector<2x16xf32>
    %c0_217 = arith.constant 0 : index
    %357 = arith.index_cast %c3_i32 : i32 to index
    %c0_218 = arith.constant 0 : index
    %c0_219 = arith.constant 0 : index
    %358 = vector.load %arg18[%c0_217, %357, %c0_218, %c0_219] : memref<2x8x2x16xf32, #tpu.memory_space<vmem>>, vector<1x1x2x16xf32>
    %359 = vector.shape_cast %358 : vector<1x1x2x16xf32> to vector<2x16xf32>
    %360 = vector.shape_cast %356 : vector<2x16xf32> to vector<1x1x2x16xf32>
    tpu.vector_store %arg18[%c0_217, %357, %c0_218, %c0_219], %360 {strides = array<i32>} : memref<2x8x2x16xf32, #tpu.memory_space<vmem>>, vector<1x1x2x16xf32>,
    %cst_220 = arith.constant dense<0.000000e+00> : vector<2x16xf32>
    %361 = tpu.matmul %318, %84, %cst_220 {dimension_numbers = #tpu.dot_dimension_numbers<[1], [0], [0], [1], [0, 0, 1, 1], [], []>} : vector<2x16xf32>, vector<16x16xf32>, vector<2x16xf32> -> vector<2x16xf32>
    %cst_221 = arith.constant dense<0.000000e+00> : vector<2x16xf32>
    %362 = tpu.matmul %318, %86, %cst_221 {dimension_numbers = #tpu.dot_dimension_numbers<[1], [0], [0], [1], [0, 0, 1, 1], [], []>} : vector<2x16xf32>, vector<16x16xf32>, vector<2x16xf32> -> vector<2x16xf32>
    %cst_222 = arith.constant dense<0.000000e+00> : vector<2x16xf32>
    %363 = tpu.matmul %318, %88, %cst_222 {dimension_numbers = #tpu.dot_dimension_numbers<[1], [0], [0], [1], [0, 0, 1, 1], [], []>} : vector<2x16xf32>, vector<16x16xf32>, vector<2x16xf32> -> vector<2x16xf32>
    %364 = arith.addf %363, %96 : vector<2x16xf32>
    %c3_223 = arith.constant 3 : index
    %365 = arith.index_cast %323 : i32 to index
    %c0_224 = arith.constant 0 : index
    %c0_225 = arith.constant 0 : index
    %366 = vector.load %arg17[%c3_223, %365, %c0_224, %c0_225] : memref<6x8x2x16xf32, #tpu.memory_space<vmem>>, vector<1x1x2x16xf32>
    %367 = vector.shape_cast %366 : vector<1x1x2x16xf32> to vector<2x16xf32>
    %368 = arith.addf %367, %361 : vector<2x16xf32>
    %369 = arith.negf %368 : vector<2x16xf32>
    %370 = math.exp %369 : vector<2x16xf32>
    %cst_226 = arith.constant 1.000000e+00 : f32
    %371 = vector.broadcast %cst_226 : f32 to vector<2x16xf32>
    %372 = arith.addf %371, %370 : vector<2x16xf32>
    %373 = arith.divf %371, %372 : vector<2x16xf32>
    %c4_227 = arith.constant 4 : index
    %374 = arith.index_cast %323 : i32 to index
    %c0_228 = arith.constant 0 : index
    %c0_229 = arith.constant 0 : index
    %375 = vector.load %arg17[%c4_227, %374, %c0_228, %c0_229] : memref<6x8x2x16xf32, #tpu.memory_space<vmem>>, vector<1x1x2x16xf32>
    %376 = vector.shape_cast %375 : vector<1x1x2x16xf32> to vector<2x16xf32>
    %377 = arith.addf %376, %362 : vector<2x16xf32>
    %378 = arith.negf %377 : vector<2x16xf32>
    %379 = math.exp %378 : vector<2x16xf32>
    %cst_230 = arith.constant 1.000000e+00 : f32
    %380 = vector.broadcast %cst_230 : f32 to vector<2x16xf32>
    %381 = arith.addf %380, %379 : vector<2x16xf32>
    %382 = arith.divf %380, %381 : vector<2x16xf32>
    %c5_231 = arith.constant 5 : index
    %383 = arith.index_cast %323 : i32 to index
    %c0_232 = arith.constant 0 : index
    %c0_233 = arith.constant 0 : index
    %384 = vector.load %arg17[%c5_231, %383, %c0_232, %c0_233] : memref<6x8x2x16xf32, #tpu.memory_space<vmem>>, vector<1x1x2x16xf32>
    %385 = vector.shape_cast %384 : vector<1x1x2x16xf32> to vector<2x16xf32>
    %386 = arith.mulf %373, %364 : vector<2x16xf32>
    %387 = arith.addf %385, %386 : vector<2x16xf32>
    %388 = math.tanh %387 : vector<2x16xf32>
    %cst_234 = arith.constant 1.000000e+00 : f32
    %389 = vector.broadcast %cst_234 : f32 to vector<2x16xf32>
    %390 = arith.subf %389, %382 : vector<2x16xf32>
    %391 = arith.mulf %390, %388 : vector<2x16xf32>
    %392 = arith.mulf %382, %318 : vector<2x16xf32>
    %393 = arith.addf %391, %392 : vector<2x16xf32>
    %c1_235 = arith.constant 1 : index
    %394 = arith.index_cast %323 : i32 to index
    %c0_236 = arith.constant 0 : index
    %c0_237 = arith.constant 0 : index
    %395 = vector.load %arg18[%c1_235, %394, %c0_236, %c0_237] : memref<2x8x2x16xf32, #tpu.memory_space<vmem>>, vector<1x1x2x16xf32>
    %396 = vector.shape_cast %395 : vector<1x1x2x16xf32> to vector<2x16xf32>
    %397 = vector.shape_cast %393 : vector<2x16xf32> to vector<1x1x2x16xf32>
    tpu.vector_store %arg18[%c1_235, %394, %c0_236, %c0_237], %397 {strides = array<i32>} : memref<2x8x2x16xf32, #tpu.memory_space<vmem>>, vector<1x1x2x16xf32>,
    %c4_i32 = arith.constant 4 : i32
    %c7_i32_238 = arith.constant 7 : i32
    %398 = arith.subi %c7_i32_238, %c4_i32 : i32
    %cst_239 = arith.constant dense<0.000000e+00> : vector<2x16xf32>
    %399 = tpu.matmul %356, %78, %cst_239 {dimension_numbers = #tpu.dot_dimension_numbers<[1], [0], [0], [1], [0, 0, 1, 1], [], []>} : vector<2x16xf32>, vector<16x16xf32>, vector<2x16xf32> -> vector<2x16xf32>
    %cst_240 = arith.constant dense<0.000000e+00> : vector<2x16xf32>
    %400 = tpu.matmul %356, %80, %cst_240 {dimension_numbers = #tpu.dot_dimension_numbers<[1], [0], [0], [1], [0, 0, 1, 1], [], []>} : vector<2x16xf32>, vector<16x16xf32>, vector<2x16xf32> -> vector<2x16xf32>
    %cst_241 = arith.constant dense<0.000000e+00> : vector<2x16xf32>
    %401 = tpu.matmul %356, %82, %cst_241 {dimension_numbers = #tpu.dot_dimension_numbers<[1], [0], [0], [1], [0, 0, 1, 1], [], []>} : vector<2x16xf32>, vector<16x16xf32>, vector<2x16xf32> -> vector<2x16xf32>
    %402 = arith.addf %401, %92 : vector<2x16xf32>
    %c0_242 = arith.constant 0 : index
    %403 = arith.index_cast %c4_i32 : i32 to index
    %c0_243 = arith.constant 0 : index
    %c0_244 = arith.constant 0 : index
    %404 = vector.load %arg17[%c0_242, %403, %c0_243, %c0_244] : memref<6x8x2x16xf32, #tpu.memory_space<vmem>>, vector<1x1x2x16xf32>
    %405 = vector.shape_cast %404 : vector<1x1x2x16xf32> to vector<2x16xf32>
    %406 = arith.addf %405, %399 : vector<2x16xf32>
    %407 = arith.negf %406 : vector<2x16xf32>
    %408 = math.exp %407 : vector<2x16xf32>
    %cst_245 = arith.constant 1.000000e+00 : f32
    %409 = vector.broadcast %cst_245 : f32 to vector<2x16xf32>
    %410 = arith.addf %409, %408 : vector<2x16xf32>
    %411 = arith.divf %409, %410 : vector<2x16xf32>
    %c1_246 = arith.constant 1 : index
    %412 = arith.index_cast %c4_i32 : i32 to index
    %c0_247 = arith.constant 0 : index
    %c0_248 = arith.constant 0 : index
    %413 = vector.load %arg17[%c1_246, %412, %c0_247, %c0_248] : memref<6x8x2x16xf32, #tpu.memory_space<vmem>>, vector<1x1x2x16xf32>
    %414 = vector.shape_cast %413 : vector<1x1x2x16xf32> to vector<2x16xf32>
    %415 = arith.addf %414, %400 : vector<2x16xf32>
    %416 = arith.negf %415 : vector<2x16xf32>
    %417 = math.exp %416 : vector<2x16xf32>
    %cst_249 = arith.constant 1.000000e+00 : f32
    %418 = vector.broadcast %cst_249 : f32 to vector<2x16xf32>
    %419 = arith.addf %418, %417 : vector<2x16xf32>
    %420 = arith.divf %418, %419 : vector<2x16xf32>
    %c2_250 = arith.constant 2 : index
    %421 = arith.index_cast %c4_i32 : i32 to index
    %c0_251 = arith.constant 0 : index
    %c0_252 = arith.constant 0 : index
    %422 = vector.load %arg17[%c2_250, %421, %c0_251, %c0_252] : memref<6x8x2x16xf32, #tpu.memory_space<vmem>>, vector<1x1x2x16xf32>
    %423 = vector.shape_cast %422 : vector<1x1x2x16xf32> to vector<2x16xf32>
    %424 = arith.mulf %411, %402 : vector<2x16xf32>
    %425 = arith.addf %423, %424 : vector<2x16xf32>
    %426 = math.tanh %425 : vector<2x16xf32>
    %cst_253 = arith.constant 1.000000e+00 : f32
    %427 = vector.broadcast %cst_253 : f32 to vector<2x16xf32>
    %428 = arith.subf %427, %420 : vector<2x16xf32>
    %429 = arith.mulf %428, %426 : vector<2x16xf32>
    %430 = arith.mulf %420, %356 : vector<2x16xf32>
    %431 = arith.addf %429, %430 : vector<2x16xf32>
    %c0_254 = arith.constant 0 : index
    %432 = arith.index_cast %c4_i32 : i32 to index
    %c0_255 = arith.constant 0 : index
    %c0_256 = arith.constant 0 : index
    %433 = vector.load %arg18[%c0_254, %432, %c0_255, %c0_256] : memref<2x8x2x16xf32, #tpu.memory_space<vmem>>, vector<1x1x2x16xf32>
    %434 = vector.shape_cast %433 : vector<1x1x2x16xf32> to vector<2x16xf32>
    %435 = vector.shape_cast %431 : vector<2x16xf32> to vector<1x1x2x16xf32>
    tpu.vector_store %arg18[%c0_254, %432, %c0_255, %c0_256], %435 {strides = array<i32>} : memref<2x8x2x16xf32, #tpu.memory_space<vmem>>, vector<1x1x2x16xf32>,
    %cst_257 = arith.constant dense<0.000000e+00> : vector<2x16xf32>
    %436 = tpu.matmul %393, %84, %cst_257 {dimension_numbers = #tpu.dot_dimension_numbers<[1], [0], [0], [1], [0, 0, 1, 1], [], []>} : vector<2x16xf32>, vector<16x16xf32>, vector<2x16xf32> -> vector<2x16xf32>
    %cst_258 = arith.constant dense<0.000000e+00> : vector<2x16xf32>
    %437 = tpu.matmul %393, %86, %cst_258 {dimension_numbers = #tpu.dot_dimension_numbers<[1], [0], [0], [1], [0, 0, 1, 1], [], []>} : vector<2x16xf32>, vector<16x16xf32>, vector<2x16xf32> -> vector<2x16xf32>
    %cst_259 = arith.constant dense<0.000000e+00> : vector<2x16xf32>
    %438 = tpu.matmul %393, %88, %cst_259 {dimension_numbers = #tpu.dot_dimension_numbers<[1], [0], [0], [1], [0, 0, 1, 1], [], []>} : vector<2x16xf32>, vector<16x16xf32>, vector<2x16xf32> -> vector<2x16xf32>
    %439 = arith.addf %438, %96 : vector<2x16xf32>
    %c3_260 = arith.constant 3 : index
    %440 = arith.index_cast %398 : i32 to index
    %c0_261 = arith.constant 0 : index
    %c0_262 = arith.constant 0 : index
    %441 = vector.load %arg17[%c3_260, %440, %c0_261, %c0_262] : memref<6x8x2x16xf32, #tpu.memory_space<vmem>>, vector<1x1x2x16xf32>
    %442 = vector.shape_cast %441 : vector<1x1x2x16xf32> to vector<2x16xf32>
    %443 = arith.addf %442, %436 : vector<2x16xf32>
    %444 = arith.negf %443 : vector<2x16xf32>
    %445 = math.exp %444 : vector<2x16xf32>
    %cst_263 = arith.constant 1.000000e+00 : f32
    %446 = vector.broadcast %cst_263 : f32 to vector<2x16xf32>
    %447 = arith.addf %446, %445 : vector<2x16xf32>
    %448 = arith.divf %446, %447 : vector<2x16xf32>
    %c4_264 = arith.constant 4 : index
    %449 = arith.index_cast %398 : i32 to index
    %c0_265 = arith.constant 0 : index
    %c0_266 = arith.constant 0 : index
    %450 = vector.load %arg17[%c4_264, %449, %c0_265, %c0_266] : memref<6x8x2x16xf32, #tpu.memory_space<vmem>>, vector<1x1x2x16xf32>
    %451 = vector.shape_cast %450 : vector<1x1x2x16xf32> to vector<2x16xf32>
    %452 = arith.addf %451, %437 : vector<2x16xf32>
    %453 = arith.negf %452 : vector<2x16xf32>
    %454 = math.exp %453 : vector<2x16xf32>
    %cst_267 = arith.constant 1.000000e+00 : f32
    %455 = vector.broadcast %cst_267 : f32 to vector<2x16xf32>
    %456 = arith.addf %455, %454 : vector<2x16xf32>
    %457 = arith.divf %455, %456 : vector<2x16xf32>
    %c5_268 = arith.constant 5 : index
    %458 = arith.index_cast %398 : i32 to index
    %c0_269 = arith.constant 0 : index
    %c0_270 = arith.constant 0 : index
    %459 = vector.load %arg17[%c5_268, %458, %c0_269, %c0_270] : memref<6x8x2x16xf32, #tpu.memory_space<vmem>>, vector<1x1x2x16xf32>
    %460 = vector.shape_cast %459 : vector<1x1x2x16xf32> to vector<2x16xf32>
    %461 = arith.mulf %448, %439 : vector<2x16xf32>
    %462 = arith.addf %460, %461 : vector<2x16xf32>
    %463 = math.tanh %462 : vector<2x16xf32>
    %cst_271 = arith.constant 1.000000e+00 : f32
    %464 = vector.broadcast %cst_271 : f32 to vector<2x16xf32>
    %465 = arith.subf %464, %457 : vector<2x16xf32>
    %466 = arith.mulf %465, %463 : vector<2x16xf32>
    %467 = arith.mulf %457, %393 : vector<2x16xf32>
    %468 = arith.addf %466, %467 : vector<2x16xf32>
    %c1_272 = arith.constant 1 : index
    %469 = arith.index_cast %398 : i32 to index
    %c0_273 = arith.constant 0 : index
    %c0_274 = arith.constant 0 : index
    %470 = vector.load %arg18[%c1_272, %469, %c0_273, %c0_274] : memref<2x8x2x16xf32, #tpu.memory_space<vmem>>, vector<1x1x2x16xf32>
    %471 = vector.shape_cast %470 : vector<1x1x2x16xf32> to vector<2x16xf32>
    %472 = vector.shape_cast %468 : vector<2x16xf32> to vector<1x1x2x16xf32>
    tpu.vector_store %arg18[%c1_272, %469, %c0_273, %c0_274], %472 {strides = array<i32>} : memref<2x8x2x16xf32, #tpu.memory_space<vmem>>, vector<1x1x2x16xf32>,
    %c5_i32 = arith.constant 5 : i32
    %c7_i32_275 = arith.constant 7 : i32
    %473 = arith.subi %c7_i32_275, %c5_i32 : i32
    %cst_276 = arith.constant dense<0.000000e+00> : vector<2x16xf32>
    %474 = tpu.matmul %431, %78, %cst_276 {dimension_numbers = #tpu.dot_dimension_numbers<[1], [0], [0], [1], [0, 0, 1, 1], [], []>} : vector<2x16xf32>, vector<16x16xf32>, vector<2x16xf32> -> vector<2x16xf32>
    %cst_277 = arith.constant dense<0.000000e+00> : vector<2x16xf32>
    %475 = tpu.matmul %431, %80, %cst_277 {dimension_numbers = #tpu.dot_dimension_numbers<[1], [0], [0], [1], [0, 0, 1, 1], [], []>} : vector<2x16xf32>, vector<16x16xf32>, vector<2x16xf32> -> vector<2x16xf32>
    %cst_278 = arith.constant dense<0.000000e+00> : vector<2x16xf32>
    %476 = tpu.matmul %431, %82, %cst_278 {dimension_numbers = #tpu.dot_dimension_numbers<[1], [0], [0], [1], [0, 0, 1, 1], [], []>} : vector<2x16xf32>, vector<16x16xf32>, vector<2x16xf32> -> vector<2x16xf32>
    %477 = arith.addf %476, %92 : vector<2x16xf32>
    %c0_279 = arith.constant 0 : index
    %478 = arith.index_cast %c5_i32 : i32 to index
    %c0_280 = arith.constant 0 : index
    %c0_281 = arith.constant 0 : index
    %479 = vector.load %arg17[%c0_279, %478, %c0_280, %c0_281] : memref<6x8x2x16xf32, #tpu.memory_space<vmem>>, vector<1x1x2x16xf32>
    %480 = vector.shape_cast %479 : vector<1x1x2x16xf32> to vector<2x16xf32>
    %481 = arith.addf %480, %474 : vector<2x16xf32>
    %482 = arith.negf %481 : vector<2x16xf32>
    %483 = math.exp %482 : vector<2x16xf32>
    %cst_282 = arith.constant 1.000000e+00 : f32
    %484 = vector.broadcast %cst_282 : f32 to vector<2x16xf32>
    %485 = arith.addf %484, %483 : vector<2x16xf32>
    %486 = arith.divf %484, %485 : vector<2x16xf32>
    %c1_283 = arith.constant 1 : index
    %487 = arith.index_cast %c5_i32 : i32 to index
    %c0_284 = arith.constant 0 : index
    %c0_285 = arith.constant 0 : index
    %488 = vector.load %arg17[%c1_283, %487, %c0_284, %c0_285] : memref<6x8x2x16xf32, #tpu.memory_space<vmem>>, vector<1x1x2x16xf32>
    %489 = vector.shape_cast %488 : vector<1x1x2x16xf32> to vector<2x16xf32>
    %490 = arith.addf %489, %475 : vector<2x16xf32>
    %491 = arith.negf %490 : vector<2x16xf32>
    %492 = math.exp %491 : vector<2x16xf32>
    %cst_286 = arith.constant 1.000000e+00 : f32
    %493 = vector.broadcast %cst_286 : f32 to vector<2x16xf32>
    %494 = arith.addf %493, %492 : vector<2x16xf32>
    %495 = arith.divf %493, %494 : vector<2x16xf32>
    %c2_287 = arith.constant 2 : index
    %496 = arith.index_cast %c5_i32 : i32 to index
    %c0_288 = arith.constant 0 : index
    %c0_289 = arith.constant 0 : index
    %497 = vector.load %arg17[%c2_287, %496, %c0_288, %c0_289] : memref<6x8x2x16xf32, #tpu.memory_space<vmem>>, vector<1x1x2x16xf32>
    %498 = vector.shape_cast %497 : vector<1x1x2x16xf32> to vector<2x16xf32>
    %499 = arith.mulf %486, %477 : vector<2x16xf32>
    %500 = arith.addf %498, %499 : vector<2x16xf32>
    %501 = math.tanh %500 : vector<2x16xf32>
    %cst_290 = arith.constant 1.000000e+00 : f32
    %502 = vector.broadcast %cst_290 : f32 to vector<2x16xf32>
    %503 = arith.subf %502, %495 : vector<2x16xf32>
    %504 = arith.mulf %503, %501 : vector<2x16xf32>
    %505 = arith.mulf %495, %431 : vector<2x16xf32>
    %506 = arith.addf %504, %505 : vector<2x16xf32>
    %c0_291 = arith.constant 0 : index
    %507 = arith.index_cast %c5_i32 : i32 to index
    %c0_292 = arith.constant 0 : index
    %c0_293 = arith.constant 0 : index
    %508 = vector.load %arg18[%c0_291, %507, %c0_292, %c0_293] : memref<2x8x2x16xf32, #tpu.memory_space<vmem>>, vector<1x1x2x16xf32>
    %509 = vector.shape_cast %508 : vector<1x1x2x16xf32> to vector<2x16xf32>
    %510 = vector.shape_cast %506 : vector<2x16xf32> to vector<1x1x2x16xf32>
    tpu.vector_store %arg18[%c0_291, %507, %c0_292, %c0_293], %510 {strides = array<i32>} : memref<2x8x2x16xf32, #tpu.memory_space<vmem>>, vector<1x1x2x16xf32>,
    %cst_294 = arith.constant dense<0.000000e+00> : vector<2x16xf32>
    %511 = tpu.matmul %468, %84, %cst_294 {dimension_numbers = #tpu.dot_dimension_numbers<[1], [0], [0], [1], [0, 0, 1, 1], [], []>} : vector<2x16xf32>, vector<16x16xf32>, vector<2x16xf32> -> vector<2x16xf32>
    %cst_295 = arith.constant dense<0.000000e+00> : vector<2x16xf32>
    %512 = tpu.matmul %468, %86, %cst_295 {dimension_numbers = #tpu.dot_dimension_numbers<[1], [0], [0], [1], [0, 0, 1, 1], [], []>} : vector<2x16xf32>, vector<16x16xf32>, vector<2x16xf32> -> vector<2x16xf32>
    %cst_296 = arith.constant dense<0.000000e+00> : vector<2x16xf32>
    %513 = tpu.matmul %468, %88, %cst_296 {dimension_numbers = #tpu.dot_dimension_numbers<[1], [0], [0], [1], [0, 0, 1, 1], [], []>} : vector<2x16xf32>, vector<16x16xf32>, vector<2x16xf32> -> vector<2x16xf32>
    %514 = arith.addf %513, %96 : vector<2x16xf32>
    %c3_297 = arith.constant 3 : index
    %515 = arith.index_cast %473 : i32 to index
    %c0_298 = arith.constant 0 : index
    %c0_299 = arith.constant 0 : index
    %516 = vector.load %arg17[%c3_297, %515, %c0_298, %c0_299] : memref<6x8x2x16xf32, #tpu.memory_space<vmem>>, vector<1x1x2x16xf32>
    %517 = vector.shape_cast %516 : vector<1x1x2x16xf32> to vector<2x16xf32>
    %518 = arith.addf %517, %511 : vector<2x16xf32>
    %519 = arith.negf %518 : vector<2x16xf32>
    %520 = math.exp %519 : vector<2x16xf32>
    %cst_300 = arith.constant 1.000000e+00 : f32
    %521 = vector.broadcast %cst_300 : f32 to vector<2x16xf32>
    %522 = arith.addf %521, %520 : vector<2x16xf32>
    %523 = arith.divf %521, %522 : vector<2x16xf32>
    %c4_301 = arith.constant 4 : index
    %524 = arith.index_cast %473 : i32 to index
    %c0_302 = arith.constant 0 : index
    %c0_303 = arith.constant 0 : index
    %525 = vector.load %arg17[%c4_301, %524, %c0_302, %c0_303] : memref<6x8x2x16xf32, #tpu.memory_space<vmem>>, vector<1x1x2x16xf32>
    %526 = vector.shape_cast %525 : vector<1x1x2x16xf32> to vector<2x16xf32>
    %527 = arith.addf %526, %512 : vector<2x16xf32>
    %528 = arith.negf %527 : vector<2x16xf32>
    %529 = math.exp %528 : vector<2x16xf32>
    %cst_304 = arith.constant 1.000000e+00 : f32
    %530 = vector.broadcast %cst_304 : f32 to vector<2x16xf32>
    %531 = arith.addf %530, %529 : vector<2x16xf32>
    %532 = arith.divf %530, %531 : vector<2x16xf32>
    %c5_305 = arith.constant 5 : index
    %533 = arith.index_cast %473 : i32 to index
    %c0_306 = arith.constant 0 : index
    %c0_307 = arith.constant 0 : index
    %534 = vector.load %arg17[%c5_305, %533, %c0_306, %c0_307] : memref<6x8x2x16xf32, #tpu.memory_space<vmem>>, vector<1x1x2x16xf32>
    %535 = vector.shape_cast %534 : vector<1x1x2x16xf32> to vector<2x16xf32>
    %536 = arith.mulf %523, %514 : vector<2x16xf32>
    %537 = arith.addf %535, %536 : vector<2x16xf32>
    %538 = math.tanh %537 : vector<2x16xf32>
    %cst_308 = arith.constant 1.000000e+00 : f32
    %539 = vector.broadcast %cst_308 : f32 to vector<2x16xf32>
    %540 = arith.subf %539, %532 : vector<2x16xf32>
    %541 = arith.mulf %540, %538 : vector<2x16xf32>
    %542 = arith.mulf %532, %468 : vector<2x16xf32>
    %543 = arith.addf %541, %542 : vector<2x16xf32>
    %c1_309 = arith.constant 1 : index
    %544 = arith.index_cast %473 : i32 to index
    %c0_310 = arith.constant 0 : index
    %c0_311 = arith.constant 0 : index
    %545 = vector.load %arg18[%c1_309, %544, %c0_310, %c0_311] : memref<2x8x2x16xf32, #tpu.memory_space<vmem>>, vector<1x1x2x16xf32>
    %546 = vector.shape_cast %545 : vector<1x1x2x16xf32> to vector<2x16xf32>
    %547 = vector.shape_cast %543 : vector<2x16xf32> to vector<1x1x2x16xf32>
    tpu.vector_store %arg18[%c1_309, %544, %c0_310, %c0_311], %547 {strides = array<i32>} : memref<2x8x2x16xf32, #tpu.memory_space<vmem>>, vector<1x1x2x16xf32>,
    %c6_i32 = arith.constant 6 : i32
    %c7_i32_312 = arith.constant 7 : i32
    %548 = arith.subi %c7_i32_312, %c6_i32 : i32
    %cst_313 = arith.constant dense<0.000000e+00> : vector<2x16xf32>
    %549 = tpu.matmul %506, %78, %cst_313 {dimension_numbers = #tpu.dot_dimension_numbers<[1], [0], [0], [1], [0, 0, 1, 1], [], []>} : vector<2x16xf32>, vector<16x16xf32>, vector<2x16xf32> -> vector<2x16xf32>
    %cst_314 = arith.constant dense<0.000000e+00> : vector<2x16xf32>
    %550 = tpu.matmul %506, %80, %cst_314 {dimension_numbers = #tpu.dot_dimension_numbers<[1], [0], [0], [1], [0, 0, 1, 1], [], []>} : vector<2x16xf32>, vector<16x16xf32>, vector<2x16xf32> -> vector<2x16xf32>
    %cst_315 = arith.constant dense<0.000000e+00> : vector<2x16xf32>
    %551 = tpu.matmul %506, %82, %cst_315 {dimension_numbers = #tpu.dot_dimension_numbers<[1], [0], [0], [1], [0, 0, 1, 1], [], []>} : vector<2x16xf32>, vector<16x16xf32>, vector<2x16xf32> -> vector<2x16xf32>
    %552 = arith.addf %551, %92 : vector<2x16xf32>
    %c0_316 = arith.constant 0 : index
    %553 = arith.index_cast %c6_i32 : i32 to index
    %c0_317 = arith.constant 0 : index
    %c0_318 = arith.constant 0 : index
    %554 = vector.load %arg17[%c0_316, %553, %c0_317, %c0_318] : memref<6x8x2x16xf32, #tpu.memory_space<vmem>>, vector<1x1x2x16xf32>
    %555 = vector.shape_cast %554 : vector<1x1x2x16xf32> to vector<2x16xf32>
    %556 = arith.addf %555, %549 : vector<2x16xf32>
    %557 = arith.negf %556 : vector<2x16xf32>
    %558 = math.exp %557 : vector<2x16xf32>
    %cst_319 = arith.constant 1.000000e+00 : f32
    %559 = vector.broadcast %cst_319 : f32 to vector<2x16xf32>
    %560 = arith.addf %559, %558 : vector<2x16xf32>
    %561 = arith.divf %559, %560 : vector<2x16xf32>
    %c1_320 = arith.constant 1 : index
    %562 = arith.index_cast %c6_i32 : i32 to index
    %c0_321 = arith.constant 0 : index
    %c0_322 = arith.constant 0 : index
    %563 = vector.load %arg17[%c1_320, %562, %c0_321, %c0_322] : memref<6x8x2x16xf32, #tpu.memory_space<vmem>>, vector<1x1x2x16xf32>
    %564 = vector.shape_cast %563 : vector<1x1x2x16xf32> to vector<2x16xf32>
    %565 = arith.addf %564, %550 : vector<2x16xf32>
    %566 = arith.negf %565 : vector<2x16xf32>
    %567 = math.exp %566 : vector<2x16xf32>
    %cst_323 = arith.constant 1.000000e+00 : f32
    %568 = vector.broadcast %cst_323 : f32 to vector<2x16xf32>
    %569 = arith.addf %568, %567 : vector<2x16xf32>
    %570 = arith.divf %568, %569 : vector<2x16xf32>
    %c2_324 = arith.constant 2 : index
    %571 = arith.index_cast %c6_i32 : i32 to index
    %c0_325 = arith.constant 0 : index
    %c0_326 = arith.constant 0 : index
    %572 = vector.load %arg17[%c2_324, %571, %c0_325, %c0_326] : memref<6x8x2x16xf32, #tpu.memory_space<vmem>>, vector<1x1x2x16xf32>
    %573 = vector.shape_cast %572 : vector<1x1x2x16xf32> to vector<2x16xf32>
    %574 = arith.mulf %561, %552 : vector<2x16xf32>
    %575 = arith.addf %573, %574 : vector<2x16xf32>
    %576 = math.tanh %575 : vector<2x16xf32>
    %cst_327 = arith.constant 1.000000e+00 : f32
    %577 = vector.broadcast %cst_327 : f32 to vector<2x16xf32>
    %578 = arith.subf %577, %570 : vector<2x16xf32>
    %579 = arith.mulf %578, %576 : vector<2x16xf32>
    %580 = arith.mulf %570, %506 : vector<2x16xf32>
    %581 = arith.addf %579, %580 : vector<2x16xf32>
    %c0_328 = arith.constant 0 : index
    %582 = arith.index_cast %c6_i32 : i32 to index
    %c0_329 = arith.constant 0 : index
    %c0_330 = arith.constant 0 : index
    %583 = vector.load %arg18[%c0_328, %582, %c0_329, %c0_330] : memref<2x8x2x16xf32, #tpu.memory_space<vmem>>, vector<1x1x2x16xf32>
    %584 = vector.shape_cast %583 : vector<1x1x2x16xf32> to vector<2x16xf32>
    %585 = vector.shape_cast %581 : vector<2x16xf32> to vector<1x1x2x16xf32>
    tpu.vector_store %arg18[%c0_328, %582, %c0_329, %c0_330], %585 {strides = array<i32>} : memref<2x8x2x16xf32, #tpu.memory_space<vmem>>, vector<1x1x2x16xf32>,
    %cst_331 = arith.constant dense<0.000000e+00> : vector<2x16xf32>
    %586 = tpu.matmul %543, %84, %cst_331 {dimension_numbers = #tpu.dot_dimension_numbers<[1], [0], [0], [1], [0, 0, 1, 1], [], []>} : vector<2x16xf32>, vector<16x16xf32>, vector<2x16xf32> -> vector<2x16xf32>
    %cst_332 = arith.constant dense<0.000000e+00> : vector<2x16xf32>
    %587 = tpu.matmul %543, %86, %cst_332 {dimension_numbers = #tpu.dot_dimension_numbers<[1], [0], [0], [1], [0, 0, 1, 1], [], []>} : vector<2x16xf32>, vector<16x16xf32>, vector<2x16xf32> -> vector<2x16xf32>
    %cst_333 = arith.constant dense<0.000000e+00> : vector<2x16xf32>
    %588 = tpu.matmul %543, %88, %cst_333 {dimension_numbers = #tpu.dot_dimension_numbers<[1], [0], [0], [1], [0, 0, 1, 1], [], []>} : vector<2x16xf32>, vector<16x16xf32>, vector<2x16xf32> -> vector<2x16xf32>
    %589 = arith.addf %588, %96 : vector<2x16xf32>
    %c3_334 = arith.constant 3 : index
    %590 = arith.index_cast %548 : i32 to index
    %c0_335 = arith.constant 0 : index
    %c0_336 = arith.constant 0 : index
    %591 = vector.load %arg17[%c3_334, %590, %c0_335, %c0_336] : memref<6x8x2x16xf32, #tpu.memory_space<vmem>>, vector<1x1x2x16xf32>
    %592 = vector.shape_cast %591 : vector<1x1x2x16xf32> to vector<2x16xf32>
    %593 = arith.addf %592, %586 : vector<2x16xf32>
    %594 = arith.negf %593 : vector<2x16xf32>
    %595 = math.exp %594 : vector<2x16xf32>
    %cst_337 = arith.constant 1.000000e+00 : f32
    %596 = vector.broadcast %cst_337 : f32 to vector<2x16xf32>
    %597 = arith.addf %596, %595 : vector<2x16xf32>
    %598 = arith.divf %596, %597 : vector<2x16xf32>
    %c4_338 = arith.constant 4 : index
    %599 = arith.index_cast %548 : i32 to index
    %c0_339 = arith.constant 0 : index
    %c0_340 = arith.constant 0 : index
    %600 = vector.load %arg17[%c4_338, %599, %c0_339, %c0_340] : memref<6x8x2x16xf32, #tpu.memory_space<vmem>>, vector<1x1x2x16xf32>
    %601 = vector.shape_cast %600 : vector<1x1x2x16xf32> to vector<2x16xf32>
    %602 = arith.addf %601, %587 : vector<2x16xf32>
    %603 = arith.negf %602 : vector<2x16xf32>
    %604 = math.exp %603 : vector<2x16xf32>
    %cst_341 = arith.constant 1.000000e+00 : f32
    %605 = vector.broadcast %cst_341 : f32 to vector<2x16xf32>
    %606 = arith.addf %605, %604 : vector<2x16xf32>
    %607 = arith.divf %605, %606 : vector<2x16xf32>
    %c5_342 = arith.constant 5 : index
    %608 = arith.index_cast %548 : i32 to index
    %c0_343 = arith.constant 0 : index
    %c0_344 = arith.constant 0 : index
    %609 = vector.load %arg17[%c5_342, %608, %c0_343, %c0_344] : memref<6x8x2x16xf32, #tpu.memory_space<vmem>>, vector<1x1x2x16xf32>
    %610 = vector.shape_cast %609 : vector<1x1x2x16xf32> to vector<2x16xf32>
    %611 = arith.mulf %598, %589 : vector<2x16xf32>
    %612 = arith.addf %610, %611 : vector<2x16xf32>
    %613 = math.tanh %612 : vector<2x16xf32>
    %cst_345 = arith.constant 1.000000e+00 : f32
    %614 = vector.broadcast %cst_345 : f32 to vector<2x16xf32>
    %615 = arith.subf %614, %607 : vector<2x16xf32>
    %616 = arith.mulf %615, %613 : vector<2x16xf32>
    %617 = arith.mulf %607, %543 : vector<2x16xf32>
    %618 = arith.addf %616, %617 : vector<2x16xf32>
    %c1_346 = arith.constant 1 : index
    %619 = arith.index_cast %548 : i32 to index
    %c0_347 = arith.constant 0 : index
    %c0_348 = arith.constant 0 : index
    %620 = vector.load %arg18[%c1_346, %619, %c0_347, %c0_348] : memref<2x8x2x16xf32, #tpu.memory_space<vmem>>, vector<1x1x2x16xf32>
    %621 = vector.shape_cast %620 : vector<1x1x2x16xf32> to vector<2x16xf32>
    %622 = vector.shape_cast %618 : vector<2x16xf32> to vector<1x1x2x16xf32>
    tpu.vector_store %arg18[%c1_346, %619, %c0_347, %c0_348], %622 {strides = array<i32>} : memref<2x8x2x16xf32, #tpu.memory_space<vmem>>, vector<1x1x2x16xf32>,
    %c7_i32_349 = arith.constant 7 : i32
    %c7_i32_350 = arith.constant 7 : i32
    %623 = arith.subi %c7_i32_350, %c7_i32_349 : i32
    %cst_351 = arith.constant dense<0.000000e+00> : vector<2x16xf32>
    %624 = tpu.matmul %581, %78, %cst_351 {dimension_numbers = #tpu.dot_dimension_numbers<[1], [0], [0], [1], [0, 0, 1, 1], [], []>} : vector<2x16xf32>, vector<16x16xf32>, vector<2x16xf32> -> vector<2x16xf32>
    %cst_352 = arith.constant dense<0.000000e+00> : vector<2x16xf32>
    %625 = tpu.matmul %581, %80, %cst_352 {dimension_numbers = #tpu.dot_dimension_numbers<[1], [0], [0], [1], [0, 0, 1, 1], [], []>} : vector<2x16xf32>, vector<16x16xf32>, vector<2x16xf32> -> vector<2x16xf32>
    %cst_353 = arith.constant dense<0.000000e+00> : vector<2x16xf32>
    %626 = tpu.matmul %581, %82, %cst_353 {dimension_numbers = #tpu.dot_dimension_numbers<[1], [0], [0], [1], [0, 0, 1, 1], [], []>} : vector<2x16xf32>, vector<16x16xf32>, vector<2x16xf32> -> vector<2x16xf32>
    %627 = arith.addf %626, %92 : vector<2x16xf32>
    %c0_354 = arith.constant 0 : index
    %628 = arith.index_cast %c7_i32_349 : i32 to index
    %c0_355 = arith.constant 0 : index
    %c0_356 = arith.constant 0 : index
    %629 = vector.load %arg17[%c0_354, %628, %c0_355, %c0_356] : memref<6x8x2x16xf32, #tpu.memory_space<vmem>>, vector<1x1x2x16xf32>
    %630 = vector.shape_cast %629 : vector<1x1x2x16xf32> to vector<2x16xf32>
    %631 = arith.addf %630, %624 : vector<2x16xf32>
    %632 = arith.negf %631 : vector<2x16xf32>
    %633 = math.exp %632 : vector<2x16xf32>
    %cst_357 = arith.constant 1.000000e+00 : f32
    %634 = vector.broadcast %cst_357 : f32 to vector<2x16xf32>
    %635 = arith.addf %634, %633 : vector<2x16xf32>
    %636 = arith.divf %634, %635 : vector<2x16xf32>
    %c1_358 = arith.constant 1 : index
    %637 = arith.index_cast %c7_i32_349 : i32 to index
    %c0_359 = arith.constant 0 : index
    %c0_360 = arith.constant 0 : index
    %638 = vector.load %arg17[%c1_358, %637, %c0_359, %c0_360] : memref<6x8x2x16xf32, #tpu.memory_space<vmem>>, vector<1x1x2x16xf32>
    %639 = vector.shape_cast %638 : vector<1x1x2x16xf32> to vector<2x16xf32>
    %640 = arith.addf %639, %625 : vector<2x16xf32>
    %641 = arith.negf %640 : vector<2x16xf32>
    %642 = math.exp %641 : vector<2x16xf32>
    %cst_361 = arith.constant 1.000000e+00 : f32
    %643 = vector.broadcast %cst_361 : f32 to vector<2x16xf32>
    %644 = arith.addf %643, %642 : vector<2x16xf32>
    %645 = arith.divf %643, %644 : vector<2x16xf32>
    %c2_362 = arith.constant 2 : index
    %646 = arith.index_cast %c7_i32_349 : i32 to index
    %c0_363 = arith.constant 0 : index
    %c0_364 = arith.constant 0 : index
    %647 = vector.load %arg17[%c2_362, %646, %c0_363, %c0_364] : memref<6x8x2x16xf32, #tpu.memory_space<vmem>>, vector<1x1x2x16xf32>
    %648 = vector.shape_cast %647 : vector<1x1x2x16xf32> to vector<2x16xf32>
    %649 = arith.mulf %636, %627 : vector<2x16xf32>
    %650 = arith.addf %648, %649 : vector<2x16xf32>
    %651 = math.tanh %650 : vector<2x16xf32>
    %cst_365 = arith.constant 1.000000e+00 : f32
    %652 = vector.broadcast %cst_365 : f32 to vector<2x16xf32>
    %653 = arith.subf %652, %645 : vector<2x16xf32>
    %654 = arith.mulf %653, %651 : vector<2x16xf32>
    %655 = arith.mulf %645, %581 : vector<2x16xf32>
    %656 = arith.addf %654, %655 : vector<2x16xf32>
    %c0_366 = arith.constant 0 : index
    %657 = arith.index_cast %c7_i32_349 : i32 to index
    %c0_367 = arith.constant 0 : index
    %c0_368 = arith.constant 0 : index
    %658 = vector.load %arg18[%c0_366, %657, %c0_367, %c0_368] : memref<2x8x2x16xf32, #tpu.memory_space<vmem>>, vector<1x1x2x16xf32>
    %659 = vector.shape_cast %658 : vector<1x1x2x16xf32> to vector<2x16xf32>
    %660 = vector.shape_cast %656 : vector<2x16xf32> to vector<1x1x2x16xf32>
    tpu.vector_store %arg18[%c0_366, %657, %c0_367, %c0_368], %660 {strides = array<i32>} : memref<2x8x2x16xf32, #tpu.memory_space<vmem>>, vector<1x1x2x16xf32>,
    %cst_369 = arith.constant dense<0.000000e+00> : vector<2x16xf32>
    %661 = tpu.matmul %618, %84, %cst_369 {dimension_numbers = #tpu.dot_dimension_numbers<[1], [0], [0], [1], [0, 0, 1, 1], [], []>} : vector<2x16xf32>, vector<16x16xf32>, vector<2x16xf32> -> vector<2x16xf32>
    %cst_370 = arith.constant dense<0.000000e+00> : vector<2x16xf32>
    %662 = tpu.matmul %618, %86, %cst_370 {dimension_numbers = #tpu.dot_dimension_numbers<[1], [0], [0], [1], [0, 0, 1, 1], [], []>} : vector<2x16xf32>, vector<16x16xf32>, vector<2x16xf32> -> vector<2x16xf32>
    %cst_371 = arith.constant dense<0.000000e+00> : vector<2x16xf32>
    %663 = tpu.matmul %618, %88, %cst_371 {dimension_numbers = #tpu.dot_dimension_numbers<[1], [0], [0], [1], [0, 0, 1, 1], [], []>} : vector<2x16xf32>, vector<16x16xf32>, vector<2x16xf32> -> vector<2x16xf32>
    %664 = arith.addf %663, %96 : vector<2x16xf32>
    %c3_372 = arith.constant 3 : index
    %665 = arith.index_cast %623 : i32 to index
    %c0_373 = arith.constant 0 : index
    %c0_374 = arith.constant 0 : index
    %666 = vector.load %arg17[%c3_372, %665, %c0_373, %c0_374] : memref<6x8x2x16xf32, #tpu.memory_space<vmem>>, vector<1x1x2x16xf32>
    %667 = vector.shape_cast %666 : vector<1x1x2x16xf32> to vector<2x16xf32>
    %668 = arith.addf %667, %661 : vector<2x16xf32>
    %669 = arith.negf %668 : vector<2x16xf32>
    %670 = math.exp %669 : vector<2x16xf32>
    %cst_375 = arith.constant 1.000000e+00 : f32
    %671 = vector.broadcast %cst_375 : f32 to vector<2x16xf32>
    %672 = arith.addf %671, %670 : vector<2x16xf32>
    %673 = arith.divf %671, %672 : vector<2x16xf32>
    %c4_376 = arith.constant 4 : index
    %674 = arith.index_cast %623 : i32 to index
    %c0_377 = arith.constant 0 : index
    %c0_378 = arith.constant 0 : index
    %675 = vector.load %arg17[%c4_376, %674, %c0_377, %c0_378] : memref<6x8x2x16xf32, #tpu.memory_space<vmem>>, vector<1x1x2x16xf32>
    %676 = vector.shape_cast %675 : vector<1x1x2x16xf32> to vector<2x16xf32>
    %677 = arith.addf %676, %662 : vector<2x16xf32>
    %678 = arith.negf %677 : vector<2x16xf32>
    %679 = math.exp %678 : vector<2x16xf32>
    %cst_379 = arith.constant 1.000000e+00 : f32
    %680 = vector.broadcast %cst_379 : f32 to vector<2x16xf32>
    %681 = arith.addf %680, %679 : vector<2x16xf32>
    %682 = arith.divf %680, %681 : vector<2x16xf32>
    %c5_380 = arith.constant 5 : index
    %683 = arith.index_cast %623 : i32 to index
    %c0_381 = arith.constant 0 : index
    %c0_382 = arith.constant 0 : index
    %684 = vector.load %arg17[%c5_380, %683, %c0_381, %c0_382] : memref<6x8x2x16xf32, #tpu.memory_space<vmem>>, vector<1x1x2x16xf32>
    %685 = vector.shape_cast %684 : vector<1x1x2x16xf32> to vector<2x16xf32>
    %686 = arith.mulf %673, %664 : vector<2x16xf32>
    %687 = arith.addf %685, %686 : vector<2x16xf32>
    %688 = math.tanh %687 : vector<2x16xf32>
    %cst_383 = arith.constant 1.000000e+00 : f32
    %689 = vector.broadcast %cst_383 : f32 to vector<2x16xf32>
    %690 = arith.subf %689, %682 : vector<2x16xf32>
    %691 = arith.mulf %690, %688 : vector<2x16xf32>
    %692 = arith.mulf %682, %618 : vector<2x16xf32>
    %693 = arith.addf %691, %692 : vector<2x16xf32>
    %c1_384 = arith.constant 1 : index
    %694 = arith.index_cast %623 : i32 to index
    %c0_385 = arith.constant 0 : index
    %c0_386 = arith.constant 0 : index
    %695 = vector.load %arg18[%c1_384, %694, %c0_385, %c0_386] : memref<2x8x2x16xf32, #tpu.memory_space<vmem>>, vector<1x1x2x16xf32>
    %696 = vector.shape_cast %695 : vector<1x1x2x16xf32> to vector<2x16xf32>
    %697 = vector.shape_cast %693 : vector<2x16xf32> to vector<1x1x2x16xf32>
    tpu.vector_store %arg18[%c1_384, %694, %c0_385, %c0_386], %697 {strides = array<i32>} : memref<2x8x2x16xf32, #tpu.memory_space<vmem>>, vector<1x1x2x16xf32>,
    %c8_i32 = arith.constant 8 : i32
    %c0_387 = arith.constant 0 : index
    %c0_388 = arith.constant 0 : index
    %c0_389 = arith.constant 0 : index
    %c0_390 = arith.constant 0 : index
    %698 = vector.load %arg18[%c0_387, %c0_388, %c0_389, %c0_390] : memref<2x8x2x16xf32, #tpu.memory_space<vmem>>, vector<1x8x2x16xf32>
    %699 = vector.shape_cast %698 : vector<1x8x2x16xf32> to vector<8x2x16xf32>
    %700 = vector.shape_cast %699 : vector<8x2x16xf32> to vector<16x16xf32>
    %c1_391 = arith.constant 1 : index
    %c0_392 = arith.constant 0 : index
    %c0_393 = arith.constant 0 : index
    %c0_394 = arith.constant 0 : index
    %701 = vector.load %arg18[%c1_391, %c0_392, %c0_393, %c0_394] : memref<2x8x2x16xf32, #tpu.memory_space<vmem>>, vector<1x8x2x16xf32>
    %702 = vector.shape_cast %701 : vector<1x8x2x16xf32> to vector<8x2x16xf32>
    %703 = vector.shape_cast %702 : vector<8x2x16xf32> to vector<16x16xf32>
    %c0_395 = arith.constant 0 : index
    %c0_396 = arith.constant 0 : index
    %c0_397 = arith.constant 0 : index
    %704 = vector.load %arg8[%c0_395, %c0_396, %c0_397] : memref<6x16x16xf32, #tpu.memory_space<vmem>>, vector<1x16x16xf32>
    %705 = vector.shape_cast %704 : vector<1x16x16xf32> to vector<16x16xf32>
    %cst_398 = arith.constant dense<0.000000e+00> : vector<16x16xf32>
    %706 = tpu.matmul %700, %705, %cst_398 {dimension_numbers = #tpu.dot_dimension_numbers<[1], [0], [0], [1], [0, 0, 1, 1], [], []>} : vector<16x16xf32>, vector<16x16xf32>, vector<16x16xf32> -> vector<16x16xf32>
    %c0_399 = arith.constant 0 : index
    %c0_400 = arith.constant 0 : index
    %c0_401 = arith.constant 0 : index
    %707 = vector.load %arg9[%c0_399, %c0_400, %c0_401] : memref<6x16x16xf32, #tpu.memory_space<vmem>>, vector<1x16x16xf32>
    %708 = vector.shape_cast %707 : vector<1x16x16xf32> to vector<16x16xf32>
    %cst_402 = arith.constant dense<0.000000e+00> : vector<16x16xf32>
    %709 = tpu.matmul %703, %708, %cst_402 {dimension_numbers = #tpu.dot_dimension_numbers<[1], [0], [0], [1], [0, 0, 1, 1], [], []>} : vector<16x16xf32>, vector<16x16xf32>, vector<16x16xf32> -> vector<16x16xf32>
    %710 = arith.addf %706, %709 : vector<16x16xf32>
    %c0_403 = arith.constant 0 : index
    %c0_404 = arith.constant 0 : index
    %c0_405 = arith.constant 0 : index
    %711 = vector.load %arg11[%c0_403, %c0_404, %c0_405] : memref<6x1x16xf32, #tpu.memory_space<vmem>>, vector<1x1x16xf32>
    %712 = vector.shape_cast %711 : vector<1x1x16xf32> to vector<1x16xf32>
    %713 = vector.broadcast %712 : vector<1x16xf32> to vector<16x16xf32>
    %714 = arith.addf %710, %713 : vector<16x16xf32>
    %715 = vector.shape_cast %714 : vector<16x16xf32> to vector<8x2x16xf32>
    %c0_406 = arith.constant 0 : index
    %c0_407 = arith.constant 0 : index
    %c0_408 = arith.constant 0 : index
    %c0_409 = arith.constant 0 : index
    %716 = vector.load %arg17[%c0_406, %c0_407, %c0_408, %c0_409] : memref<6x8x2x16xf32, #tpu.memory_space<vmem>>, vector<1x8x2x16xf32>
    %717 = vector.shape_cast %716 : vector<1x8x2x16xf32> to vector<8x2x16xf32>
    %718 = vector.shape_cast %715 : vector<8x2x16xf32> to vector<1x8x2x16xf32>
    tpu.vector_store %arg17[%c0_406, %c0_407, %c0_408, %c0_409], %718 {strides = array<i32>} : memref<6x8x2x16xf32, #tpu.memory_space<vmem>>, vector<1x8x2x16xf32>,
    %c1_410 = arith.constant 1 : index
    %c0_411 = arith.constant 0 : index
    %c0_412 = arith.constant 0 : index
    %719 = vector.load %arg8[%c1_410, %c0_411, %c0_412] : memref<6x16x16xf32, #tpu.memory_space<vmem>>, vector<1x16x16xf32>
    %720 = vector.shape_cast %719 : vector<1x16x16xf32> to vector<16x16xf32>
    %cst_413 = arith.constant dense<0.000000e+00> : vector<16x16xf32>
    %721 = tpu.matmul %700, %720, %cst_413 {dimension_numbers = #tpu.dot_dimension_numbers<[1], [0], [0], [1], [0, 0, 1, 1], [], []>} : vector<16x16xf32>, vector<16x16xf32>, vector<16x16xf32> -> vector<16x16xf32>
    %c1_414 = arith.constant 1 : index
    %c0_415 = arith.constant 0 : index
    %c0_416 = arith.constant 0 : index
    %722 = vector.load %arg9[%c1_414, %c0_415, %c0_416] : memref<6x16x16xf32, #tpu.memory_space<vmem>>, vector<1x16x16xf32>
    %723 = vector.shape_cast %722 : vector<1x16x16xf32> to vector<16x16xf32>
    %cst_417 = arith.constant dense<0.000000e+00> : vector<16x16xf32>
    %724 = tpu.matmul %703, %723, %cst_417 {dimension_numbers = #tpu.dot_dimension_numbers<[1], [0], [0], [1], [0, 0, 1, 1], [], []>} : vector<16x16xf32>, vector<16x16xf32>, vector<16x16xf32> -> vector<16x16xf32>
    %725 = arith.addf %721, %724 : vector<16x16xf32>
    %c1_418 = arith.constant 1 : index
    %c0_419 = arith.constant 0 : index
    %c0_420 = arith.constant 0 : index
    %726 = vector.load %arg11[%c1_418, %c0_419, %c0_420] : memref<6x1x16xf32, #tpu.memory_space<vmem>>, vector<1x1x16xf32>
    %727 = vector.shape_cast %726 : vector<1x1x16xf32> to vector<1x16xf32>
    %728 = vector.broadcast %727 : vector<1x16xf32> to vector<16x16xf32>
    %729 = arith.addf %725, %728 : vector<16x16xf32>
    %730 = vector.shape_cast %729 : vector<16x16xf32> to vector<8x2x16xf32>
    %c1_421 = arith.constant 1 : index
    %c0_422 = arith.constant 0 : index
    %c0_423 = arith.constant 0 : index
    %c0_424 = arith.constant 0 : index
    %731 = vector.load %arg17[%c1_421, %c0_422, %c0_423, %c0_424] : memref<6x8x2x16xf32, #tpu.memory_space<vmem>>, vector<1x8x2x16xf32>
    %732 = vector.shape_cast %731 : vector<1x8x2x16xf32> to vector<8x2x16xf32>
    %733 = vector.shape_cast %730 : vector<8x2x16xf32> to vector<1x8x2x16xf32>
    tpu.vector_store %arg17[%c1_421, %c0_422, %c0_423, %c0_424], %733 {strides = array<i32>} : memref<6x8x2x16xf32, #tpu.memory_space<vmem>>, vector<1x8x2x16xf32>,
    %c2_425 = arith.constant 2 : index
    %c0_426 = arith.constant 0 : index
    %c0_427 = arith.constant 0 : index
    %734 = vector.load %arg8[%c2_425, %c0_426, %c0_427] : memref<6x16x16xf32, #tpu.memory_space<vmem>>, vector<1x16x16xf32>
    %735 = vector.shape_cast %734 : vector<1x16x16xf32> to vector<16x16xf32>
    %cst_428 = arith.constant dense<0.000000e+00> : vector<16x16xf32>
    %736 = tpu.matmul %700, %735, %cst_428 {dimension_numbers = #tpu.dot_dimension_numbers<[1], [0], [0], [1], [0, 0, 1, 1], [], []>} : vector<16x16xf32>, vector<16x16xf32>, vector<16x16xf32> -> vector<16x16xf32>
    %c2_429 = arith.constant 2 : index
    %c0_430 = arith.constant 0 : index
    %c0_431 = arith.constant 0 : index
    %737 = vector.load %arg9[%c2_429, %c0_430, %c0_431] : memref<6x16x16xf32, #tpu.memory_space<vmem>>, vector<1x16x16xf32>
    %738 = vector.shape_cast %737 : vector<1x16x16xf32> to vector<16x16xf32>
    %cst_432 = arith.constant dense<0.000000e+00> : vector<16x16xf32>
    %739 = tpu.matmul %703, %738, %cst_432 {dimension_numbers = #tpu.dot_dimension_numbers<[1], [0], [0], [1], [0, 0, 1, 1], [], []>} : vector<16x16xf32>, vector<16x16xf32>, vector<16x16xf32> -> vector<16x16xf32>
    %740 = arith.addf %736, %739 : vector<16x16xf32>
    %c2_433 = arith.constant 2 : index
    %c0_434 = arith.constant 0 : index
    %c0_435 = arith.constant 0 : index
    %741 = vector.load %arg11[%c2_433, %c0_434, %c0_435] : memref<6x1x16xf32, #tpu.memory_space<vmem>>, vector<1x1x16xf32>
    %742 = vector.shape_cast %741 : vector<1x1x16xf32> to vector<1x16xf32>
    %743 = vector.broadcast %742 : vector<1x16xf32> to vector<16x16xf32>
    %744 = arith.addf %740, %743 : vector<16x16xf32>
    %745 = vector.shape_cast %744 : vector<16x16xf32> to vector<8x2x16xf32>
    %c2_436 = arith.constant 2 : index
    %c0_437 = arith.constant 0 : index
    %c0_438 = arith.constant 0 : index
    %c0_439 = arith.constant 0 : index
    %746 = vector.load %arg17[%c2_436, %c0_437, %c0_438, %c0_439] : memref<6x8x2x16xf32, #tpu.memory_space<vmem>>, vector<1x8x2x16xf32>
    %747 = vector.shape_cast %746 : vector<1x8x2x16xf32> to vector<8x2x16xf32>
    %748 = vector.shape_cast %745 : vector<8x2x16xf32> to vector<1x8x2x16xf32>
    tpu.vector_store %arg17[%c2_436, %c0_437, %c0_438, %c0_439], %748 {strides = array<i32>} : memref<6x8x2x16xf32, #tpu.memory_space<vmem>>, vector<1x8x2x16xf32>,
    %c3_440 = arith.constant 3 : index
    %c0_441 = arith.constant 0 : index
    %c0_442 = arith.constant 0 : index
    %749 = vector.load %arg8[%c3_440, %c0_441, %c0_442] : memref<6x16x16xf32, #tpu.memory_space<vmem>>, vector<1x16x16xf32>
    %750 = vector.shape_cast %749 : vector<1x16x16xf32> to vector<16x16xf32>
    %cst_443 = arith.constant dense<0.000000e+00> : vector<16x16xf32>
    %751 = tpu.matmul %700, %750, %cst_443 {dimension_numbers = #tpu.dot_dimension_numbers<[1], [0], [0], [1], [0, 0, 1, 1], [], []>} : vector<16x16xf32>, vector<16x16xf32>, vector<16x16xf32> -> vector<16x16xf32>
    %c3_444 = arith.constant 3 : index
    %c0_445 = arith.constant 0 : index
    %c0_446 = arith.constant 0 : index
    %752 = vector.load %arg9[%c3_444, %c0_445, %c0_446] : memref<6x16x16xf32, #tpu.memory_space<vmem>>, vector<1x16x16xf32>
    %753 = vector.shape_cast %752 : vector<1x16x16xf32> to vector<16x16xf32>
    %cst_447 = arith.constant dense<0.000000e+00> : vector<16x16xf32>
    %754 = tpu.matmul %703, %753, %cst_447 {dimension_numbers = #tpu.dot_dimension_numbers<[1], [0], [0], [1], [0, 0, 1, 1], [], []>} : vector<16x16xf32>, vector<16x16xf32>, vector<16x16xf32> -> vector<16x16xf32>
    %755 = arith.addf %751, %754 : vector<16x16xf32>
    %c3_448 = arith.constant 3 : index
    %c0_449 = arith.constant 0 : index
    %c0_450 = arith.constant 0 : index
    %756 = vector.load %arg11[%c3_448, %c0_449, %c0_450] : memref<6x1x16xf32, #tpu.memory_space<vmem>>, vector<1x1x16xf32>
    %757 = vector.shape_cast %756 : vector<1x1x16xf32> to vector<1x16xf32>
    %758 = vector.broadcast %757 : vector<1x16xf32> to vector<16x16xf32>
    %759 = arith.addf %755, %758 : vector<16x16xf32>
    %760 = vector.shape_cast %759 : vector<16x16xf32> to vector<8x2x16xf32>
    %c3_451 = arith.constant 3 : index
    %c0_452 = arith.constant 0 : index
    %c0_453 = arith.constant 0 : index
    %c0_454 = arith.constant 0 : index
    %761 = vector.load %arg17[%c3_451, %c0_452, %c0_453, %c0_454] : memref<6x8x2x16xf32, #tpu.memory_space<vmem>>, vector<1x8x2x16xf32>
    %762 = vector.shape_cast %761 : vector<1x8x2x16xf32> to vector<8x2x16xf32>
    %763 = vector.shape_cast %760 : vector<8x2x16xf32> to vector<1x8x2x16xf32>
    tpu.vector_store %arg17[%c3_451, %c0_452, %c0_453, %c0_454], %763 {strides = array<i32>} : memref<6x8x2x16xf32, #tpu.memory_space<vmem>>, vector<1x8x2x16xf32>,
    %c4_455 = arith.constant 4 : index
    %c0_456 = arith.constant 0 : index
    %c0_457 = arith.constant 0 : index
    %764 = vector.load %arg8[%c4_455, %c0_456, %c0_457] : memref<6x16x16xf32, #tpu.memory_space<vmem>>, vector<1x16x16xf32>
    %765 = vector.shape_cast %764 : vector<1x16x16xf32> to vector<16x16xf32>
    %cst_458 = arith.constant dense<0.000000e+00> : vector<16x16xf32>
    %766 = tpu.matmul %700, %765, %cst_458 {dimension_numbers = #tpu.dot_dimension_numbers<[1], [0], [0], [1], [0, 0, 1, 1], [], []>} : vector<16x16xf32>, vector<16x16xf32>, vector<16x16xf32> -> vector<16x16xf32>
    %c4_459 = arith.constant 4 : index
    %c0_460 = arith.constant 0 : index
    %c0_461 = arith.constant 0 : index
    %767 = vector.load %arg9[%c4_459, %c0_460, %c0_461] : memref<6x16x16xf32, #tpu.memory_space<vmem>>, vector<1x16x16xf32>
    %768 = vector.shape_cast %767 : vector<1x16x16xf32> to vector<16x16xf32>
    %cst_462 = arith.constant dense<0.000000e+00> : vector<16x16xf32>
    %769 = tpu.matmul %703, %768, %cst_462 {dimension_numbers = #tpu.dot_dimension_numbers<[1], [0], [0], [1], [0, 0, 1, 1], [], []>} : vector<16x16xf32>, vector<16x16xf32>, vector<16x16xf32> -> vector<16x16xf32>
    %770 = arith.addf %766, %769 : vector<16x16xf32>
    %c4_463 = arith.constant 4 : index
    %c0_464 = arith.constant 0 : index
    %c0_465 = arith.constant 0 : index
    %771 = vector.load %arg11[%c4_463, %c0_464, %c0_465] : memref<6x1x16xf32, #tpu.memory_space<vmem>>, vector<1x1x16xf32>
    %772 = vector.shape_cast %771 : vector<1x1x16xf32> to vector<1x16xf32>
    %773 = vector.broadcast %772 : vector<1x16xf32> to vector<16x16xf32>
    %774 = arith.addf %770, %773 : vector<16x16xf32>
    %775 = vector.shape_cast %774 : vector<16x16xf32> to vector<8x2x16xf32>
    %c4_466 = arith.constant 4 : index
    %c0_467 = arith.constant 0 : index
    %c0_468 = arith.constant 0 : index
    %c0_469 = arith.constant 0 : index
    %776 = vector.load %arg17[%c4_466, %c0_467, %c0_468, %c0_469] : memref<6x8x2x16xf32, #tpu.memory_space<vmem>>, vector<1x8x2x16xf32>
    %777 = vector.shape_cast %776 : vector<1x8x2x16xf32> to vector<8x2x16xf32>
    %778 = vector.shape_cast %775 : vector<8x2x16xf32> to vector<1x8x2x16xf32>
    tpu.vector_store %arg17[%c4_466, %c0_467, %c0_468, %c0_469], %778 {strides = array<i32>} : memref<6x8x2x16xf32, #tpu.memory_space<vmem>>, vector<1x8x2x16xf32>,
    %c5_470 = arith.constant 5 : index
    %c0_471 = arith.constant 0 : index
    %c0_472 = arith.constant 0 : index
    %779 = vector.load %arg8[%c5_470, %c0_471, %c0_472] : memref<6x16x16xf32, #tpu.memory_space<vmem>>, vector<1x16x16xf32>
    %780 = vector.shape_cast %779 : vector<1x16x16xf32> to vector<16x16xf32>
    %cst_473 = arith.constant dense<0.000000e+00> : vector<16x16xf32>
    %781 = tpu.matmul %700, %780, %cst_473 {dimension_numbers = #tpu.dot_dimension_numbers<[1], [0], [0], [1], [0, 0, 1, 1], [], []>} : vector<16x16xf32>, vector<16x16xf32>, vector<16x16xf32> -> vector<16x16xf32>
    %c5_474 = arith.constant 5 : index
    %c0_475 = arith.constant 0 : index
    %c0_476 = arith.constant 0 : index
    %782 = vector.load %arg9[%c5_474, %c0_475, %c0_476] : memref<6x16x16xf32, #tpu.memory_space<vmem>>, vector<1x16x16xf32>
    %783 = vector.shape_cast %782 : vector<1x16x16xf32> to vector<16x16xf32>
    %cst_477 = arith.constant dense<0.000000e+00> : vector<16x16xf32>
    %784 = tpu.matmul %703, %783, %cst_477 {dimension_numbers = #tpu.dot_dimension_numbers<[1], [0], [0], [1], [0, 0, 1, 1], [], []>} : vector<16x16xf32>, vector<16x16xf32>, vector<16x16xf32> -> vector<16x16xf32>
    %785 = arith.addf %781, %784 : vector<16x16xf32>
    %c5_478 = arith.constant 5 : index
    %c0_479 = arith.constant 0 : index
    %c0_480 = arith.constant 0 : index
    %786 = vector.load %arg11[%c5_478, %c0_479, %c0_480] : memref<6x1x16xf32, #tpu.memory_space<vmem>>, vector<1x1x16xf32>
    %787 = vector.shape_cast %786 : vector<1x1x16xf32> to vector<1x16xf32>
    %788 = vector.broadcast %787 : vector<1x16xf32> to vector<16x16xf32>
    %789 = arith.addf %785, %788 : vector<16x16xf32>
    %790 = vector.shape_cast %789 : vector<16x16xf32> to vector<8x2x16xf32>
    %c5_481 = arith.constant 5 : index
    %c0_482 = arith.constant 0 : index
    %c0_483 = arith.constant 0 : index
    %c0_484 = arith.constant 0 : index
    %791 = vector.load %arg17[%c5_481, %c0_482, %c0_483, %c0_484] : memref<6x8x2x16xf32, #tpu.memory_space<vmem>>, vector<1x8x2x16xf32>
    %792 = vector.shape_cast %791 : vector<1x8x2x16xf32> to vector<8x2x16xf32>
    %793 = vector.shape_cast %790 : vector<8x2x16xf32> to vector<1x8x2x16xf32>
    tpu.vector_store %arg17[%c5_481, %c0_482, %c0_483, %c0_484], %793 {strides = array<i32>} : memref<6x8x2x16xf32, #tpu.memory_space<vmem>>, vector<1x8x2x16xf32>,
    %c0_485 = arith.constant 0 : index
    %c0_486 = arith.constant 0 : index
    %c0_487 = arith.constant 0 : index
    %794 = vector.load %arg10[%c0_485, %c0_486, %c0_487] : memref<6x16x16xf32, #tpu.memory_space<vmem>>, vector<1x16x16xf32>
    %795 = vector.shape_cast %794 : vector<1x16x16xf32> to vector<16x16xf32>
    %c1_488 = arith.constant 1 : index
    %c0_489 = arith.constant 0 : index
    %c0_490 = arith.constant 0 : index
    %796 = vector.load %arg10[%c1_488, %c0_489, %c0_490] : memref<6x16x16xf32, #tpu.memory_space<vmem>>, vector<1x16x16xf32>
    %797 = vector.shape_cast %796 : vector<1x16x16xf32> to vector<16x16xf32>
    %c2_491 = arith.constant 2 : index
    %c0_492 = arith.constant 0 : index
    %c0_493 = arith.constant 0 : index
    %798 = vector.load %arg10[%c2_491, %c0_492, %c0_493] : memref<6x16x16xf32, #tpu.memory_space<vmem>>, vector<1x16x16xf32>
    %799 = vector.shape_cast %798 : vector<1x16x16xf32> to vector<16x16xf32>
    %c3_494 = arith.constant 3 : index
    %c0_495 = arith.constant 0 : index
    %c0_496 = arith.constant 0 : index
    %800 = vector.load %arg10[%c3_494, %c0_495, %c0_496] : memref<6x16x16xf32, #tpu.memory_space<vmem>>, vector<1x16x16xf32>
    %801 = vector.shape_cast %800 : vector<1x16x16xf32> to vector<16x16xf32>
    %c4_497 = arith.constant 4 : index
    %c0_498 = arith.constant 0 : index
    %c0_499 = arith.constant 0 : index
    %802 = vector.load %arg10[%c4_497, %c0_498, %c0_499] : memref<6x16x16xf32, #tpu.memory_space<vmem>>, vector<1x16x16xf32>
    %803 = vector.shape_cast %802 : vector<1x16x16xf32> to vector<16x16xf32>
    %c5_500 = arith.constant 5 : index
    %c0_501 = arith.constant 0 : index
    %c0_502 = arith.constant 0 : index
    %804 = vector.load %arg10[%c5_500, %c0_501, %c0_502] : memref<6x16x16xf32, #tpu.memory_space<vmem>>, vector<1x16x16xf32>
    %805 = vector.shape_cast %804 : vector<1x16x16xf32> to vector<16x16xf32>
    %c0_503 = arith.constant 0 : index
    %c0_504 = arith.constant 0 : index
    %c0_505 = arith.constant 0 : index
    %806 = vector.load %arg12[%c0_503, %c0_504, %c0_505] : memref<2x1x16xf32, #tpu.memory_space<vmem>>, vector<1x1x16xf32>
    %807 = vector.shape_cast %806 : vector<1x1x16xf32> to vector<1x16xf32>
    %808 = vector.shape_cast %807 : vector<1x16xf32> to vector<1x16xf32>
    %809 = vector.broadcast %808 : vector<1x16xf32> to vector<2x16xf32>
    %c1_506 = arith.constant 1 : index
    %c0_507 = arith.constant 0 : index
    %c0_508 = arith.constant 0 : index
    %810 = vector.load %arg12[%c1_506, %c0_507, %c0_508] : memref<2x1x16xf32, #tpu.memory_space<vmem>>, vector<1x1x16xf32>
    %811 = vector.shape_cast %810 : vector<1x1x16xf32> to vector<1x16xf32>
    %812 = vector.shape_cast %811 : vector<1x16xf32> to vector<1x16xf32>
    %813 = vector.broadcast %812 : vector<1x16xf32> to vector<2x16xf32>
    %cst_509 = arith.constant 0.000000e+00 : f32
    %814 = vector.broadcast %cst_509 : f32 to vector<2x16xf32>
    %c0_i32_510 = arith.constant 0 : i32
    %c7_i32_511 = arith.constant 7 : i32
    %815 = arith.subi %c7_i32_511, %c0_i32_510 : i32
    %cst_512 = arith.constant dense<0.000000e+00> : vector<2x16xf32>
    %816 = tpu.matmul %814, %795, %cst_512 {dimension_numbers = #tpu.dot_dimension_numbers<[1], [0], [0], [1], [0, 0, 1, 1], [], []>} : vector<2x16xf32>, vector<16x16xf32>, vector<2x16xf32> -> vector<2x16xf32>
    %cst_513 = arith.constant dense<0.000000e+00> : vector<2x16xf32>
    %817 = tpu.matmul %814, %797, %cst_513 {dimension_numbers = #tpu.dot_dimension_numbers<[1], [0], [0], [1], [0, 0, 1, 1], [], []>} : vector<2x16xf32>, vector<16x16xf32>, vector<2x16xf32> -> vector<2x16xf32>
    %cst_514 = arith.constant dense<0.000000e+00> : vector<2x16xf32>
    %818 = tpu.matmul %814, %799, %cst_514 {dimension_numbers = #tpu.dot_dimension_numbers<[1], [0], [0], [1], [0, 0, 1, 1], [], []>} : vector<2x16xf32>, vector<16x16xf32>, vector<2x16xf32> -> vector<2x16xf32>
    %819 = arith.addf %818, %809 : vector<2x16xf32>
    %c0_515 = arith.constant 0 : index
    %820 = arith.index_cast %c0_i32_510 : i32 to index
    %c0_516 = arith.constant 0 : index
    %c0_517 = arith.constant 0 : index
    %821 = vector.load %arg17[%c0_515, %820, %c0_516, %c0_517] : memref<6x8x2x16xf32, #tpu.memory_space<vmem>>, vector<1x1x2x16xf32>
    %822 = vector.shape_cast %821 : vector<1x1x2x16xf32> to vector<2x16xf32>
    %823 = arith.addf %822, %816 : vector<2x16xf32>
    %824 = arith.negf %823 : vector<2x16xf32>
    %825 = math.exp %824 : vector<2x16xf32>
    %cst_518 = arith.constant 1.000000e+00 : f32
    %826 = vector.broadcast %cst_518 : f32 to vector<2x16xf32>
    %827 = arith.addf %826, %825 : vector<2x16xf32>
    %828 = arith.divf %826, %827 : vector<2x16xf32>
    %c1_519 = arith.constant 1 : index
    %829 = arith.index_cast %c0_i32_510 : i32 to index
    %c0_520 = arith.constant 0 : index
    %c0_521 = arith.constant 0 : index
    %830 = vector.load %arg17[%c1_519, %829, %c0_520, %c0_521] : memref<6x8x2x16xf32, #tpu.memory_space<vmem>>, vector<1x1x2x16xf32>
    %831 = vector.shape_cast %830 : vector<1x1x2x16xf32> to vector<2x16xf32>
    %832 = arith.addf %831, %817 : vector<2x16xf32>
    %833 = arith.negf %832 : vector<2x16xf32>
    %834 = math.exp %833 : vector<2x16xf32>
    %cst_522 = arith.constant 1.000000e+00 : f32
    %835 = vector.broadcast %cst_522 : f32 to vector<2x16xf32>
    %836 = arith.addf %835, %834 : vector<2x16xf32>
    %837 = arith.divf %835, %836 : vector<2x16xf32>
    %c2_523 = arith.constant 2 : index
    %838 = arith.index_cast %c0_i32_510 : i32 to index
    %c0_524 = arith.constant 0 : index
    %c0_525 = arith.constant 0 : index
    %839 = vector.load %arg17[%c2_523, %838, %c0_524, %c0_525] : memref<6x8x2x16xf32, #tpu.memory_space<vmem>>, vector<1x1x2x16xf32>
    %840 = vector.shape_cast %839 : vector<1x1x2x16xf32> to vector<2x16xf32>
    %841 = arith.mulf %828, %819 : vector<2x16xf32>
    %842 = arith.addf %840, %841 : vector<2x16xf32>
    %843 = math.tanh %842 : vector<2x16xf32>
    %cst_526 = arith.constant 1.000000e+00 : f32
    %844 = vector.broadcast %cst_526 : f32 to vector<2x16xf32>
    %845 = arith.subf %844, %837 : vector<2x16xf32>
    %846 = arith.mulf %845, %843 : vector<2x16xf32>
    %847 = arith.mulf %837, %814 : vector<2x16xf32>
    %848 = arith.addf %846, %847 : vector<2x16xf32>
    %c0_527 = arith.constant 0 : index
    %849 = arith.index_cast %c0_i32_510 : i32 to index
    %c0_528 = arith.constant 0 : index
    %c0_529 = arith.constant 0 : index
    %850 = vector.load %arg18[%c0_527, %849, %c0_528, %c0_529] : memref<2x8x2x16xf32, #tpu.memory_space<vmem>>, vector<1x1x2x16xf32>
    %851 = vector.shape_cast %850 : vector<1x1x2x16xf32> to vector<2x16xf32>
    %852 = vector.shape_cast %848 : vector<2x16xf32> to vector<1x1x2x16xf32>
    tpu.vector_store %arg18[%c0_527, %849, %c0_528, %c0_529], %852 {strides = array<i32>} : memref<2x8x2x16xf32, #tpu.memory_space<vmem>>, vector<1x1x2x16xf32>,
    %cst_530 = arith.constant dense<0.000000e+00> : vector<2x16xf32>
    %853 = tpu.matmul %814, %801, %cst_530 {dimension_numbers = #tpu.dot_dimension_numbers<[1], [0], [0], [1], [0, 0, 1, 1], [], []>} : vector<2x16xf32>, vector<16x16xf32>, vector<2x16xf32> -> vector<2x16xf32>
    %cst_531 = arith.constant dense<0.000000e+00> : vector<2x16xf32>
    %854 = tpu.matmul %814, %803, %cst_531 {dimension_numbers = #tpu.dot_dimension_numbers<[1], [0], [0], [1], [0, 0, 1, 1], [], []>} : vector<2x16xf32>, vector<16x16xf32>, vector<2x16xf32> -> vector<2x16xf32>
    %cst_532 = arith.constant dense<0.000000e+00> : vector<2x16xf32>
    %855 = tpu.matmul %814, %805, %cst_532 {dimension_numbers = #tpu.dot_dimension_numbers<[1], [0], [0], [1], [0, 0, 1, 1], [], []>} : vector<2x16xf32>, vector<16x16xf32>, vector<2x16xf32> -> vector<2x16xf32>
    %856 = arith.addf %855, %813 : vector<2x16xf32>
    %c3_533 = arith.constant 3 : index
    %857 = arith.index_cast %815 : i32 to index
    %c0_534 = arith.constant 0 : index
    %c0_535 = arith.constant 0 : index
    %858 = vector.load %arg17[%c3_533, %857, %c0_534, %c0_535] : memref<6x8x2x16xf32, #tpu.memory_space<vmem>>, vector<1x1x2x16xf32>
    %859 = vector.shape_cast %858 : vector<1x1x2x16xf32> to vector<2x16xf32>
    %860 = arith.addf %859, %853 : vector<2x16xf32>
    %861 = arith.negf %860 : vector<2x16xf32>
    %862 = math.exp %861 : vector<2x16xf32>
    %cst_536 = arith.constant 1.000000e+00 : f32
    %863 = vector.broadcast %cst_536 : f32 to vector<2x16xf32>
    %864 = arith.addf %863, %862 : vector<2x16xf32>
    %865 = arith.divf %863, %864 : vector<2x16xf32>
    %c4_537 = arith.constant 4 : index
    %866 = arith.index_cast %815 : i32 to index
    %c0_538 = arith.constant 0 : index
    %c0_539 = arith.constant 0 : index
    %867 = vector.load %arg17[%c4_537, %866, %c0_538, %c0_539] : memref<6x8x2x16xf32, #tpu.memory_space<vmem>>, vector<1x1x2x16xf32>
    %868 = vector.shape_cast %867 : vector<1x1x2x16xf32> to vector<2x16xf32>
    %869 = arith.addf %868, %854 : vector<2x16xf32>
    %870 = arith.negf %869 : vector<2x16xf32>
    %871 = math.exp %870 : vector<2x16xf32>
    %cst_540 = arith.constant 1.000000e+00 : f32
    %872 = vector.broadcast %cst_540 : f32 to vector<2x16xf32>
    %873 = arith.addf %872, %871 : vector<2x16xf32>
    %874 = arith.divf %872, %873 : vector<2x16xf32>
    %c5_541 = arith.constant 5 : index
    %875 = arith.index_cast %815 : i32 to index
    %c0_542 = arith.constant 0 : index
    %c0_543 = arith.constant 0 : index
    %876 = vector.load %arg17[%c5_541, %875, %c0_542, %c0_543] : memref<6x8x2x16xf32, #tpu.memory_space<vmem>>, vector<1x1x2x16xf32>
    %877 = vector.shape_cast %876 : vector<1x1x2x16xf32> to vector<2x16xf32>
    %878 = arith.mulf %865, %856 : vector<2x16xf32>
    %879 = arith.addf %877, %878 : vector<2x16xf32>
    %880 = math.tanh %879 : vector<2x16xf32>
    %cst_544 = arith.constant 1.000000e+00 : f32
    %881 = vector.broadcast %cst_544 : f32 to vector<2x16xf32>
    %882 = arith.subf %881, %874 : vector<2x16xf32>
    %883 = arith.mulf %882, %880 : vector<2x16xf32>
    %884 = arith.mulf %874, %814 : vector<2x16xf32>
    %885 = arith.addf %883, %884 : vector<2x16xf32>
    %c1_545 = arith.constant 1 : index
    %886 = arith.index_cast %815 : i32 to index
    %c0_546 = arith.constant 0 : index
    %c0_547 = arith.constant 0 : index
    %887 = vector.load %arg18[%c1_545, %886, %c0_546, %c0_547] : memref<2x8x2x16xf32, #tpu.memory_space<vmem>>, vector<1x1x2x16xf32>
    %888 = vector.shape_cast %887 : vector<1x1x2x16xf32> to vector<2x16xf32>
    %889 = vector.shape_cast %885 : vector<2x16xf32> to vector<1x1x2x16xf32>
    tpu.vector_store %arg18[%c1_545, %886, %c0_546, %c0_547], %889 {strides = array<i32>} : memref<2x8x2x16xf32, #tpu.memory_space<vmem>>, vector<1x1x2x16xf32>,
    %c1_i32_548 = arith.constant 1 : i32
    %c7_i32_549 = arith.constant 7 : i32
    %890 = arith.subi %c7_i32_549, %c1_i32_548 : i32
    %cst_550 = arith.constant dense<0.000000e+00> : vector<2x16xf32>
    %891 = tpu.matmul %848, %795, %cst_550 {dimension_numbers = #tpu.dot_dimension_numbers<[1], [0], [0], [1], [0, 0, 1, 1], [], []>} : vector<2x16xf32>, vector<16x16xf32>, vector<2x16xf32> -> vector<2x16xf32>
    %cst_551 = arith.constant dense<0.000000e+00> : vector<2x16xf32>
    %892 = tpu.matmul %848, %797, %cst_551 {dimension_numbers = #tpu.dot_dimension_numbers<[1], [0], [0], [1], [0, 0, 1, 1], [], []>} : vector<2x16xf32>, vector<16x16xf32>, vector<2x16xf32> -> vector<2x16xf32>
    %cst_552 = arith.constant dense<0.000000e+00> : vector<2x16xf32>
    %893 = tpu.matmul %848, %799, %cst_552 {dimension_numbers = #tpu.dot_dimension_numbers<[1], [0], [0], [1], [0, 0, 1, 1], [], []>} : vector<2x16xf32>, vector<16x16xf32>, vector<2x16xf32> -> vector<2x16xf32>
    %894 = arith.addf %893, %809 : vector<2x16xf32>
    %c0_553 = arith.constant 0 : index
    %895 = arith.index_cast %c1_i32_548 : i32 to index
    %c0_554 = arith.constant 0 : index
    %c0_555 = arith.constant 0 : index
    %896 = vector.load %arg17[%c0_553, %895, %c0_554, %c0_555] : memref<6x8x2x16xf32, #tpu.memory_space<vmem>>, vector<1x1x2x16xf32>
    %897 = vector.shape_cast %896 : vector<1x1x2x16xf32> to vector<2x16xf32>
    %898 = arith.addf %897, %891 : vector<2x16xf32>
    %899 = arith.negf %898 : vector<2x16xf32>
    %900 = math.exp %899 : vector<2x16xf32>
    %cst_556 = arith.constant 1.000000e+00 : f32
    %901 = vector.broadcast %cst_556 : f32 to vector<2x16xf32>
    %902 = arith.addf %901, %900 : vector<2x16xf32>
    %903 = arith.divf %901, %902 : vector<2x16xf32>
    %c1_557 = arith.constant 1 : index
    %904 = arith.index_cast %c1_i32_548 : i32 to index
    %c0_558 = arith.constant 0 : index
    %c0_559 = arith.constant 0 : index
    %905 = vector.load %arg17[%c1_557, %904, %c0_558, %c0_559] : memref<6x8x2x16xf32, #tpu.memory_space<vmem>>, vector<1x1x2x16xf32>
    %906 = vector.shape_cast %905 : vector<1x1x2x16xf32> to vector<2x16xf32>
    %907 = arith.addf %906, %892 : vector<2x16xf32>
    %908 = arith.negf %907 : vector<2x16xf32>
    %909 = math.exp %908 : vector<2x16xf32>
    %cst_560 = arith.constant 1.000000e+00 : f32
    %910 = vector.broadcast %cst_560 : f32 to vector<2x16xf32>
    %911 = arith.addf %910, %909 : vector<2x16xf32>
    %912 = arith.divf %910, %911 : vector<2x16xf32>
    %c2_561 = arith.constant 2 : index
    %913 = arith.index_cast %c1_i32_548 : i32 to index
    %c0_562 = arith.constant 0 : index
    %c0_563 = arith.constant 0 : index
    %914 = vector.load %arg17[%c2_561, %913, %c0_562, %c0_563] : memref<6x8x2x16xf32, #tpu.memory_space<vmem>>, vector<1x1x2x16xf32>
    %915 = vector.shape_cast %914 : vector<1x1x2x16xf32> to vector<2x16xf32>
    %916 = arith.mulf %903, %894 : vector<2x16xf32>
    %917 = arith.addf %915, %916 : vector<2x16xf32>
    %918 = math.tanh %917 : vector<2x16xf32>
    %cst_564 = arith.constant 1.000000e+00 : f32
    %919 = vector.broadcast %cst_564 : f32 to vector<2x16xf32>
    %920 = arith.subf %919, %912 : vector<2x16xf32>
    %921 = arith.mulf %920, %918 : vector<2x16xf32>
    %922 = arith.mulf %912, %848 : vector<2x16xf32>
    %923 = arith.addf %921, %922 : vector<2x16xf32>
    %c0_565 = arith.constant 0 : index
    %924 = arith.index_cast %c1_i32_548 : i32 to index
    %c0_566 = arith.constant 0 : index
    %c0_567 = arith.constant 0 : index
    %925 = vector.load %arg18[%c0_565, %924, %c0_566, %c0_567] : memref<2x8x2x16xf32, #tpu.memory_space<vmem>>, vector<1x1x2x16xf32>
    %926 = vector.shape_cast %925 : vector<1x1x2x16xf32> to vector<2x16xf32>
    %927 = vector.shape_cast %923 : vector<2x16xf32> to vector<1x1x2x16xf32>
    tpu.vector_store %arg18[%c0_565, %924, %c0_566, %c0_567], %927 {strides = array<i32>} : memref<2x8x2x16xf32, #tpu.memory_space<vmem>>, vector<1x1x2x16xf32>,
    %cst_568 = arith.constant dense<0.000000e+00> : vector<2x16xf32>
    %928 = tpu.matmul %885, %801, %cst_568 {dimension_numbers = #tpu.dot_dimension_numbers<[1], [0], [0], [1], [0, 0, 1, 1], [], []>} : vector<2x16xf32>, vector<16x16xf32>, vector<2x16xf32> -> vector<2x16xf32>
    %cst_569 = arith.constant dense<0.000000e+00> : vector<2x16xf32>
    %929 = tpu.matmul %885, %803, %cst_569 {dimension_numbers = #tpu.dot_dimension_numbers<[1], [0], [0], [1], [0, 0, 1, 1], [], []>} : vector<2x16xf32>, vector<16x16xf32>, vector<2x16xf32> -> vector<2x16xf32>
    %cst_570 = arith.constant dense<0.000000e+00> : vector<2x16xf32>
    %930 = tpu.matmul %885, %805, %cst_570 {dimension_numbers = #tpu.dot_dimension_numbers<[1], [0], [0], [1], [0, 0, 1, 1], [], []>} : vector<2x16xf32>, vector<16x16xf32>, vector<2x16xf32> -> vector<2x16xf32>
    %931 = arith.addf %930, %813 : vector<2x16xf32>
    %c3_571 = arith.constant 3 : index
    %932 = arith.index_cast %890 : i32 to index
    %c0_572 = arith.constant 0 : index
    %c0_573 = arith.constant 0 : index
    %933 = vector.load %arg17[%c3_571, %932, %c0_572, %c0_573] : memref<6x8x2x16xf32, #tpu.memory_space<vmem>>, vector<1x1x2x16xf32>
    %934 = vector.shape_cast %933 : vector<1x1x2x16xf32> to vector<2x16xf32>
    %935 = arith.addf %934, %928 : vector<2x16xf32>
    %936 = arith.negf %935 : vector<2x16xf32>
    %937 = math.exp %936 : vector<2x16xf32>
    %cst_574 = arith.constant 1.000000e+00 : f32
    %938 = vector.broadcast %cst_574 : f32 to vector<2x16xf32>
    %939 = arith.addf %938, %937 : vector<2x16xf32>
    %940 = arith.divf %938, %939 : vector<2x16xf32>
    %c4_575 = arith.constant 4 : index
    %941 = arith.index_cast %890 : i32 to index
    %c0_576 = arith.constant 0 : index
    %c0_577 = arith.constant 0 : index
    %942 = vector.load %arg17[%c4_575, %941, %c0_576, %c0_577] : memref<6x8x2x16xf32, #tpu.memory_space<vmem>>, vector<1x1x2x16xf32>
    %943 = vector.shape_cast %942 : vector<1x1x2x16xf32> to vector<2x16xf32>
    %944 = arith.addf %943, %929 : vector<2x16xf32>
    %945 = arith.negf %944 : vector<2x16xf32>
    %946 = math.exp %945 : vector<2x16xf32>
    %cst_578 = arith.constant 1.000000e+00 : f32
    %947 = vector.broadcast %cst_578 : f32 to vector<2x16xf32>
    %948 = arith.addf %947, %946 : vector<2x16xf32>
    %949 = arith.divf %947, %948 : vector<2x16xf32>
    %c5_579 = arith.constant 5 : index
    %950 = arith.index_cast %890 : i32 to index
    %c0_580 = arith.constant 0 : index
    %c0_581 = arith.constant 0 : index
    %951 = vector.load %arg17[%c5_579, %950, %c0_580, %c0_581] : memref<6x8x2x16xf32, #tpu.memory_space<vmem>>, vector<1x1x2x16xf32>
    %952 = vector.shape_cast %951 : vector<1x1x2x16xf32> to vector<2x16xf32>
    %953 = arith.mulf %940, %931 : vector<2x16xf32>
    %954 = arith.addf %952, %953 : vector<2x16xf32>
    %955 = math.tanh %954 : vector<2x16xf32>
    %cst_582 = arith.constant 1.000000e+00 : f32
    %956 = vector.broadcast %cst_582 : f32 to vector<2x16xf32>
    %957 = arith.subf %956, %949 : vector<2x16xf32>
    %958 = arith.mulf %957, %955 : vector<2x16xf32>
    %959 = arith.mulf %949, %885 : vector<2x16xf32>
    %960 = arith.addf %958, %959 : vector<2x16xf32>
    %c1_583 = arith.constant 1 : index
    %961 = arith.index_cast %890 : i32 to index
    %c0_584 = arith.constant 0 : index
    %c0_585 = arith.constant 0 : index
    %962 = vector.load %arg18[%c1_583, %961, %c0_584, %c0_585] : memref<2x8x2x16xf32, #tpu.memory_space<vmem>>, vector<1x1x2x16xf32>
    %963 = vector.shape_cast %962 : vector<1x1x2x16xf32> to vector<2x16xf32>
    %964 = vector.shape_cast %960 : vector<2x16xf32> to vector<1x1x2x16xf32>
    tpu.vector_store %arg18[%c1_583, %961, %c0_584, %c0_585], %964 {strides = array<i32>} : memref<2x8x2x16xf32, #tpu.memory_space<vmem>>, vector<1x1x2x16xf32>,
    %c2_i32_586 = arith.constant 2 : i32
    %c7_i32_587 = arith.constant 7 : i32
    %965 = arith.subi %c7_i32_587, %c2_i32_586 : i32
    %cst_588 = arith.constant dense<0.000000e+00> : vector<2x16xf32>
    %966 = tpu.matmul %923, %795, %cst_588 {dimension_numbers = #tpu.dot_dimension_numbers<[1], [0], [0], [1], [0, 0, 1, 1], [], []>} : vector<2x16xf32>, vector<16x16xf32>, vector<2x16xf32> -> vector<2x16xf32>
    %cst_589 = arith.constant dense<0.000000e+00> : vector<2x16xf32>
    %967 = tpu.matmul %923, %797, %cst_589 {dimension_numbers = #tpu.dot_dimension_numbers<[1], [0], [0], [1], [0, 0, 1, 1], [], []>} : vector<2x16xf32>, vector<16x16xf32>, vector<2x16xf32> -> vector<2x16xf32>
    %cst_590 = arith.constant dense<0.000000e+00> : vector<2x16xf32>
    %968 = tpu.matmul %923, %799, %cst_590 {dimension_numbers = #tpu.dot_dimension_numbers<[1], [0], [0], [1], [0, 0, 1, 1], [], []>} : vector<2x16xf32>, vector<16x16xf32>, vector<2x16xf32> -> vector<2x16xf32>
    %969 = arith.addf %968, %809 : vector<2x16xf32>
    %c0_591 = arith.constant 0 : index
    %970 = arith.index_cast %c2_i32_586 : i32 to index
    %c0_592 = arith.constant 0 : index
    %c0_593 = arith.constant 0 : index
    %971 = vector.load %arg17[%c0_591, %970, %c0_592, %c0_593] : memref<6x8x2x16xf32, #tpu.memory_space<vmem>>, vector<1x1x2x16xf32>
    %972 = vector.shape_cast %971 : vector<1x1x2x16xf32> to vector<2x16xf32>
    %973 = arith.addf %972, %966 : vector<2x16xf32>
    %974 = arith.negf %973 : vector<2x16xf32>
    %975 = math.exp %974 : vector<2x16xf32>
    %cst_594 = arith.constant 1.000000e+00 : f32
    %976 = vector.broadcast %cst_594 : f32 to vector<2x16xf32>
    %977 = arith.addf %976, %975 : vector<2x16xf32>
    %978 = arith.divf %976, %977 : vector<2x16xf32>
    %c1_595 = arith.constant 1 : index
    %979 = arith.index_cast %c2_i32_586 : i32 to index
    %c0_596 = arith.constant 0 : index
    %c0_597 = arith.constant 0 : index
    %980 = vector.load %arg17[%c1_595, %979, %c0_596, %c0_597] : memref<6x8x2x16xf32, #tpu.memory_space<vmem>>, vector<1x1x2x16xf32>
    %981 = vector.shape_cast %980 : vector<1x1x2x16xf32> to vector<2x16xf32>
    %982 = arith.addf %981, %967 : vector<2x16xf32>
    %983 = arith.negf %982 : vector<2x16xf32>
    %984 = math.exp %983 : vector<2x16xf32>
    %cst_598 = arith.constant 1.000000e+00 : f32
    %985 = vector.broadcast %cst_598 : f32 to vector<2x16xf32>
    %986 = arith.addf %985, %984 : vector<2x16xf32>
    %987 = arith.divf %985, %986 : vector<2x16xf32>
    %c2_599 = arith.constant 2 : index
    %988 = arith.index_cast %c2_i32_586 : i32 to index
    %c0_600 = arith.constant 0 : index
    %c0_601 = arith.constant 0 : index
    %989 = vector.load %arg17[%c2_599, %988, %c0_600, %c0_601] : memref<6x8x2x16xf32, #tpu.memory_space<vmem>>, vector<1x1x2x16xf32>
    %990 = vector.shape_cast %989 : vector<1x1x2x16xf32> to vector<2x16xf32>
    %991 = arith.mulf %978, %969 : vector<2x16xf32>
    %992 = arith.addf %990, %991 : vector<2x16xf32>
    %993 = math.tanh %992 : vector<2x16xf32>
    %cst_602 = arith.constant 1.000000e+00 : f32
    %994 = vector.broadcast %cst_602 : f32 to vector<2x16xf32>
    %995 = arith.subf %994, %987 : vector<2x16xf32>
    %996 = arith.mulf %995, %993 : vector<2x16xf32>
    %997 = arith.mulf %987, %923 : vector<2x16xf32>
    %998 = arith.addf %996, %997 : vector<2x16xf32>
    %c0_603 = arith.constant 0 : index
    %999 = arith.index_cast %c2_i32_586 : i32 to index
    %c0_604 = arith.constant 0 : index
    %c0_605 = arith.constant 0 : index
    %1000 = vector.load %arg18[%c0_603, %999, %c0_604, %c0_605] : memref<2x8x2x16xf32, #tpu.memory_space<vmem>>, vector<1x1x2x16xf32>
    %1001 = vector.shape_cast %1000 : vector<1x1x2x16xf32> to vector<2x16xf32>
    %1002 = vector.shape_cast %998 : vector<2x16xf32> to vector<1x1x2x16xf32>
    tpu.vector_store %arg18[%c0_603, %999, %c0_604, %c0_605], %1002 {strides = array<i32>} : memref<2x8x2x16xf32, #tpu.memory_space<vmem>>, vector<1x1x2x16xf32>,
    %cst_606 = arith.constant dense<0.000000e+00> : vector<2x16xf32>
    %1003 = tpu.matmul %960, %801, %cst_606 {dimension_numbers = #tpu.dot_dimension_numbers<[1], [0], [0], [1], [0, 0, 1, 1], [], []>} : vector<2x16xf32>, vector<16x16xf32>, vector<2x16xf32> -> vector<2x16xf32>
    %cst_607 = arith.constant dense<0.000000e+00> : vector<2x16xf32>
    %1004 = tpu.matmul %960, %803, %cst_607 {dimension_numbers = #tpu.dot_dimension_numbers<[1], [0], [0], [1], [0, 0, 1, 1], [], []>} : vector<2x16xf32>, vector<16x16xf32>, vector<2x16xf32> -> vector<2x16xf32>
    %cst_608 = arith.constant dense<0.000000e+00> : vector<2x16xf32>
    %1005 = tpu.matmul %960, %805, %cst_608 {dimension_numbers = #tpu.dot_dimension_numbers<[1], [0], [0], [1], [0, 0, 1, 1], [], []>} : vector<2x16xf32>, vector<16x16xf32>, vector<2x16xf32> -> vector<2x16xf32>
    %1006 = arith.addf %1005, %813 : vector<2x16xf32>
    %c3_609 = arith.constant 3 : index
    %1007 = arith.index_cast %965 : i32 to index
    %c0_610 = arith.constant 0 : index
    %c0_611 = arith.constant 0 : index
    %1008 = vector.load %arg17[%c3_609, %1007, %c0_610, %c0_611] : memref<6x8x2x16xf32, #tpu.memory_space<vmem>>, vector<1x1x2x16xf32>
    %1009 = vector.shape_cast %1008 : vector<1x1x2x16xf32> to vector<2x16xf32>
    %1010 = arith.addf %1009, %1003 : vector<2x16xf32>
    %1011 = arith.negf %1010 : vector<2x16xf32>
    %1012 = math.exp %1011 : vector<2x16xf32>
    %cst_612 = arith.constant 1.000000e+00 : f32
    %1013 = vector.broadcast %cst_612 : f32 to vector<2x16xf32>
    %1014 = arith.addf %1013, %1012 : vector<2x16xf32>
    %1015 = arith.divf %1013, %1014 : vector<2x16xf32>
    %c4_613 = arith.constant 4 : index
    %1016 = arith.index_cast %965 : i32 to index
    %c0_614 = arith.constant 0 : index
    %c0_615 = arith.constant 0 : index
    %1017 = vector.load %arg17[%c4_613, %1016, %c0_614, %c0_615] : memref<6x8x2x16xf32, #tpu.memory_space<vmem>>, vector<1x1x2x16xf32>
    %1018 = vector.shape_cast %1017 : vector<1x1x2x16xf32> to vector<2x16xf32>
    %1019 = arith.addf %1018, %1004 : vector<2x16xf32>
    %1020 = arith.negf %1019 : vector<2x16xf32>
    %1021 = math.exp %1020 : vector<2x16xf32>
    %cst_616 = arith.constant 1.000000e+00 : f32
    %1022 = vector.broadcast %cst_616 : f32 to vector<2x16xf32>
    %1023 = arith.addf %1022, %1021 : vector<2x16xf32>
    %1024 = arith.divf %1022, %1023 : vector<2x16xf32>
    %c5_617 = arith.constant 5 : index
    %1025 = arith.index_cast %965 : i32 to index
    %c0_618 = arith.constant 0 : index
    %c0_619 = arith.constant 0 : index
    %1026 = vector.load %arg17[%c5_617, %1025, %c0_618, %c0_619] : memref<6x8x2x16xf32, #tpu.memory_space<vmem>>, vector<1x1x2x16xf32>
    %1027 = vector.shape_cast %1026 : vector<1x1x2x16xf32> to vector<2x16xf32>
    %1028 = arith.mulf %1015, %1006 : vector<2x16xf32>
    %1029 = arith.addf %1027, %1028 : vector<2x16xf32>
    %1030 = math.tanh %1029 : vector<2x16xf32>
    %cst_620 = arith.constant 1.000000e+00 : f32
    %1031 = vector.broadcast %cst_620 : f32 to vector<2x16xf32>
    %1032 = arith.subf %1031, %1024 : vector<2x16xf32>
    %1033 = arith.mulf %1032, %1030 : vector<2x16xf32>
    %1034 = arith.mulf %1024, %960 : vector<2x16xf32>
    %1035 = arith.addf %1033, %1034 : vector<2x16xf32>
    %c1_621 = arith.constant 1 : index
    %1036 = arith.index_cast %965 : i32 to index
    %c0_622 = arith.constant 0 : index
    %c0_623 = arith.constant 0 : index
    %1037 = vector.load %arg18[%c1_621, %1036, %c0_622, %c0_623] : memref<2x8x2x16xf32, #tpu.memory_space<vmem>>, vector<1x1x2x16xf32>
    %1038 = vector.shape_cast %1037 : vector<1x1x2x16xf32> to vector<2x16xf32>
    %1039 = vector.shape_cast %1035 : vector<2x16xf32> to vector<1x1x2x16xf32>
    tpu.vector_store %arg18[%c1_621, %1036, %c0_622, %c0_623], %1039 {strides = array<i32>} : memref<2x8x2x16xf32, #tpu.memory_space<vmem>>, vector<1x1x2x16xf32>,
    %c3_i32_624 = arith.constant 3 : i32
    %c7_i32_625 = arith.constant 7 : i32
    %1040 = arith.subi %c7_i32_625, %c3_i32_624 : i32
    %cst_626 = arith.constant dense<0.000000e+00> : vector<2x16xf32>
    %1041 = tpu.matmul %998, %795, %cst_626 {dimension_numbers = #tpu.dot_dimension_numbers<[1], [0], [0], [1], [0, 0, 1, 1], [], []>} : vector<2x16xf32>, vector<16x16xf32>, vector<2x16xf32> -> vector<2x16xf32>
    %cst_627 = arith.constant dense<0.000000e+00> : vector<2x16xf32>
    %1042 = tpu.matmul %998, %797, %cst_627 {dimension_numbers = #tpu.dot_dimension_numbers<[1], [0], [0], [1], [0, 0, 1, 1], [], []>} : vector<2x16xf32>, vector<16x16xf32>, vector<2x16xf32> -> vector<2x16xf32>
    %cst_628 = arith.constant dense<0.000000e+00> : vector<2x16xf32>
    %1043 = tpu.matmul %998, %799, %cst_628 {dimension_numbers = #tpu.dot_dimension_numbers<[1], [0], [0], [1], [0, 0, 1, 1], [], []>} : vector<2x16xf32>, vector<16x16xf32>, vector<2x16xf32> -> vector<2x16xf32>
    %1044 = arith.addf %1043, %809 : vector<2x16xf32>
    %c0_629 = arith.constant 0 : index
    %1045 = arith.index_cast %c3_i32_624 : i32 to index
    %c0_630 = arith.constant 0 : index
    %c0_631 = arith.constant 0 : index
    %1046 = vector.load %arg17[%c0_629, %1045, %c0_630, %c0_631] : memref<6x8x2x16xf32, #tpu.memory_space<vmem>>, vector<1x1x2x16xf32>
    %1047 = vector.shape_cast %1046 : vector<1x1x2x16xf32> to vector<2x16xf32>
    %1048 = arith.addf %1047, %1041 : vector<2x16xf32>
    %1049 = arith.negf %1048 : vector<2x16xf32>
    %1050 = math.exp %1049 : vector<2x16xf32>
    %cst_632 = arith.constant 1.000000e+00 : f32
    %1051 = vector.broadcast %cst_632 : f32 to vector<2x16xf32>
    %1052 = arith.addf %1051, %1050 : vector<2x16xf32>
    %1053 = arith.divf %1051, %1052 : vector<2x16xf32>
    %c1_633 = arith.constant 1 : index
    %1054 = arith.index_cast %c3_i32_624 : i32 to index
    %c0_634 = arith.constant 0 : index
    %c0_635 = arith.constant 0 : index
    %1055 = vector.load %arg17[%c1_633, %1054, %c0_634, %c0_635] : memref<6x8x2x16xf32, #tpu.memory_space<vmem>>, vector<1x1x2x16xf32>
    %1056 = vector.shape_cast %1055 : vector<1x1x2x16xf32> to vector<2x16xf32>
    %1057 = arith.addf %1056, %1042 : vector<2x16xf32>
    %1058 = arith.negf %1057 : vector<2x16xf32>
    %1059 = math.exp %1058 : vector<2x16xf32>
    %cst_636 = arith.constant 1.000000e+00 : f32
    %1060 = vector.broadcast %cst_636 : f32 to vector<2x16xf32>
    %1061 = arith.addf %1060, %1059 : vector<2x16xf32>
    %1062 = arith.divf %1060, %1061 : vector<2x16xf32>
    %c2_637 = arith.constant 2 : index
    %1063 = arith.index_cast %c3_i32_624 : i32 to index
    %c0_638 = arith.constant 0 : index
    %c0_639 = arith.constant 0 : index
    %1064 = vector.load %arg17[%c2_637, %1063, %c0_638, %c0_639] : memref<6x8x2x16xf32, #tpu.memory_space<vmem>>, vector<1x1x2x16xf32>
    %1065 = vector.shape_cast %1064 : vector<1x1x2x16xf32> to vector<2x16xf32>
    %1066 = arith.mulf %1053, %1044 : vector<2x16xf32>
    %1067 = arith.addf %1065, %1066 : vector<2x16xf32>
    %1068 = math.tanh %1067 : vector<2x16xf32>
    %cst_640 = arith.constant 1.000000e+00 : f32
    %1069 = vector.broadcast %cst_640 : f32 to vector<2x16xf32>
    %1070 = arith.subf %1069, %1062 : vector<2x16xf32>
    %1071 = arith.mulf %1070, %1068 : vector<2x16xf32>
    %1072 = arith.mulf %1062, %998 : vector<2x16xf32>
    %1073 = arith.addf %1071, %1072 : vector<2x16xf32>
    %c0_641 = arith.constant 0 : index
    %1074 = arith.index_cast %c3_i32_624 : i32 to index
    %c0_642 = arith.constant 0 : index
    %c0_643 = arith.constant 0 : index
    %1075 = vector.load %arg18[%c0_641, %1074, %c0_642, %c0_643] : memref<2x8x2x16xf32, #tpu.memory_space<vmem>>, vector<1x1x2x16xf32>
    %1076 = vector.shape_cast %1075 : vector<1x1x2x16xf32> to vector<2x16xf32>
    %1077 = vector.shape_cast %1073 : vector<2x16xf32> to vector<1x1x2x16xf32>
    tpu.vector_store %arg18[%c0_641, %1074, %c0_642, %c0_643], %1077 {strides = array<i32>} : memref<2x8x2x16xf32, #tpu.memory_space<vmem>>, vector<1x1x2x16xf32>,
    %cst_644 = arith.constant dense<0.000000e+00> : vector<2x16xf32>
    %1078 = tpu.matmul %1035, %801, %cst_644 {dimension_numbers = #tpu.dot_dimension_numbers<[1], [0], [0], [1], [0, 0, 1, 1], [], []>} : vector<2x16xf32>, vector<16x16xf32>, vector<2x16xf32> -> vector<2x16xf32>
    %cst_645 = arith.constant dense<0.000000e+00> : vector<2x16xf32>
    %1079 = tpu.matmul %1035, %803, %cst_645 {dimension_numbers = #tpu.dot_dimension_numbers<[1], [0], [0], [1], [0, 0, 1, 1], [], []>} : vector<2x16xf32>, vector<16x16xf32>, vector<2x16xf32> -> vector<2x16xf32>
    %cst_646 = arith.constant dense<0.000000e+00> : vector<2x16xf32>
    %1080 = tpu.matmul %1035, %805, %cst_646 {dimension_numbers = #tpu.dot_dimension_numbers<[1], [0], [0], [1], [0, 0, 1, 1], [], []>} : vector<2x16xf32>, vector<16x16xf32>, vector<2x16xf32> -> vector<2x16xf32>
    %1081 = arith.addf %1080, %813 : vector<2x16xf32>
    %c3_647 = arith.constant 3 : index
    %1082 = arith.index_cast %1040 : i32 to index
    %c0_648 = arith.constant 0 : index
    %c0_649 = arith.constant 0 : index
    %1083 = vector.load %arg17[%c3_647, %1082, %c0_648, %c0_649] : memref<6x8x2x16xf32, #tpu.memory_space<vmem>>, vector<1x1x2x16xf32>
    %1084 = vector.shape_cast %1083 : vector<1x1x2x16xf32> to vector<2x16xf32>
    %1085 = arith.addf %1084, %1078 : vector<2x16xf32>
    %1086 = arith.negf %1085 : vector<2x16xf32>
    %1087 = math.exp %1086 : vector<2x16xf32>
    %cst_650 = arith.constant 1.000000e+00 : f32
    %1088 = vector.broadcast %cst_650 : f32 to vector<2x16xf32>
    %1089 = arith.addf %1088, %1087 : vector<2x16xf32>
    %1090 = arith.divf %1088, %1089 : vector<2x16xf32>
    %c4_651 = arith.constant 4 : index
    %1091 = arith.index_cast %1040 : i32 to index
    %c0_652 = arith.constant 0 : index
    %c0_653 = arith.constant 0 : index
    %1092 = vector.load %arg17[%c4_651, %1091, %c0_652, %c0_653] : memref<6x8x2x16xf32, #tpu.memory_space<vmem>>, vector<1x1x2x16xf32>
    %1093 = vector.shape_cast %1092 : vector<1x1x2x16xf32> to vector<2x16xf32>
    %1094 = arith.addf %1093, %1079 : vector<2x16xf32>
    %1095 = arith.negf %1094 : vector<2x16xf32>
    %1096 = math.exp %1095 : vector<2x16xf32>
    %cst_654 = arith.constant 1.000000e+00 : f32
    %1097 = vector.broadcast %cst_654 : f32 to vector<2x16xf32>
    %1098 = arith.addf %1097, %1096 : vector<2x16xf32>
    %1099 = arith.divf %1097, %1098 : vector<2x16xf32>
    %c5_655 = arith.constant 5 : index
    %1100 = arith.index_cast %1040 : i32 to index
    %c0_656 = arith.constant 0 : index
    %c0_657 = arith.constant 0 : index
    %1101 = vector.load %arg17[%c5_655, %1100, %c0_656, %c0_657] : memref<6x8x2x16xf32, #tpu.memory_space<vmem>>, vector<1x1x2x16xf32>
    %1102 = vector.shape_cast %1101 : vector<1x1x2x16xf32> to vector<2x16xf32>
    %1103 = arith.mulf %1090, %1081 : vector<2x16xf32>
    %1104 = arith.addf %1102, %1103 : vector<2x16xf32>
    %1105 = math.tanh %1104 : vector<2x16xf32>
    %cst_658 = arith.constant 1.000000e+00 : f32
    %1106 = vector.broadcast %cst_658 : f32 to vector<2x16xf32>
    %1107 = arith.subf %1106, %1099 : vector<2x16xf32>
    %1108 = arith.mulf %1107, %1105 : vector<2x16xf32>
    %1109 = arith.mulf %1099, %1035 : vector<2x16xf32>
    %1110 = arith.addf %1108, %1109 : vector<2x16xf32>
    %c1_659 = arith.constant 1 : index
    %1111 = arith.index_cast %1040 : i32 to index
    %c0_660 = arith.constant 0 : index
    %c0_661 = arith.constant 0 : index
    %1112 = vector.load %arg18[%c1_659, %1111, %c0_660, %c0_661] : memref<2x8x2x16xf32, #tpu.memory_space<vmem>>, vector<1x1x2x16xf32>
    %1113 = vector.shape_cast %1112 : vector<1x1x2x16xf32> to vector<2x16xf32>
    %1114 = vector.shape_cast %1110 : vector<2x16xf32> to vector<1x1x2x16xf32>
    tpu.vector_store %arg18[%c1_659, %1111, %c0_660, %c0_661], %1114 {strides = array<i32>} : memref<2x8x2x16xf32, #tpu.memory_space<vmem>>, vector<1x1x2x16xf32>,
    %c4_i32_662 = arith.constant 4 : i32
    %c7_i32_663 = arith.constant 7 : i32
    %1115 = arith.subi %c7_i32_663, %c4_i32_662 : i32
    %cst_664 = arith.constant dense<0.000000e+00> : vector<2x16xf32>
    %1116 = tpu.matmul %1073, %795, %cst_664 {dimension_numbers = #tpu.dot_dimension_numbers<[1], [0], [0], [1], [0, 0, 1, 1], [], []>} : vector<2x16xf32>, vector<16x16xf32>, vector<2x16xf32> -> vector<2x16xf32>
    %cst_665 = arith.constant dense<0.000000e+00> : vector<2x16xf32>
    %1117 = tpu.matmul %1073, %797, %cst_665 {dimension_numbers = #tpu.dot_dimension_numbers<[1], [0], [0], [1], [0, 0, 1, 1], [], []>} : vector<2x16xf32>, vector<16x16xf32>, vector<2x16xf32> -> vector<2x16xf32>
    %cst_666 = arith.constant dense<0.000000e+00> : vector<2x16xf32>
    %1118 = tpu.matmul %1073, %799, %cst_666 {dimension_numbers = #tpu.dot_dimension_numbers<[1], [0], [0], [1], [0, 0, 1, 1], [], []>} : vector<2x16xf32>, vector<16x16xf32>, vector<2x16xf32> -> vector<2x16xf32>
    %1119 = arith.addf %1118, %809 : vector<2x16xf32>
    %c0_667 = arith.constant 0 : index
    %1120 = arith.index_cast %c4_i32_662 : i32 to index
    %c0_668 = arith.constant 0 : index
    %c0_669 = arith.constant 0 : index
    %1121 = vector.load %arg17[%c0_667, %1120, %c0_668, %c0_669] : memref<6x8x2x16xf32, #tpu.memory_space<vmem>>, vector<1x1x2x16xf32>
    %1122 = vector.shape_cast %1121 : vector<1x1x2x16xf32> to vector<2x16xf32>
    %1123 = arith.addf %1122, %1116 : vector<2x16xf32>
    %1124 = arith.negf %1123 : vector<2x16xf32>
    %1125 = math.exp %1124 : vector<2x16xf32>
    %cst_670 = arith.constant 1.000000e+00 : f32
    %1126 = vector.broadcast %cst_670 : f32 to vector<2x16xf32>
    %1127 = arith.addf %1126, %1125 : vector<2x16xf32>
    %1128 = arith.divf %1126, %1127 : vector<2x16xf32>
    %c1_671 = arith.constant 1 : index
    %1129 = arith.index_cast %c4_i32_662 : i32 to index
    %c0_672 = arith.constant 0 : index
    %c0_673 = arith.constant 0 : index
    %1130 = vector.load %arg17[%c1_671, %1129, %c0_672, %c0_673] : memref<6x8x2x16xf32, #tpu.memory_space<vmem>>, vector<1x1x2x16xf32>
    %1131 = vector.shape_cast %1130 : vector<1x1x2x16xf32> to vector<2x16xf32>
    %1132 = arith.addf %1131, %1117 : vector<2x16xf32>
    %1133 = arith.negf %1132 : vector<2x16xf32>
    %1134 = math.exp %1133 : vector<2x16xf32>
    %cst_674 = arith.constant 1.000000e+00 : f32
    %1135 = vector.broadcast %cst_674 : f32 to vector<2x16xf32>
    %1136 = arith.addf %1135, %1134 : vector<2x16xf32>
    %1137 = arith.divf %1135, %1136 : vector<2x16xf32>
    %c2_675 = arith.constant 2 : index
    %1138 = arith.index_cast %c4_i32_662 : i32 to index
    %c0_676 = arith.constant 0 : index
    %c0_677 = arith.constant 0 : index
    %1139 = vector.load %arg17[%c2_675, %1138, %c0_676, %c0_677] : memref<6x8x2x16xf32, #tpu.memory_space<vmem>>, vector<1x1x2x16xf32>
    %1140 = vector.shape_cast %1139 : vector<1x1x2x16xf32> to vector<2x16xf32>
    %1141 = arith.mulf %1128, %1119 : vector<2x16xf32>
    %1142 = arith.addf %1140, %1141 : vector<2x16xf32>
    %1143 = math.tanh %1142 : vector<2x16xf32>
    %cst_678 = arith.constant 1.000000e+00 : f32
    %1144 = vector.broadcast %cst_678 : f32 to vector<2x16xf32>
    %1145 = arith.subf %1144, %1137 : vector<2x16xf32>
    %1146 = arith.mulf %1145, %1143 : vector<2x16xf32>
    %1147 = arith.mulf %1137, %1073 : vector<2x16xf32>
    %1148 = arith.addf %1146, %1147 : vector<2x16xf32>
    %c0_679 = arith.constant 0 : index
    %1149 = arith.index_cast %c4_i32_662 : i32 to index
    %c0_680 = arith.constant 0 : index
    %c0_681 = arith.constant 0 : index
    %1150 = vector.load %arg18[%c0_679, %1149, %c0_680, %c0_681] : memref<2x8x2x16xf32, #tpu.memory_space<vmem>>, vector<1x1x2x16xf32>
    %1151 = vector.shape_cast %1150 : vector<1x1x2x16xf32> to vector<2x16xf32>
    %1152 = vector.shape_cast %1148 : vector<2x16xf32> to vector<1x1x2x16xf32>
    tpu.vector_store %arg18[%c0_679, %1149, %c0_680, %c0_681], %1152 {strides = array<i32>} : memref<2x8x2x16xf32, #tpu.memory_space<vmem>>, vector<1x1x2x16xf32>,
    %cst_682 = arith.constant dense<0.000000e+00> : vector<2x16xf32>
    %1153 = tpu.matmul %1110, %801, %cst_682 {dimension_numbers = #tpu.dot_dimension_numbers<[1], [0], [0], [1], [0, 0, 1, 1], [], []>} : vector<2x16xf32>, vector<16x16xf32>, vector<2x16xf32> -> vector<2x16xf32>
    %cst_683 = arith.constant dense<0.000000e+00> : vector<2x16xf32>
    %1154 = tpu.matmul %1110, %803, %cst_683 {dimension_numbers = #tpu.dot_dimension_numbers<[1], [0], [0], [1], [0, 0, 1, 1], [], []>} : vector<2x16xf32>, vector<16x16xf32>, vector<2x16xf32> -> vector<2x16xf32>
    %cst_684 = arith.constant dense<0.000000e+00> : vector<2x16xf32>
    %1155 = tpu.matmul %1110, %805, %cst_684 {dimension_numbers = #tpu.dot_dimension_numbers<[1], [0], [0], [1], [0, 0, 1, 1], [], []>} : vector<2x16xf32>, vector<16x16xf32>, vector<2x16xf32> -> vector<2x16xf32>
    %1156 = arith.addf %1155, %813 : vector<2x16xf32>
    %c3_685 = arith.constant 3 : index
    %1157 = arith.index_cast %1115 : i32 to index
    %c0_686 = arith.constant 0 : index
    %c0_687 = arith.constant 0 : index
    %1158 = vector.load %arg17[%c3_685, %1157, %c0_686, %c0_687] : memref<6x8x2x16xf32, #tpu.memory_space<vmem>>, vector<1x1x2x16xf32>
    %1159 = vector.shape_cast %1158 : vector<1x1x2x16xf32> to vector<2x16xf32>
    %1160 = arith.addf %1159, %1153 : vector<2x16xf32>
    %1161 = arith.negf %1160 : vector<2x16xf32>
    %1162 = math.exp %1161 : vector<2x16xf32>
    %cst_688 = arith.constant 1.000000e+00 : f32
    %1163 = vector.broadcast %cst_688 : f32 to vector<2x16xf32>
    %1164 = arith.addf %1163, %1162 : vector<2x16xf32>
    %1165 = arith.divf %1163, %1164 : vector<2x16xf32>
    %c4_689 = arith.constant 4 : index
    %1166 = arith.index_cast %1115 : i32 to index
    %c0_690 = arith.constant 0 : index
    %c0_691 = arith.constant 0 : index
    %1167 = vector.load %arg17[%c4_689, %1166, %c0_690, %c0_691] : memref<6x8x2x16xf32, #tpu.memory_space<vmem>>, vector<1x1x2x16xf32>
    %1168 = vector.shape_cast %1167 : vector<1x1x2x16xf32> to vector<2x16xf32>
    %1169 = arith.addf %1168, %1154 : vector<2x16xf32>
    %1170 = arith.negf %1169 : vector<2x16xf32>
    %1171 = math.exp %1170 : vector<2x16xf32>
    %cst_692 = arith.constant 1.000000e+00 : f32
    %1172 = vector.broadcast %cst_692 : f32 to vector<2x16xf32>
    %1173 = arith.addf %1172, %1171 : vector<2x16xf32>
    %1174 = arith.divf %1172, %1173 : vector<2x16xf32>
    %c5_693 = arith.constant 5 : index
    %1175 = arith.index_cast %1115 : i32 to index
    %c0_694 = arith.constant 0 : index
    %c0_695 = arith.constant 0 : index
    %1176 = vector.load %arg17[%c5_693, %1175, %c0_694, %c0_695] : memref<6x8x2x16xf32, #tpu.memory_space<vmem>>, vector<1x1x2x16xf32>
    %1177 = vector.shape_cast %1176 : vector<1x1x2x16xf32> to vector<2x16xf32>
    %1178 = arith.mulf %1165, %1156 : vector<2x16xf32>
    %1179 = arith.addf %1177, %1178 : vector<2x16xf32>
    %1180 = math.tanh %1179 : vector<2x16xf32>
    %cst_696 = arith.constant 1.000000e+00 : f32
    %1181 = vector.broadcast %cst_696 : f32 to vector<2x16xf32>
    %1182 = arith.subf %1181, %1174 : vector<2x16xf32>
    %1183 = arith.mulf %1182, %1180 : vector<2x16xf32>
    %1184 = arith.mulf %1174, %1110 : vector<2x16xf32>
    %1185 = arith.addf %1183, %1184 : vector<2x16xf32>
    %c1_697 = arith.constant 1 : index
    %1186 = arith.index_cast %1115 : i32 to index
    %c0_698 = arith.constant 0 : index
    %c0_699 = arith.constant 0 : index
    %1187 = vector.load %arg18[%c1_697, %1186, %c0_698, %c0_699] : memref<2x8x2x16xf32, #tpu.memory_space<vmem>>, vector<1x1x2x16xf32>
    %1188 = vector.shape_cast %1187 : vector<1x1x2x16xf32> to vector<2x16xf32>
    %1189 = vector.shape_cast %1185 : vector<2x16xf32> to vector<1x1x2x16xf32>
    tpu.vector_store %arg18[%c1_697, %1186, %c0_698, %c0_699], %1189 {strides = array<i32>} : memref<2x8x2x16xf32, #tpu.memory_space<vmem>>, vector<1x1x2x16xf32>,
    %c5_i32_700 = arith.constant 5 : i32
    %c7_i32_701 = arith.constant 7 : i32
    %1190 = arith.subi %c7_i32_701, %c5_i32_700 : i32
    %cst_702 = arith.constant dense<0.000000e+00> : vector<2x16xf32>
    %1191 = tpu.matmul %1148, %795, %cst_702 {dimension_numbers = #tpu.dot_dimension_numbers<[1], [0], [0], [1], [0, 0, 1, 1], [], []>} : vector<2x16xf32>, vector<16x16xf32>, vector<2x16xf32> -> vector<2x16xf32>
    %cst_703 = arith.constant dense<0.000000e+00> : vector<2x16xf32>
    %1192 = tpu.matmul %1148, %797, %cst_703 {dimension_numbers = #tpu.dot_dimension_numbers<[1], [0], [0], [1], [0, 0, 1, 1], [], []>} : vector<2x16xf32>, vector<16x16xf32>, vector<2x16xf32> -> vector<2x16xf32>
    %cst_704 = arith.constant dense<0.000000e+00> : vector<2x16xf32>
    %1193 = tpu.matmul %1148, %799, %cst_704 {dimension_numbers = #tpu.dot_dimension_numbers<[1], [0], [0], [1], [0, 0, 1, 1], [], []>} : vector<2x16xf32>, vector<16x16xf32>, vector<2x16xf32> -> vector<2x16xf32>
    %1194 = arith.addf %1193, %809 : vector<2x16xf32>
    %c0_705 = arith.constant 0 : index
    %1195 = arith.index_cast %c5_i32_700 : i32 to index
    %c0_706 = arith.constant 0 : index
    %c0_707 = arith.constant 0 : index
    %1196 = vector.load %arg17[%c0_705, %1195, %c0_706, %c0_707] : memref<6x8x2x16xf32, #tpu.memory_space<vmem>>, vector<1x1x2x16xf32>
    %1197 = vector.shape_cast %1196 : vector<1x1x2x16xf32> to vector<2x16xf32>
    %1198 = arith.addf %1197, %1191 : vector<2x16xf32>
    %1199 = arith.negf %1198 : vector<2x16xf32>
    %1200 = math.exp %1199 : vector<2x16xf32>
    %cst_708 = arith.constant 1.000000e+00 : f32
    %1201 = vector.broadcast %cst_708 : f32 to vector<2x16xf32>
    %1202 = arith.addf %1201, %1200 : vector<2x16xf32>
    %1203 = arith.divf %1201, %1202 : vector<2x16xf32>
    %c1_709 = arith.constant 1 : index
    %1204 = arith.index_cast %c5_i32_700 : i32 to index
    %c0_710 = arith.constant 0 : index
    %c0_711 = arith.constant 0 : index
    %1205 = vector.load %arg17[%c1_709, %1204, %c0_710, %c0_711] : memref<6x8x2x16xf32, #tpu.memory_space<vmem>>, vector<1x1x2x16xf32>
    %1206 = vector.shape_cast %1205 : vector<1x1x2x16xf32> to vector<2x16xf32>
    %1207 = arith.addf %1206, %1192 : vector<2x16xf32>
    %1208 = arith.negf %1207 : vector<2x16xf32>
    %1209 = math.exp %1208 : vector<2x16xf32>
    %cst_712 = arith.constant 1.000000e+00 : f32
    %1210 = vector.broadcast %cst_712 : f32 to vector<2x16xf32>
    %1211 = arith.addf %1210, %1209 : vector<2x16xf32>
    %1212 = arith.divf %1210, %1211 : vector<2x16xf32>
    %c2_713 = arith.constant 2 : index
    %1213 = arith.index_cast %c5_i32_700 : i32 to index
    %c0_714 = arith.constant 0 : index
    %c0_715 = arith.constant 0 : index
    %1214 = vector.load %arg17[%c2_713, %1213, %c0_714, %c0_715] : memref<6x8x2x16xf32, #tpu.memory_space<vmem>>, vector<1x1x2x16xf32>
    %1215 = vector.shape_cast %1214 : vector<1x1x2x16xf32> to vector<2x16xf32>
    %1216 = arith.mulf %1203, %1194 : vector<2x16xf32>
    %1217 = arith.addf %1215, %1216 : vector<2x16xf32>
    %1218 = math.tanh %1217 : vector<2x16xf32>
    %cst_716 = arith.constant 1.000000e+00 : f32
    %1219 = vector.broadcast %cst_716 : f32 to vector<2x16xf32>
    %1220 = arith.subf %1219, %1212 : vector<2x16xf32>
    %1221 = arith.mulf %1220, %1218 : vector<2x16xf32>
    %1222 = arith.mulf %1212, %1148 : vector<2x16xf32>
    %1223 = arith.addf %1221, %1222 : vector<2x16xf32>
    %c0_717 = arith.constant 0 : index
    %1224 = arith.index_cast %c5_i32_700 : i32 to index
    %c0_718 = arith.constant 0 : index
    %c0_719 = arith.constant 0 : index
    %1225 = vector.load %arg18[%c0_717, %1224, %c0_718, %c0_719] : memref<2x8x2x16xf32, #tpu.memory_space<vmem>>, vector<1x1x2x16xf32>
    %1226 = vector.shape_cast %1225 : vector<1x1x2x16xf32> to vector<2x16xf32>
    %1227 = vector.shape_cast %1223 : vector<2x16xf32> to vector<1x1x2x16xf32>
    tpu.vector_store %arg18[%c0_717, %1224, %c0_718, %c0_719], %1227 {strides = array<i32>} : memref<2x8x2x16xf32, #tpu.memory_space<vmem>>, vector<1x1x2x16xf32>,
    %cst_720 = arith.constant dense<0.000000e+00> : vector<2x16xf32>
    %1228 = tpu.matmul %1185, %801, %cst_720 {dimension_numbers = #tpu.dot_dimension_numbers<[1], [0], [0], [1], [0, 0, 1, 1], [], []>} : vector<2x16xf32>, vector<16x16xf32>, vector<2x16xf32> -> vector<2x16xf32>
    %cst_721 = arith.constant dense<0.000000e+00> : vector<2x16xf32>
    %1229 = tpu.matmul %1185, %803, %cst_721 {dimension_numbers = #tpu.dot_dimension_numbers<[1], [0], [0], [1], [0, 0, 1, 1], [], []>} : vector<2x16xf32>, vector<16x16xf32>, vector<2x16xf32> -> vector<2x16xf32>
    %cst_722 = arith.constant dense<0.000000e+00> : vector<2x16xf32>
    %1230 = tpu.matmul %1185, %805, %cst_722 {dimension_numbers = #tpu.dot_dimension_numbers<[1], [0], [0], [1], [0, 0, 1, 1], [], []>} : vector<2x16xf32>, vector<16x16xf32>, vector<2x16xf32> -> vector<2x16xf32>
    %1231 = arith.addf %1230, %813 : vector<2x16xf32>
    %c3_723 = arith.constant 3 : index
    %1232 = arith.index_cast %1190 : i32 to index
    %c0_724 = arith.constant 0 : index
    %c0_725 = arith.constant 0 : index
    %1233 = vector.load %arg17[%c3_723, %1232, %c0_724, %c0_725] : memref<6x8x2x16xf32, #tpu.memory_space<vmem>>, vector<1x1x2x16xf32>
    %1234 = vector.shape_cast %1233 : vector<1x1x2x16xf32> to vector<2x16xf32>
    %1235 = arith.addf %1234, %1228 : vector<2x16xf32>
    %1236 = arith.negf %1235 : vector<2x16xf32>
    %1237 = math.exp %1236 : vector<2x16xf32>
    %cst_726 = arith.constant 1.000000e+00 : f32
    %1238 = vector.broadcast %cst_726 : f32 to vector<2x16xf32>
    %1239 = arith.addf %1238, %1237 : vector<2x16xf32>
    %1240 = arith.divf %1238, %1239 : vector<2x16xf32>
    %c4_727 = arith.constant 4 : index
    %1241 = arith.index_cast %1190 : i32 to index
    %c0_728 = arith.constant 0 : index
    %c0_729 = arith.constant 0 : index
    %1242 = vector.load %arg17[%c4_727, %1241, %c0_728, %c0_729] : memref<6x8x2x16xf32, #tpu.memory_space<vmem>>, vector<1x1x2x16xf32>
    %1243 = vector.shape_cast %1242 : vector<1x1x2x16xf32> to vector<2x16xf32>
    %1244 = arith.addf %1243, %1229 : vector<2x16xf32>
    %1245 = arith.negf %1244 : vector<2x16xf32>
    %1246 = math.exp %1245 : vector<2x16xf32>
    %cst_730 = arith.constant 1.000000e+00 : f32
    %1247 = vector.broadcast %cst_730 : f32 to vector<2x16xf32>
    %1248 = arith.addf %1247, %1246 : vector<2x16xf32>
    %1249 = arith.divf %1247, %1248 : vector<2x16xf32>
    %c5_731 = arith.constant 5 : index
    %1250 = arith.index_cast %1190 : i32 to index
    %c0_732 = arith.constant 0 : index
    %c0_733 = arith.constant 0 : index
    %1251 = vector.load %arg17[%c5_731, %1250, %c0_732, %c0_733] : memref<6x8x2x16xf32, #tpu.memory_space<vmem>>, vector<1x1x2x16xf32>
    %1252 = vector.shape_cast %1251 : vector<1x1x2x16xf32> to vector<2x16xf32>
    %1253 = arith.mulf %1240, %1231 : vector<2x16xf32>
    %1254 = arith.addf %1252, %1253 : vector<2x16xf32>
    %1255 = math.tanh %1254 : vector<2x16xf32>
    %cst_734 = arith.constant 1.000000e+00 : f32
    %1256 = vector.broadcast %cst_734 : f32 to vector<2x16xf32>
    %1257 = arith.subf %1256, %1249 : vector<2x16xf32>
    %1258 = arith.mulf %1257, %1255 : vector<2x16xf32>
    %1259 = arith.mulf %1249, %1185 : vector<2x16xf32>
    %1260 = arith.addf %1258, %1259 : vector<2x16xf32>
    %c1_735 = arith.constant 1 : index
    %1261 = arith.index_cast %1190 : i32 to index
    %c0_736 = arith.constant 0 : index
    %c0_737 = arith.constant 0 : index
    %1262 = vector.load %arg18[%c1_735, %1261, %c0_736, %c0_737] : memref<2x8x2x16xf32, #tpu.memory_space<vmem>>, vector<1x1x2x16xf32>
    %1263 = vector.shape_cast %1262 : vector<1x1x2x16xf32> to vector<2x16xf32>
    %1264 = vector.shape_cast %1260 : vector<2x16xf32> to vector<1x1x2x16xf32>
    tpu.vector_store %arg18[%c1_735, %1261, %c0_736, %c0_737], %1264 {strides = array<i32>} : memref<2x8x2x16xf32, #tpu.memory_space<vmem>>, vector<1x1x2x16xf32>,
    %c6_i32_738 = arith.constant 6 : i32
    %c7_i32_739 = arith.constant 7 : i32
    %1265 = arith.subi %c7_i32_739, %c6_i32_738 : i32
    %cst_740 = arith.constant dense<0.000000e+00> : vector<2x16xf32>
    %1266 = tpu.matmul %1223, %795, %cst_740 {dimension_numbers = #tpu.dot_dimension_numbers<[1], [0], [0], [1], [0, 0, 1, 1], [], []>} : vector<2x16xf32>, vector<16x16xf32>, vector<2x16xf32> -> vector<2x16xf32>
    %cst_741 = arith.constant dense<0.000000e+00> : vector<2x16xf32>
    %1267 = tpu.matmul %1223, %797, %cst_741 {dimension_numbers = #tpu.dot_dimension_numbers<[1], [0], [0], [1], [0, 0, 1, 1], [], []>} : vector<2x16xf32>, vector<16x16xf32>, vector<2x16xf32> -> vector<2x16xf32>
    %cst_742 = arith.constant dense<0.000000e+00> : vector<2x16xf32>
    %1268 = tpu.matmul %1223, %799, %cst_742 {dimension_numbers = #tpu.dot_dimension_numbers<[1], [0], [0], [1], [0, 0, 1, 1], [], []>} : vector<2x16xf32>, vector<16x16xf32>, vector<2x16xf32> -> vector<2x16xf32>
    %1269 = arith.addf %1268, %809 : vector<2x16xf32>
    %c0_743 = arith.constant 0 : index
    %1270 = arith.index_cast %c6_i32_738 : i32 to index
    %c0_744 = arith.constant 0 : index
    %c0_745 = arith.constant 0 : index
    %1271 = vector.load %arg17[%c0_743, %1270, %c0_744, %c0_745] : memref<6x8x2x16xf32, #tpu.memory_space<vmem>>, vector<1x1x2x16xf32>
    %1272 = vector.shape_cast %1271 : vector<1x1x2x16xf32> to vector<2x16xf32>
    %1273 = arith.addf %1272, %1266 : vector<2x16xf32>
    %1274 = arith.negf %1273 : vector<2x16xf32>
    %1275 = math.exp %1274 : vector<2x16xf32>
    %cst_746 = arith.constant 1.000000e+00 : f32
    %1276 = vector.broadcast %cst_746 : f32 to vector<2x16xf32>
    %1277 = arith.addf %1276, %1275 : vector<2x16xf32>
    %1278 = arith.divf %1276, %1277 : vector<2x16xf32>
    %c1_747 = arith.constant 1 : index
    %1279 = arith.index_cast %c6_i32_738 : i32 to index
    %c0_748 = arith.constant 0 : index
    %c0_749 = arith.constant 0 : index
    %1280 = vector.load %arg17[%c1_747, %1279, %c0_748, %c0_749] : memref<6x8x2x16xf32, #tpu.memory_space<vmem>>, vector<1x1x2x16xf32>
    %1281 = vector.shape_cast %1280 : vector<1x1x2x16xf32> to vector<2x16xf32>
    %1282 = arith.addf %1281, %1267 : vector<2x16xf32>
    %1283 = arith.negf %1282 : vector<2x16xf32>
    %1284 = math.exp %1283 : vector<2x16xf32>
    %cst_750 = arith.constant 1.000000e+00 : f32
    %1285 = vector.broadcast %cst_750 : f32 to vector<2x16xf32>
    %1286 = arith.addf %1285, %1284 : vector<2x16xf32>
    %1287 = arith.divf %1285, %1286 : vector<2x16xf32>
    %c2_751 = arith.constant 2 : index
    %1288 = arith.index_cast %c6_i32_738 : i32 to index
    %c0_752 = arith.constant 0 : index
    %c0_753 = arith.constant 0 : index
    %1289 = vector.load %arg17[%c2_751, %1288, %c0_752, %c0_753] : memref<6x8x2x16xf32, #tpu.memory_space<vmem>>, vector<1x1x2x16xf32>
    %1290 = vector.shape_cast %1289 : vector<1x1x2x16xf32> to vector<2x16xf32>
    %1291 = arith.mulf %1278, %1269 : vector<2x16xf32>
    %1292 = arith.addf %1290, %1291 : vector<2x16xf32>
    %1293 = math.tanh %1292 : vector<2x16xf32>
    %cst_754 = arith.constant 1.000000e+00 : f32
    %1294 = vector.broadcast %cst_754 : f32 to vector<2x16xf32>
    %1295 = arith.subf %1294, %1287 : vector<2x16xf32>
    %1296 = arith.mulf %1295, %1293 : vector<2x16xf32>
    %1297 = arith.mulf %1287, %1223 : vector<2x16xf32>
    %1298 = arith.addf %1296, %1297 : vector<2x16xf32>
    %c0_755 = arith.constant 0 : index
    %1299 = arith.index_cast %c6_i32_738 : i32 to index
    %c0_756 = arith.constant 0 : index
    %c0_757 = arith.constant 0 : index
    %1300 = vector.load %arg18[%c0_755, %1299, %c0_756, %c0_757] : memref<2x8x2x16xf32, #tpu.memory_space<vmem>>, vector<1x1x2x16xf32>
    %1301 = vector.shape_cast %1300 : vector<1x1x2x16xf32> to vector<2x16xf32>
    %1302 = vector.shape_cast %1298 : vector<2x16xf32> to vector<1x1x2x16xf32>
    tpu.vector_store %arg18[%c0_755, %1299, %c0_756, %c0_757], %1302 {strides = array<i32>} : memref<2x8x2x16xf32, #tpu.memory_space<vmem>>, vector<1x1x2x16xf32>,
    %cst_758 = arith.constant dense<0.000000e+00> : vector<2x16xf32>
    %1303 = tpu.matmul %1260, %801, %cst_758 {dimension_numbers = #tpu.dot_dimension_numbers<[1], [0], [0], [1], [0, 0, 1, 1], [], []>} : vector<2x16xf32>, vector<16x16xf32>, vector<2x16xf32> -> vector<2x16xf32>
    %cst_759 = arith.constant dense<0.000000e+00> : vector<2x16xf32>
    %1304 = tpu.matmul %1260, %803, %cst_759 {dimension_numbers = #tpu.dot_dimension_numbers<[1], [0], [0], [1], [0, 0, 1, 1], [], []>} : vector<2x16xf32>, vector<16x16xf32>, vector<2x16xf32> -> vector<2x16xf32>
    %cst_760 = arith.constant dense<0.000000e+00> : vector<2x16xf32>
    %1305 = tpu.matmul %1260, %805, %cst_760 {dimension_numbers = #tpu.dot_dimension_numbers<[1], [0], [0], [1], [0, 0, 1, 1], [], []>} : vector<2x16xf32>, vector<16x16xf32>, vector<2x16xf32> -> vector<2x16xf32>
    %1306 = arith.addf %1305, %813 : vector<2x16xf32>
    %c3_761 = arith.constant 3 : index
    %1307 = arith.index_cast %1265 : i32 to index
    %c0_762 = arith.constant 0 : index
    %c0_763 = arith.constant 0 : index
    %1308 = vector.load %arg17[%c3_761, %1307, %c0_762, %c0_763] : memref<6x8x2x16xf32, #tpu.memory_space<vmem>>, vector<1x1x2x16xf32>
    %1309 = vector.shape_cast %1308 : vector<1x1x2x16xf32> to vector<2x16xf32>
    %1310 = arith.addf %1309, %1303 : vector<2x16xf32>
    %1311 = arith.negf %1310 : vector<2x16xf32>
    %1312 = math.exp %1311 : vector<2x16xf32>
    %cst_764 = arith.constant 1.000000e+00 : f32
    %1313 = vector.broadcast %cst_764 : f32 to vector<2x16xf32>
    %1314 = arith.addf %1313, %1312 : vector<2x16xf32>
    %1315 = arith.divf %1313, %1314 : vector<2x16xf32>
    %c4_765 = arith.constant 4 : index
    %1316 = arith.index_cast %1265 : i32 to index
    %c0_766 = arith.constant 0 : index
    %c0_767 = arith.constant 0 : index
    %1317 = vector.load %arg17[%c4_765, %1316, %c0_766, %c0_767] : memref<6x8x2x16xf32, #tpu.memory_space<vmem>>, vector<1x1x2x16xf32>
    %1318 = vector.shape_cast %1317 : vector<1x1x2x16xf32> to vector<2x16xf32>
    %1319 = arith.addf %1318, %1304 : vector<2x16xf32>
    %1320 = arith.negf %1319 : vector<2x16xf32>
    %1321 = math.exp %1320 : vector<2x16xf32>
    %cst_768 = arith.constant 1.000000e+00 : f32
    %1322 = vector.broadcast %cst_768 : f32 to vector<2x16xf32>
    %1323 = arith.addf %1322, %1321 : vector<2x16xf32>
    %1324 = arith.divf %1322, %1323 : vector<2x16xf32>
    %c5_769 = arith.constant 5 : index
    %1325 = arith.index_cast %1265 : i32 to index
    %c0_770 = arith.constant 0 : index
    %c0_771 = arith.constant 0 : index
    %1326 = vector.load %arg17[%c5_769, %1325, %c0_770, %c0_771] : memref<6x8x2x16xf32, #tpu.memory_space<vmem>>, vector<1x1x2x16xf32>
    %1327 = vector.shape_cast %1326 : vector<1x1x2x16xf32> to vector<2x16xf32>
    %1328 = arith.mulf %1315, %1306 : vector<2x16xf32>
    %1329 = arith.addf %1327, %1328 : vector<2x16xf32>
    %1330 = math.tanh %1329 : vector<2x16xf32>
    %cst_772 = arith.constant 1.000000e+00 : f32
    %1331 = vector.broadcast %cst_772 : f32 to vector<2x16xf32>
    %1332 = arith.subf %1331, %1324 : vector<2x16xf32>
    %1333 = arith.mulf %1332, %1330 : vector<2x16xf32>
    %1334 = arith.mulf %1324, %1260 : vector<2x16xf32>
    %1335 = arith.addf %1333, %1334 : vector<2x16xf32>
    %c1_773 = arith.constant 1 : index
    %1336 = arith.index_cast %1265 : i32 to index
    %c0_774 = arith.constant 0 : index
    %c0_775 = arith.constant 0 : index
    %1337 = vector.load %arg18[%c1_773, %1336, %c0_774, %c0_775] : memref<2x8x2x16xf32, #tpu.memory_space<vmem>>, vector<1x1x2x16xf32>
    %1338 = vector.shape_cast %1337 : vector<1x1x2x16xf32> to vector<2x16xf32>
    %1339 = vector.shape_cast %1335 : vector<2x16xf32> to vector<1x1x2x16xf32>
    tpu.vector_store %arg18[%c1_773, %1336, %c0_774, %c0_775], %1339 {strides = array<i32>} : memref<2x8x2x16xf32, #tpu.memory_space<vmem>>, vector<1x1x2x16xf32>,
    %c7_i32_776 = arith.constant 7 : i32
    %c7_i32_777 = arith.constant 7 : i32
    %1340 = arith.subi %c7_i32_777, %c7_i32_776 : i32
    %cst_778 = arith.constant dense<0.000000e+00> : vector<2x16xf32>
    %1341 = tpu.matmul %1298, %795, %cst_778 {dimension_numbers = #tpu.dot_dimension_numbers<[1], [0], [0], [1], [0, 0, 1, 1], [], []>} : vector<2x16xf32>, vector<16x16xf32>, vector<2x16xf32> -> vector<2x16xf32>
    %cst_779 = arith.constant dense<0.000000e+00> : vector<2x16xf32>
    %1342 = tpu.matmul %1298, %797, %cst_779 {dimension_numbers = #tpu.dot_dimension_numbers<[1], [0], [0], [1], [0, 0, 1, 1], [], []>} : vector<2x16xf32>, vector<16x16xf32>, vector<2x16xf32> -> vector<2x16xf32>
    %cst_780 = arith.constant dense<0.000000e+00> : vector<2x16xf32>
    %1343 = tpu.matmul %1298, %799, %cst_780 {dimension_numbers = #tpu.dot_dimension_numbers<[1], [0], [0], [1], [0, 0, 1, 1], [], []>} : vector<2x16xf32>, vector<16x16xf32>, vector<2x16xf32> -> vector<2x16xf32>
    %1344 = arith.addf %1343, %809 : vector<2x16xf32>
    %c0_781 = arith.constant 0 : index
    %1345 = arith.index_cast %c7_i32_776 : i32 to index
    %c0_782 = arith.constant 0 : index
    %c0_783 = arith.constant 0 : index
    %1346 = vector.load %arg17[%c0_781, %1345, %c0_782, %c0_783] : memref<6x8x2x16xf32, #tpu.memory_space<vmem>>, vector<1x1x2x16xf32>
    %1347 = vector.shape_cast %1346 : vector<1x1x2x16xf32> to vector<2x16xf32>
    %1348 = arith.addf %1347, %1341 : vector<2x16xf32>
    %1349 = arith.negf %1348 : vector<2x16xf32>
    %1350 = math.exp %1349 : vector<2x16xf32>
    %cst_784 = arith.constant 1.000000e+00 : f32
    %1351 = vector.broadcast %cst_784 : f32 to vector<2x16xf32>
    %1352 = arith.addf %1351, %1350 : vector<2x16xf32>
    %1353 = arith.divf %1351, %1352 : vector<2x16xf32>
    %c1_785 = arith.constant 1 : index
    %1354 = arith.index_cast %c7_i32_776 : i32 to index
    %c0_786 = arith.constant 0 : index
    %c0_787 = arith.constant 0 : index
    %1355 = vector.load %arg17[%c1_785, %1354, %c0_786, %c0_787] : memref<6x8x2x16xf32, #tpu.memory_space<vmem>>, vector<1x1x2x16xf32>
    %1356 = vector.shape_cast %1355 : vector<1x1x2x16xf32> to vector<2x16xf32>
    %1357 = arith.addf %1356, %1342 : vector<2x16xf32>
    %1358 = arith.negf %1357 : vector<2x16xf32>
    %1359 = math.exp %1358 : vector<2x16xf32>
    %cst_788 = arith.constant 1.000000e+00 : f32
    %1360 = vector.broadcast %cst_788 : f32 to vector<2x16xf32>
    %1361 = arith.addf %1360, %1359 : vector<2x16xf32>
    %1362 = arith.divf %1360, %1361 : vector<2x16xf32>
    %c2_789 = arith.constant 2 : index
    %1363 = arith.index_cast %c7_i32_776 : i32 to index
    %c0_790 = arith.constant 0 : index
    %c0_791 = arith.constant 0 : index
    %1364 = vector.load %arg17[%c2_789, %1363, %c0_790, %c0_791] : memref<6x8x2x16xf32, #tpu.memory_space<vmem>>, vector<1x1x2x16xf32>
    %1365 = vector.shape_cast %1364 : vector<1x1x2x16xf32> to vector<2x16xf32>
    %1366 = arith.mulf %1353, %1344 : vector<2x16xf32>
    %1367 = arith.addf %1365, %1366 : vector<2x16xf32>
    %1368 = math.tanh %1367 : vector<2x16xf32>
    %cst_792 = arith.constant 1.000000e+00 : f32
    %1369 = vector.broadcast %cst_792 : f32 to vector<2x16xf32>
    %1370 = arith.subf %1369, %1362 : vector<2x16xf32>
    %1371 = arith.mulf %1370, %1368 : vector<2x16xf32>
    %1372 = arith.mulf %1362, %1298 : vector<2x16xf32>
    %1373 = arith.addf %1371, %1372 : vector<2x16xf32>
    %c0_793 = arith.constant 0 : index
    %1374 = arith.index_cast %c7_i32_776 : i32 to index
    %c0_794 = arith.constant 0 : index
    %c0_795 = arith.constant 0 : index
    %1375 = vector.load %arg18[%c0_793, %1374, %c0_794, %c0_795] : memref<2x8x2x16xf32, #tpu.memory_space<vmem>>, vector<1x1x2x16xf32>
    %1376 = vector.shape_cast %1375 : vector<1x1x2x16xf32> to vector<2x16xf32>
    %1377 = vector.shape_cast %1373 : vector<2x16xf32> to vector<1x1x2x16xf32>
    tpu.vector_store %arg18[%c0_793, %1374, %c0_794, %c0_795], %1377 {strides = array<i32>} : memref<2x8x2x16xf32, #tpu.memory_space<vmem>>, vector<1x1x2x16xf32>,
    %cst_796 = arith.constant dense<0.000000e+00> : vector<2x16xf32>
    %1378 = tpu.matmul %1335, %801, %cst_796 {dimension_numbers = #tpu.dot_dimension_numbers<[1], [0], [0], [1], [0, 0, 1, 1], [], []>} : vector<2x16xf32>, vector<16x16xf32>, vector<2x16xf32> -> vector<2x16xf32>
    %cst_797 = arith.constant dense<0.000000e+00> : vector<2x16xf32>
    %1379 = tpu.matmul %1335, %803, %cst_797 {dimension_numbers = #tpu.dot_dimension_numbers<[1], [0], [0], [1], [0, 0, 1, 1], [], []>} : vector<2x16xf32>, vector<16x16xf32>, vector<2x16xf32> -> vector<2x16xf32>
    %cst_798 = arith.constant dense<0.000000e+00> : vector<2x16xf32>
    %1380 = tpu.matmul %1335, %805, %cst_798 {dimension_numbers = #tpu.dot_dimension_numbers<[1], [0], [0], [1], [0, 0, 1, 1], [], []>} : vector<2x16xf32>, vector<16x16xf32>, vector<2x16xf32> -> vector<2x16xf32>
    %1381 = arith.addf %1380, %813 : vector<2x16xf32>
    %c3_799 = arith.constant 3 : index
    %1382 = arith.index_cast %1340 : i32 to index
    %c0_800 = arith.constant 0 : index
    %c0_801 = arith.constant 0 : index
    %1383 = vector.load %arg17[%c3_799, %1382, %c0_800, %c0_801] : memref<6x8x2x16xf32, #tpu.memory_space<vmem>>, vector<1x1x2x16xf32>
    %1384 = vector.shape_cast %1383 : vector<1x1x2x16xf32> to vector<2x16xf32>
    %1385 = arith.addf %1384, %1378 : vector<2x16xf32>
    %1386 = arith.negf %1385 : vector<2x16xf32>
    %1387 = math.exp %1386 : vector<2x16xf32>
    %cst_802 = arith.constant 1.000000e+00 : f32
    %1388 = vector.broadcast %cst_802 : f32 to vector<2x16xf32>
    %1389 = arith.addf %1388, %1387 : vector<2x16xf32>
    %1390 = arith.divf %1388, %1389 : vector<2x16xf32>
    %c4_803 = arith.constant 4 : index
    %1391 = arith.index_cast %1340 : i32 to index
    %c0_804 = arith.constant 0 : index
    %c0_805 = arith.constant 0 : index
    %1392 = vector.load %arg17[%c4_803, %1391, %c0_804, %c0_805] : memref<6x8x2x16xf32, #tpu.memory_space<vmem>>, vector<1x1x2x16xf32>
    %1393 = vector.shape_cast %1392 : vector<1x1x2x16xf32> to vector<2x16xf32>
    %1394 = arith.addf %1393, %1379 : vector<2x16xf32>
    %1395 = arith.negf %1394 : vector<2x16xf32>
    %1396 = math.exp %1395 : vector<2x16xf32>
    %cst_806 = arith.constant 1.000000e+00 : f32
    %1397 = vector.broadcast %cst_806 : f32 to vector<2x16xf32>
    %1398 = arith.addf %1397, %1396 : vector<2x16xf32>
    %1399 = arith.divf %1397, %1398 : vector<2x16xf32>
    %c5_807 = arith.constant 5 : index
    %1400 = arith.index_cast %1340 : i32 to index
    %c0_808 = arith.constant 0 : index
    %c0_809 = arith.constant 0 : index
    %1401 = vector.load %arg17[%c5_807, %1400, %c0_808, %c0_809] : memref<6x8x2x16xf32, #tpu.memory_space<vmem>>, vector<1x1x2x16xf32>
    %1402 = vector.shape_cast %1401 : vector<1x1x2x16xf32> to vector<2x16xf32>
    %1403 = arith.mulf %1390, %1381 : vector<2x16xf32>
    %1404 = arith.addf %1402, %1403 : vector<2x16xf32>
    %1405 = math.tanh %1404 : vector<2x16xf32>
    %cst_810 = arith.constant 1.000000e+00 : f32
    %1406 = vector.broadcast %cst_810 : f32 to vector<2x16xf32>
    %1407 = arith.subf %1406, %1399 : vector<2x16xf32>
    %1408 = arith.mulf %1407, %1405 : vector<2x16xf32>
    %1409 = arith.mulf %1399, %1335 : vector<2x16xf32>
    %1410 = arith.addf %1408, %1409 : vector<2x16xf32>
    %c1_811 = arith.constant 1 : index
    %1411 = arith.index_cast %1340 : i32 to index
    %c0_812 = arith.constant 0 : index
    %c0_813 = arith.constant 0 : index
    %1412 = vector.load %arg18[%c1_811, %1411, %c0_812, %c0_813] : memref<2x8x2x16xf32, #tpu.memory_space<vmem>>, vector<1x1x2x16xf32>
    %1413 = vector.shape_cast %1412 : vector<1x1x2x16xf32> to vector<2x16xf32>
    %1414 = vector.shape_cast %1410 : vector<2x16xf32> to vector<1x1x2x16xf32>
    tpu.vector_store %arg18[%c1_811, %1411, %c0_812, %c0_813], %1414 {strides = array<i32>} : memref<2x8x2x16xf32, #tpu.memory_space<vmem>>, vector<1x1x2x16xf32>,
    %c8_i32_814 = arith.constant 8 : i32
    %c0_815 = arith.constant 0 : index
    %c0_816 = arith.constant 0 : index
    %c0_817 = arith.constant 0 : index
    %1415 = vector.load %arg3[%c0_815, %c0_816, %c0_817] : memref<8x2x1xf32, #tpu.memory_space<vmem>>, vector<8x2x1xf32>
    %cst_818 = arith.constant 0.000000e+00 : f32
    %1416 = vector.broadcast %cst_818 : f32 to vector<8x2x1xf32>
    %1417 = arith.cmpf ogt, %1415, %1416 : vector<8x2x1xf32>
    %c0_819 = arith.constant 0 : index
    %c0_820 = arith.constant 0 : index
    %c0_821 = arith.constant 0 : index
    %c0_822 = arith.constant 0 : index
    %1418 = vector.load %arg18[%c0_819, %c0_820, %c0_821, %c0_822] : memref<2x8x2x16xf32, #tpu.memory_space<vmem>>, vector<1x8x2x16xf32>
    %1419 = vector.shape_cast %1418 : vector<1x8x2x16xf32> to vector<8x2x16xf32>
    %cst_823 = arith.constant -1.000000e+06 : f32
    %1420 = vector.shape_cast %1417 : vector<8x2x1xi1> to vector<8x2x1xi1>
    %1421 = vector.broadcast %1420 : vector<8x2x1xi1> to vector<8x2x16xi1>
    %1422 = vector.broadcast %cst_823 : f32 to vector<8x2x16xf32>
    %1423 = arith.select %1421, %1419, %1422 : vector<8x2x16xi1>, vector<8x2x16xf32>
    %cst_824 = arith.constant dense<0xFF800000> : vector<2x16xf32>
    %1424 = vector.multi_reduction <maximumf>, %1423, %cst_824 [0] : vector<8x2x16xf32> to vector<2x16xf32>
    %c1_825 = arith.constant 1 : index
    %c0_826 = arith.constant 0 : index
    %c0_827 = arith.constant 0 : index
    %c0_828 = arith.constant 0 : index
    %1425 = vector.load %arg18[%c1_825, %c0_826, %c0_827, %c0_828] : memref<2x8x2x16xf32, #tpu.memory_space<vmem>>, vector<1x8x2x16xf32>
    %1426 = vector.shape_cast %1425 : vector<1x8x2x16xf32> to vector<8x2x16xf32>
    %cst_829 = arith.constant -1.000000e+06 : f32
    %1427 = vector.shape_cast %1417 : vector<8x2x1xi1> to vector<8x2x1xi1>
    %1428 = vector.broadcast %1427 : vector<8x2x1xi1> to vector<8x2x16xi1>
    %1429 = vector.broadcast %cst_829 : f32 to vector<8x2x16xf32>
    %1430 = arith.select %1428, %1426, %1429 : vector<8x2x16xi1>, vector<8x2x16xf32>
    %cst_830 = arith.constant dense<0xFF800000> : vector<2x16xf32>
    %1431 = vector.multi_reduction <maximumf>, %1430, %cst_830 [0] : vector<8x2x16xf32> to vector<2x16xf32>
    %c0_831 = arith.constant 0 : index
    %c0_832 = arith.constant 0 : index
    %1432 = vector.load %arg13[%c0_831, %c0_832] : memref<16x4xf32, #tpu.memory_space<vmem>>, vector<16x4xf32>
    %cst_833 = arith.constant dense<0.000000e+00> : vector<2x4xf32>
    %1433 = tpu.matmul %1424, %1432, %cst_833 {dimension_numbers = #tpu.dot_dimension_numbers<[1], [0], [0], [1], [0, 0, 1, 1], [], []>} : vector<2x16xf32>, vector<16x4xf32>, vector<2x4xf32> -> vector<2x4xf32>
    %c0_834 = arith.constant 0 : index
    %c0_835 = arith.constant 0 : index
    %1434 = vector.load %arg14[%c0_834, %c0_835] : memref<16x4xf32, #tpu.memory_space<vmem>>, vector<16x4xf32>
    %cst_836 = arith.constant dense<0.000000e+00> : vector<2x4xf32>
    %1435 = tpu.matmul %1431, %1434, %cst_836 {dimension_numbers = #tpu.dot_dimension_numbers<[1], [0], [0], [1], [0, 0, 1, 1], [], []>} : vector<2x16xf32>, vector<16x4xf32>, vector<2x4xf32> -> vector<2x4xf32>
    %1436 = arith.addf %1433, %1435 : vector<2x4xf32>
    %c0_837 = arith.constant 0 : index
    %c0_838 = arith.constant 0 : index
    %1437 = vector.load %arg15[%c0_837, %c0_838] : memref<1x4xf32, #tpu.memory_space<vmem>>, vector<1x4xf32>
    %1438 = vector.broadcast %1437 : vector<1x4xf32> to vector<2x4xf32>
    %1439 = arith.addf %1436, %1438 : vector<2x4xf32>
    %c0_839 = arith.constant 0 : index
    %c0_840 = arith.constant 0 : index
    %1440 = vector.load %arg16[%c0_839, %c0_840] : memref<2x4xf32, #tpu.memory_space<vmem>>, vector<2x4xf32>
    tpu.vector_store %arg16[%c0_839, %c0_840], %1439 {strides = array<i32>} : memref<2x4xf32, #tpu.memory_space<vmem>>, vector<2x4xf32>,
    return
  }
}

</mosaic_0001>

<bundles_post_ra>
// kernel: tpu_custom_call.1
= control target key start
LH: loop header
LB: loop body
LE: loop exit
PB: predicated region body
PF: predicated region fallthrough
CT: control target
= control target key end

     0   :  { %s14015_s0 = inlined_call_operand.vmem [shape: s32[16,1], index: 0, kind: input, shape index: {}]   ;;  %s14016_s1 = inlined_call_operand.vmem [shape: f32[16,1], index: 1, kind: input, shape index: {}]   ;;  %s14017_s2 = inlined_call_operand.vmem [shape: f32[32,16], index: 2, kind: input, shape index: {}]   ;;  %s14018_s3 = inlined_call_operand.vmem [shape: f32[8,2,1], index: 3, kind: input, shape index: {}]   ;;  %s14019_s4 = inlined_call_operand.vmem [shape: f32[6,16,16], index: 4, kind: input, shape index: {}]   ;;  %s14020_s5 = inlined_call_operand.hbm [shape: f32[6,16,16], index: 5, kind: input, shape index: {}]   ;;  %s14021_s6 = inlined_call_operand.vmem [shape: f32[6,1,16], index: 6, kind: input, shape index: {}]   ;;  %s14022_s7 = inlined_call_operand.vmem [shape: f32[2,1,16], index: 7, kind: input, shape index: {}]   ;;  %s14023_s8 = inlined_call_operand.hbm [shape: f32[6,16,16], index: 8, kind: input, shape index: {}]   ;;  %s14024_s9 = inlined_call_operand.hbm [shape: f32[6,16,16], index: 9, kind: input, shape index: {}]   ;;  %s14025_s10 = inlined_call_operand.hbm [shape: f32[6,16,16], index: 10, kind: input, shape index: {}]   ;;  %s14026_s11 = inlined_call_operand.vmem [shape: f32[6,1,16], index: 11, kind: input, shape index: {}]   ;;  %s14027_s12 = inlined_call_operand.vmem [shape: f32[2,1,16], index: 12, kind: input, shape index: {}]   ;;  %s14028_s13 = inlined_call_operand.vmem [shape: f32[16,4], index: 13, kind: input, shape index: {}]   ;;  %s14029_s14 = inlined_call_operand.vmem [shape: f32[16,4], index: 14, kind: input, shape index: {}]   ;;  %s14030_s15 = inlined_call_operand.vmem [shape: f32[1,4], index: 15, kind: input, shape index: {}]   ;;  %s14031_s16 = inlined_call_operand.hbm [shape: f32[2,4], index: 16, kind: output, shape index: {}]  }
   0x1   :  { %14033 = sst [smem:[#allocation17_spill]] %s14015_s0 }
   0x2   :  { %21 = vsyncpa [#allocation5], 0 }
   0x3   :  { %22 = vsyncpa [#allocation8], 0 }
   0x4   :  { %23 = vsyncpa [#allocation11], 0 }
   0x5   :  { %24 = vsyncpa [#allocation6], 0  ;;  %s12393_s21 = smov [#allocation7]   ;;  %s12394_s23 = smov [#allocation4]  }
   0x6   :  { %s56_s22 = sshll.u32 %s12393_s21, 4  ;;  %s40_s24 = sshll.u32 %s12394_s23, 4  ;;  %s57_s22 = int_to_ptr.vmem [resolvable:$true] %s56_s22  ;;  %s41_s24 = int_to_ptr.vmem [resolvable:$true] %s40_s24 }
   0x7   :  { %s12293_s25 = scalar_lea.vmem %s57_s22, 1536  ;;  %p12298_p1 = scmp.lt.s32.totalorder %s57_s22, %s57_s22 }
   0x8   :  { %p12294_p0 = scmp.ne.s32.totalorder %s57_s22, %s12293_s25  ;;  %p12299_p2 = scmp.lt.s32.totalorder %s12293_s25, %s12293_s25 }
   0xa   :  { %p12300_p3 = por %p12299_p2, %p12298_p1 }
   0xc   :  { %p12301_p4 = pnand %p12300_p3, %p12294_p0 }
   0xe   :  { %12304 = shalt.err (!%p12301_p4)
}
   0xf   :  { %s12395_s26 = smov 128   ;;  %s12396_s27 = smov 8  }
  0x10   :  { %62 = dma.hbm_to_vmem [thread:$0]  %s14023_s8, 1536, %s57_s22, [#allocation8], %s12395_s26, %s12395_s26, %s12396_s27  }
  0x11   :  { %s12313_s30 = scalar_lea.vmem %s41_s24, 1536  ;;  %p12318_p6 = scmp.lt.s32.totalorder %s41_s24, %s41_s24 }
  0x12   :  { %p12314_p5 = scmp.ne.s32.totalorder %s41_s24, %s12313_s30  ;;  %p12319_p7 = scmp.lt.s32.totalorder %s12313_s30, %s12313_s30 }
  0x14   :  { %p12320_p8 = por %p12319_p7, %p12318_p6 }
  0x16   :  { %p12321_p9 = pnand %p12320_p8, %p12314_p5 }
  0x18   :  { %12324 = shalt.err (!%p12321_p9)
}
  0x19   :  { %46 = dma.hbm_to_vmem [thread:$0]  %s14020_s5, 1536, %s41_s24, [#allocation5], %s12395_s26, %s12395_s26, %s12396_s27  }
  0x1a   :  { %s12397_s18 = smov [#allocation9]   ;;  %s12398_s20 = smov [#allocation10]  }
  0x1b   :  { %s68_s19 = sshll.u32 %s12397_s18, 4  ;;  %s80_s21 = sshll.u32 %s12398_s20, 4  ;;  %s69_s19 = int_to_ptr.vmem [resolvable:$true] %s68_s19  ;;  %s81_s21 = int_to_ptr.vmem [resolvable:$true] %s80_s21 }
  0x1c   :  { %s12333_s8 = scalar_lea.vmem %s69_s19, 1536  ;;  %p12338_p11 = scmp.lt.s32.totalorder %s69_s19, %s69_s19 }
  0x1d   :  { %p12334_p10 = scmp.ne.s32.totalorder %s69_s19, %s12333_s8  ;;  %p12339_p12 = scmp.lt.s32.totalorder %s12333_s8, %s12333_s8 }
  0x1f   :  { %p12340_p13 = por %p12339_p12, %p12338_p11 }
  0x21   :  { %p12341_p0 = pnand %p12340_p13, %p12334_p10 }
  0x23   :  { %12344 = shalt.err (!%p12341_p0)
}
  0x24   :  { %74 = dma.hbm_to_vmem [thread:$0]  %s14024_s9, 1536, %s69_s19, [#allocation8], %s12395_s26, %s12395_s26, %s12396_s27  }
  0x25   :  { %s12353_s5 = scalar_lea.vmem %s81_s21, 1536  ;;  %p12358_p2 = scmp.lt.s32.totalorder %s81_s21, %s81_s21 }
  0x26   :  { %p12354_p1 = scmp.ne.s32.totalorder %s81_s21, %s12353_s5  ;;  %p12359_p3 = scmp.lt.s32.totalorder %s12353_s5, %s12353_s5 }
  0x28   :  { %p12360_p4 = por %p12359_p3, %p12358_p2 }
  0x2a   :  { %p12361_p5 = pnand %p12360_p4, %p12354_p1 }
  0x2c   :  { %12364 = shalt.err (!%p12361_p5)
}
  0x2d   :  { %86 = dma.hbm_to_vmem [thread:$0]  %s14025_s10, 1536, %s81_s21, [#allocation11], %s12395_s26, %s12395_s26, %s12396_s27  }
  0x2e   :  { %12385 = dma.done.wait [#allocation5], 1536  }
  0x2f   :  { %12386 = vsyncadd [#allocation5], 4294965760 }
  0x30   :  { %12387 = dma.done.wait [#allocation8], 3072  }
  0x31   :  { %12388 = vsyncadd [#allocation8], 4294964224 }
  0x32   :  { %12389 = dma.done.wait [#allocation11], 1536  }
  0x33   :  { %12390 = vsyncadd [#allocation11], 4294965760  ;;  %v12399_v0 = vmov 0   ;;  %s14034_s29 = sld [smem:[#allocation17_spill]]  ;;  %v10205_v2 = vld [vmem:[%s14018_s3] sm:$0x3]  ;;  %v109_v25 = vlaneseq }
  0x34   :  { %11935 = vset.pattern.permute.xlu0 %v12399_v0  ;;  %11936 = vset.pattern.permute.xlu1 %v12399_v0  ;;  %v128_v3 = vld [vmem:[%s14017_s2 + $0x18] sm:$0xff]  ;;  %v127_v5 = vld [vmem:[%s14017_s2 + $0x10] sm:$0xff]  ;;  %vm10213_vm0 = vcmp.gt.f32.partialorder %v10205_v2, 0.0  ;;  %v126_v6 = vld [vmem:[%s14017_s2 + $0x8] sm:$0xff]  ;;  %vm129_vm8 = vcmask 261120   ;;  %v12400_v28 = vmov 0.0  }
  0x35   :  { %11101 = vmatprep.subr.mxu0 %v128_v3  ;;  %v10207_v7 = vld [vmem:[%s14018_s3 + $0x4] sm:$0x3]  ;;  %v10229_v9 = vsel %vm10213_vm0, 1, %v12399_v0  ;;  %v10209_v10 = vld [vmem:[%s14018_s3 + $0x8] sm:$0x3]  ;;  %v110_v26 = vand.u32 127, %v109_v25 }
  0x36   :  { %11102 = vmatpush3.msra.mxu0 %v128_v3  ;;  %v125_v8 = vld [vmem:[%s14017_s2] sm:$0xff]  ;;  %vm10215_vm1 = vcmp.gt.f32.partialorder %v10207_v7, 0.0  ;;  %vm10217_vm2 = vcmp.gt.f32.partialorder %v10209_v10, 0.0  ;;  %v10211_v12 = vld [vmem:[%s14018_s3 + $0xc] sm:$0x3]  ;;  %v10508_v36 = vld [vmem:[%s14019_s4 + $0x18] sm:$0xff] }
  0x37   :  { %11103 = vmatprep.subr.mxu0 %v127_v5  ;;  %v10231_v11 = vsel %vm10215_vm1, 1, %v12399_v0  ;;  %v10233_v13 = vsel %vm10217_vm2, 1, %v12399_v0  ;;  %vm10219_vm3 = vcmp.gt.f32.partialorder %v10211_v12, 0.0  ;;  %v211_v14 = vld [vmem:[%s14016_s1] sm:$0xff]  ;;  %v212_v17 = vld [vmem:[%s14016_s1 + $0x8] sm:$0xff]  ;;  %vm234_vm11 = vcmask 130048  }
  0x38   :  { %11104 = vmatpush3.msra.mxu0 %v127_v5  ;;  %v10206_v15 = vld [vmem:[%s14018_s3 + $0x2] sm:$0x3]  ;;  %v10235_v16 = vsel %vm10219_vm3, 1, %v12399_v0  ;;  %215 = vperm.xlu1 %11936, %v211_v14   ;;  %v10208_v18 = vld [vmem:[%s14018_s3 + $0x6] sm:$0x3]  ;;  %v226_v32 = vld [vmem:[%s14019_s4 + $0x8] sm:$0xff] }
  0x39   :  { %v111_v1 = vld [vmem:[%s14034_s29] sm:$0xff]  ;;  %v112_v4 = vld [vmem:[%s14034_s29 + $0x8] sm:$0xff]  ;;  %11105 = vmatprep.subr.mxu0 %v126_v6  ;;  %vm10214_vm4 = vcmp.gt.f32.partialorder %v10206_v15, 0.0  ;;  %vm10216_vm5 = vcmp.gt.f32.partialorder %v10208_v18, 0.0  ;;  %11112 = vmatprep.subr.mxu1 %v226_v32  ;;  %v10507_v44 = vld [vmem:[%s14019_s4 + $0x10] sm:$0xff]  ;;  %vm12401_vm12 = vmmov 0  }
  0x3a   :  { %114 = vperm.xlu0 %11935, %v111_v1   ;;  %11106 = vmatpush3.msra.mxu0 %v126_v6  ;;  %v10230_v19 = vsel %vm10214_vm4, 1, %v12399_v0  ;;  %v10210_v20 = vld [vmem:[%s14018_s3 + $0xa] sm:$0x3]  ;;  %v10232_v21 = vsel %vm10216_vm5, 1, %v12399_v0  ;;  %v10212_v22 = vld [vmem:[%s14018_s3 + $0xe] sm:$0x3] }
  0x3b   :  { %11107 = vmatprep.subr.mxu0 %v125_v8  ;;  %vm10218_vm6 = vcmp.gt.f32.partialorder %v10210_v20, 0.0  ;;  %vm10220_vm7 = vcmp.gt.f32.partialorder %v10212_v22, 0.0  ;;  %v10514_v33 = vld [vmem:[%s14019_s4 + $0x28] sm:$0xff]  ;;  %11113 = vmatpush3.msra.mxu1 %v226_v32  ;;  %v225_v34 = vld [vmem:[%s14019_s4] sm:$0xff]  ;;  %v10520_v46 = vld [vmem:[%s14019_s4 + $0x38] sm:$0xff]  ;;  %v323_v1 = vshrl.u32 %v109_v25, 7 }
  0x3c   :  { %11108 = vmatpush3.msra.mxu0 %v125_v8  ;;  %220 = vperm.xlu1 %11936, %v212_v17   ;;  %v10234_v23 = vsel %vm10218_vm6, 1, %v12399_v0  ;;  %v10236_v24 = vsel %vm10220_vm7, 1, %v12399_v0  ;;  %v10513_v35 = vld [vmem:[%s14019_s4 + $0x20] sm:$0xff]  ;;  %v10526_v37 = vld [vmem:[%s14019_s4 + $0x48] sm:$0xff]  ;;  %v10519_v47 = vld [vmem:[%s14019_s4 + $0x30] sm:$0xff]  ;;  %vm360_vm13 = vcmask 123904  }
  0x3d   :  { %11126 = vmatprep.subr.mxu0 %v10514_v33  ;;  %11114 = vmatprep.subr.mxu1 %v225_v34  ;;  %v10525_v45 = vld [vmem:[%s14019_s4 + $0x40] sm:$0xff]  ;;  %v10532_v48 = vld [vmem:[%s14019_s4 + $0x58] sm:$0xff]  ;;  %v12607_v49 = vld [vmem:[#allocation4 + $0x8] sm:$0xff]  ;;  %v12402_v62 = vmov 1983009808   ;;  %s12403_s20 = smov [#allocation12]  }
  0x3e   :  { %117 = vperm.xlu0 %11935, %v112_v4   ;;  %11115 = vmatpush3.msra.mxu1 %v225_v34  ;;  %v10531_v50 = vld [vmem:[%s14019_s4 + $0x50] sm:$0xff]  ;;  %v12614_v51 = vld [vmem:[#allocation4] sm:$0xff]  ;;  %v12621_v52 = vld [vmem:[#allocation4 + $0x28] sm:$0xff]  ;;  %v320_v63 = vunpack.c.l.s4 %v12402_v62  ;;  %s10489_s21 = sshll.u32 %s12403_s20, 4  ;;  %vm10481_vm6 = vcmask 25600   ;;  %s10490_s21 = int_to_ptr.vmem [resolvable:$true] %s10489_s21 }
  0x3f   :  { %11119 = vmatprep.subr.mxu1 %v10508_v36  ;;  %v12623_v53 = vld [vmem:[#allocation4 + $0x18] sm:$0xff]  ;;  %v12629_v54 = vld [vmem:[#allocation4 + $0x20] sm:$0xff]  ;;  %v12636_v55 = vld [vmem:[#allocation4 + $0x10] sm:$0xff]  ;;  %s12365_s1 = scalar_lea.vmem %s10490_s21, 32  ;;  %p12370_p7 = scmp.lt.s32.totalorder %s10490_s21, %s10490_s21 }
  0x40   :  { %10241 = vperm.xlu1 %11936, %v10230_v19   ;;  %v12640_v56 = vld [vmem:[#allocation4 + $0x48] sm:$0xff]  ;;  %v12647_v57 = vld [vmem:[#allocation4 + $0x38] sm:$0xff]  ;;  %v12649_v58 = vld [vmem:[#allocation4 + $0x40] sm:$0xff]  ;;  %v321_v0 = vunpack.c.0.s8 %v320_v63  ;;  %p12366_p6 = scmp.ne.s32.totalorder %s10490_s21, %s12365_s1  ;;  %p12371_p8 = scmp.lt.s32.totalorder %s12365_s1, %s12365_s1 }
  0x41   :  { %v12655_v59 = vld [vmem:[#allocation4 + $0x30] sm:$0xff]  ;;  %v12664_v60 = vld [vmem:[#allocation4 + $0x58] sm:$0xff]  ;;  %v10504_v2 = vld [vmem:[%s14021_s6] ss:$0 sm:$0xff] }
  0x42   :  { %10238 = vperm.xlu0 %11935, %v10229_v9   ;;  %v12670_v61 = vld [vmem:[#allocation4 + $0x50] sm:$0xff]  ;;  %v10516_v3 = vld [vmem:[%s14021_s6 + $0x2] ss:$0 sm:$0xff]  ;;  %v12699_v4 = vsub.s32 %v321_v0, %v323_v1  ;;  %v10510_v17 = vld [vmem:[%s14021_s6 + $0x1] ss:$0 sm:$0xff]  ;;  %p12372_p9 = por %p12371_p8, %p12370_p7 }
  0x43   :  { %v10528_v18 = vld [vmem:[%s14021_s6 + $0x4] ss:$0 sm:$0xff] }
  0x44   :  { %10247 = vperm.xlu1 %11936, %v10232_v21   ;;  %p12373_p10 = pnand %p12372_p9, %p12366_p6 }
  0x46   :  { %10244 = vperm.xlu0 %11935, %v10231_v11  }
  0x48   :  { %10253 = vperm.xlu1 %11936, %v10234_v23  }
  0x4a   :  { %10250 = vperm.xlu0 %11935, %v10233_v13  }
  0x4c   :  { %10259 = vperm.xlu1 %11936, %v10236_v24  }
  0x4e   :  { %10256 = vperm.xlu0 %11935, %v10235_v16  }
  0xb3   :  { %v216_v38 = vpop.permute.xlu1 %215 }
  0xb5   :  { %v115_v27 = vpop.permute.xlu0 %114 }
  0xb6   :  { %vm119_vm9 = vcmp.eq.s32.totalorder %v115_v27, %v110_v26 }
  0xb7   :  { %v10500_v29 = vsel %vm119_vm9, 1.0, %v12400_v28  ;;  %v221_v41 = vpop.permute.xlu1 %220 }
  0xb8   :  { %11109 = vmatprep.mubr.msk.f32.mxu0 %vm129_vm8, %v10500_v29 }
  0xb9   :  { %v118_v30 = vpop.permute.xlu0 %117 }
  0xba   :  { %vm120_vm10 = vcmp.eq.s32.totalorder %v118_v30, %v110_v26 }
  0xbb   :  { %v10501_v31 = vsel %vm120_vm10, 1.0, %v12400_v28 }
  0xbc   :  { %11110 = vmatmul.mubr.msk.f32.vlgmr.msra.gmra.mxu0 %vm129_vm8, %v10501_v31 }
  0xbd   :  { %11127 = vmatpush3.msra.mxu0 %v10514_v33 }
  0xbe   :  { %11128 = vmatprep.subr.mxu0 %v10513_v35 }
  0xbf   :  { %11129 = vmatpush3.msra.mxu0 %v10513_v35 }
  0xc0   :  { %11140 = vmatprep.subr.mxu0 %v10526_v37 }
 0x17c   :  { %v11111_v39 = vpop.f32.mrf.mxu0 }
 0x17d   :  { %v224_v43 = vmul.f32 %v11111_v39, %v221_v41 }
 0x17e   :  { %v202_v40 = vpop.f32.mrf.mxu0 }
 0x17f   :  { %v223_v42 = vmul.f32 %v216_v38, %v202_v40 }
 0x181   :  { %11116 = vmatprep.mubr.msk.f32.mxu1 %vm234_vm11, %v223_v42  ;;  %11130 = vmatprep.mubr.msk.f32.mxu0 %vm234_vm11, %v223_v42 }
 0x182   :  { %11117 = vmatmul.mubr.msk.f32.vlgmr.msra.gmra.mxu1 %vm234_vm11, %v224_v43  ;;  %11131 = vmatmul.mubr.msk.f32.vlgmr.msra.gmra.mxu0 %vm234_vm11, %v224_v43 }
 0x183   :  { %11120 = vmatpush3.msra.mxu1 %v10508_v36  ;;  %11123 = vmatprep.mubr.msk.f32.mxu1 %vm234_vm11, %v223_v42 }
 0x184   :  { %11121 = vmatprep.subr.mxu1 %v10507_v44  ;;  %11141 = vmatpush3.msra.mxu0 %v10526_v37 }
 0x185   :  { %11144 = vmatprep.mubr.msk.f32.mxu0 %vm234_vm11, %v223_v42  ;;  %11122 = vmatpush3.msra.mxu1 %v10507_v44 }
 0x186   :  { %11142 = vmatprep.subr.mxu0 %v10525_v45  ;;  %11133 = vmatprep.subr.mxu1 %v10520_v46 }
 0x187   :  { %11143 = vmatpush3.msra.mxu0 %v10525_v45  ;;  %11124 = vmatmul.mubr.msk.f32.vlgmr.msra.gmra.mxu1 %vm234_vm11, %v224_v43 }
 0x188   :  { %11134 = vmatpush3.msra.mxu1 %v10520_v46  ;;  %11145 = vmatmul.mubr.msk.f32.vlgmr.msra.gmra.mxu0 %vm234_vm11, %v224_v43 }
 0x189   :  { %11135 = vmatprep.subr.mxu1 %v10519_v47  ;;  %11137 = vmatprep.mubr.msk.f32.mxu1 %vm234_vm11, %v223_v42 }
 0x18a   :  { %11136 = vmatpush3.msra.mxu1 %v10519_v47  ;;  %11154 = vmatprep.subr.mxu0 %v12400_v28 }
 0x18b   :  { %11138 = vmatmul.mubr.msk.f32.vlgmr.msra.gmra.mxu1 %vm234_vm11, %v224_v43  ;;  %11147 = vmatprep.subr.mxu1 %v10532_v48 }
 0x18c   :  { %11148 = vmatpush3.msra.mxu1 %v10532_v48  ;;  %11151 = vmatprep.mubr.msk.f32.mxu1 %vm234_vm11, %v223_v42 }
 0x18d   :  { %11155 = vmatpush3.msra.mxu0 %v12607_v49  ;;  %11149 = vmatprep.subr.mxu1 %v10531_v50 }
 0x18e   :  { %11156 = vmatprep.subr.mxu0 %v12400_v28  ;;  %11150 = vmatpush3.msra.mxu1 %v10531_v50  ;;  %v10522_v50 = vld [vmem:[%s14021_s6 + $0x3] ss:$0 sm:$0xff] }
 0x18f   :  { %11157 = vmatpush3.msra.mxu0 %v12614_v51  ;;  %11158 = vmatprep.mubr.msk.f32.mxu0 %vm12401_vm12, %v12400_v28 }
 0x190   :  { %11152 = vmatmul.mubr.msk.f32.vlgmr.msra.gmra.mxu1 %vm234_vm11, %v224_v43  ;;  %11159 = vmatmul.mubr.f32.vlgmr.msra.gmra.mxu0 %v12400_v28 }
 0x191   :  { %11168 = vmatprep.subr.mxu0 %v12400_v28  ;;  %11161 = vmatprep.subr.mxu1 %v12400_v28 }
 0x192   :  { %11169 = vmatpush3.msra.mxu0 %v12621_v52  ;;  %11162 = vmatpush3.msra.mxu1 %v12623_v53 }
 0x193   :  { %11170 = vmatprep.subr.mxu0 %v12400_v28  ;;  %11172 = vmatprep.mubr.msk.f32.mxu0 %vm12401_vm12, %v12400_v28 }
 0x194   :  { %11171 = vmatpush3.msra.mxu0 %v12629_v54  ;;  %11163 = vmatprep.subr.mxu1 %v12400_v28 }
 0x195   :  { %11173 = vmatmul.mubr.f32.vlgmr.msra.gmra.mxu0 %v12400_v28  ;;  %11182 = vmatprep.subr.mxu0 %v12400_v28 }
 0x196   :  { %11164 = vmatpush3.msra.mxu1 %v12636_v55  ;;  %11165 = vmatprep.mubr.msk.f32.mxu1 %vm12401_vm12, %v12400_v28 }
 0x197   :  { %11183 = vmatpush3.msra.mxu0 %v12640_v56  ;;  %11166 = vmatmul.mubr.f32.vlgmr.msra.gmra.mxu1 %v12400_v28 }
 0x198   :  { %11175 = vmatprep.subr.mxu1 %v12400_v28  ;;  %11184 = vmatprep.subr.mxu0 %v12400_v28 }
 0x199   :  { %11176 = vmatpush3.msra.mxu1 %v12647_v57  ;;  %11185 = vmatpush3.msra.mxu0 %v12649_v58 }
 0x19a   :  { %11186 = vmatprep.mubr.msk.f32.mxu0 %vm12401_vm12, %v12400_v28  ;;  %11177 = vmatprep.subr.mxu1 %v12400_v28 }
 0x19b   :  { %11187 = vmatmul.mubr.f32.vlgmr.msra.gmra.mxu0 %v12400_v28  ;;  %11178 = vmatpush3.msra.mxu1 %v12655_v59 }
 0x19c   :  { %11179 = vmatprep.mubr.msk.f32.mxu1 %vm12401_vm12, %v12400_v28  ;;  %11189 = vmatprep.subr.mxu1 %v12400_v28 }
 0x19d   :  { %11180 = vmatmul.mubr.f32.vlgmr.msra.gmra.mxu1 %v12400_v28  ;;  %11196 = vmatprep.subr.mxu0 %v12400_v28 }
 0x19e   :  { %11190 = vmatpush3.msra.mxu1 %v12664_v60  ;;  %11193 = vmatprep.mubr.msk.f32.mxu1 %vm12401_vm12, %v12400_v28 }
 0x19f   :  { %11191 = vmatprep.subr.mxu1 %v12400_v28  ;;  %11197 = vmatpush3.msra.mxu0 %v12607_v49 }
 0x1a0   :  { %11192 = vmatpush3.msra.mxu1 %v12670_v61  ;;  %11198 = vmatprep.subr.mxu0 %v12400_v28 }
 0x1a1   :  { %11194 = vmatmul.mubr.f32.vlgmr.msra.gmra.mxu1 %v12400_v28  ;;  %11203 = vmatprep.subr.mxu1 %v12400_v28 }
 0x1a2   :  { %11204 = vmatpush3.msra.mxu1 %v12623_v53  ;;  %11199 = vmatpush3.msra.mxu0 %v12614_v51 }
 0x1a3   :  { %11205 = vmatprep.subr.mxu1 %v12400_v28  ;;  %11200 = vmatprep.mubr.msk.f32.mxu0 %vm12401_vm12, %v12400_v28 }
 0x1a4   :  { %11206 = vmatpush3.msra.mxu1 %v12636_v55  ;;  %11207 = vmatprep.mubr.msk.f32.mxu1 %vm12401_vm12, %v12400_v28 }
 0x1a5   :  { %11210 = vmatprep.subr.mxu0 %v12400_v28  ;;  %11217 = vmatprep.subr.mxu1 %v12400_v28 }
 0x242   :  { %v11118_v5 = vpop.f32.mrf.mxu1  ;;  %v11132_v6 = vpop.f32.mrf.mxu0 }
 0x243   :  { %v313_v7 = vadd.f32 %v11118_v5, %v10504_v2  ;;  %v591_v8 = vadd.f32 %v11132_v6, %v10516_v3 }
 0x244   :  { %v307_v9 = vpop.f32.mrf.mxu1  ;;  %v585_v10 = vpop.f32.mrf.mxu0 }
 0x245   :  { %v335_v11 = vcombine.high %v313_v7, %v313_v7  ;;  %v342_v12 = vrot.slane %v313_v7, %v12699_v4  ;;  %v613_v13 = vcombine.high %v591_v8, %v591_v8  ;;  %v620_v14 = vrot.slane %v591_v8, %v12699_v4 }
 0x246   :  { %v308_v15 = vadd.f32 %v10504_v2, %v307_v9  ;;  %v586_v16 = vadd.f32 %v10516_v3, %v585_v10 }
 0x247   :  { %v349_v19 = vrot.slane %v335_v11, %v12699_v4  ;;  %v350_v20 = vcombine.high %v342_v12, %v342_v12  ;;  %365 = vst.msk [vmem:[#allocation2 + $0x8] sm:$0x3] %vm360_vm13, %v342_v12  ;;  %v627_v21 = vrot.slane %v613_v13, %v12699_v4  ;;  %v628_v22 = vcombine.high %v620_v14, %v620_v14  ;;  %v11125_v23 = vpop.f32.mrf.mxu1  ;;  %v10534_v12 = vld [vmem:[%s14021_s6 + $0x5] ss:$0 sm:$0xff] }
 0x248   :  { %643 = vst.msk [vmem:[#allocation2 + $0x28] sm:$0x3] %vm360_vm13, %v620_v14  ;;  %v318_v24 = vcombine.high %v308_v15, %v308_v15  ;;  %v325_v25 = vrot.slane %v308_v15, %v12699_v4  ;;  %v596_v26 = vcombine.high %v586_v16, %v586_v16  ;;  %v603_v27 = vrot.slane %v586_v16, %v12699_v4  ;;  %v11146_v29 = vpop.f32.mrf.mxu0 }
 0x249   :  { %v351_v30 = vcombine.high %v349_v19, %v349_v19  ;;  %366 = vst.msk [vmem:[#allocation2 + $0xa] sm:$0x3] %vm360_vm13, %v350_v20  ;;  %367 = vst.msk [vmem:[#allocation2 + $0xc] sm:$0x3] %vm360_vm13, %v349_v19  ;;  %v629_v31 = vcombine.high %v627_v21, %v627_v21  ;;  %v452_v32 = vadd.f32 %v11125_v23, %v10510_v17  ;;  %v446_v34 = vpop.f32.mrf.mxu1 }
 0x24a   :  { %644 = vst.msk [vmem:[#allocation2 + $0x2a] sm:$0x3] %vm360_vm13, %v628_v22  ;;  %645 = vst.msk [vmem:[#allocation2 + $0x2c] sm:$0x3] %vm360_vm13, %v627_v21  ;;  %v869_v33 = vadd.f32 %v11146_v29, %v10528_v18  ;;  %v332_v35 = vrot.slane %v318_v24, %v12699_v4  ;;  %v333_v36 = vcombine.high %v325_v25, %v325_v25  ;;  %v863_v39 = vpop.f32.mrf.mxu0 }
 0x24b   :  { %361 = vst.msk [vmem:[#allocation2] sm:$0x3] %vm360_vm13, %v325_v25  ;;  %v610_v37 = vrot.slane %v596_v26, %v12699_v4  ;;  %v611_v38 = vcombine.high %v603_v27, %v603_v27  ;;  %639 = vst.msk [vmem:[#allocation2 + $0x20] sm:$0x3] %vm360_vm13, %v603_v27  ;;  %v474_v40 = vcombine.high %v452_v32, %v452_v32  ;;  %v11139_v44 = vpop.f32.mrf.mxu1 }
 0x24c   :  { %368 = vst.msk [vmem:[#allocation2 + $0xe] sm:$0x3] %vm360_vm13, %v351_v30  ;;  %646 = vst.msk [vmem:[#allocation2 + $0x2e] sm:$0x3] %vm360_vm13, %v629_v31  ;;  %v481_v41 = vrot.slane %v452_v32, %v12699_v4  ;;  %v891_v42 = vcombine.high %v869_v33, %v869_v33  ;;  %v898_v43 = vrot.slane %v869_v33, %v12699_v4 }
 0x24d   :  { %v334_v45 = vcombine.high %v332_v35, %v332_v35  ;;  %362 = vst.msk [vmem:[#allocation2 + $0x2] sm:$0x3] %vm360_vm13, %v333_v36  ;;  %363 = vst.msk [vmem:[#allocation2 + $0x4] sm:$0x3] %vm360_vm13, %v332_v35  ;;  %v612_v46 = vcombine.high %v610_v37, %v610_v37  ;;  %v447_v47 = vadd.f32 %v10510_v17, %v446_v34  ;;  %v724_v2 = vpop.f32.mrf.mxu1 }
 0x24e   :  { %640 = vst.msk [vmem:[#allocation2 + $0x22] sm:$0x3] %vm360_vm13, %v611_v38  ;;  %641 = vst.msk [vmem:[#allocation2 + $0x24] sm:$0x3] %vm360_vm13, %v610_v37  ;;  %v864_v48 = vadd.f32 %v10528_v18, %v863_v39  ;;  %v488_v62 = vrot.slane %v474_v40, %v12699_v4  ;;  %v489_v63 = vcombine.high %v481_v41, %v481_v41 }
 0x24f   :  { %504 = vst.msk [vmem:[#allocation2 + $0x18] sm:$0x3] %vm360_vm13, %v481_v41  ;;  %v905_v0 = vrot.slane %v891_v42, %v12699_v4  ;;  %v906_v1 = vcombine.high %v898_v43, %v898_v43  ;;  %921 = vst.msk [vmem:[#allocation2 + $0x48] sm:$0x3] %vm360_vm13, %v898_v43  ;;  %v457_v3 = vcombine.high %v447_v47, %v447_v47 }
 0x250   :  { %364 = vst.msk [vmem:[#allocation2 + $0x6] sm:$0x3] %vm360_vm13, %v334_v45  ;;  %642 = vst.msk [vmem:[#allocation2 + $0x26] sm:$0x3] %vm360_vm13, %v612_v46  ;;  %v464_v5 = vrot.slane %v447_v47, %v12699_v4  ;;  %v874_v6 = vcombine.high %v864_v48, %v864_v48  ;;  %v881_v7 = vrot.slane %v864_v48, %v12699_v4  ;;  %v11153_v17 = vpop.f32.mrf.mxu1  ;;  %v1165_v18 = vpop.f32.mrf.mxu0 }
 0x251   :  { %v490_v8 = vcombine.high %v488_v62, %v488_v62  ;;  %505 = vst.msk [vmem:[#allocation2 + $0x1a] sm:$0x3] %vm360_vm13, %v489_v63  ;;  %506 = vst.msk [vmem:[#allocation2 + $0x1c] sm:$0x3] %vm360_vm13, %v488_v62  ;;  %v907_v9 = vcombine.high %v905_v0, %v905_v0  ;;  %v730_v10 = vadd.f32 %v11139_v44, %v10522_v50 }
 0x252   :  { %922 = vst.msk [vmem:[#allocation2 + $0x4a] sm:$0x3] %vm360_vm13, %v906_v1  ;;  %923 = vst.msk [vmem:[#allocation2 + $0x4c] sm:$0x3] %vm360_vm13, %v905_v0  ;;  %v725_v11 = vadd.f32 %v10522_v50, %v724_v2  ;;  %v471_v13 = vrot.slane %v457_v3, %v12699_v4  ;;  %v472_v14 = vcombine.high %v464_v5, %v464_v5  ;;  %v1309_v23 = vld [vmem:[#allocation2] sm:$0x3]  ;;  %v1002_v29 = vpop.f32.mrf.mxu1  ;;  %v11160_v30 = vpop.f32.mrf.mxu0 }
 0x253   :  { %500 = vst.msk [vmem:[#allocation2 + $0x10] sm:$0x3] %vm360_vm13, %v464_v5  ;;  %v888_v15 = vrot.slane %v874_v6, %v12699_v4  ;;  %v889_v16 = vcombine.high %v881_v7, %v881_v7  ;;  %917 = vst.msk [vmem:[#allocation2 + $0x40] sm:$0x3] %vm360_vm13, %v881_v7  ;;  %v752_v19 = vcombine.high %v730_v10, %v730_v10 }
 0x254   :  { %507 = vst.msk [vmem:[#allocation2 + $0x1e] sm:$0x3] %vm360_vm13, %v490_v8  ;;  %924 = vst.msk [vmem:[#allocation2 + $0x4e] sm:$0x3] %vm360_vm13, %v907_v9  ;;  %v759_v20 = vrot.slane %v730_v10, %v12699_v4  ;;  %v735_v21 = vcombine.high %v725_v11, %v725_v11  ;;  %v742_v22 = vrot.slane %v725_v11, %v12699_v4 }
 0x255   :  { %v473_v24 = vcombine.high %v471_v13, %v471_v13  ;;  %501 = vst.msk [vmem:[#allocation2 + $0x12] sm:$0x3] %vm360_vm13, %v472_v14  ;;  %502 = vst.msk [vmem:[#allocation2 + $0x14] sm:$0x3] %vm360_vm13, %v471_v13  ;;  %v890_v25 = vcombine.high %v888_v15, %v888_v15  ;;  %v1008_v26 = vadd.f32 %v11153_v17, %v10534_v12  ;;  %v1305_v41 = vpop.f32.mrf.mxu0 }
 0x256   :  { %918 = vst.msk [vmem:[#allocation2 + $0x42] sm:$0x3] %vm360_vm13, %v889_v16  ;;  %919 = vst.msk [vmem:[#allocation2 + $0x44] sm:$0x3] %vm360_vm13, %v888_v15  ;;  %v1310_v27 = vadd.f32 %v1309_v23, %v1165_v18  ;;  %v766_v31 = vrot.slane %v752_v19, %v12699_v4  ;;  %v767_v32 = vcombine.high %v759_v20, %v759_v20 }
 0x257   :  { %782 = vst.msk [vmem:[#allocation2 + $0x38] sm:$0x3] %vm360_vm13, %v759_v20  ;;  %v749_v33 = vrot.slane %v735_v21, %v12699_v4  ;;  %v750_v34 = vcombine.high %v742_v22, %v742_v22  ;;  %778 = vst.msk [vmem:[#allocation2 + $0x30] sm:$0x3] %vm360_vm13, %v742_v22  ;;  %v1030_v35 = vcombine.high %v1008_v26, %v1008_v26  ;;  %v1235_v46 = vpop.f32.mrf.mxu1  ;;  %v11174_v48 = vpop.f32.mrf.mxu0  ;;  %v12788_v20 = vld [vmem:[%s14022_s7] ss:$0 sm:$0xff] }
 0x258   :  { %503 = vst.msk [vmem:[#allocation2 + $0x16] sm:$0x3] %vm360_vm13, %v473_v24  ;;  %920 = vst.msk [vmem:[#allocation2 + $0x46] sm:$0x3] %vm360_vm13, %v890_v25  ;;  %v1037_v36 = vrot.slane %v1008_v26, %v12699_v4  ;;  %v10540_v37 = vmul.f32 -1.442695, %v1310_v27  ;;  %v1003_v38 = vadd.f32 %v10534_v12, %v1002_v29  ;;  %v768_v39 = vcombine.high %v766_v31, %v766_v31 }
 0x259   :  { %783 = vst.msk [vmem:[#allocation2 + $0x3a] sm:$0x3] %vm360_vm13, %v767_v32  ;;  %784 = vst.msk [vmem:[#allocation2 + $0x3c] sm:$0x3] %vm360_vm13, %v766_v31  ;;  %v751_v40 = vcombine.high %v749_v33, %v749_v33  ;;  %v1044_v42 = vrot.slane %v1030_v35, %v12699_v4  ;;  %v11167_v1 = vpop.f32.mrf.mxu1  ;;  %v1306_v24 = vadd.f32 %v12788_v20, %v1305_v41  ;;  %v1325_v27 = vld [vmem:[#allocation2 + $0x20] sm:$0x3] }
 0x25a   :  { %779 = vst.msk [vmem:[#allocation2 + $0x32] sm:$0x3] %vm360_vm13, %v750_v34  ;;  %780 = vst.msk [vmem:[#allocation2 + $0x34] sm:$0x3] %vm360_vm13, %v749_v33  ;;  %v1045_v43 = vcombine.high %v1037_v36, %v1037_v36  ;;  %11937 = vpow2.f32 %v10540_v37  ;;  %v1013_v44 = vcombine.high %v1003_v38, %v1003_v38  ;;  %v1020_v45 = vrot.slane %v1003_v38, %v12699_v4  ;;  %v1317_v47 = vld [vmem:[#allocation2 + $0x10] sm:$0x3] }
 0x25b   :  { %1060 = vst.msk [vmem:[#allocation2 + $0x58] sm:$0x3] %vm360_vm13, %v1037_v36  ;;  %785 = vst.msk [vmem:[#allocation2 + $0x3e] sm:$0x3] %vm360_vm13, %v768_v39  ;;  %v1046_v50 = vcombine.high %v1044_v42, %v1044_v42  ;;  %v1318_v63 = vadd.f32 %v1317_v47, %v1235_v46  ;;  %v1470_v3 = vpop.f32.mrf.mxu0  ;;  %v1554_v13 = vld [vmem:[#allocation2 + $0x4e] sm:$0x3] }
 0x25c   :  { %781 = vst.msk [vmem:[#allocation2 + $0x36] sm:$0x3] %vm360_vm13, %v751_v40  ;;  %1061 = vst.msk [vmem:[#allocation2 + $0x5a] sm:$0x3] %vm360_vm13, %v1045_v43  ;;  %v1027_v62 = vrot.slane %v1013_v44, %v12699_v4  ;;  %v1028_v0 = vcombine.high %v1020_v45, %v1020_v45  ;;  %v1555_v17 = vadd.f32 %v1554_v13, %v1470_v3  ;;  %v12794_v31 = vld [vmem:[%s14022_s7 + $0x1] ss:$0 sm:$0xff] }
 0x25d   :  { %1062 = vst.msk [vmem:[#allocation2 + $0x5c] sm:$0x3] %vm360_vm13, %v1044_v42  ;;  %1056 = vst.msk [vmem:[#allocation2 + $0x50] sm:$0x3] %vm360_vm13, %v1020_v45  ;;  %v10541_v5 = vmul.f32 -1.442695, %v1318_v63  ;;  %v1400_v6 = vpop.f32.mrf.mxu1  ;;  %v11188_v7 = vpop.f32.mrf.mxu0 }
 0x25e   :  { %1063 = vst.msk [vmem:[#allocation2 + $0x5e] sm:$0x3] %vm360_vm13, %v1046_v50  ;;  %v1029_v2 = vcombine.high %v1027_v62, %v1027_v62  ;;  %1058 = vst.msk [vmem:[#allocation2 + $0x54] sm:$0x3] %vm360_vm13, %v1027_v62  ;;  %v10543_v18 = vmul.f32 -1.442695, %v1555_v17 }
 0x25f   :  { %1057 = vst.msk [vmem:[#allocation2 + $0x52] sm:$0x3] %vm360_vm13, %v1028_v0  ;;  %v11181_v10 = vpop.f32.mrf.mxu1  ;;  %11939 = vpow2.f32 %v10541_v5  ;;  %v1787_v63 = vld [vmem:[#allocation2 + $0x2] sm:$0x3]  ;;  %v1796_v7 = vld [vmem:[#allocation2 + $0x12] sm:$0x3] }
 0x260   :  { %1059 = vst.msk [vmem:[#allocation2 + $0x56] sm:$0x3] %vm360_vm13, %v1029_v2 }
 0x261   :  { %v1540_v12 = vpop.f32.mrf.mxu1 }
 0x262   :  { %v1545_v8 = vld [vmem:[#allocation2 + $0x3e] sm:$0x3]  ;;  %v1541_v33 = vadd.f32 %v12794_v31, %v1540_v12  ;;  %v2029_v12 = vld [vmem:[#allocation2 + $0x3c] sm:$0x3] }
 0x263   :  { %v1546_v9 = vadd.f32 %v1545_v8, %v1400_v6  ;;  %v11195_v15 = vpop.f32.mrf.mxu1 }
 0x265   :  { %v10542_v11 = vmul.f32 -1.442695, %v1546_v9  ;;  %v1563_v37 = vld [vmem:[#allocation2 + $0x5e] sm:$0x3] }
 0x267   :  { %v11938_v14 = vpop.eup %11937  ;;  %11941 = vpow2.f32 %v10542_v11 }
 0x268   :  { %v1314_v16 = vadd.f32 1.0, %v11938_v14 }
 0x26a   :  { %11943 = vrcp.f32 %v1314_v16 }
 0x26b   :  { %11945 = vpow2.f32 %v10543_v18 }
 0x26c   :  { %v11940_v19 = vpop.eup %11939 }
 0x26d   :  { %v1322_v22 = vadd.f32 1.0, %v11940_v19 }
 0x274   :  { %v11942_v21 = vpop.eup %11941 }
 0x275   :  { %v1550_v23 = vadd.f32 1.0, %v11942_v21 }
 0x277   :  { %v11944_v25 = vpop.eup %11943  ;;  %11947 = vrcp.f32 %v1550_v23 }
 0x278   :  { %v1326_v26 = vmul.f32 %v11944_v25, %v1306_v24  ;;  %11949 = vrcp.f32 %v1322_v22  ;;  %v11946_v30 = vpop.eup %11945  ;;  %v2038_v22 = vld [vmem:[#allocation2 + $0x4c] sm:$0x3] }
 0x279   :  { %v1559_v32 = vadd.f32 1.0, %v11946_v30 }
 0x27a   :  { %v1327_v29 = vadd.f32 %v1326_v26, %v1325_v27 }
 0x27c   :  { %11951 = vtanh.f32 %v1327_v29 }
 0x27d   :  { %11953 = vrcp.f32 %v1559_v32 }
 0x284   :  { %v11948_v34 = vpop.eup %11947 }
 0x285   :  { %v11950_v35 = vpop.eup %11949  ;;  %v1564_v36 = vmul.f32 %v11948_v34, %v1541_v33 }
 0x286   :  { %v1329_v39 = vsub.f32 1.0, %v11950_v35  ;;  %v1331_v42 = vmul.f32 0.0, %v11950_v35  ;;  %v1805_v35 = vld [vmem:[#allocation2 + $0x22] sm:$0x3] }
 0x287   :  { %v1565_v38 = vadd.f32 %v1564_v36, %v1563_v37 }
 0x289   :  { %v11952_v40 = vpop.eup %11951  ;;  %11955 = vtanh.f32 %v1565_v38 }
 0x28a   :  { %v1330_v41 = vmul.f32 %v11952_v40, %v1329_v39  ;;  %v11954_v44 = vpop.eup %11953 }
 0x28b   :  { %v1567_v45 = vsub.f32 1.0, %v11954_v44  ;;  %v1569_v48 = vmul.f32 0.0, %v11954_v44  ;;  %v2047_v44 = vld [vmem:[#allocation2 + $0x5c] sm:$0x3] }
 0x28c   :  { %v12797_v43 = vadd.f32 %v1331_v42, %v1330_v41 }
 0x28e   :  { %1333 = vst.msk [vmem:[#allocation3] sm:$0x3] %vm360_vm13, %v12797_v43  ;;  %11201 = vmatmul.mubr.msk.f32.vlgmr.msra.gmra.mxu0 %vm234_vm11, %v12797_v43  ;;  %11208 = vmatmul.mubr.msk.f32.vlgmr.msra.gmra.mxu1 %vm234_vm11, %v12797_v43 }
 0x28f   :  { %11211 = vmatpush3.msra.mxu0 %v12621_v52  ;;  %11214 = vmatprep.mubr.msk.f32.mxu0 %vm12401_vm12, %v12400_v28 }
 0x290   :  { %11212 = vmatprep.subr.mxu0 %v12400_v28  ;;  %11218 = vmatpush3.msra.mxu1 %v12647_v57 }
 0x291   :  { %11213 = vmatpush3.msra.mxu0 %v12629_v54  ;;  %11219 = vmatprep.subr.mxu1 %v12400_v28 }
 0x292   :  { %11215 = vmatmul.mubr.msk.f32.vlgmr.msra.gmra.mxu0 %vm234_vm11, %v12797_v43  ;;  %11224 = vmatprep.subr.mxu0 %v12400_v28 }
 0x293   :  { %11225 = vmatpush3.msra.mxu0 %v12640_v56  ;;  %11220 = vmatpush3.msra.mxu1 %v12655_v59 }
 0x294   :  { %11226 = vmatprep.subr.mxu0 %v12400_v28  ;;  %11221 = vmatprep.mubr.msk.f32.mxu1 %vm12401_vm12, %v12400_v28 }
 0x295   :  { %11227 = vmatpush3.msra.mxu0 %v12649_v58  ;;  %11228 = vmatprep.mubr.msk.f32.mxu0 %vm12401_vm12, %v12400_v28 }
 0x296   :  { %v11956_v46 = vpop.eup %11955  ;;  %11231 = vmatprep.subr.mxu1 %v12400_v28  ;;  %11238 = vmatprep.subr.mxu0 %v12400_v28 }
 0x297   :  { %v1568_v47 = vmul.f32 %v11956_v46, %v1567_v45 }
 0x299   :  { %v12825_v50 = vadd.f32 %v1569_v48, %v1568_v47 }
 0x29b   :  { %1572 = vst.msk [vmem:[#allocation3 + $0x1e] sm:$0x3] %vm360_vm13, %v12825_v50  ;;  %11222 = vmatmul.mubr.msk.f32.vlgmr.msra.gmra.mxu1 %vm234_vm11, %v12825_v50  ;;  %11229 = vmatmul.mubr.msk.f32.vlgmr.msra.gmra.mxu0 %vm234_vm11, %v12825_v50 }
 0x29c   :  { %11232 = vmatpush3.msra.mxu1 %v12664_v60  ;;  %11235 = vmatprep.mubr.msk.f32.mxu1 %vm12401_vm12, %v12400_v28 }
 0x29d   :  { %11233 = vmatprep.subr.mxu1 %v12400_v28  ;;  %11239 = vmatpush3.msra.mxu0 %v12607_v49 }
 0x29e   :  { %11234 = vmatpush3.msra.mxu1 %v12670_v61  ;;  %11240 = vmatprep.subr.mxu0 %v12400_v28 }
 0x29f   :  { %11236 = vmatmul.mubr.msk.f32.vlgmr.msra.gmra.mxu1 %vm234_vm11, %v12825_v50  ;;  %11245 = vmatprep.subr.mxu1 %v12400_v28 }
 0x2a0   :  { %11246 = vmatpush3.msra.mxu1 %v12623_v53  ;;  %11241 = vmatpush3.msra.mxu0 %v12614_v51 }
 0x2a1   :  { %11247 = vmatprep.subr.mxu1 %v12400_v28  ;;  %11242 = vmatprep.mubr.msk.f32.mxu0 %vm12401_vm12, %v12400_v28 }
 0x2a2   :  { %11248 = vmatpush3.msra.mxu1 %v12636_v55  ;;  %11249 = vmatprep.mubr.msk.f32.mxu1 %vm12401_vm12, %v12400_v28 }
 0x2a3   :  { %11252 = vmatprep.subr.mxu0 %v12400_v28  ;;  %11259 = vmatprep.subr.mxu1 %v12400_v28 }
 0x34e   :  { %v1642_v62 = vpop.f32.mrf.mxu0  ;;  %v1712_v0 = vpop.f32.mrf.mxu1 }
 0x34f   :  { %v1788_v1 = vadd.f32 %v1787_v63, %v1642_v62  ;;  %v1797_v9 = vadd.f32 %v1796_v7, %v1712_v0 }
 0x350   :  { %v11202_v2 = vpop.f32.mrf.mxu0  ;;  %v11209_v3 = vpop.f32.mrf.mxu1 }
 0x351   :  { %v10547_v5 = vmul.f32 -1.442695, %v1788_v1  ;;  %v10548_v10 = vmul.f32 -1.442695, %v1797_v9 }
 0x352   :  { %v1782_v6 = vpop.f32.mrf.mxu0 }
 0x353   :  { %11957 = vpow2.f32 %v10547_v5  ;;  %v1783_v32 = vadd.f32 %v12788_v20, %v1782_v6  ;;  %v2271_v6 = vld [vmem:[#allocation2 + $0x4] sm:$0x3] }
 0x354   :  { %v11216_v8 = vpop.f32.mrf.mxu0  ;;  %11959 = vpow2.f32 %v10548_v10 }
 0x35b   :  { %v1884_v11 = vpop.f32.mrf.mxu1  ;;  %v1954_v13 = vpop.f32.mrf.mxu0 }
 0x35c   :  { %v2030_v14 = vadd.f32 %v2029_v12, %v1884_v11  ;;  %v2039_v24 = vadd.f32 %v2038_v22, %v1954_v13  ;;  %v2280_v13 = vld [vmem:[#allocation2 + $0x14] sm:$0x3] }
 0x35d   :  { %v11223_v15 = vpop.f32.mrf.mxu1  ;;  %v11230_v16 = vpop.f32.mrf.mxu0 }
 0x35e   :  { %v10552_v17 = vmul.f32 -1.442695, %v2030_v14  ;;  %v10553_v25 = vmul.f32 -1.442695, %v2039_v24 }
 0x35f   :  { %v2024_v18 = vpop.f32.mrf.mxu1 }
 0x360   :  { %v11958_v19 = vpop.eup %11957  ;;  %11961 = vpow2.f32 %v10552_v17  ;;  %v2025_v39 = vadd.f32 %v12794_v31, %v2024_v18  ;;  %v2513_v18 = vld [vmem:[#allocation2 + $0x3a] sm:$0x3] }
 0x361   :  { %v1792_v21 = vadd.f32 1.0, %v11958_v19  ;;  %v11237_v23 = vpop.f32.mrf.mxu1  ;;  %v11960_v26 = vpop.eup %11959 }
 0x362   :  { %v1801_v29 = vadd.f32 1.0, %v11960_v26 }
 0x363   :  { %11963 = vrcp.f32 %v1792_v21 }
 0x364   :  { %11965 = vpow2.f32 %v10553_v25 }
 0x36d   :  { %v11962_v27 = vpop.eup %11961 }
 0x36e   :  { %v2034_v30 = vadd.f32 1.0, %v11962_v27 }
 0x370   :  { %v11964_v33 = vpop.eup %11963  ;;  %11967 = vrcp.f32 %v2034_v30 }
 0x371   :  { %11969 = vrcp.f32 %v1801_v29  ;;  %v1806_v34 = vmul.f32 %v11964_v33, %v1783_v32  ;;  %v11966_v37 = vpop.eup %11965  ;;  %v2522_v29 = vld [vmem:[#allocation2 + $0x4a] sm:$0x3] }
 0x372   :  { %v2043_v38 = vadd.f32 1.0, %v11966_v37 }
 0x373   :  { %v1807_v36 = vadd.f32 %v1806_v34, %v1805_v35 }
 0x375   :  { %11971 = vtanh.f32 %v1807_v36 }
 0x376   :  { %11973 = vrcp.f32 %v2043_v38 }
 0x37d   :  { %v11968_v40 = vpop.eup %11967 }
 0x37e   :  { %v11970_v41 = vpop.eup %11969  ;;  %v2048_v42 = vmul.f32 %v11968_v40, %v2025_v39 }
 0x37f   :  { %v1809_v46 = vsub.f32 1.0, %v11970_v41  ;;  %v1811_v62 = vmul.f32 %v11970_v41, %v12797_v43  ;;  %v2289_v41 = vld [vmem:[#allocation2 + $0x24] sm:$0x3] }
 0x380   :  { %v2049_v45 = vadd.f32 %v2048_v42, %v2047_v44 }
 0x382   :  { %v11972_v47 = vpop.eup %11971  ;;  %11975 = vtanh.f32 %v2049_v45 }
 0x383   :  { %v1810_v48 = vmul.f32 %v11972_v47, %v1809_v46  ;;  %v11974_v43 = vpop.eup %11973 }
 0x384   :  { %v2051_v0 = vsub.f32 1.0, %v11974_v43  ;;  %v2053_v3 = vmul.f32 %v11974_v43, %v12825_v50  ;;  %v2531_v43 = vld [vmem:[#allocation2 + $0x5a] sm:$0x3] }
 0x385   :  { %v12856_v63 = vadd.f32 %v1811_v62, %v1810_v48 }
 0x387   :  { %1814 = vst.msk [vmem:[#allocation3 + $0x2] sm:$0x3] %vm360_vm13, %v12856_v63  ;;  %11243 = vmatmul.mubr.msk.f32.vlgmr.msra.gmra.mxu0 %vm234_vm11, %v12856_v63  ;;  %11250 = vmatmul.mubr.msk.f32.vlgmr.msra.gmra.mxu1 %vm234_vm11, %v12856_v63 }
 0x388   :  { %11253 = vmatpush3.msra.mxu0 %v12621_v52  ;;  %11256 = vmatprep.mubr.msk.f32.mxu0 %vm12401_vm12, %v12400_v28 }
 0x389   :  { %11254 = vmatprep.subr.mxu0 %v12400_v28  ;;  %11260 = vmatpush3.msra.mxu1 %v12647_v57 }
 0x38a   :  { %11255 = vmatpush3.msra.mxu0 %v12629_v54  ;;  %11261 = vmatprep.subr.mxu1 %v12400_v28 }
 0x38b   :  { %11257 = vmatmul.mubr.msk.f32.vlgmr.msra.gmra.mxu0 %vm234_vm11, %v12856_v63  ;;  %11266 = vmatprep.subr.mxu0 %v12400_v28 }
 0x38c   :  { %11267 = vmatpush3.msra.mxu0 %v12640_v56  ;;  %11262 = vmatpush3.msra.mxu1 %v12655_v59 }
 0x38d   :  { %11268 = vmatprep.subr.mxu0 %v12400_v28  ;;  %11263 = vmatprep.mubr.msk.f32.mxu1 %vm12401_vm12, %v12400_v28 }
 0x38e   :  { %11269 = vmatpush3.msra.mxu0 %v12649_v58  ;;  %11270 = vmatprep.mubr.msk.f32.mxu0 %vm12401_vm12, %v12400_v28 }
 0x38f   :  { %v11976_v1 = vpop.eup %11975  ;;  %11273 = vmatprep.subr.mxu1 %v12400_v28  ;;  %11280 = vmatprep.subr.mxu0 %v12400_v28 }
 0x390   :  { %v2052_v2 = vmul.f32 %v11976_v1, %v2051_v0 }
 0x392   :  { %v12885_v5 = vadd.f32 %v2053_v3, %v2052_v2 }
 0x394   :  { %2056 = vst.msk [vmem:[#allocation3 + $0x1c] sm:$0x3] %vm360_vm13, %v12885_v5  ;;  %11264 = vmatmul.mubr.msk.f32.vlgmr.msra.gmra.mxu1 %vm234_vm11, %v12885_v5  ;;  %11271 = vmatmul.mubr.msk.f32.vlgmr.msra.gmra.mxu0 %vm234_vm11, %v12885_v5 }
 0x395   :  { %11274 = vmatpush3.msra.mxu1 %v12664_v60  ;;  %11277 = vmatprep.mubr.msk.f32.mxu1 %vm12401_vm12, %v12400_v28 }
 0x396   :  { %11275 = vmatprep.subr.mxu1 %v12400_v28  ;;  %11281 = vmatpush3.msra.mxu0 %v12607_v49 }
 0x397   :  { %11276 = vmatpush3.msra.mxu1 %v12670_v61  ;;  %11282 = vmatprep.subr.mxu0 %v12400_v28 }
 0x398   :  { %11278 = vmatmul.mubr.msk.f32.vlgmr.msra.gmra.mxu1 %vm234_vm11, %v12885_v5  ;;  %11287 = vmatprep.subr.mxu1 %v12400_v28 }
 0x399   :  { %11288 = vmatpush3.msra.mxu1 %v12623_v53  ;;  %11283 = vmatpush3.msra.mxu0 %v12614_v51 }
 0x39a   :  { %11289 = vmatprep.subr.mxu1 %v12400_v28  ;;  %11284 = vmatprep.mubr.msk.f32.mxu0 %vm12401_vm12, %v12400_v28 }
 0x39b   :  { %11290 = vmatpush3.msra.mxu1 %v12636_v55  ;;  %11291 = vmatprep.mubr.msk.f32.mxu1 %vm12401_vm12, %v12400_v28 }
 0x39c   :  { %11294 = vmatprep.subr.mxu0 %v12400_v28  ;;  %11301 = vmatprep.subr.mxu1 %v12400_v28 }
 0x447   :  { %v2126_v50 = vpop.f32.mrf.mxu0  ;;  %v2196_v7 = vpop.f32.mrf.mxu1 }
 0x448   :  { %v2272_v8 = vadd.f32 %v2271_v6, %v2126_v50  ;;  %v2281_v15 = vadd.f32 %v2280_v13, %v2196_v7 }
 0x449   :  { %v11244_v9 = vpop.f32.mrf.mxu0  ;;  %v11251_v10 = vpop.f32.mrf.mxu1 }
 0x44a   :  { %v10557_v11 = vmul.f32 -1.442695, %v2272_v8  ;;  %v10558_v16 = vmul.f32 -1.442695, %v2281_v15  ;;  %v2764_v8 = vld [vmem:[#allocation2 + $0x16] sm:$0x3] }
 0x44b   :  { %v2266_v12 = vpop.f32.mrf.mxu0 }
 0x44c   :  { %11977 = vpow2.f32 %v10557_v11  ;;  %v2267_v38 = vadd.f32 %v12788_v20, %v2266_v12  ;;  %v2997_v12 = vld [vmem:[#allocation2 + $0x38] sm:$0x3] }
 0x44d   :  { %v11258_v14 = vpop.f32.mrf.mxu0  ;;  %11979 = vpow2.f32 %v10558_v16 }
 0x454   :  { %v2368_v17 = vpop.f32.mrf.mxu1  ;;  %v2438_v19 = vpop.f32.mrf.mxu0 }
 0x455   :  { %v2514_v21 = vadd.f32 %v2513_v18, %v2368_v17  ;;  %v2523_v32 = vadd.f32 %v2522_v29, %v2438_v19 }
 0x456   :  { %v11265_v22 = vpop.f32.mrf.mxu1  ;;  %v11272_v23 = vpop.f32.mrf.mxu0 }
 0x457   :  { %v10562_v24 = vmul.f32 -1.442695, %v2514_v21  ;;  %v10563_v33 = vmul.f32 -1.442695, %v2523_v32  ;;  %v3006_v22 = vld [vmem:[#allocation2 + $0x48] sm:$0x3] }
 0x458   :  { %v2508_v25 = vpop.f32.mrf.mxu1 }
 0x459   :  { %v11978_v26 = vpop.eup %11977  ;;  %11981 = vpow2.f32 %v10562_v24  ;;  %v2509_v46 = vadd.f32 %v12794_v31, %v2508_v25 }
 0x45a   :  { %v2276_v27 = vadd.f32 1.0, %v11978_v26  ;;  %v11279_v30 = vpop.f32.mrf.mxu1  ;;  %v11980_v34 = vpop.eup %11979 }
 0x45b   :  { %v2285_v36 = vadd.f32 1.0, %v11980_v34 }
 0x45c   :  { %11983 = vrcp.f32 %v2276_v27 }
 0x45d   :  { %11985 = vpow2.f32 %v10563_v33 }
 0x466   :  { %v11982_v35 = vpop.eup %11981 }
 0x467   :  { %v2518_v37 = vadd.f32 1.0, %v11982_v35  ;;  %v2773_v35 = vld [vmem:[#allocation2 + $0x26] sm:$0x3] }
 0x469   :  { %v11984_v39 = vpop.eup %11983  ;;  %11987 = vrcp.f32 %v2518_v37 }
 0x46a   :  { %11989 = vrcp.f32 %v2285_v36  ;;  %v2290_v40 = vmul.f32 %v11984_v39, %v2267_v38  ;;  %v11986_v44 = vpop.eup %11985 }
 0x46b   :  { %v2527_v45 = vadd.f32 1.0, %v11986_v44  ;;  %v3015_v44 = vld [vmem:[#allocation2 + $0x58] sm:$0x3] }
 0x46c   :  { %v2291_v42 = vadd.f32 %v2290_v40, %v2289_v41 }
 0x46e   :  { %11991 = vtanh.f32 %v2291_v42 }
 0x46f   :  { %11993 = vrcp.f32 %v2527_v45 }
 0x476   :  { %v11988_v47 = vpop.eup %11987 }
 0x477   :  { %v11990_v48 = vpop.eup %11989  ;;  %v2532_v62 = vmul.f32 %v11988_v47, %v2509_v46 }
 0x478   :  { %v2293_v1 = vsub.f32 1.0, %v11990_v48  ;;  %v2295_v50 = vmul.f32 %v11990_v48, %v12856_v63 }
 0x479   :  { %v2533_v0 = vadd.f32 %v2532_v62, %v2531_v43 }
 0x47b   :  { %v11992_v2 = vpop.eup %11991  ;;  %11995 = vtanh.f32 %v2533_v0  ;;  %v12984_v0 = vld [vmem:[#allocation4 + $0x28] sm:$0xff] }
 0x47c   :  { %v2294_v3 = vmul.f32 %v11992_v2, %v2293_v1  ;;  %v11994_v63 = vpop.eup %11993  ;;  %v12990_v1 = vld [vmem:[#allocation4 + $0x38] sm:$0xff]  ;;  %v12993_v2 = vld [vmem:[#allocation4 + $0x20] sm:$0xff] }
 0x47e   :  { %v12916_v6 = vadd.f32 %v2295_v50, %v2294_v3  ;;  %v13000_v50 = vld [vmem:[#allocation4 + $0x48] sm:$0xff] }
 0x480   :  { %2298 = vst.msk [vmem:[#allocation3 + $0x4] sm:$0x3] %vm360_vm13, %v12916_v6  ;;  %11285 = vmatmul.mubr.msk.f32.vlgmr.msra.gmra.mxu0 %vm234_vm11, %v12916_v6  ;;  %11292 = vmatmul.mubr.msk.f32.vlgmr.msra.gmra.mxu1 %vm234_vm11, %v12916_v6 }
 0x481   :  { %11295 = vmatpush3.msra.mxu0 %v12621_v52  ;;  %11298 = vmatprep.mubr.msk.f32.mxu0 %vm12401_vm12, %v12400_v28  ;;  %v2535_v52 = vsub.f32 1.0, %v11994_v63 }
 0x482   :  { %11296 = vmatprep.subr.mxu0 %v12400_v28  ;;  %11302 = vmatpush3.msra.mxu1 %v12647_v57 }
 0x483   :  { %11297 = vmatpush3.msra.mxu0 %v12629_v54  ;;  %11303 = vmatprep.subr.mxu1 %v12400_v28 }
 0x484   :  { %11299 = vmatmul.mubr.msk.f32.vlgmr.msra.gmra.mxu0 %vm234_vm11, %v12916_v6  ;;  %11308 = vmatprep.subr.mxu0 %v12400_v28 }
 0x485   :  { %11309 = vmatpush3.msra.mxu0 %v12640_v56  ;;  %11304 = vmatpush3.msra.mxu1 %v12655_v59  ;;  %v2537_v56 = vmul.f32 %v11994_v63, %v12885_v5  ;;  %v13009_v63 = vld [vmem:[#allocation4 + $0x40] sm:$0xff] }
 0x486   :  { %11310 = vmatprep.subr.mxu0 %v12400_v28  ;;  %11305 = vmatprep.mubr.msk.f32.mxu1 %vm12401_vm12, %v12400_v28 }
 0x487   :  { %11311 = vmatpush3.msra.mxu0 %v12649_v58  ;;  %11312 = vmatprep.mubr.msk.f32.mxu0 %vm12401_vm12, %v12400_v28  ;;  %v2755_v58 = vld [vmem:[#allocation2 + $0x6] sm:$0x3] }
 0x488   :  { %v11996_v54 = vpop.eup %11995  ;;  %11315 = vmatprep.subr.mxu1 %v12400_v28  ;;  %11322 = vmatprep.subr.mxu0 %v12400_v28 }
 0x489   :  { %v2536_v57 = vmul.f32 %v11996_v54, %v2535_v52 }
 0x48b   :  { %v12945_v59 = vadd.f32 %v2537_v56, %v2536_v57 }
 0x48d   :  { %2540 = vst.msk [vmem:[#allocation3 + $0x1a] sm:$0x3] %vm360_vm13, %v12945_v59  ;;  %11306 = vmatmul.mubr.msk.f32.vlgmr.msra.gmra.mxu1 %vm234_vm11, %v12945_v59  ;;  %11313 = vmatmul.mubr.msk.f32.vlgmr.msra.gmra.mxu0 %vm234_vm11, %v12945_v59 }
 0x48e   :  { %11316 = vmatpush3.msra.mxu1 %v12664_v60  ;;  %11319 = vmatprep.mubr.msk.f32.mxu1 %vm12401_vm12, %v12400_v28 }
 0x48f   :  { %11317 = vmatprep.subr.mxu1 %v12400_v28  ;;  %11323 = vmatpush3.msra.mxu0 %v12607_v49 }
 0x490   :  { %11318 = vmatpush3.msra.mxu1 %v12670_v61  ;;  %11324 = vmatprep.subr.mxu0 %v12400_v28 }
 0x491   :  { %11320 = vmatmul.mubr.msk.f32.vlgmr.msra.gmra.mxu1 %vm234_vm11, %v12945_v59  ;;  %11329 = vmatprep.subr.mxu1 %v12400_v28 }
 0x492   :  { %11330 = vmatpush3.msra.mxu1 %v12623_v53  ;;  %11325 = vmatpush3.msra.mxu0 %v12614_v51 }
 0x493   :  { %11331 = vmatprep.subr.mxu1 %v12400_v28  ;;  %11326 = vmatprep.mubr.msk.f32.mxu0 %vm12401_vm12, %v12400_v28 }
 0x494   :  { %11332 = vmatpush3.msra.mxu1 %v12636_v55  ;;  %11333 = vmatprep.mubr.msk.f32.mxu1 %vm12401_vm12, %v12400_v28 }
 0x495   :  { %11336 = vmatprep.subr.mxu0 %v12400_v28  ;;  %11343 = vmatprep.subr.mxu1 %v12400_v28 }
 0x540   :  { %v2610_v49 = vpop.f32.mrf.mxu0  ;;  %v2680_v60 = vpop.f32.mrf.mxu1 }
 0x541   :  { %v2756_v53 = vadd.f32 %v2755_v58, %v2610_v49  ;;  %v2765_v10 = vadd.f32 %v2764_v8, %v2680_v60  ;;  %v13025_v58 = vld [vmem:[#allocation4 + $0x58] sm:$0xff]  ;;  %v13034_v60 = vld [vmem:[#allocation4 + $0x50] sm:$0xff] }
 0x542   :  { %v11286_v61 = vpop.f32.mrf.mxu0  ;;  %v11293_v51 = vpop.f32.mrf.mxu1 }
 0x543   :  { %v10567_v5 = vmul.f32 -1.442695, %v2756_v53  ;;  %v10568_v55 = vmul.f32 -1.442695, %v2765_v10  ;;  %v13041_v53 = vld [vmem:[#allocation4 + $0x18] sm:$0xff]  ;;  %v13044_v61 = vld [vmem:[#allocation4] sm:$0xff] }
 0x544   :  { %v2750_v7 = vpop.f32.mrf.mxu0  ;;  %v13050_v51 = vld [vmem:[#allocation4 + $0x10] sm:$0xff] }
 0x545   :  { %11997 = vpow2.f32 %v10567_v5  ;;  %v2751_v32 = vadd.f32 %v12788_v20, %v2750_v7  ;;  %v3239_v7 = vld [vmem:[#allocation2 + $0x8] sm:$0x3] }
 0x546   :  { %v11300_v9 = vpop.f32.mrf.mxu0  ;;  %11999 = vpow2.f32 %v10568_v55 }
 0x54d   :  { %v2852_v11 = vpop.f32.mrf.mxu1  ;;  %v2922_v13 = vpop.f32.mrf.mxu0 }
 0x54e   :  { %v2998_v14 = vadd.f32 %v2997_v12, %v2852_v11  ;;  %v3007_v24 = vadd.f32 %v3006_v22, %v2922_v13  ;;  %v3248_v13 = vld [vmem:[#allocation2 + $0x18] sm:$0x3] }
 0x54f   :  { %v11307_v15 = vpop.f32.mrf.mxu1  ;;  %v11314_v16 = vpop.f32.mrf.mxu0 }
 0x550   :  { %v10572_v17 = vmul.f32 -1.442695, %v2998_v14  ;;  %v10573_v25 = vmul.f32 -1.442695, %v3007_v24 }
 0x551   :  { %v2992_v18 = vpop.f32.mrf.mxu1 }
 0x552   :  { %v11998_v19 = vpop.eup %11997  ;;  %12001 = vpow2.f32 %v10572_v17  ;;  %v2993_v39 = vadd.f32 %v12794_v31, %v2992_v18  ;;  %v3481_v18 = vld [vmem:[#allocation2 + $0x36] sm:$0x3] }
 0x553   :  { %v2760_v21 = vadd.f32 1.0, %v11998_v19  ;;  %v11321_v23 = vpop.f32.mrf.mxu1  ;;  %v12000_v26 = vpop.eup %11999 }
 0x554   :  { %v2769_v29 = vadd.f32 1.0, %v12000_v26 }
 0x555   :  { %12003 = vrcp.f32 %v2760_v21 }
 0x556   :  { %12005 = vpow2.f32 %v10573_v25 }
 0x55f   :  { %v12002_v27 = vpop.eup %12001 }
 0x560   :  { %v3002_v30 = vadd.f32 1.0, %v12002_v27 }
 0x562   :  { %v12004_v33 = vpop.eup %12003  ;;  %12007 = vrcp.f32 %v3002_v30 }
 0x563   :  { %12009 = vrcp.f32 %v2769_v29  ;;  %v2774_v34 = vmul.f32 %v12004_v33, %v2751_v32  ;;  %v12006_v37 = vpop.eup %12005  ;;  %v3490_v29 = vld [vmem:[#allocation2 + $0x46] sm:$0x3] }
 0x564   :  { %v3011_v38 = vadd.f32 1.0, %v12006_v37 }
 0x565   :  { %v2775_v36 = vadd.f32 %v2774_v34, %v2773_v35 }
 0x567   :  { %12011 = vtanh.f32 %v2775_v36 }
 0x568   :  { %12013 = vrcp.f32 %v3011_v38 }
 0x56f   :  { %v12008_v40 = vpop.eup %12007 }
 0x570   :  { %v12010_v41 = vpop.eup %12009  ;;  %v3016_v42 = vmul.f32 %v12008_v40, %v2993_v39 }
 0x571   :  { %v2777_v46 = vsub.f32 1.0, %v12010_v41  ;;  %v2779_v62 = vmul.f32 %v12010_v41, %v12916_v6  ;;  %v13003_v6 = vld [vmem:[#allocation4 + $0x30] sm:$0xff]  ;;  %v3257_v41 = vld [vmem:[#allocation2 + $0x28] sm:$0x3] }
 0x572   :  { %v3017_v45 = vadd.f32 %v3016_v42, %v3015_v44 }
 0x574   :  { %v12012_v47 = vpop.eup %12011  ;;  %12015 = vtanh.f32 %v3017_v45 }
 0x575   :  { %v2778_v48 = vmul.f32 %v12012_v47, %v2777_v46  ;;  %v12014_v3 = vpop.eup %12013 }
 0x576   :  { %v3019_v52 = vsub.f32 1.0, %v12014_v3  ;;  %v3021_v56 = vmul.f32 %v12014_v3, %v12945_v59  ;;  %v13031_v59 = vld [vmem:[#allocation4 + $0x8] sm:$0xff]  ;;  %v3499_v3 = vld [vmem:[#allocation2 + $0x56] sm:$0x3] }
 0x577   :  { %v12976_v43 = vadd.f32 %v2779_v62, %v2778_v48 }
 0x579   :  { %2782 = vst.msk [vmem:[#allocation3 + $0x6] sm:$0x3] %vm360_vm13, %v12976_v43  ;;  %11327 = vmatmul.mubr.msk.f32.vlgmr.msra.gmra.mxu0 %vm234_vm11, %v12976_v43  ;;  %11334 = vmatmul.mubr.msk.f32.vlgmr.msra.gmra.mxu1 %vm234_vm11, %v12976_v43 }
 0x57a   :  { %11337 = vmatpush3.msra.mxu0 %v12984_v0  ;;  %11340 = vmatprep.mubr.msk.f32.mxu0 %vm12401_vm12, %v12400_v28 }
 0x57b   :  { %11338 = vmatprep.subr.mxu0 %v12400_v28  ;;  %11344 = vmatpush3.msra.mxu1 %v12990_v1 }
 0x57c   :  { %11339 = vmatpush3.msra.mxu0 %v12993_v2  ;;  %11345 = vmatprep.subr.mxu1 %v12400_v28 }
 0x57d   :  { %11341 = vmatmul.mubr.msk.f32.vlgmr.msra.gmra.mxu0 %vm234_vm11, %v12976_v43  ;;  %11350 = vmatprep.subr.mxu0 %v12400_v28 }
 0x57e   :  { %11351 = vmatpush3.msra.mxu0 %v13000_v50  ;;  %11346 = vmatpush3.msra.mxu1 %v13003_v6 }
 0x57f   :  { %11352 = vmatprep.subr.mxu0 %v12400_v28  ;;  %11347 = vmatprep.mubr.msk.f32.mxu1 %vm12401_vm12, %v12400_v28 }
 0x580   :  { %11353 = vmatpush3.msra.mxu0 %v13009_v63  ;;  %11354 = vmatprep.mubr.msk.f32.mxu0 %vm12401_vm12, %v12400_v28 }
 0x581   :  { %v12016_v54 = vpop.eup %12015  ;;  %11357 = vmatprep.subr.mxu1 %v12400_v28  ;;  %11364 = vmatprep.subr.mxu0 %v12400_v28 }
 0x582   :  { %v3020_v57 = vmul.f32 %v12016_v54, %v3019_v52 }
 0x584   :  { %v13017_v49 = vadd.f32 %v3021_v56, %v3020_v57 }
 0x586   :  { %3024 = vst.msk [vmem:[#allocation3 + $0x18] sm:$0x3] %vm360_vm13, %v13017_v49  ;;  %11348 = vmatmul.mubr.msk.f32.vlgmr.msra.gmra.mxu1 %vm234_vm11, %v13017_v49  ;;  %11355 = vmatmul.mubr.msk.f32.vlgmr.msra.gmra.mxu0 %vm234_vm11, %v13017_v49 }
 0x587   :  { %11358 = vmatpush3.msra.mxu1 %v13025_v58  ;;  %11361 = vmatprep.mubr.msk.f32.mxu1 %vm12401_vm12, %v12400_v28 }
 0x588   :  { %11359 = vmatprep.subr.mxu1 %v12400_v28  ;;  %11365 = vmatpush3.msra.mxu0 %v13031_v59 }
 0x589   :  { %11360 = vmatpush3.msra.mxu1 %v13034_v60  ;;  %11366 = vmatprep.subr.mxu0 %v12400_v28 }
 0x58a   :  { %11362 = vmatmul.mubr.msk.f32.vlgmr.msra.gmra.mxu1 %vm234_vm11, %v13017_v49  ;;  %11371 = vmatprep.subr.mxu1 %v12400_v28 }
 0x58b   :  { %11372 = vmatpush3.msra.mxu1 %v13041_v53  ;;  %11367 = vmatpush3.msra.mxu0 %v13044_v61 }
 0x58c   :  { %11373 = vmatprep.subr.mxu1 %v12400_v28  ;;  %11368 = vmatprep.mubr.msk.f32.mxu0 %vm12401_vm12, %v12400_v28 }
 0x58d   :  { %11374 = vmatpush3.msra.mxu1 %v13050_v51  ;;  %11375 = vmatprep.mubr.msk.f32.mxu1 %vm12401_vm12, %v12400_v28 }
 0x58e   :  { %11378 = vmatprep.subr.mxu0 %v12400_v28  ;;  %11385 = vmatprep.subr.mxu1 %v12400_v28 }
 0x639   :  { %v3094_v5 = vpop.f32.mrf.mxu0  ;;  %v3164_v8 = vpop.f32.mrf.mxu1 }
 0x63a   :  { %v3240_v9 = vadd.f32 %v3239_v7, %v3094_v5  ;;  %v3249_v15 = vadd.f32 %v3248_v13, %v3164_v8 }
 0x63b   :  { %v11328_v10 = vpop.f32.mrf.mxu0  ;;  %v11335_v55 = vpop.f32.mrf.mxu1 }
 0x63c   :  { %v10577_v11 = vmul.f32 -1.442695, %v3240_v9  ;;  %v10578_v16 = vmul.f32 -1.442695, %v3249_v15  ;;  %v3723_v55 = vld [vmem:[#allocation2 + $0xa] sm:$0x3] }
 0x63d   :  { %v3234_v12 = vpop.f32.mrf.mxu0 }
 0x63e   :  { %12017 = vpow2.f32 %v10577_v11  ;;  %v3235_v38 = vadd.f32 %v12788_v20, %v3234_v12 }
 0x63f   :  { %v11342_v14 = vpop.f32.mrf.mxu0  ;;  %12019 = vpow2.f32 %v10578_v16 }
 0x646   :  { %v3336_v17 = vpop.f32.mrf.mxu1  ;;  %v3406_v19 = vpop.f32.mrf.mxu0 }
 0x647   :  { %v3482_v21 = vadd.f32 %v3481_v18, %v3336_v17  ;;  %v3491_v32 = vadd.f32 %v3490_v29, %v3406_v19  ;;  %v3732_v17 = vld [vmem:[#allocation2 + $0x1a] sm:$0x3] }
 0x648   :  { %v11349_v22 = vpop.f32.mrf.mxu1  ;;  %v11356_v23 = vpop.f32.mrf.mxu0 }
 0x649   :  { %v10582_v24 = vmul.f32 -1.442695, %v3482_v21  ;;  %v10583_v33 = vmul.f32 -1.442695, %v3491_v32  ;;  %v3965_v23 = vld [vmem:[#allocation2 + $0x34] sm:$0x3] }
 0x64a   :  { %v3476_v25 = vpop.f32.mrf.mxu1 }
 0x64b   :  { %v12018_v26 = vpop.eup %12017  ;;  %12021 = vpow2.f32 %v10582_v24  ;;  %v3477_v46 = vadd.f32 %v12794_v31, %v3476_v25 }
 0x64c   :  { %v3244_v27 = vadd.f32 1.0, %v12018_v26  ;;  %v11363_v30 = vpop.f32.mrf.mxu1  ;;  %v12020_v34 = vpop.eup %12019 }
 0x64d   :  { %v3253_v36 = vadd.f32 1.0, %v12020_v34  ;;  %v3974_v34 = vld [vmem:[#allocation2 + $0x44] sm:$0x3] }
 0x64e   :  { %12023 = vrcp.f32 %v3244_v27 }
 0x64f   :  { %12025 = vpow2.f32 %v10583_v33 }
 0x658   :  { %v12022_v35 = vpop.eup %12021 }
 0x659   :  { %v3486_v37 = vadd.f32 1.0, %v12022_v35 }
 0x65b   :  { %v12024_v39 = vpop.eup %12023  ;;  %12027 = vrcp.f32 %v3486_v37 }
 0x65c   :  { %12029 = vrcp.f32 %v3253_v36  ;;  %v3258_v40 = vmul.f32 %v12024_v39, %v3235_v38  ;;  %v12026_v44 = vpop.eup %12025 }
 0x65d   :  { %v3495_v45 = vadd.f32 1.0, %v12026_v44 }
 0x65e   :  { %v3259_v42 = vadd.f32 %v3258_v40, %v3257_v41 }
 0x660   :  { %12031 = vtanh.f32 %v3259_v42  ;;  %v13120_v42 = vld [vmem:[%s14022_s7] ss:$0 sm:$0xff] }
 0x661   :  { %12033 = vrcp.f32 %v3495_v45 }
 0x668   :  { %v12028_v47 = vpop.eup %12027 }
 0x669   :  { %v12030_v48 = vpop.eup %12029  ;;  %v3500_v62 = vmul.f32 %v12028_v47, %v3477_v46  ;;  %v3741_v47 = vld [vmem:[#allocation2 + $0x2a] sm:$0x3] }
 0x66a   :  { %v3261_v54 = vsub.f32 1.0, %v12030_v48  ;;  %v3263_v56 = vmul.f32 %v12030_v48, %v12976_v43 }
 0x66b   :  { %v3501_v52 = vadd.f32 %v3500_v62, %v3499_v3 }
 0x66d   :  { %v12032_v57 = vpop.eup %12031  ;;  %12035 = vtanh.f32 %v3501_v52  ;;  %v13126_v52 = vld [vmem:[%s14022_s7 + $0x1] ss:$0 sm:$0xff] }
 0x66e   :  { %v3262_v20 = vmul.f32 %v12032_v57, %v3261_v54  ;;  %v12034_v31 = vpop.eup %12033 }
 0x66f   :  { %v3503_v43 = vsub.f32 1.0, %v12034_v31  ;;  %v3505_v9 = vmul.f32 %v12034_v31, %v13017_v49  ;;  %v3983_v31 = vld [vmem:[#allocation2 + $0x54] sm:$0x3] }
 0x670   :  { %v13060_v5 = vadd.f32 %v3263_v56, %v3262_v20 }
 0x672   :  { %3266 = vst.msk [vmem:[#allocation3 + $0x8] sm:$0x3] %vm360_vm13, %v13060_v5  ;;  %11369 = vmatmul.mubr.msk.f32.vlgmr.msra.gmra.mxu0 %vm234_vm11, %v13060_v5  ;;  %11376 = vmatmul.mubr.msk.f32.vlgmr.msra.gmra.mxu1 %vm234_vm11, %v13060_v5 }
 0x673   :  { %11379 = vmatpush3.msra.mxu0 %v12984_v0  ;;  %11382 = vmatprep.mubr.msk.f32.mxu0 %vm12401_vm12, %v12400_v28 }
 0x674   :  { %11380 = vmatprep.subr.mxu0 %v12400_v28  ;;  %11386 = vmatpush3.msra.mxu1 %v12990_v1 }
 0x675   :  { %11381 = vmatpush3.msra.mxu0 %v12993_v2  ;;  %11387 = vmatprep.subr.mxu1 %v12400_v28 }
 0x676   :  { %11383 = vmatmul.mubr.msk.f32.vlgmr.msra.gmra.mxu0 %vm234_vm11, %v13060_v5  ;;  %11392 = vmatprep.subr.mxu0 %v12400_v28 }
 0x677   :  { %11393 = vmatpush3.msra.mxu0 %v13000_v50  ;;  %11388 = vmatpush3.msra.mxu1 %v13003_v6 }
 0x678   :  { %11394 = vmatprep.subr.mxu0 %v12400_v28  ;;  %11389 = vmatprep.mubr.msk.f32.mxu1 %vm12401_vm12, %v12400_v28 }
 0x679   :  { %11395 = vmatpush3.msra.mxu0 %v13009_v63  ;;  %11396 = vmatprep.mubr.msk.f32.mxu0 %vm12401_vm12, %v12400_v28 }
 0x67a   :  { %v12036_v7 = vpop.eup %12035  ;;  %11399 = vmatprep.subr.mxu1 %v12400_v28  ;;  %11406 = vmatprep.subr.mxu0 %v12400_v28 }
 0x67b   :  { %v3504_v8 = vmul.f32 %v12036_v7, %v3503_v43 }
 0x67d   :  { %v13089_v10 = vadd.f32 %v3505_v9, %v3504_v8 }
 0x67f   :  { %3508 = vst.msk [vmem:[#allocation3 + $0x16] sm:$0x3] %vm360_vm13, %v13089_v10  ;;  %11390 = vmatmul.mubr.msk.f32.vlgmr.msra.gmra.mxu1 %vm234_vm11, %v13089_v10  ;;  %11397 = vmatmul.mubr.msk.f32.vlgmr.msra.gmra.mxu0 %vm234_vm11, %v13089_v10 }
 0x680   :  { %11400 = vmatpush3.msra.mxu1 %v13025_v58  ;;  %11403 = vmatprep.mubr.msk.f32.mxu1 %vm12401_vm12, %v12400_v28 }
 0x681   :  { %11401 = vmatprep.subr.mxu1 %v12400_v28  ;;  %11407 = vmatpush3.msra.mxu0 %v13031_v59 }
 0x682   :  { %11402 = vmatpush3.msra.mxu1 %v13034_v60  ;;  %11408 = vmatprep.subr.mxu0 %v12400_v28 }
 0x683   :  { %11404 = vmatmul.mubr.msk.f32.vlgmr.msra.gmra.mxu1 %vm234_vm11, %v13089_v10  ;;  %11413 = vmatprep.subr.mxu1 %v12400_v28 }
 0x684   :  { %11414 = vmatpush3.msra.mxu1 %v13041_v53  ;;  %11409 = vmatpush3.msra.mxu0 %v13044_v61 }
 0x685   :  { %11415 = vmatprep.subr.mxu1 %v12400_v28  ;;  %11410 = vmatprep.mubr.msk.f32.mxu0 %vm12401_vm12, %v12400_v28 }
 0x686   :  { %11416 = vmatpush3.msra.mxu1 %v13050_v51  ;;  %11417 = vmatprep.mubr.msk.f32.mxu1 %vm12401_vm12, %v12400_v28 }
 0x687   :  { %11420 = vmatprep.subr.mxu0 %v12400_v28  ;;  %11427 = vmatprep.subr.mxu1 %v12400_v28 }
 0x732   :  { %v3578_v49 = vpop.f32.mrf.mxu0  ;;  %v3648_v11 = vpop.f32.mrf.mxu1 }
 0x733   :  { %v3724_v12 = vadd.f32 %v3723_v55, %v3578_v49  ;;  %v3733_v19 = vadd.f32 %v3732_v17, %v3648_v11 }
 0x734   :  { %v11370_v13 = vpop.f32.mrf.mxu0  ;;  %v11377_v14 = vpop.f32.mrf.mxu1 }
 0x735   :  { %v10587_v15 = vmul.f32 -1.442695, %v3724_v12  ;;  %v10588_v21 = vmul.f32 -1.442695, %v3733_v19 }
 0x736   :  { %v3718_v16 = vpop.f32.mrf.mxu0 }
 0x737   :  { %12037 = vpow2.f32 %v10587_v15  ;;  %v3719_v44 = vadd.f32 %v13120_v42, %v3718_v16 }
 0x738   :  { %v11384_v18 = vpop.f32.mrf.mxu0  ;;  %12039 = vpow2.f32 %v10588_v21  ;;  %v4216_v21 = vld [vmem:[#allocation2 + $0x1c] sm:$0x3] }
 0x73f   :  { %v3820_v22 = vpop.f32.mrf.mxu1  ;;  %v3890_v24 = vpop.f32.mrf.mxu0 }
 0x740   :  { %v3966_v25 = vadd.f32 %v3965_v23, %v3820_v22  ;;  %v3975_v36 = vadd.f32 %v3974_v34, %v3890_v24 }
 0x741   :  { %v11391_v26 = vpop.f32.mrf.mxu1  ;;  %v11398_v27 = vpop.f32.mrf.mxu0 }
 0x742   :  { %v10592_v29 = vmul.f32 -1.442695, %v3966_v25  ;;  %v10593_v37 = vmul.f32 -1.442695, %v3975_v36  ;;  %v4449_v25 = vld [vmem:[#allocation2 + $0x32] sm:$0x3] }
 0x743   :  { %v3960_v30 = vpop.f32.mrf.mxu1  ;;  %v4458_v36 = vld [vmem:[#allocation2 + $0x42] sm:$0x3] }
 0x744   :  { %v12038_v32 = vpop.eup %12037  ;;  %12041 = vpow2.f32 %v10592_v29  ;;  %v3961_v54 = vadd.f32 %v13126_v52, %v3960_v30 }
 0x745   :  { %v3728_v33 = vadd.f32 1.0, %v12038_v32  ;;  %v11405_v35 = vpop.f32.mrf.mxu1  ;;  %v12040_v38 = vpop.eup %12039 }
 0x746   :  { %v3737_v40 = vadd.f32 1.0, %v12040_v38 }
 0x747   :  { %12043 = vrcp.f32 %v3728_v33 }
 0x748   :  { %12045 = vpow2.f32 %v10593_v37 }
 0x751   :  { %v12042_v39 = vpop.eup %12041 }
 0x752   :  { %v3970_v41 = vadd.f32 1.0, %v12042_v39 }
 0x754   :  { %v12044_v45 = vpop.eup %12043  ;;  %12047 = vrcp.f32 %v3970_v41 }
 0x755   :  { %12049 = vrcp.f32 %v3737_v40  ;;  %v3742_v46 = vmul.f32 %v12044_v45, %v3719_v44  ;;  %v12046_v62 = vpop.eup %12045 }
 0x756   :  { %v3979_v3 = vadd.f32 1.0, %v12046_v62  ;;  %v4225_v62 = vld [vmem:[#allocation2 + $0x2c] sm:$0x3] }
 0x757   :  { %v3743_v48 = vadd.f32 %v3742_v46, %v3741_v47 }
 0x759   :  { %12051 = vtanh.f32 %v3743_v48 }
 0x75a   :  { %12053 = vrcp.f32 %v3979_v3 }
 0x761   :  { %v12048_v57 = vpop.eup %12047 }
 0x762   :  { %v12050_v20 = vpop.eup %12049  ;;  %v3984_v56 = vmul.f32 %v12048_v57, %v3961_v54 }
 0x763   :  { %v3745_v7 = vsub.f32 1.0, %v12050_v20  ;;  %v3747_v49 = vmul.f32 %v12050_v20, %v13060_v5 }
 0x764   :  { %v3985_v43 = vadd.f32 %v3984_v56, %v3983_v31 }
 0x766   :  { %v12052_v8 = vpop.eup %12051  ;;  %12055 = vtanh.f32 %v3985_v43 }
 0x767   :  { %v3746_v9 = vmul.f32 %v12052_v8, %v3745_v7  ;;  %v12054_v5 = vpop.eup %12053  ;;  %v4467_v7 = vld [vmem:[#allocation2 + $0x52] sm:$0x3] }
 0x768   :  { %v3987_v11 = vsub.f32 1.0, %v12054_v5  ;;  %v3989_v14 = vmul.f32 %v12054_v5, %v13089_v10  ;;  %v4207_v10 = vld [vmem:[#allocation2 + $0xc] sm:$0x3] }
 0x769   :  { %v13130_v55 = vadd.f32 %v3747_v49, %v3746_v9 }
 0x76b   :  { %3750 = vst.msk [vmem:[#allocation3 + $0xa] sm:$0x3] %vm360_vm13, %v13130_v55  ;;  %11411 = vmatmul.mubr.msk.f32.vlgmr.msra.gmra.mxu0 %vm234_vm11, %v13130_v55  ;;  %11418 = vmatmul.mubr.msk.f32.vlgmr.msra.gmra.mxu1 %vm234_vm11, %v13130_v55 }
 0x76c   :  { %11421 = vmatpush3.msra.mxu0 %v12984_v0  ;;  %11424 = vmatprep.mubr.msk.f32.mxu0 %vm12401_vm12, %v12400_v28 }
 0x76d   :  { %11422 = vmatprep.subr.mxu0 %v12400_v28  ;;  %11428 = vmatpush3.msra.mxu1 %v12990_v1 }
 0x76e   :  { %11423 = vmatpush3.msra.mxu0 %v12993_v2  ;;  %11429 = vmatprep.subr.mxu1 %v12400_v28 }
 0x76f   :  { %11425 = vmatmul.mubr.msk.f32.vlgmr.msra.gmra.mxu0 %vm234_vm11, %v13130_v55  ;;  %11434 = vmatprep.subr.mxu0 %v12400_v28 }
 0x770   :  { %11435 = vmatpush3.msra.mxu0 %v13000_v50  ;;  %11430 = vmatpush3.msra.mxu1 %v13003_v6 }
 0x771   :  { %11436 = vmatprep.subr.mxu0 %v12400_v28  ;;  %11431 = vmatprep.mubr.msk.f32.mxu1 %vm12401_vm12, %v12400_v28 }
 0x772   :  { %11437 = vmatpush3.msra.mxu0 %v13009_v63  ;;  %11438 = vmatprep.mubr.msk.f32.mxu0 %vm12401_vm12, %v12400_v28 }
 0x773   :  { %v12056_v12 = vpop.eup %12055  ;;  %11441 = vmatprep.subr.mxu1 %v12400_v28  ;;  %11448 = vmatprep.subr.mxu0 %v12400_v28 }
 0x774   :  { %v3988_v13 = vmul.f32 %v12056_v12, %v3987_v11 }
 0x776   :  { %v13159_v15 = vadd.f32 %v3989_v14, %v3988_v13  ;;  %v4960_v13 = vld [vmem:[#allocation3 + $0x4] sm:$0x3] }
 0x778   :  { %3992 = vst.msk [vmem:[#allocation3 + $0x14] sm:$0x3] %vm360_vm13, %v13159_v15  ;;  %11432 = vmatmul.mubr.msk.f32.vlgmr.msra.gmra.mxu1 %vm234_vm11, %v13159_v15  ;;  %11439 = vmatmul.mubr.msk.f32.vlgmr.msra.gmra.mxu0 %vm234_vm11, %v13159_v15 }
 0x779   :  { %11442 = vmatpush3.msra.mxu1 %v13025_v58  ;;  %11445 = vmatprep.mubr.msk.f32.mxu1 %vm12401_vm12, %v12400_v28 }
 0x77a   :  { %11443 = vmatprep.subr.mxu1 %v12400_v28  ;;  %11449 = vmatpush3.msra.mxu0 %v13031_v59 }
 0x77b   :  { %11444 = vmatpush3.msra.mxu1 %v13034_v60  ;;  %11450 = vmatprep.subr.mxu0 %v12400_v28 }
 0x77c   :  { %11446 = vmatmul.mubr.msk.f32.vlgmr.msra.gmra.mxu1 %vm234_vm11, %v13159_v15  ;;  %11455 = vmatprep.subr.mxu1 %v12400_v28 }
 0x77d   :  { %11456 = vmatpush3.msra.mxu1 %v13041_v53  ;;  %11451 = vmatpush3.msra.mxu0 %v13044_v61 }
 0x77e   :  { %11457 = vmatprep.subr.mxu1 %v12400_v28  ;;  %11452 = vmatprep.mubr.msk.f32.mxu0 %vm12401_vm12, %v12400_v28 }
 0x77f   :  { %11458 = vmatpush3.msra.mxu1 %v13050_v51  ;;  %11459 = vmatprep.mubr.msk.f32.mxu1 %vm12401_vm12, %v12400_v28 }
 0x780   :  { %11462 = vmatprep.subr.mxu0 %v12400_v28  ;;  %11469 = vmatprep.subr.mxu1 %v12400_v28 }
 0x82b   :  { %v4062_v59 = vpop.f32.mrf.mxu0  ;;  %v4132_v16 = vpop.f32.mrf.mxu1 }
 0x82c   :  { %v4208_v53 = vadd.f32 %v4207_v10, %v4062_v59  ;;  %v4217_v23 = vadd.f32 %v4216_v21, %v4132_v16  ;;  %v4958_v10 = vld [vmem:[#allocation3] sm:$0x3]  ;;  %v13242_v21 = vld [vmem:[#allocation9 + $0x18] sm:$0xff] }
 0x82d   :  { %v11412_v17 = vpop.f32.mrf.mxu0  ;;  %v11419_v61 = vpop.f32.mrf.mxu1 }
 0x82e   :  { %v10597_v18 = vmul.f32 -1.442695, %v4208_v53  ;;  %v10598_v51 = vmul.f32 -1.442695, %v4217_v23  ;;  %v4975_v61 = vld [vmem:[#allocation7 + $0x8] sm:$0xff] }
 0x82f   :  { %v4202_v19 = vpop.f32.mrf.mxu0  ;;  %v4691_v23 = vld [vmem:[#allocation2 + $0xe] sm:$0x3] }
 0x830   :  { %12057 = vpow2.f32 %v10597_v18  ;;  %v4203_v46 = vadd.f32 %v13120_v42, %v4202_v19  ;;  %v4974_v18 = vld [vmem:[#allocation7] sm:$0xff]  ;;  %v4977_v19 = vld [vmem:[#allocation9 + $0x8] sm:$0xff] }
 0x831   :  { %v11426_v22 = vpop.f32.mrf.mxu0  ;;  %12059 = vpow2.f32 %v10598_v51 }
 0x838   :  { %v4304_v24 = vpop.f32.mrf.mxu1  ;;  %v4374_v26 = vpop.f32.mrf.mxu0 }
 0x839   :  { %v4450_v27 = vadd.f32 %v4449_v25, %v4304_v24  ;;  %v4459_v38 = vadd.f32 %v4458_v36, %v4374_v26  ;;  %v4932_v36 = vld [vmem:[#allocation2 + $0x30] sm:$0x3] }
 0x83a   :  { %v11433_v29 = vpop.f32.mrf.mxu1  ;;  %v11440_v30 = vpop.f32.mrf.mxu0 }
 0x83b   :  { %v10602_v32 = vmul.f32 -1.442695, %v4450_v27  ;;  %v10603_v39 = vmul.f32 -1.442695, %v4459_v38  ;;  %v4700_v30 = vld [vmem:[#allocation2 + $0x1e] sm:$0x3] }
 0x83c   :  { %v4444_v33 = vpop.f32.mrf.mxu1 }
 0x83d   :  { %v12058_v34 = vpop.eup %12057  ;;  %12061 = vpow2.f32 %v10602_v32  ;;  %v4445_v20 = vadd.f32 %v13126_v52, %v4444_v33 }
 0x83e   :  { %v4212_v35 = vadd.f32 1.0, %v12058_v34  ;;  %v11447_v37 = vpop.f32.mrf.mxu1  ;;  %v12060_v40 = vpop.eup %12059 }
 0x83f   :  { %v4221_v44 = vadd.f32 1.0, %v12060_v40 }
 0x840   :  { %12063 = vrcp.f32 %v4212_v35 }
 0x841   :  { %12065 = vpow2.f32 %v10603_v39 }
 0x84a   :  { %v12062_v41 = vpop.eup %12061 }
 0x84b   :  { %v4454_v45 = vadd.f32 1.0, %v12062_v41 }
 0x84d   :  { %v12064_v47 = vpop.eup %12063  ;;  %12067 = vrcp.f32 %v4454_v45 }
 0x84e   :  { %12069 = vrcp.f32 %v4221_v44  ;;  %v4226_v48 = vmul.f32 %v12064_v47, %v4203_v46  ;;  %v12066_v54 = vpop.eup %12065  ;;  %v4940_v47 = vld [vmem:[#allocation2 + $0x40] sm:$0x3] }
 0x84f   :  { %v4463_v57 = vadd.f32 1.0, %v12066_v54 }
 0x850   :  { %v4227_v3 = vadd.f32 %v4226_v48, %v4225_v62 }
 0x852   :  { %12071 = vtanh.f32 %v4227_v3 }
 0x853   :  { %12073 = vrcp.f32 %v4463_v57 }
 0x85a   :  { %v12068_v56 = vpop.eup %12067 }
 0x85b   :  { %v12070_v31 = vpop.eup %12069  ;;  %v4468_v43 = vmul.f32 %v12068_v56, %v4445_v20 }
 0x85c   :  { %v4229_v9 = vsub.f32 1.0, %v12070_v31  ;;  %v4231_v11 = vmul.f32 %v12070_v31, %v13130_v55 }
 0x85d   :  { %v4469_v8 = vadd.f32 %v4468_v43, %v4467_v7 }
 0x85f   :  { %v12072_v49 = vpop.eup %12071  ;;  %12075 = vtanh.f32 %v4469_v8  ;;  %v4709_v8 = vld [vmem:[#allocation2 + $0x2e] sm:$0x3] }
 0x860   :  { %v4230_v5 = vmul.f32 %v12072_v49, %v4229_v9  ;;  %v12074_v55 = vpop.eup %12073 }
 0x862   :  { %v13190_v12 = vadd.f32 %v4231_v11, %v4230_v5 }
 0x864   :  { %4234 = vst.msk [vmem:[#allocation3 + $0xc] sm:$0x3] %vm360_vm13, %v13190_v12  ;;  %11453 = vmatmul.mubr.msk.f32.vlgmr.msra.gmra.mxu0 %vm234_vm11, %v13190_v12  ;;  %11460 = vmatmul.mubr.msk.f32.vlgmr.msra.gmra.mxu1 %vm234_vm11, %v13190_v12 }
 0x865   :  { %11463 = vmatpush3.msra.mxu0 %v12984_v0  ;;  %11466 = vmatprep.mubr.msk.f32.mxu0 %vm12401_vm12, %v12400_v28  ;;  %v4961_v0 = vld [vmem:[#allocation3 + $0x6] sm:$0x3] }
 0x866   :  { %11464 = vmatprep.subr.mxu0 %v12400_v28  ;;  %11470 = vmatpush3.msra.mxu1 %v12990_v1  ;;  %v4471_v1 = vsub.f32 1.0, %v12074_v55 }
 0x867   :  { %11465 = vmatpush3.msra.mxu0 %v12993_v2  ;;  %11471 = vmatprep.subr.mxu1 %v12400_v28  ;;  %v4959_v2 = vld [vmem:[#allocation3 + $0x2] sm:$0x3] }
 0x868   :  { %11467 = vmatmul.mubr.msk.f32.vlgmr.msra.gmra.mxu0 %vm234_vm11, %v13190_v12  ;;  %11476 = vmatprep.subr.mxu0 %v12400_v28  ;;  %v5107_v16 = vcombine.low %v4958_v10, %v4959_v2  ;;  %v4948_v2 = vld [vmem:[#allocation2 + $0x50] sm:$0x3]  ;;  %v4963_v10 = vld [vmem:[#allocation3 + $0xa] sm:$0x3] }
 0x869   :  { %11477 = vmatpush3.msra.mxu0 %v13000_v50  ;;  %11472 = vmatpush3.msra.mxu1 %v13003_v6  ;;  %v5108_v50 = vcombine.low %v4960_v13, %v4961_v0  ;;  %v4473_v6 = vmul.f32 %v12074_v55, %v13159_v15 }
 0x86a   :  { %11478 = vmatprep.subr.mxu0 %v12400_v28  ;;  %11473 = vmatprep.mubr.msk.f32.mxu1 %vm12401_vm12, %v12400_v28 }
 0x86b   :  { %11479 = vmatpush3.msra.mxu0 %v13009_v63  ;;  %11480 = vmatprep.mubr.msk.f32.mxu0 %vm12401_vm12, %v12400_v28  ;;  %v5122_v17 = vrot.slane %v5108_v50, %v12699_v4  ;;  %v5115_v63 = vrot.slane %v5107_v16, %v12699_v4 }
 0x86c   :  { %v12076_v14 = vpop.eup %12075  ;;  %11483 = vmatprep.subr.mxu1 %v12400_v28  ;;  %11490 = vmatprep.subr.mxu0 %v4977_v19 }
 0x86d   :  { %v4472_v59 = vmul.f32 %v12076_v14, %v4471_v1  ;;  %v13233_v15 = vcombine.low %v5115_v63, %v5122_v17  ;;  %v4962_v17 = vld [vmem:[#allocation3 + $0x8] sm:$0x3] }
 0x86e   :  { %v5124_v63 = vcombine.low %v4962_v17, %v4963_v10  ;;  %v13358_v10 = vld [vmem:[#allocation10 + $0x50] sm:$0xff] }
 0x86f   :  { %v13218_v53 = vadd.f32 %v4473_v6, %v4472_v59 }
 0x871   :  { %4476 = vst.msk [vmem:[#allocation3 + $0x12] sm:$0x3] %vm360_vm13, %v13218_v53  ;;  %11474 = vmatmul.mubr.msk.f32.vlgmr.msra.gmra.mxu1 %vm234_vm11, %v13218_v53  ;;  %11481 = vmatmul.mubr.msk.f32.vlgmr.msra.gmra.mxu0 %vm234_vm11, %v13218_v53 }
 0x872   :  { %11484 = vmatpush3.msra.mxu1 %v13025_v58  ;;  %11487 = vmatprep.mubr.msk.f32.mxu1 %vm12401_vm12, %v12400_v28  ;;  %v13239_v58 = vld [vmem:[#allocation7 + $0x18] sm:$0xff] }
 0x873   :  { %11485 = vmatprep.subr.mxu1 %v12400_v28  ;;  %11491 = vmatpush3.msra.mxu0 %v4977_v19 }
 0x874   :  { %11486 = vmatpush3.msra.mxu1 %v13034_v60  ;;  %v4976_v60 = vld [vmem:[#allocation9] sm:$0xff] }
 0x875   :  { %11488 = vmatmul.mubr.msk.f32.vlgmr.msra.gmra.mxu1 %vm234_vm11, %v13218_v53  ;;  %11497 = vmatprep.subr.mxu1 %v4975_v61 }
 0x876   :  { %11501 = vmatprep.mubr.msk.f32.mxu1 %vm234_vm11, %v13233_v15  ;;  %11498 = vmatpush3.msra.mxu1 %v4975_v61  ;;  %v4964_v61 = vld [vmem:[#allocation3 + $0xc] sm:$0x3] }
 0x877   :  { %11499 = vmatprep.subr.mxu1 %v4974_v18  ;;  %11492 = vmatprep.subr.mxu0 %v4976_v60 }
 0x878   :  { %11500 = vmatpush3.msra.mxu1 %v4974_v18  ;;  %11493 = vmatpush3.msra.mxu0 %v4976_v60 }
 0x879   :  { %11511 = vmatprep.subr.mxu1 %v13239_v58  ;;  %11504 = vmatprep.subr.mxu0 %v13242_v21 }
 0x924   :  { %v4546_v22 = vpop.f32.mrf.mxu0  ;;  %v4616_v51 = vpop.f32.mrf.mxu1 }
 0x925   :  { %v4692_v24 = vadd.f32 %v4691_v23, %v4546_v22  ;;  %v4701_v33 = vadd.f32 %v4700_v30, %v4616_v51  ;;  %v5132_v51 = vrot.slane %v5124_v63, %v12699_v4  ;;  %v5500_v30 = vld [vmem:[#allocation7 + $0x20] sm:$0xff] }
 0x926   :  { %v11454_v25 = vpop.f32.mrf.mxu0  ;;  %v11461_v26 = vpop.f32.mrf.mxu1 }
 0x927   :  { %v10607_v27 = vmul.f32 -1.442695, %v4692_v24  ;;  %v10608_v34 = vmul.f32 -1.442695, %v4701_v33  ;;  %v5282_v26 = vld [vmem:[#allocation7 + $0x10] sm:$0xff] }
 0x928   :  { %v4686_v29 = vpop.f32.mrf.mxu0  ;;  %v4972_v33 = vld [vmem:[#allocation3 + $0x1c] sm:$0x3] }
 0x929   :  { %12077 = vpow2.f32 %v10607_v27  ;;  %v4687_v31 = vadd.f32 %v13120_v42, %v4686_v29  ;;  %v4970_v27 = vld [vmem:[#allocation3 + $0x18] sm:$0x3]  ;;  %v4968_v29 = vld [vmem:[#allocation3 + $0x14] sm:$0x3] }
 0x92a   :  { %v11468_v32 = vpop.f32.mrf.mxu0  ;;  %12079 = vpow2.f32 %v10608_v34  ;;  %v4969_v34 = vld [vmem:[#allocation3 + $0x16] sm:$0x3] }
 0x92b   :  { %v4971_v32 = vld [vmem:[#allocation3 + $0x1a] sm:$0x3] }
 0x931   :  { %v4788_v35 = vpop.f32.mrf.mxu1  ;;  %v4858_v37 = vpop.f32.mrf.mxu0 }
 0x932   :  { %v4933_v38 = vadd.f32 %v4932_v36, %v4788_v35  ;;  %v4941_v62 = vadd.f32 %v4940_v47, %v4858_v37  ;;  %v5003_v35 = vcombine.low %v4970_v27, %v4971_v32  ;;  %v4987_v36 = vcombine.low %v4968_v29, %v4969_v34  ;;  %v4973_v37 = vld [vmem:[#allocation3 + $0x1e] sm:$0x3]  ;;  %v10624_v32 = vld [vmem:[%s14026_s11 + $0x1] ss:$0 sm:$0xff] }
 0x933   :  { %v11475_v39 = vpop.f32.mrf.mxu1  ;;  %v11482_v40 = vpop.f32.mrf.mxu0 }
 0x934   :  { %v10612_v41 = vmul.f32 -1.442695, %v4933_v38  ;;  %v10613_v3 = vmul.f32 -1.442695, %v4941_v62  ;;  %v4967_v39 = vld [vmem:[#allocation3 + $0x12] sm:$0x3]  ;;  %v5004_v40 = vcombine.low %v4972_v33, %v4973_v37  ;;  %v5001_v47 = vrot.slane %v4987_v36, %v12699_v4 }
 0x935   :  { %v4928_v44 = vpop.f32.mrf.mxu1 }
 0x936   :  { %v12078_v45 = vpop.eup %12077  ;;  %12081 = vpow2.f32 %v10612_v41  ;;  %v4929_v11 = vadd.f32 %v13126_v52, %v4928_v44  ;;  %v5718_v44 = vld [vmem:[#allocation7 + $0x30] sm:$0xff]  ;;  %v5018_v62 = vrot.slane %v5004_v40, %v12699_v4 }
 0x937   :  { %v4696_v46 = vadd.f32 1.0, %v12078_v45  ;;  %v11489_v48 = vpop.f32.mrf.mxu1  ;;  %v12080_v54 = vpop.eup %12079  ;;  %v5011_v45 = vrot.slane %v5003_v35, %v12699_v4 }
 0x938   :  { %v4705_v20 = vadd.f32 1.0, %v12080_v54  ;;  %v5937_v48 = vld [vmem:[#allocation7 + $0x48] sm:$0xff] }
 0x939   :  { %12083 = vrcp.f32 %v4696_v46  ;;  %v13272_v54 = vcombine.low %v5011_v45, %v5018_v62  ;;  %v10630_v62 = vld [vmem:[%s14026_s11 + $0x2] ss:$0 sm:$0xff] }
 0x93a   :  { %12085 = vpow2.f32 %v10613_v3 }
 0x943   :  { %v12082_v57 = vpop.eup %12081 }
 0x944   :  { %v4937_v56 = vadd.f32 1.0, %v12082_v57  ;;  %v5285_v57 = vld [vmem:[#allocation9 + $0x10] sm:$0xff] }
 0x946   :  { %v12084_v43 = vpop.eup %12083  ;;  %12087 = vrcp.f32 %v4937_v56  ;;  %v5504_v56 = vld [vmem:[#allocation9 + $0x28] sm:$0xff] }
 0x947   :  { %12089 = vrcp.f32 %v4705_v20  ;;  %v4710_v7 = vmul.f32 %v12084_v43, %v4687_v31  ;;  %v12086_v49 = vpop.eup %12085  ;;  %v5936_v20 = vld [vmem:[#allocation7 + $0x40] sm:$0xff]  ;;  %v6155_v43 = vld [vmem:[#allocation7 + $0x58] sm:$0xff] }
 0x948   :  { %v4945_v5 = vadd.f32 1.0, %v12086_v49  ;;  %v5503_v31 = vld [vmem:[#allocation9 + $0x20] sm:$0xff] }
 0x949   :  { %v4711_v9 = vadd.f32 %v4710_v7, %v4709_v8  ;;  %v6154_v7 = vld [vmem:[#allocation7 + $0x50] sm:$0xff]  ;;  %v5939_v49 = vld [vmem:[#allocation9 + $0x40] sm:$0xff] }
 0x94a   :  { %v5721_v8 = vld [vmem:[#allocation9 + $0x30] sm:$0xff] }
 0x94b   :  { %12091 = vtanh.f32 %v4711_v9  ;;  %v5940_v9 = vld [vmem:[#allocation9 + $0x48] sm:$0xff] }
 0x94c   :  { %12093 = vrcp.f32 %v4945_v5  ;;  %v6158_v5 = vld [vmem:[#allocation9 + $0x58] sm:$0xff] }
 0x953   :  { %v12088_v55 = vpop.eup %12087 }
 0x954   :  { %v12090_v0 = vpop.eup %12089  ;;  %v4949_v1 = vmul.f32 %v12088_v55, %v4929_v11  ;;  %v6157_v11 = vld [vmem:[#allocation9 + $0x50] sm:$0xff] }
 0x955   :  { %v4713_v14 = vsub.f32 1.0, %v12090_v0  ;;  %v4715_v42 = vmul.f32 %v12090_v0, %v13190_v12  ;;  %v13303_v55 = vld [vmem:[#allocation10 + $0x10] sm:$0xff]  ;;  %v13309_v0 = vld [vmem:[#allocation10 + $0x8] sm:$0xff] }
 0x956   :  { %v4950_v13 = vadd.f32 %v4949_v1, %v4948_v2  ;;  %v13316_v1 = vld [vmem:[#allocation10] sm:$0xff]  ;;  %v13320_v2 = vld [vmem:[#allocation10 + $0x38] sm:$0xff] }
 0x958   :  { %v12092_v50 = vpop.eup %12091  ;;  %12095 = vtanh.f32 %v4950_v13  ;;  %v13327_v13 = vld [vmem:[#allocation10 + $0x28] sm:$0xff] }
 0x959   :  { %v4714_v59 = vmul.f32 %v12092_v50, %v4713_v14  ;;  %v12094_v16 = vpop.eup %12093  ;;  %v13329_v14 = vld [vmem:[#allocation10 + $0x30] sm:$0xff]  ;;  %v13335_v50 = vld [vmem:[#allocation10 + $0x20] sm:$0xff] }
 0x95a   :  { %v4952_v52 = vsub.f32 1.0, %v12094_v16  ;;  %v4954_v22 = vmul.f32 %v12094_v16, %v13218_v53  ;;  %v5501_v53 = vld [vmem:[#allocation7 + $0x28] sm:$0xff] }
 0x95b   :  { %v4716_v6 = vadd.f32 %v4715_v42, %v4714_v59  ;;  %v13344_v42 = vld [vmem:[#allocation10 + $0x48] sm:$0xff]  ;;  %v13349_v59 = vld [vmem:[#allocation10 + $0x58] sm:$0xff] }
 0x95d   :  { %4718 = vst.msk [vmem:[#allocation3 + $0xe] sm:$0x3] %vm360_vm13, %v4716_v6  ;;  %v13352_v6 = vld [vmem:[#allocation10 + $0x40] sm:$0xff] }
 0x964   :  { %v4965_v18 = vld [vmem:[#allocation3 + $0xe] sm:$0x3] }
 0x965   :  { %v12096_v19 = vpop.eup %12095  ;;  %v5125_v60 = vcombine.low %v4964_v61, %v4965_v18 }
 0x966   :  { %v4953_v23 = vmul.f32 %v12096_v19, %v4952_v52 }
 0x967   :  { %v5139_v12 = vrot.slane %v5125_v60, %v12699_v4  ;;  %v10618_v60 = vld [vmem:[%s14026_s11] ss:$0 sm:$0xff] }
 0x968   :  { %v4955_v24 = vadd.f32 %v4954_v22, %v4953_v23 }
 0x969   :  { %v13252_v25 = vcombine.low %v5132_v51, %v5139_v12 }
 0x96a   :  { %4957 = vst.msk [vmem:[#allocation3 + $0x10] sm:$0x3] %vm360_vm13, %v4955_v24 }
 0x96b   :  { %11502 = vmatmul.mubr.msk.f32.vlgmr.msra.gmra.mxu1 %vm234_vm11, %v13252_v25 }
 0x96c   :  { %11512 = vmatpush3.msra.mxu1 %v13239_v58  ;;  %11515 = vmatprep.mubr.msk.f32.mxu1 %vm234_vm11, %v13233_v15  ;;  %v5719_v58 = vld [vmem:[#allocation7 + $0x38] sm:$0xff] }
 0x96d   :  { %11513 = vmatprep.subr.mxu1 %v5282_v26 }
 0x96e   :  { %11514 = vmatpush3.msra.mxu1 %v5282_v26 }
 0x96f   :  { %11516 = vmatmul.mubr.msk.f32.vlgmr.msra.gmra.mxu1 %vm234_vm11, %v13252_v25  ;;  %11525 = vmatprep.subr.mxu1 %v5501_v53 }
 0x970   :  { %11526 = vmatpush3.msra.mxu1 %v5501_v53  ;;  %11529 = vmatprep.mubr.msk.f32.mxu1 %vm234_vm11, %v13233_v15 }
 0x971   :  { %11527 = vmatprep.subr.mxu1 %v5500_v30  ;;  %v4966_v38 = vld [vmem:[#allocation3 + $0x10] sm:$0x3] }
 0x972   :  { %11528 = vmatpush3.msra.mxu1 %v5500_v30  ;;  %v4986_v41 = vcombine.low %v4966_v38, %v4967_v39 }
 0x973   :  { %11530 = vmatmul.mubr.msk.f32.vlgmr.msra.gmra.mxu1 %vm234_vm11, %v13252_v25  ;;  %11539 = vmatprep.subr.mxu1 %v5719_v58 }
 0x974   :  { %11540 = vmatpush3.msra.mxu1 %v5719_v58  ;;  %11543 = vmatprep.mubr.msk.f32.mxu1 %vm234_vm11, %v13233_v15  ;;  %v4994_v46 = vrot.slane %v4986_v41, %v12699_v4 }
 0x975   :  { %11541 = vmatprep.subr.mxu1 %v5718_v44 }
 0x976   :  { %v5002_v3 = vcombine.low %v4994_v46, %v5001_v47  ;;  %11542 = vmatpush3.msra.mxu1 %v5718_v44 }
 0x977   :  { %11544 = vmatmul.mubr.msk.f32.vlgmr.msra.gmra.mxu1 %vm234_vm11, %v13252_v25  ;;  %11553 = vmatprep.subr.mxu1 %v5937_v48 }
 0x978   :  { %11494 = vmatprep.mubr.msk.f32.mxu0 %vm234_vm11, %v5002_v3  ;;  %11554 = vmatpush3.msra.mxu1 %v5937_v48 }
 0x979   :  { %11495 = vmatmul.mubr.msk.f32.vlgmr.msra.gmra.mxu0 %vm234_vm11, %v13272_v54  ;;  %11557 = vmatprep.mubr.msk.f32.mxu1 %vm234_vm11, %v13233_v15 }
 0x97a   :  { %11505 = vmatpush3.msra.mxu0 %v13242_v21  ;;  %11508 = vmatprep.mubr.msk.f32.mxu0 %vm234_vm11, %v5002_v3  ;;  %v5722_v21 = vld [vmem:[#allocation9 + $0x38] sm:$0xff] }
 0x97b   :  { %11506 = vmatprep.subr.mxu0 %v5285_v57  ;;  %11555 = vmatprep.subr.mxu1 %v5936_v20 }
 0x97c   :  { %11507 = vmatpush3.msra.mxu0 %v5285_v57  ;;  %11556 = vmatpush3.msra.mxu1 %v5936_v20 }
 0x97d   :  { %11518 = vmatprep.subr.mxu0 %v5504_v56  ;;  %11509 = vmatmul.mubr.msk.f32.vlgmr.msra.gmra.mxu0 %vm234_vm11, %v13272_v54 }
 0x97e   :  { %11519 = vmatpush3.msra.mxu0 %v5504_v56  ;;  %11522 = vmatprep.mubr.msk.f32.mxu0 %vm234_vm11, %v5002_v3 }
 0x97f   :  { %11520 = vmatprep.subr.mxu0 %v5503_v31  ;;  %11558 = vmatmul.mubr.msk.f32.vlgmr.msra.gmra.mxu1 %vm234_vm11, %v13252_v25 }
 0x980   :  { %11567 = vmatprep.subr.mxu1 %v6155_v43  ;;  %11521 = vmatpush3.msra.mxu0 %v5503_v31 }
 0x981   :  { %11568 = vmatpush3.msra.mxu1 %v6155_v43  ;;  %11571 = vmatprep.mubr.msk.f32.mxu1 %vm234_vm11, %v13233_v15  ;;  %v13296_v15 = vld [vmem:[#allocation10 + $0x18] sm:$0xff] }
 0x982   :  { %11532 = vmatprep.subr.mxu0 %v5722_v21  ;;  %11569 = vmatprep.subr.mxu1 %v6154_v7 }
 0x983   :  { %11523 = vmatmul.mubr.msk.f32.vlgmr.msra.gmra.mxu0 %vm234_vm11, %v13272_v54  ;;  %11570 = vmatpush3.msra.mxu1 %v6154_v7 }
 0x984   :  { %11533 = vmatpush3.msra.mxu0 %v5722_v21  ;;  %11536 = vmatprep.mubr.msk.f32.mxu0 %vm234_vm11, %v5002_v3 }
 0x985   :  { %11534 = vmatprep.subr.mxu0 %v5721_v8  ;;  %11572 = vmatmul.mubr.msk.f32.vlgmr.msra.gmra.mxu1 %vm234_vm11, %v13252_v25 }
 0x986   :  { %11535 = vmatpush3.msra.mxu0 %v5721_v8  ;;  %11581 = vmatprep.subr.mxu1 %v12400_v28 }
 0x987   :  { %11537 = vmatmul.mubr.msk.f32.vlgmr.msra.gmra.mxu0 %vm234_vm11, %v13272_v54  ;;  %11546 = vmatprep.subr.mxu0 %v5940_v9 }
 0x988   :  { %11547 = vmatpush3.msra.mxu0 %v5940_v9  ;;  %11550 = vmatprep.mubr.msk.f32.mxu0 %vm234_vm11, %v5002_v3 }
 0x989   :  { %11548 = vmatprep.subr.mxu0 %v5939_v49  ;;  %11582 = vmatpush3.msra.mxu1 %v13296_v15 }
 0x98a   :  { %11549 = vmatpush3.msra.mxu0 %v5939_v49  ;;  %11583 = vmatprep.subr.mxu1 %v12400_v28 }
 0x98b   :  { %11551 = vmatmul.mubr.msk.f32.vlgmr.msra.gmra.mxu0 %vm234_vm11, %v13272_v54  ;;  %11560 = vmatprep.subr.mxu0 %v6158_v5 }
 0x98c   :  { %11561 = vmatpush3.msra.mxu0 %v6158_v5  ;;  %11564 = vmatprep.mubr.msk.f32.mxu0 %vm234_vm11, %v5002_v3 }
 0x98d   :  { %11562 = vmatprep.subr.mxu0 %v6157_v11  ;;  %11584 = vmatpush3.msra.mxu1 %v13303_v55 }
 0x98e   :  { %11563 = vmatpush3.msra.mxu0 %v6157_v11  ;;  %11585 = vmatprep.mubr.msk.f32.mxu1 %vm12401_vm12, %v12400_v28 }
 0x98f   :  { %11565 = vmatmul.mubr.msk.f32.vlgmr.msra.gmra.mxu0 %vm234_vm11, %v13272_v54  ;;  %11574 = vmatprep.subr.mxu0 %v12400_v28 }
 0x990   :  { %11586 = vmatmul.mubr.f32.vlgmr.msra.gmra.mxu1 %v12400_v28  ;;  %11575 = vmatpush3.msra.mxu0 %v13309_v0 }
 0x991   :  { %11576 = vmatprep.subr.mxu0 %v12400_v28  ;;  %11578 = vmatprep.mubr.msk.f32.mxu0 %vm12401_vm12, %v12400_v28 }
 0x992   :  { %11577 = vmatpush3.msra.mxu0 %v13316_v1  ;;  %11595 = vmatprep.subr.mxu1 %v12400_v28 }
 0x993   :  { %11579 = vmatmul.mubr.f32.vlgmr.msra.gmra.mxu0 %v12400_v28  ;;  %11596 = vmatpush3.msra.mxu1 %v13320_v2 }
 0x994   :  { %11588 = vmatprep.subr.mxu0 %v12400_v28  ;;  %11597 = vmatprep.subr.mxu1 %v12400_v28 }
 0x995   :  { %11589 = vmatpush3.msra.mxu0 %v13327_v13  ;;  %11598 = vmatpush3.msra.mxu1 %v13329_v14 }
 0x996   :  { %11599 = vmatprep.mubr.msk.f32.mxu1 %vm12401_vm12, %v12400_v28  ;;  %11590 = vmatprep.subr.mxu0 %v12400_v28 }
 0x997   :  { %11600 = vmatmul.mubr.f32.vlgmr.msra.gmra.mxu1 %v12400_v28  ;;  %11591 = vmatpush3.msra.mxu0 %v13335_v50 }
 0x998   :  { %11592 = vmatprep.mubr.msk.f32.mxu0 %vm12401_vm12, %v12400_v28  ;;  %11602 = vmatprep.subr.mxu0 %v12400_v28 }
 0x999   :  { %11593 = vmatmul.mubr.f32.vlgmr.msra.gmra.mxu0 %v12400_v28  ;;  %11609 = vmatprep.subr.mxu1 %v12400_v28 }
 0x99a   :  { %11603 = vmatpush3.msra.mxu0 %v13344_v42  ;;  %11606 = vmatprep.mubr.msk.f32.mxu0 %vm12401_vm12, %v12400_v28 }
 0x99b   :  { %11604 = vmatprep.subr.mxu0 %v12400_v28  ;;  %11610 = vmatpush3.msra.mxu1 %v13349_v59 }
 0x99c   :  { %11605 = vmatpush3.msra.mxu0 %v13352_v6  ;;  %11611 = vmatprep.subr.mxu1 %v12400_v28 }
 0x99d   :  { %11607 = vmatmul.mubr.f32.vlgmr.msra.gmra.mxu0 %v12400_v28  ;;  %11612 = vmatpush3.msra.mxu1 %v13358_v10 }
 0x99e   :  { %11613 = vmatprep.mubr.msk.f32.mxu1 %vm12401_vm12, %v12400_v28  ;;  %11616 = vmatprep.subr.mxu0 %v12400_v28 }
 0x99f   :  { %11614 = vmatmul.mubr.f32.vlgmr.msra.gmra.mxu1 %v12400_v28  ;;  %11623 = vmatprep.subr.mxu1 %v12400_v28 }
 0x9a0   :  { %11617 = vmatpush3.msra.mxu0 %v13309_v0  ;;  %11624 = vmatpush3.msra.mxu1 %v13296_v15 }
 0x9a1   :  { %11618 = vmatprep.subr.mxu0 %v12400_v28  ;;  %11625 = vmatprep.subr.mxu1 %v12400_v28 }
 0x9a2   :  { %11619 = vmatpush3.msra.mxu0 %v13316_v1  ;;  %11620 = vmatprep.mubr.msk.f32.mxu0 %vm12401_vm12, %v12400_v28 }
 0x9a3   :  { %11626 = vmatpush3.msra.mxu1 %v13303_v55  ;;  %11627 = vmatprep.mubr.msk.f32.mxu1 %vm12401_vm12, %v12400_v28 }
 0x9a4   :  { %11630 = vmatprep.subr.mxu0 %v12400_v28  ;;  %11637 = vmatprep.subr.mxu1 %v12400_v28 }
 0xa2b   :  { %v11503_v16 = vpop.f32.mrf.mxu1 }
 0xa2d   :  { %v5211_v17 = vpop.f32.mrf.mxu1 }
 0xa2f   :  { %v11517_v63 = vpop.f32.mrf.mxu1 }
 0xa31   :  { %v5428_v52 = vpop.f32.mrf.mxu1 }
 0xa33   :  { %v11531_v61 = vpop.f32.mrf.mxu1 }
 0xa35   :  { %v5646_v18 = vpop.f32.mrf.mxu1 }
 0xa37   :  { %v11545_v23 = vpop.f32.mrf.mxu1 }
 0xa39   :  { %v11496_v19 = vpop.f32.mrf.mxu0  ;;  %v13387_v29 = vpop.f32.mrf.mxu1 }
 0xa3a   :  { %v5217_v22 = vadd.f32 %v11503_v16, %v11496_v19 }
 0xa3b   :  { %v5090_v51 = vpop.f32.mrf.mxu0 }
 0xa3c   :  { %v5228_v12 = vadd.f32 %v10618_v60, %v5217_v22  ;;  %v5212_v24 = vadd.f32 %v5211_v17, %v5090_v51 }
 0xa3d   :  { %v11510_v25 = vpop.f32.mrf.mxu0 }
 0xa3e   :  { %v5248_v26 = vcombine.high %v5228_v12, %v5228_v12  ;;  %v5255_v53 = vrot.slane %v5228_v12, %v12699_v4  ;;  %v5227_v27 = vadd.f32 %v10618_v60, %v5212_v24  ;;  %v5434_v30 = vadd.f32 %v11517_v63, %v11510_v25 }
 0xa3f   :  { %v5353_v33 = vpop.f32.mrf.mxu0  ;;  %v11559_v44 = vpop.f32.mrf.mxu1 }
 0xa40   :  { %v5262_v34 = vrot.slane %v5248_v26, %v12699_v4  ;;  %v5263_v35 = vcombine.high %v5255_v53, %v5255_v53  ;;  %5277 = vst.msk [vmem:[#allocation2 + $0x8] sm:$0x3] %vm360_vm13, %v5255_v53  ;;  %v5231_v58 = vcombine.high %v5227_v27, %v5227_v27  ;;  %v5238_v36 = vrot.slane %v5227_v27, %v12699_v4  ;;  %v10642_v53 = vld [vmem:[%s14026_s11 + $0x4] ss:$0 sm:$0xff] }
 0xa41   :  { %v5446_v37 = vadd.f32 %v10624_v32, %v5434_v30  ;;  %v5429_v38 = vadd.f32 %v5428_v52, %v5353_v33  ;;  %v6082_v21 = vpop.f32.mrf.mxu1 }
 0xa42   :  { %v5264_v39 = vcombine.high %v5262_v34, %v5262_v34  ;;  %5278 = vst.msk [vmem:[#allocation2 + $0xa] sm:$0x3] %vm360_vm13, %v5263_v35  ;;  %5279 = vst.msk [vmem:[#allocation2 + $0xc] sm:$0x3] %vm360_vm13, %v5262_v34  ;;  %v5245_v40 = vrot.slane %v5231_v58, %v12699_v4  ;;  %v5246_v41 = vcombine.high %v5238_v36, %v5238_v36 }
 0xa43   :  { %5273 = vst.msk [vmem:[#allocation2] sm:$0x3] %vm360_vm13, %v5238_v36  ;;  %v5466_v45 = vcombine.high %v5446_v37, %v5446_v37  ;;  %v5473_v46 = vrot.slane %v5446_v37, %v12699_v4  ;;  %v5445_v47 = vadd.f32 %v10624_v32, %v5429_v38  ;;  %v11524_v48 = vpop.f32.mrf.mxu0 }
 0xa44   :  { %5280 = vst.msk [vmem:[#allocation2 + $0xe] sm:$0x3] %vm360_vm13, %v5264_v39  ;;  %v5247_v3 = vcombine.high %v5245_v40, %v5245_v40  ;;  %5274 = vst.msk [vmem:[#allocation2 + $0x2] sm:$0x3] %vm360_vm13, %v5246_v41  ;;  %v5652_v54 = vadd.f32 %v11531_v61, %v11524_v48  ;;  %v10636_v61 = vld [vmem:[%s14026_s11 + $0x3] ss:$0 sm:$0xff] }
 0xa45   :  { %5275 = vst.msk [vmem:[#allocation2 + $0x4] sm:$0x3] %vm360_vm13, %v5245_v40  ;;  %v5480_v57 = vrot.slane %v5466_v45, %v12699_v4  ;;  %v5481_v20 = vcombine.high %v5473_v46, %v5473_v46  ;;  %5495 = vst.msk [vmem:[#allocation2 + $0x18] sm:$0x3] %vm360_vm13, %v5473_v46  ;;  %v5449_v56 = vcombine.high %v5445_v47, %v5445_v47  ;;  %v5571_v43 = vpop.f32.mrf.mxu0  ;;  %v11573_v51 = vpop.f32.mrf.mxu1 }
 0xa46   :  { %v5456_v31 = vrot.slane %v5445_v47, %v12699_v4  ;;  %5276 = vst.msk [vmem:[#allocation2 + $0x6] sm:$0x3] %vm360_vm13, %v5247_v3  ;;  %v5664_v7 = vadd.f32 %v10630_v62, %v5652_v54  ;;  %v5647_v8 = vadd.f32 %v5646_v18, %v5571_v43  ;;  %v10648_v54 = vld [vmem:[%s14026_s11 + $0x5] ss:$0 sm:$0xff] }
 0xa47   :  { %v5482_v9 = vcombine.high %v5480_v57, %v5480_v57  ;;  %5496 = vst.msk [vmem:[#allocation2 + $0x1a] sm:$0x3] %vm360_vm13, %v5481_v20  ;;  %5497 = vst.msk [vmem:[#allocation2 + $0x1c] sm:$0x3] %vm360_vm13, %v5480_v57  ;;  %v5463_v49 = vrot.slane %v5449_v56, %v12699_v4  ;;  %v11538_v11 = vpop.f32.mrf.mxu0  ;;  %v6300_v37 = vpop.f32.mrf.mxu1 }
 0xa48   :  { %v5464_v5 = vcombine.high %v5456_v31, %v5456_v31  ;;  %5491 = vst.msk [vmem:[#allocation2 + $0x10] sm:$0x3] %vm360_vm13, %v5456_v31  ;;  %v5684_v16 = vcombine.high %v5664_v7, %v5664_v7  ;;  %v5691_v17 = vrot.slane %v5664_v7, %v12699_v4  ;;  %v5663_v63 = vadd.f32 %v10630_v62, %v5647_v8 }
 0xa49   :  { %v5870_v52 = vadd.f32 %v11545_v23, %v11538_v11  ;;  %5498 = vst.msk [vmem:[#allocation2 + $0x1e] sm:$0x3] %vm360_vm13, %v5482_v9  ;;  %v5465_v18 = vcombine.high %v5463_v49, %v5463_v49  ;;  %5493 = vst.msk [vmem:[#allocation2 + $0x14] sm:$0x3] %vm360_vm13, %v5463_v49  ;;  %v5789_v19 = vpop.f32.mrf.mxu0 }
 0xa4a   :  { %5492 = vst.msk [vmem:[#allocation2 + $0x12] sm:$0x3] %vm360_vm13, %v5464_v5  ;;  %v5698_v60 = vrot.slane %v5684_v16, %v12699_v4  ;;  %v5699_v22 = vcombine.high %v5691_v17, %v5691_v17  ;;  %5713 = vst.msk [vmem:[#allocation2 + $0x28] sm:$0x3] %vm360_vm13, %v5691_v17  ;;  %v5667_v12 = vcombine.high %v5663_v63, %v5663_v63 }
 0xa4b   :  { %v5674_v23 = vrot.slane %v5663_v63, %v12699_v4  ;;  %5494 = vst.msk [vmem:[#allocation2 + $0x16] sm:$0x3] %vm360_vm13, %v5465_v18  ;;  %v5882_v24 = vadd.f32 %v10636_v61, %v5870_v52  ;;  %v5865_v25 = vadd.f32 %v13387_v29, %v5789_v19  ;;  %v11552_v26 = vpop.f32.mrf.mxu0  ;;  %v6613_v63 = vld [vmem:[#allocation2] sm:$0x3] }
 0xa4c   :  { %v5700_v27 = vcombine.high %v5698_v60, %v5698_v60  ;;  %5714 = vst.msk [vmem:[#allocation2 + $0x2a] sm:$0x3] %vm360_vm13, %v5699_v22  ;;  %5715 = vst.msk [vmem:[#allocation2 + $0x2c] sm:$0x3] %vm360_vm13, %v5698_v60  ;;  %v5681_v30 = vrot.slane %v5667_v12, %v12699_v4  ;;  %v6088_v33 = vadd.f32 %v11559_v44, %v11552_v26 }
 0xa4d   :  { %v5682_v32 = vcombine.high %v5674_v23, %v5674_v23  ;;  %5709 = vst.msk [vmem:[#allocation2 + $0x20] sm:$0x3] %vm360_vm13, %v5674_v23  ;;  %v5902_v34 = vcombine.high %v5882_v24, %v5882_v24  ;;  %v5909_v35 = vrot.slane %v5882_v24, %v12699_v4  ;;  %v5881_v29 = vadd.f32 %v10636_v61, %v5865_v25  ;;  %v6007_v58 = vpop.f32.mrf.mxu0 }
 0xa4e   :  { %5716 = vst.msk [vmem:[#allocation2 + $0x2e] sm:$0x3] %vm360_vm13, %v5700_v27  ;;  %v5683_v36 = vcombine.high %v5681_v30, %v5681_v30  ;;  %5711 = vst.msk [vmem:[#allocation2 + $0x24] sm:$0x3] %vm360_vm13, %v5681_v30  ;;  %v6100_v38 = vadd.f32 %v10642_v53, %v6088_v33  ;;  %v6083_v39 = vadd.f32 %v6082_v21, %v6007_v58 }
 0xa4f   :  { %5710 = vst.msk [vmem:[#allocation2 + $0x22] sm:$0x3] %vm360_vm13, %v5682_v32  ;;  %v5916_v40 = vrot.slane %v5902_v34, %v12699_v4  ;;  %v5917_v41 = vcombine.high %v5909_v35, %v5909_v35  ;;  %5931 = vst.msk [vmem:[#allocation2 + $0x38] sm:$0x3] %vm360_vm13, %v5909_v35  ;;  %v5885_v44 = vcombine.high %v5881_v29, %v5881_v29  ;;  %v11566_v46 = vpop.f32.mrf.mxu0 }
 0xa50   :  { %v5892_v45 = vrot.slane %v5881_v29, %v12699_v4  ;;  %5712 = vst.msk [vmem:[#allocation2 + $0x26] sm:$0x3] %vm360_vm13, %v5683_v36  ;;  %v6120_v47 = vcombine.high %v6100_v38, %v6100_v38  ;;  %v6127_v48 = vrot.slane %v6100_v38, %v12699_v4  ;;  %v6099_v62 = vadd.f32 %v10642_v53, %v6083_v39  ;;  %v6539_v57 = vpop.f32.mrf.mxu1  ;;  %v6621_v53 = vld [vmem:[#allocation2 + $0x10] sm:$0x3] }
 0xa51   :  { %v6306_v3 = vadd.f32 %v11573_v51, %v11566_v46  ;;  %v5918_v20 = vcombine.high %v5916_v40, %v5916_v40  ;;  %5932 = vst.msk [vmem:[#allocation2 + $0x3a] sm:$0x3] %vm360_vm13, %v5917_v41  ;;  %5933 = vst.msk [vmem:[#allocation2 + $0x3c] sm:$0x3] %vm360_vm13, %v5916_v40  ;;  %v5899_v56 = vrot.slane %v5885_v44, %v12699_v4  ;;  %v6225_v43 = vpop.f32.mrf.mxu0 }
 0xa52   :  { %v5900_v31 = vcombine.high %v5892_v45, %v5892_v45  ;;  %5927 = vst.msk [vmem:[#allocation2 + $0x30] sm:$0x3] %vm360_vm13, %v5892_v45  ;;  %v6134_v21 = vrot.slane %v6120_v47, %v12699_v4  ;;  %v6135_v7 = vcombine.high %v6127_v48, %v6127_v48  ;;  %6149 = vst.msk [vmem:[#allocation2 + $0x48] sm:$0x3] %vm360_vm13, %v6127_v48  ;;  %v11587_v49 = vpop.f32.mrf.mxu1 }
 0xa53   :  { %v6103_v8 = vcombine.high %v6099_v62, %v6099_v62  ;;  %v6110_v9 = vrot.slane %v6099_v62, %v12699_v4  ;;  %5934 = vst.msk [vmem:[#allocation2 + $0x3e] sm:$0x3] %vm360_vm13, %v5918_v20  ;;  %v5901_v5 = vcombine.high %v5899_v56, %v5899_v56  ;;  %5929 = vst.msk [vmem:[#allocation2 + $0x34] sm:$0x3] %vm360_vm13, %v5899_v56  ;;  %v6469_v17 = vpop.f32.mrf.mxu0 }
 0xa54   :  { %5928 = vst.msk [vmem:[#allocation2 + $0x32] sm:$0x3] %vm360_vm13, %v5900_v31  ;;  %v6318_v11 = vadd.f32 %v10648_v54, %v6306_v3  ;;  %v6301_v16 = vadd.f32 %v6300_v37, %v6225_v43  ;;  %v6136_v52 = vcombine.high %v6134_v21, %v6134_v21  ;;  %6150 = vst.msk [vmem:[#allocation2 + $0x4a] sm:$0x3] %vm360_vm13, %v6135_v7  ;;  %v13479_v43 = vld [vmem:[%s14027_s12] ss:$0 sm:$0xff] }
 0xa55   :  { %6151 = vst.msk [vmem:[#allocation2 + $0x4c] sm:$0x3] %vm360_vm13, %v6134_v21  ;;  %v6117_v61 = vrot.slane %v6103_v8, %v12699_v4  ;;  %v6118_v18 = vcombine.high %v6110_v9, %v6110_v9  ;;  %6145 = vst.msk [vmem:[#allocation2 + $0x40] sm:$0x3] %vm360_vm13, %v6110_v9  ;;  %v6614_v19 = vadd.f32 %v6613_v63, %v6469_v17  ;;  %v11580_v12 = vpop.f32.mrf.mxu0 }
 0xa56   :  { %5930 = vst.msk [vmem:[#allocation2 + $0x36] sm:$0x3] %vm360_vm13, %v5901_v5  ;;  %v6338_v60 = vcombine.high %v6318_v11, %v6318_v11  ;;  %v6345_v22 = vrot.slane %v6318_v11, %v12699_v4  ;;  %v6317_v51 = vadd.f32 %v10648_v54, %v6301_v16  ;;  %6152 = vst.msk [vmem:[#allocation2 + $0x4e] sm:$0x3] %vm360_vm13, %v6136_v52  ;;  %v13485_v5 = vld [vmem:[%s14027_s12 + $0x1] ss:$0 sm:$0xff] }
 0xa57   :  { %v6119_v23 = vcombine.high %v6117_v61, %v6117_v61  ;;  %6146 = vst.msk [vmem:[#allocation2 + $0x42] sm:$0x3] %vm360_vm13, %v6118_v18  ;;  %6147 = vst.msk [vmem:[#allocation2 + $0x44] sm:$0x3] %vm360_vm13, %v6117_v61  ;;  %v10652_v24 = vmul.f32 -1.442695, %v6614_v19  ;;  %v6704_v32 = vpop.f32.mrf.mxu1  ;;  %v6622_v36 = vadd.f32 %v6621_v53, %v6539_v57 }
 0xa58   :  { %v6352_v25 = vrot.slane %v6338_v60, %v12699_v4  ;;  %v6353_v26 = vcombine.high %v6345_v22, %v6345_v22  ;;  %6367 = vst.msk [vmem:[#allocation2 + $0x58] sm:$0x3] %vm360_vm13, %v6345_v22  ;;  %v6321_v27 = vcombine.high %v6317_v51, %v6317_v51  ;;  %v6328_v30 = vrot.slane %v6317_v51, %v12699_v4  ;;  %v6629_v11 = vld [vmem:[#allocation2 + $0x20] sm:$0x3] }
 0xa59   :  { %6148 = vst.msk [vmem:[#allocation2 + $0x46] sm:$0x3] %vm360_vm13, %v6119_v23  ;;  %12097 = vpow2.f32 %v10652_v24  ;;  %v6609_v29 = vpop.f32.mrf.mxu0  ;;  %v11601_v58 = vpop.f32.mrf.mxu1  ;;  %v10653_v44 = vmul.f32 -1.442695, %v6622_v36 }
 0xa5a   :  { %v6354_v33 = vcombine.high %v6352_v25, %v6352_v25  ;;  %6368 = vst.msk [vmem:[#allocation2 + $0x5a] sm:$0x3] %vm360_vm13, %v6353_v26  ;;  %6369 = vst.msk [vmem:[#allocation2 + $0x5c] sm:$0x3] %vm360_vm13, %v6352_v25  ;;  %v6335_v34 = vrot.slane %v6321_v27, %v12699_v4  ;;  %v6336_v35 = vcombine.high %v6328_v30, %v6328_v30  ;;  %v6848_v37 = vld [vmem:[#allocation2 + $0x3e] sm:$0x3] }
 0xa5b   :  { %6363 = vst.msk [vmem:[#allocation2 + $0x50] sm:$0x3] %vm360_vm13, %v6328_v30  ;;  %v6849_v39 = vadd.f32 %v6848_v37, %v6704_v32  ;;  %v11594_v40 = vpop.f32.mrf.mxu0  ;;  %v6610_v7 = vadd.f32 %v13479_v43, %v6609_v29 }
 0xa5c   :  { %6370 = vst.msk [vmem:[#allocation2 + $0x5e] sm:$0x3] %vm360_vm13, %v6354_v33  ;;  %v6337_v38 = vcombine.high %v6335_v34, %v6335_v34  ;;  %6364 = vst.msk [vmem:[#allocation2 + $0x52] sm:$0x3] %vm360_vm13, %v6336_v35 }
 0xa5d   :  { %6365 = vst.msk [vmem:[#allocation2 + $0x54] sm:$0x3] %vm360_vm13, %v6335_v34  ;;  %v10654_v41 = vmul.f32 -1.442695, %v6849_v39  ;;  %v6774_v4 = vpop.f32.mrf.mxu0  ;;  %v6856_v45 = vld [vmem:[#allocation2 + $0x4e] sm:$0x3] }
 0xa5e   :  { %6366 = vst.msk [vmem:[#allocation2 + $0x56] sm:$0x3] %vm360_vm13, %v6337_v38  ;;  %v6857_v48 = vadd.f32 %v6856_v45, %v6774_v4  ;;  %v7086_v34 = vld [vmem:[#allocation2 + $0x2] sm:$0x3]  ;;  %v7094_v39 = vld [vmem:[#allocation2 + $0x12] sm:$0x3] }
 0xa5f   :  { %12099 = vpow2.f32 %v10654_v41  ;;  %v11608_v46 = vpop.f32.mrf.mxu0  ;;  %v6844_v47 = vpop.f32.mrf.mxu1 }
 0xa60   :  { %12101 = vpow2.f32 %v10653_v44  ;;  %v10655_v54 = vmul.f32 -1.442695, %v6857_v48  ;;  %v6845_v63 = vadd.f32 %v13485_v5, %v6844_v47  ;;  %v7324_v44 = vld [vmem:[#allocation2 + $0x3c] sm:$0x3] }
 0xa61   :  { %v11615_v62 = vpop.f32.mrf.mxu1 }
 0xa63   :  { %v6864_v18 = vld [vmem:[#allocation2 + $0x5e] sm:$0x3] }
 0xa66   :  { %v12098_v3 = vpop.eup %12097 }
 0xa67   :  { %v6618_v57 = vadd.f32 1.0, %v12098_v3 }
 0xa69   :  { %12103 = vrcp.f32 %v6618_v57  ;;  %v7332_v57 = vld [vmem:[#allocation2 + $0x4c] sm:$0x3] }
 0xa6a   :  { %12105 = vpow2.f32 %v10655_v54 }
 0xa6c   :  { %v12100_v20 = vpop.eup %12099 }
 0xa6d   :  { %v6853_v56 = vadd.f32 1.0, %v12100_v20  ;;  %v12102_v31 = vpop.eup %12101 }
 0xa6e   :  { %v6626_v21 = vadd.f32 1.0, %v12102_v31 }
 0xa6f   :  { %12107 = vrcp.f32 %v6853_v56 }
 0xa70   :  { %12109 = vrcp.f32 %v6626_v21 }
 0xa76   :  { %v12104_v8 = vpop.eup %12103 }
 0xa77   :  { %v12106_v9 = vpop.eup %12105  ;;  %v6630_v49 = vmul.f32 %v12104_v8, %v6610_v7 }
 0xa78   :  { %v6861_v17 = vadd.f32 1.0, %v12106_v9 }
 0xa79   :  { %v6631_v16 = vadd.f32 %v6630_v49, %v6629_v11 }
 0xa7b   :  { %12111 = vtanh.f32 %v6631_v16 }
 0xa7c   :  { %v12108_v52 = vpop.eup %12107  ;;  %12113 = vrcp.f32 %v6861_v17 }
 0xa7d   :  { %v6865_v61 = vmul.f32 %v12108_v52, %v6845_v63  ;;  %v12110_v60 = vpop.eup %12109 }
 0xa7e   :  { %v6633_v22 = vsub.f32 1.0, %v12110_v60  ;;  %v6635_v23 = vmul.f32 0.0, %v12110_v60 }
 0xa7f   :  { %v6866_v19 = vadd.f32 %v6865_v61, %v6864_v18  ;;  %v7102_v61 = vld [vmem:[#allocation2 + $0x22] sm:$0x3] }
 0xa81   :  { %12115 = vtanh.f32 %v6866_v19 }
 0xa88   :  { %v12112_v51 = vpop.eup %12111 }
 0xa89   :  { %v6634_v12 = vmul.f32 %v12112_v51, %v6633_v22  ;;  %v12114_v24 = vpop.eup %12113 }
 0xa8a   :  { %v6868_v26 = vsub.f32 1.0, %v12114_v24  ;;  %v6870_v30 = vmul.f32 0.0, %v12114_v24 }
 0xa8b   :  { %v13488_v25 = vadd.f32 %v6635_v23, %v6634_v12  ;;  %v7340_v12 = vld [vmem:[#allocation2 + $0x5c] sm:$0x3] }
 0xa8d   :  { %6637 = vst.msk [vmem:[#allocation3] sm:$0x3] %vm360_vm13, %v13488_v25  ;;  %11621 = vmatmul.mubr.msk.f32.vlgmr.msra.gmra.mxu0 %vm234_vm11, %v13488_v25  ;;  %11628 = vmatmul.mubr.msk.f32.vlgmr.msra.gmra.mxu1 %vm234_vm11, %v13488_v25 }
 0xa8e   :  { %11631 = vmatpush3.msra.mxu0 %v13327_v13  ;;  %11638 = vmatpush3.msra.mxu1 %v13320_v2  ;;  %v12116_v53 = vpop.eup %12115 }
 0xa8f   :  { %11632 = vmatprep.subr.mxu0 %v12400_v28  ;;  %11634 = vmatprep.mubr.msk.f32.mxu0 %vm12401_vm12, %v12400_v28  ;;  %v6869_v27 = vmul.f32 %v12116_v53, %v6868_v26 }
 0xa90   :  { %11633 = vmatpush3.msra.mxu0 %v13335_v50  ;;  %11639 = vmatprep.subr.mxu1 %v12400_v28 }
 0xa91   :  { %11635 = vmatmul.mubr.msk.f32.vlgmr.msra.gmra.mxu0 %vm234_vm11, %v13488_v25  ;;  %11640 = vmatpush3.msra.mxu1 %v13329_v14  ;;  %v13509_v32 = vadd.f32 %v6870_v30, %v6869_v27 }
 0xa92   :  { %11644 = vmatprep.subr.mxu0 %v12400_v28  ;;  %11641 = vmatprep.mubr.msk.f32.mxu1 %vm12401_vm12, %v12400_v28 }
 0xa93   :  { %11645 = vmatpush3.msra.mxu0 %v13344_v42  ;;  %11651 = vmatprep.subr.mxu1 %v12400_v28  ;;  %6872 = vst.msk [vmem:[#allocation3 + $0x1e] sm:$0x3] %vm360_vm13, %v13509_v32 }
 0xa94   :  { %11642 = vmatmul.mubr.msk.f32.vlgmr.msra.gmra.mxu1 %vm234_vm11, %v13509_v32  ;;  %11646 = vmatprep.subr.mxu0 %v12400_v28 }
 0xa95   :  { %11647 = vmatpush3.msra.mxu0 %v13352_v6  ;;  %11648 = vmatprep.mubr.msk.f32.mxu0 %vm12401_vm12, %v12400_v28 }
 0xa96   :  { %11652 = vmatpush3.msra.mxu1 %v13349_v59  ;;  %11649 = vmatmul.mubr.msk.f32.vlgmr.msra.gmra.mxu0 %vm234_vm11, %v13509_v32 }
 0xa97   :  { %11653 = vmatprep.subr.mxu1 %v12400_v28  ;;  %11655 = vmatprep.mubr.msk.f32.mxu1 %vm12401_vm12, %v12400_v28 }
 0xa98   :  { %11654 = vmatpush3.msra.mxu1 %v13358_v10  ;;  %11658 = vmatprep.subr.mxu0 %v12400_v28 }
 0xa99   :  { %11656 = vmatmul.mubr.msk.f32.vlgmr.msra.gmra.mxu1 %vm234_vm11, %v13509_v32  ;;  %11665 = vmatprep.subr.mxu1 %v12400_v28 }
 0xa9a   :  { %11659 = vmatpush3.msra.mxu0 %v13309_v0  ;;  %11666 = vmatpush3.msra.mxu1 %v13296_v15 }
 0xa9b   :  { %11660 = vmatprep.subr.mxu0 %v12400_v28  ;;  %11667 = vmatprep.subr.mxu1 %v12400_v28 }
 0xa9c   :  { %11661 = vmatpush3.msra.mxu0 %v13316_v1  ;;  %11662 = vmatprep.mubr.msk.f32.mxu0 %vm12401_vm12, %v12400_v28 }
 0xa9d   :  { %11668 = vmatpush3.msra.mxu1 %v13303_v55  ;;  %11669 = vmatprep.mubr.msk.f32.mxu1 %vm12401_vm12, %v12400_v28 }
 0xa9e   :  { %11672 = vmatprep.subr.mxu0 %v12400_v28  ;;  %11679 = vmatprep.subr.mxu1 %v12400_v28 }
 0xb4d   :  { %v6942_v33 = vpop.f32.mrf.mxu0  ;;  %v7012_v35 = vpop.f32.mrf.mxu1 }
 0xb4e   :  { %v7087_v29 = vadd.f32 %v7086_v34, %v6942_v33  ;;  %v7095_v41 = vadd.f32 %v7094_v39, %v7012_v35 }
 0xb4f   :  { %v11622_v58 = vpop.f32.mrf.mxu0  ;;  %v11629_v36 = vpop.f32.mrf.mxu1 }
 0xb50   :  { %v10659_v37 = vmul.f32 -1.442695, %v7087_v29  ;;  %v10660_v62 = vmul.f32 -1.442695, %v7095_v41  ;;  %v7570_v41 = vld [vmem:[#allocation2 + $0x14] sm:$0x3] }
 0xb51   :  { %v7082_v38 = vpop.f32.mrf.mxu0 }
 0xb52   :  { %12117 = vpow2.f32 %v10659_v37  ;;  %v7083_v16 = vadd.f32 %v13479_v43, %v7082_v38 }
 0xb53   :  { %v11636_v40 = vpop.f32.mrf.mxu0 }
 0xb54   :  { %v7180_v4 = vpop.f32.mrf.mxu1 }
 0xb55   :  { %v7325_v45 = vadd.f32 %v7324_v44, %v7180_v4 }
 0xb56   :  { %v11643_v46 = vpop.f32.mrf.mxu1  ;;  %v7250_v47 = vpop.f32.mrf.mxu0 }
 0xb57   :  { %v10664_v48 = vmul.f32 -1.442695, %v7325_v45  ;;  %v7333_v20 = vadd.f32 %v7332_v57, %v7250_v47  ;;  %v7800_v45 = vld [vmem:[#allocation2 + $0x3a] sm:$0x3] }
 0xb58   :  { %v11650_v3 = vpop.f32.mrf.mxu0 }
 0xb59   :  { %12119 = vpow2.f32 %v10664_v48  ;;  %v7320_v54 = vpop.f32.mrf.mxu1  ;;  %v10665_v21 = vmul.f32 -1.442695, %v7333_v20  ;;  %v7808_v20 = vld [vmem:[#allocation2 + $0x4a] sm:$0x3] }
 0xb5a   :  { %12121 = vpow2.f32 %v10660_v62  ;;  %v7321_v60 = vadd.f32 %v13485_v5, %v7320_v54 }
 0xb5b   :  { %v11657_v56 = vpop.f32.mrf.mxu1 }
 0xb5f   :  { %v12118_v31 = vpop.eup %12117 }
 0xb60   :  { %v7091_v7 = vadd.f32 1.0, %v12118_v31 }
 0xb62   :  { %12123 = vrcp.f32 %v7091_v7 }
 0xb63   :  { %12125 = vpow2.f32 %v10665_v21 }
 0xb66   :  { %v12120_v8 = vpop.eup %12119 }
 0xb67   :  { %v7329_v9 = vadd.f32 1.0, %v12120_v8  ;;  %v12122_v49 = vpop.eup %12121 }
 0xb68   :  { %v7099_v11 = vadd.f32 1.0, %v12122_v49 }
 0xb69   :  { %12127 = vrcp.f32 %v7329_v9 }
 0xb6a   :  { %12129 = vrcp.f32 %v7099_v11 }
 0xb6f   :  { %v12124_v17 = vpop.eup %12123 }
 0xb70   :  { %v12126_v63 = vpop.eup %12125  ;;  %v7103_v52 = vmul.f32 %v12124_v17, %v7083_v16 }
 0xb71   :  { %v7337_v19 = vadd.f32 1.0, %v12126_v63 }
 0xb72   :  { %v7104_v18 = vadd.f32 %v7103_v52, %v7102_v61 }
 0xb74   :  { %12131 = vtanh.f32 %v7104_v18  ;;  %v7578_v18 = vld [vmem:[#allocation2 + $0x24] sm:$0x3] }
 0xb75   :  { %12133 = vrcp.f32 %v7337_v19 }
 0xb76   :  { %v12128_v22 = vpop.eup %12127 }
 0xb77   :  { %v7341_v51 = vmul.f32 %v12128_v22, %v7321_v60  ;;  %v12130_v24 = vpop.eup %12129 }
 0xb78   :  { %v7106_v26 = vsub.f32 1.0, %v12130_v24  ;;  %v7108_v30 = vmul.f32 %v12130_v24, %v13488_v25 }
 0xb79   :  { %v7342_v23 = vadd.f32 %v7341_v51, %v7340_v12 }
 0xb7b   :  { %12135 = vtanh.f32 %v7342_v23  ;;  %v7816_v23 = vld [vmem:[#allocation2 + $0x5a] sm:$0x3] }
 0xb81   :  { %v12132_v53 = vpop.eup %12131 }
 0xb82   :  { %v7107_v27 = vmul.f32 %v12132_v53, %v7106_v26  ;;  %v12134_v33 = vpop.eup %12133 }
 0xb83   :  { %v7344_v35 = vsub.f32 1.0, %v12134_v33  ;;  %v7346_v58 = vmul.f32 %v12134_v33, %v13509_v32 }
 0xb84   :  { %v13547_v34 = vadd.f32 %v7108_v30, %v7107_v27 }
 0xb86   :  { %7110 = vst.msk [vmem:[#allocation3 + $0x2] sm:$0x3] %vm360_vm13, %v13547_v34  ;;  %11663 = vmatmul.mubr.msk.f32.vlgmr.msra.gmra.mxu0 %vm234_vm11, %v13547_v34  ;;  %11670 = vmatmul.mubr.msk.f32.vlgmr.msra.gmra.mxu1 %vm234_vm11, %v13547_v34 }
 0xb87   :  { %11673 = vmatpush3.msra.mxu0 %v13327_v13  ;;  %11680 = vmatpush3.msra.mxu1 %v13320_v2 }
 0xb88   :  { %v12136_v29 = vpop.eup %12135  ;;  %11674 = vmatprep.subr.mxu0 %v12400_v28  ;;  %11676 = vmatprep.mubr.msk.f32.mxu0 %vm12401_vm12, %v12400_v28 }
 0xb89   :  { %11675 = vmatpush3.msra.mxu0 %v13335_v50  ;;  %11681 = vmatprep.subr.mxu1 %v12400_v28  ;;  %v7345_v25 = vmul.f32 %v12136_v29, %v7344_v35 }
 0xb8a   :  { %11677 = vmatmul.mubr.msk.f32.vlgmr.msra.gmra.mxu0 %vm234_vm11, %v13547_v34  ;;  %11682 = vmatpush3.msra.mxu1 %v13329_v14 }
 0xb8b   :  { %11686 = vmatprep.subr.mxu0 %v12400_v28  ;;  %11683 = vmatprep.mubr.msk.f32.mxu1 %vm12401_vm12, %v12400_v28  ;;  %v13569_v36 = vadd.f32 %v7346_v58, %v7345_v25 }
 0xb8c   :  { %11687 = vmatpush3.msra.mxu0 %v13344_v42  ;;  %11693 = vmatprep.subr.mxu1 %v12400_v28 }
 0xb8d   :  { %7348 = vst.msk [vmem:[#allocation3 + $0x1c] sm:$0x3] %vm360_vm13, %v13569_v36  ;;  %11684 = vmatmul.mubr.msk.f32.vlgmr.msra.gmra.mxu1 %vm234_vm11, %v13569_v36  ;;  %11688 = vmatprep.subr.mxu0 %v12400_v28 }
 0xb8e   :  { %11689 = vmatpush3.msra.mxu0 %v13352_v6  ;;  %11690 = vmatprep.mubr.msk.f32.mxu0 %vm12401_vm12, %v12400_v28 }
 0xb8f   :  { %11694 = vmatpush3.msra.mxu1 %v13349_v59  ;;  %11691 = vmatmul.mubr.msk.f32.vlgmr.msra.gmra.mxu0 %vm234_vm11, %v13569_v36 }
 0xb90   :  { %11695 = vmatprep.subr.mxu1 %v12400_v28  ;;  %11697 = vmatprep.mubr.msk.f32.mxu1 %vm12401_vm12, %v12400_v28 }
 0xb91   :  { %11696 = vmatpush3.msra.mxu1 %v13358_v10  ;;  %11700 = vmatprep.subr.mxu0 %v12400_v28 }
 0xb92   :  { %11698 = vmatmul.mubr.msk.f32.vlgmr.msra.gmra.mxu1 %vm234_vm11, %v13569_v36  ;;  %11707 = vmatprep.subr.mxu1 %v12400_v28 }
 0xb93   :  { %11701 = vmatpush3.msra.mxu0 %v13309_v0  ;;  %11708 = vmatpush3.msra.mxu1 %v13296_v15  ;;  %v7562_v15 = vld [vmem:[#allocation2 + $0x4] sm:$0x3] }
 0xb94   :  { %11702 = vmatprep.subr.mxu0 %v12400_v28  ;;  %11709 = vmatprep.subr.mxu1 %v12400_v28 }
 0xb95   :  { %11703 = vmatpush3.msra.mxu0 %v13316_v1  ;;  %11704 = vmatprep.mubr.msk.f32.mxu0 %vm12401_vm12, %v12400_v28 }
 0xb96   :  { %11710 = vmatpush3.msra.mxu1 %v13303_v55  ;;  %11711 = vmatprep.mubr.msk.f32.mxu1 %vm12401_vm12, %v12400_v28 }
 0xb97   :  { %11714 = vmatprep.subr.mxu0 %v12400_v28  ;;  %11721 = vmatprep.subr.mxu1 %v12400_v28 }
 0xc46   :  { %v7418_v0 = vpop.f32.mrf.mxu0  ;;  %v7488_v32 = vpop.f32.mrf.mxu1 }
 0xc47   :  { %v7563_v37 = vadd.f32 %v7562_v15, %v7418_v0  ;;  %v7571_v44 = vadd.f32 %v7570_v41, %v7488_v32 }
 0xc48   :  { %v11664_v38 = vpop.f32.mrf.mxu0  ;;  %v11671_v39 = vpop.f32.mrf.mxu1 }
 0xc49   :  { %v10669_v40 = vmul.f32 -1.442695, %v7563_v37  ;;  %v10670_v3 = vmul.f32 -1.442695, %v7571_v44  ;;  %v8046_v39 = vld [vmem:[#allocation2 + $0x16] sm:$0x3] }
 0xc4a   :  { %v7558_v1 = vpop.f32.mrf.mxu0 }
 0xc4b   :  { %12137 = vpow2.f32 %v10669_v40  ;;  %v7559_v17 = vadd.f32 %v13479_v43, %v7558_v1 }
 0xc4c   :  { %v11678_v4 = vpop.f32.mrf.mxu0 }
 0xc4d   :  { %v7656_v55 = vpop.f32.mrf.mxu1  ;;  %v8276_v4 = vld [vmem:[#allocation2 + $0x38] sm:$0x3] }
 0xc4e   :  { %v7801_v46 = vadd.f32 %v7800_v45, %v7656_v55 }
 0xc4f   :  { %v11685_v47 = vpop.f32.mrf.mxu1  ;;  %v7726_v48 = vpop.f32.mrf.mxu0 }
 0xc50   :  { %v10674_v62 = vmul.f32 -1.442695, %v7801_v46  ;;  %v7809_v56 = vadd.f32 %v7808_v20, %v7726_v48 }
 0xc51   :  { %v11692_v54 = vpop.f32.mrf.mxu0 }
 0xc52   :  { %12139 = vpow2.f32 %v10674_v62  ;;  %v7796_v57 = vpop.f32.mrf.mxu1  ;;  %v10675_v7 = vmul.f32 -1.442695, %v7809_v56 }
 0xc53   :  { %12141 = vpow2.f32 %v10670_v3  ;;  %v7797_v22 = vadd.f32 %v13485_v5, %v7796_v57  ;;  %v8284_v3 = vld [vmem:[#allocation2 + $0x48] sm:$0x3] }
 0xc54   :  { %v11699_v31 = vpop.f32.mrf.mxu1 }
 0xc58   :  { %v12138_v21 = vpop.eup %12137 }
 0xc59   :  { %v7567_v8 = vadd.f32 1.0, %v12138_v21 }
 0xc5b   :  { %12143 = vrcp.f32 %v7567_v8 }
 0xc5c   :  { %12145 = vpow2.f32 %v10675_v7 }
 0xc5f   :  { %v12140_v9 = vpop.eup %12139 }
 0xc60   :  { %v7805_v49 = vadd.f32 1.0, %v12140_v9  ;;  %v12142_v11 = vpop.eup %12141 }
 0xc61   :  { %v7575_v16 = vadd.f32 1.0, %v12142_v11 }
 0xc62   :  { %12147 = vrcp.f32 %v7805_v49 }
 0xc63   :  { %12149 = vrcp.f32 %v7575_v16 }
 0xc68   :  { %v12144_v63 = vpop.eup %12143 }
 0xc69   :  { %v12146_v52 = vpop.eup %12145  ;;  %v7579_v61 = vmul.f32 %v12144_v63, %v7559_v17  ;;  %v8054_v63 = vld [vmem:[#allocation2 + $0x26] sm:$0x3] }
 0xc6a   :  { %v7813_v60 = vadd.f32 1.0, %v12146_v52 }
 0xc6b   :  { %v7580_v19 = vadd.f32 %v7579_v61, %v7578_v18 }
 0xc6d   :  { %12151 = vtanh.f32 %v7580_v19 }
 0xc6e   :  { %12153 = vrcp.f32 %v7813_v60 }
 0xc6f   :  { %v12148_v51 = vpop.eup %12147 }
 0xc70   :  { %v7817_v12 = vmul.f32 %v12148_v51, %v7797_v22  ;;  %v12150_v26 = vpop.eup %12149  ;;  %v8292_v22 = vld [vmem:[#allocation2 + $0x58] sm:$0x3] }
 0xc71   :  { %v7582_v53 = vsub.f32 1.0, %v12150_v26  ;;  %v7584_v33 = vmul.f32 %v12150_v26, %v13547_v34 }
 0xc72   :  { %v7818_v24 = vadd.f32 %v7817_v12, %v7816_v23 }
 0xc74   :  { %12155 = vtanh.f32 %v7818_v24 }
 0xc7a   :  { %v12152_v27 = vpop.eup %12151 }
 0xc7b   :  { %v7583_v30 = vmul.f32 %v12152_v27, %v7582_v53  ;;  %v12154_v35 = vpop.eup %12153 }
 0xc7c   :  { %v7820_v25 = vsub.f32 1.0, %v12154_v35  ;;  %v7822_v0 = vmul.f32 %v12154_v35, %v13569_v36  ;;  %v13686_v35 = vld [vmem:[#allocation10 + $0x38] sm:$0xff] }
 0xc7d   :  { %v13607_v29 = vadd.f32 %v7584_v33, %v7583_v30  ;;  %v13683_v33 = vld [vmem:[#allocation10 + $0x28] sm:$0xff] }
 0xc7f   :  { %7586 = vst.msk [vmem:[#allocation3 + $0x4] sm:$0x3] %vm360_vm13, %v13607_v29  ;;  %11705 = vmatmul.mubr.msk.f32.vlgmr.msra.gmra.mxu0 %vm234_vm11, %v13607_v29  ;;  %11712 = vmatmul.mubr.msk.f32.vlgmr.msra.gmra.mxu1 %vm234_vm11, %v13607_v29 }
 0xc80   :  { %11715 = vmatpush3.msra.mxu0 %v13327_v13  ;;  %11722 = vmatpush3.msra.mxu1 %v13320_v2  ;;  %v13652_v13 = vld [vmem:[#allocation10 + $0x8] sm:$0xff] }
 0xc81   :  { %v12156_v58 = vpop.eup %12155  ;;  %11716 = vmatprep.subr.mxu0 %v12400_v28  ;;  %11718 = vmatprep.mubr.msk.f32.mxu0 %vm12401_vm12, %v12400_v28 }
 0xc82   :  { %11717 = vmatpush3.msra.mxu0 %v13335_v50  ;;  %11723 = vmatprep.subr.mxu1 %v12400_v28  ;;  %v7821_v34 = vmul.f32 %v12156_v58, %v7820_v25  ;;  %v13660_v50 = vld [vmem:[#allocation10] sm:$0xff] }
 0xc83   :  { %11719 = vmatmul.mubr.msk.f32.vlgmr.msra.gmra.mxu0 %vm234_vm11, %v13607_v29  ;;  %11724 = vmatpush3.msra.mxu1 %v13329_v14  ;;  %v13655_v14 = vld [vmem:[#allocation10 + $0x18] sm:$0xff]  ;;  %v13692_v58 = vld [vmem:[#allocation10 + $0x20] sm:$0xff] }
 0xc84   :  { %11728 = vmatprep.subr.mxu0 %v12400_v28  ;;  %11725 = vmatprep.mubr.msk.f32.mxu1 %vm12401_vm12, %v12400_v28  ;;  %v13629_v2 = vadd.f32 %v7822_v0, %v7821_v34 }
 0xc85   :  { %11729 = vmatpush3.msra.mxu0 %v13344_v42  ;;  %11735 = vmatprep.subr.mxu1 %v12400_v28  ;;  %v13665_v42 = vld [vmem:[#allocation10 + $0x10] sm:$0xff] }
 0xc86   :  { %7824 = vst.msk [vmem:[#allocation3 + $0x1a] sm:$0x3] %vm360_vm13, %v13629_v2  ;;  %11726 = vmatmul.mubr.msk.f32.vlgmr.msra.gmra.mxu1 %vm234_vm11, %v13629_v2  ;;  %11730 = vmatprep.subr.mxu0 %v12400_v28 }
 0xc87   :  { %11731 = vmatpush3.msra.mxu0 %v13352_v6  ;;  %11732 = vmatprep.mubr.msk.f32.mxu0 %vm12401_vm12, %v12400_v28  ;;  %v8038_v6 = vld [vmem:[#allocation2 + $0x6] sm:$0x3] }
 0xc88   :  { %11736 = vmatpush3.msra.mxu1 %v13349_v59  ;;  %11733 = vmatmul.mubr.msk.f32.vlgmr.msra.gmra.mxu0 %vm234_vm11, %v13629_v2 }
 0xc89   :  { %11737 = vmatprep.subr.mxu1 %v12400_v28  ;;  %11739 = vmatprep.mubr.msk.f32.mxu1 %vm12401_vm12, %v12400_v28 }
 0xc8a   :  { %11738 = vmatpush3.msra.mxu1 %v13358_v10  ;;  %11742 = vmatprep.subr.mxu0 %v12400_v28 }
 0xc8b   :  { %11740 = vmatmul.mubr.msk.f32.vlgmr.msra.gmra.mxu1 %vm234_vm11, %v13629_v2  ;;  %11749 = vmatprep.subr.mxu1 %v12400_v28 }
 0xc8c   :  { %11743 = vmatpush3.msra.mxu0 %v13652_v13  ;;  %11750 = vmatpush3.msra.mxu1 %v13655_v14 }
 0xc8d   :  { %11744 = vmatprep.subr.mxu0 %v12400_v28  ;;  %11751 = vmatprep.subr.mxu1 %v12400_v28 }
 0xc8e   :  { %11745 = vmatpush3.msra.mxu0 %v13660_v50  ;;  %11746 = vmatprep.mubr.msk.f32.mxu0 %vm12401_vm12, %v12400_v28 }
 0xc8f   :  { %11752 = vmatpush3.msra.mxu1 %v13665_v42  ;;  %11753 = vmatprep.mubr.msk.f32.mxu1 %vm12401_vm12, %v12400_v28 }
 0xc90   :  { %11756 = vmatprep.subr.mxu0 %v12400_v28  ;;  %11763 = vmatprep.subr.mxu1 %v12400_v28 }
 0xd3f   :  { %v7894_v59 = vpop.f32.mrf.mxu0  ;;  %v7964_v10 = vpop.f32.mrf.mxu1 }
 0xd40   :  { %v8039_v36 = vadd.f32 %v8038_v6, %v7894_v59  ;;  %v8047_v1 = vadd.f32 %v8046_v39, %v7964_v10  ;;  %v13699_v59 = vld [vmem:[#allocation10 + $0x30] sm:$0xff]  ;;  %v13707_v10 = vld [vmem:[#allocation10 + $0x48] sm:$0xff] }
 0xd41   :  { %v11706_v15 = vpop.f32.mrf.mxu0  ;;  %v11713_v32 = vpop.f32.mrf.mxu1 }
 0xd42   :  { %v10679_v37 = vmul.f32 -1.442695, %v8039_v36  ;;  %v10680_v47 = vmul.f32 -1.442695, %v8047_v1  ;;  %v13721_v36 = vld [vmem:[#allocation10 + $0x58] sm:$0xff]  ;;  %v13729_v15 = vld [vmem:[#allocation10 + $0x50] sm:$0xff] }
 0xd43   :  { %v8034_v38 = vpop.f32.mrf.mxu0 }
 0xd44   :  { %12157 = vpow2.f32 %v10679_v37  ;;  %v8035_v49 = vadd.f32 %v13479_v43, %v8034_v38  ;;  %v8514_v37 = vld [vmem:[#allocation2 + $0x8] sm:$0x3] }
 0xd45   :  { %v11720_v40 = vpop.f32.mrf.mxu0 }
 0xd46   :  { %v8132_v41 = vpop.f32.mrf.mxu1 }
 0xd47   :  { %v8277_v44 = vadd.f32 %v8276_v4, %v8132_v41 }
 0xd48   :  { %v11727_v55 = vpop.f32.mrf.mxu1  ;;  %v8202_v45 = vpop.f32.mrf.mxu0 }
 0xd49   :  { %v10684_v46 = vmul.f32 -1.442695, %v8277_v44  ;;  %v8285_v54 = vadd.f32 %v8284_v3, %v8202_v45  ;;  %v8522_v44 = vld [vmem:[#allocation2 + $0x18] sm:$0x3] }
 0xd4a   :  { %v11734_v48 = vpop.f32.mrf.mxu0 }
 0xd4b   :  { %12159 = vpow2.f32 %v10684_v46  ;;  %v8272_v62 = vpop.f32.mrf.mxu1  ;;  %v10685_v56 = vmul.f32 -1.442695, %v8285_v54 }
 0xd4c   :  { %12161 = vpow2.f32 %v10680_v47  ;;  %v8273_v18 = vadd.f32 %v13485_v5, %v8272_v62  ;;  %v8752_v47 = vld [vmem:[#allocation2 + $0x36] sm:$0x3] }
 0xd4d   :  { %v11741_v57 = vpop.f32.mrf.mxu1 }
 0xd51   :  { %v12158_v20 = vpop.eup %12157 }
 0xd52   :  { %v8043_v31 = vadd.f32 1.0, %v12158_v20 }
 0xd54   :  { %12163 = vrcp.f32 %v8043_v31  ;;  %v8760_v31 = vld [vmem:[#allocation2 + $0x46] sm:$0x3] }
 0xd55   :  { %12165 = vpow2.f32 %v10685_v56 }
 0xd58   :  { %v12160_v21 = vpop.eup %12159 }
 0xd59   :  { %v8281_v7 = vadd.f32 1.0, %v12160_v21  ;;  %v12162_v8 = vpop.eup %12161 }
 0xd5a   :  { %v8051_v9 = vadd.f32 1.0, %v12162_v8 }
 0xd5b   :  { %12167 = vrcp.f32 %v8281_v7 }
 0xd5c   :  { %12169 = vrcp.f32 %v8051_v9 }
 0xd61   :  { %v12164_v11 = vpop.eup %12163 }
 0xd62   :  { %v12166_v16 = vpop.eup %12165  ;;  %v8055_v17 = vmul.f32 %v12164_v11, %v8035_v49 }
 0xd63   :  { %v8289_v61 = vadd.f32 1.0, %v12166_v16 }
 0xd64   :  { %v8056_v52 = vadd.f32 %v8055_v17, %v8054_v63 }
 0xd66   :  { %12171 = vtanh.f32 %v8056_v52 }
 0xd67   :  { %12173 = vrcp.f32 %v8289_v61 }
 0xd68   :  { %v12168_v19 = vpop.eup %12167 }
 0xd69   :  { %v8293_v60 = vmul.f32 %v12168_v19, %v8273_v18  ;;  %v12170_v12 = vpop.eup %12169 }
 0xd6a   :  { %v8058_v23 = vsub.f32 1.0, %v12170_v12  ;;  %v8060_v53 = vmul.f32 %v12170_v12, %v13607_v29 }
 0xd6b   :  { %v8294_v51 = vadd.f32 %v8293_v60, %v8292_v22  ;;  %v8530_v60 = vld [vmem:[#allocation2 + $0x28] sm:$0x3] }
 0xd6d   :  { %12175 = vtanh.f32 %v8294_v51 }
 0xd73   :  { %v12172_v24 = vpop.eup %12171 }
 0xd74   :  { %v8059_v26 = vmul.f32 %v12172_v24, %v8058_v23  ;;  %v12174_v27 = vpop.eup %12173 }
 0xd75   :  { %v8296_v29 = vsub.f32 1.0, %v12174_v27  ;;  %v8298_v0 = vmul.f32 %v12174_v27, %v13629_v2  ;;  %v13716_v2 = vld [vmem:[#allocation10 + $0x40] sm:$0xff] }
 0xd76   :  { %v13675_v30 = vadd.f32 %v8060_v53, %v8059_v26  ;;  %v8768_v26 = vld [vmem:[#allocation2 + $0x56] sm:$0x3] }
 0xd78   :  { %8062 = vst.msk [vmem:[#allocation3 + $0x6] sm:$0x3] %vm360_vm13, %v13675_v30  ;;  %11747 = vmatmul.mubr.msk.f32.vlgmr.msra.gmra.mxu0 %vm234_vm11, %v13675_v30  ;;  %11754 = vmatmul.mubr.msk.f32.vlgmr.msra.gmra.mxu1 %vm234_vm11, %v13675_v30 }
 0xd79   :  { %11757 = vmatpush3.msra.mxu0 %v13683_v33  ;;  %11764 = vmatpush3.msra.mxu1 %v13686_v35 }
 0xd7a   :  { %v12176_v25 = vpop.eup %12175  ;;  %11758 = vmatprep.subr.mxu0 %v12400_v28  ;;  %11760 = vmatprep.mubr.msk.f32.mxu0 %vm12401_vm12, %v12400_v28 }
 0xd7b   :  { %11759 = vmatpush3.msra.mxu0 %v13692_v58  ;;  %11765 = vmatprep.subr.mxu1 %v12400_v28  ;;  %v8297_v34 = vmul.f32 %v12176_v25, %v8296_v29 }
 0xd7c   :  { %11761 = vmatmul.mubr.msk.f32.vlgmr.msra.gmra.mxu0 %vm234_vm11, %v13675_v30  ;;  %11766 = vmatpush3.msra.mxu1 %v13699_v59 }
 0xd7d   :  { %11770 = vmatprep.subr.mxu0 %v12400_v28  ;;  %11767 = vmatprep.mubr.msk.f32.mxu1 %vm12401_vm12, %v12400_v28  ;;  %v13705_v6 = vadd.f32 %v8298_v0, %v8297_v34 }
 0xd7e   :  { %11771 = vmatpush3.msra.mxu0 %v13707_v10  ;;  %11777 = vmatprep.subr.mxu1 %v12400_v28 }
 0xd7f   :  { %8300 = vst.msk [vmem:[#allocation3 + $0x18] sm:$0x3] %vm360_vm13, %v13705_v6  ;;  %11768 = vmatmul.mubr.msk.f32.vlgmr.msra.gmra.mxu1 %vm234_vm11, %v13705_v6  ;;  %11772 = vmatprep.subr.mxu0 %v12400_v28 }
 0xd80   :  { %11773 = vmatpush3.msra.mxu0 %v13716_v2  ;;  %11774 = vmatprep.mubr.msk.f32.mxu0 %vm12401_vm12, %v12400_v28 }
 0xd81   :  { %11778 = vmatpush3.msra.mxu1 %v13721_v36  ;;  %11775 = vmatmul.mubr.msk.f32.vlgmr.msra.gmra.mxu0 %vm234_vm11, %v13705_v6 }
 0xd82   :  { %11779 = vmatprep.subr.mxu1 %v12400_v28  ;;  %11781 = vmatprep.mubr.msk.f32.mxu1 %vm12401_vm12, %v12400_v28 }
 0xd83   :  { %11780 = vmatpush3.msra.mxu1 %v13729_v15  ;;  %11784 = vmatprep.subr.mxu0 %v12400_v28 }
 0xd84   :  { %11782 = vmatmul.mubr.msk.f32.vlgmr.msra.gmra.mxu1 %vm234_vm11, %v13705_v6  ;;  %11791 = vmatprep.subr.mxu1 %v12400_v28 }
 0xd85   :  { %11785 = vmatpush3.msra.mxu0 %v13652_v13  ;;  %11792 = vmatpush3.msra.mxu1 %v13655_v14 }
 0xd86   :  { %11786 = vmatprep.subr.mxu0 %v12400_v28  ;;  %11793 = vmatprep.subr.mxu1 %v12400_v28 }
 0xd87   :  { %11787 = vmatpush3.msra.mxu0 %v13660_v50  ;;  %11788 = vmatprep.mubr.msk.f32.mxu0 %vm12401_vm12, %v12400_v28 }
 0xd88   :  { %11794 = vmatpush3.msra.mxu1 %v13665_v42  ;;  %11795 = vmatprep.mubr.msk.f32.mxu1 %vm12401_vm12, %v12400_v28 }
 0xd89   :  { %11798 = vmatprep.subr.mxu0 %v12400_v28  ;;  %11805 = vmatprep.subr.mxu1 %v12400_v28 }
 0xe38   :  { %v8370_v32 = vpop.f32.mrf.mxu0  ;;  %v8440_v38 = vpop.f32.mrf.mxu1 }
 0xe39   :  { %v8515_v39 = vadd.f32 %v8514_v37, %v8370_v32  ;;  %v8523_v45 = vadd.f32 %v8522_v44, %v8440_v38 }
 0xe3a   :  { %v11748_v40 = vpop.f32.mrf.mxu0  ;;  %v11755_v1 = vpop.f32.mrf.mxu1 }
 0xe3b   :  { %v10689_v41 = vmul.f32 -1.442695, %v8515_v39  ;;  %v10690_v57 = vmul.f32 -1.442695, %v8523_v45  ;;  %v8990_v40 = vld [vmem:[#allocation2 + $0xa] sm:$0x3] }
 0xe3c   :  { %v8510_v4 = vpop.f32.mrf.mxu0 }
 0xe3d   :  { %12177 = vpow2.f32 %v10689_v41  ;;  %v8511_v52 = vadd.f32 %v13479_v43, %v8510_v4 }
 0xe3e   :  { %v11762_v55 = vpop.f32.mrf.mxu0 }
 0xe3f   :  { %v8608_v46 = vpop.f32.mrf.mxu1 }
 0xe40   :  { %v8753_v48 = vadd.f32 %v8752_v47, %v8608_v46  ;;  %v8998_v46 = vld [vmem:[#allocation2 + $0x1a] sm:$0x3] }
 0xe41   :  { %v11769_v62 = vpop.f32.mrf.mxu1  ;;  %v8678_v3 = vpop.f32.mrf.mxu0 }
 0xe42   :  { %v10694_v54 = vmul.f32 -1.442695, %v8753_v48  ;;  %v8761_v21 = vadd.f32 %v8760_v31, %v8678_v3  ;;  %v9228_v3 = vld [vmem:[#allocation2 + $0x34] sm:$0x3] }
 0xe43   :  { %v11776_v20 = vpop.f32.mrf.mxu0 }
 0xe44   :  { %12179 = vpow2.f32 %v10694_v54  ;;  %v8748_v56 = vpop.f32.mrf.mxu1  ;;  %v10695_v9 = vmul.f32 -1.442695, %v8761_v21 }
 0xe45   :  { %12181 = vpow2.f32 %v10690_v57  ;;  %v8749_v12 = vadd.f32 %v13485_v5, %v8748_v56 }
 0xe46   :  { %v11783_v7 = vpop.f32.mrf.mxu1 }
 0xe4a   :  { %v12178_v8 = vpop.eup %12177 }
 0xe4b   :  { %v8519_v49 = vadd.f32 1.0, %v12178_v8  ;;  %v9236_v8 = vld [vmem:[#allocation2 + $0x44] sm:$0x3] }
 0xe4d   :  { %12183 = vrcp.f32 %v8519_v49 }
 0xe4e   :  { %12185 = vpow2.f32 %v10695_v9 }
 0xe51   :  { %v12180_v11 = vpop.eup %12179 }
 0xe52   :  { %v8757_v16 = vadd.f32 1.0, %v12180_v11  ;;  %v12182_v17 = vpop.eup %12181 }
 0xe53   :  { %v8527_v63 = vadd.f32 1.0, %v12182_v17 }
 0xe54   :  { %12187 = vrcp.f32 %v8757_v16 }
 0xe55   :  { %12189 = vrcp.f32 %v8527_v63 }
 0xe5a   :  { %v12184_v61 = vpop.eup %12183 }
 0xe5b   :  { %v12186_v18 = vpop.eup %12185  ;;  %v8531_v19 = vmul.f32 %v12184_v61, %v8511_v52 }
 0xe5c   :  { %v8765_v51 = vadd.f32 1.0, %v12186_v18 }
 0xe5d   :  { %v8532_v22 = vadd.f32 %v8531_v19, %v8530_v60  ;;  %v13811_v19 = vld [vmem:[%s14027_s12] ss:$0 sm:$0xff] }
 0xe5f   :  { %12191 = vtanh.f32 %v8532_v22 }
 0xe60   :  { %12193 = vrcp.f32 %v8765_v51 }
 0xe61   :  { %v12188_v23 = vpop.eup %12187 }
 0xe62   :  { %v8769_v24 = vmul.f32 %v12188_v23, %v8749_v12  ;;  %v12190_v27 = vpop.eup %12189  ;;  %v9006_v23 = vld [vmem:[#allocation2 + $0x2a] sm:$0x3] }
 0xe63   :  { %v8534_v29 = vsub.f32 1.0, %v12190_v27  ;;  %v8536_v34 = vmul.f32 %v12190_v27, %v13675_v30 }
 0xe64   :  { %v8770_v53 = vadd.f32 %v8769_v24, %v8768_v26 }
 0xe66   :  { %12195 = vtanh.f32 %v8770_v53  ;;  %v13817_v53 = vld [vmem:[%s14027_s12 + $0x1] ss:$0 sm:$0xff] }
 0xe6c   :  { %v12192_v25 = vpop.eup %12191 }
 0xe6d   :  { %v8535_v43 = vmul.f32 %v12192_v25, %v8534_v29  ;;  %v12194_v0 = vpop.eup %12193 }
 0xe6e   :  { %v8772_v5 = vsub.f32 1.0, %v12194_v0  ;;  %v8774_v38 = vmul.f32 %v12194_v0, %v13705_v6 }
 0xe6f   :  { %v13751_v32 = vadd.f32 %v8536_v34, %v8535_v43  ;;  %v9244_v43 = vld [vmem:[#allocation2 + $0x54] sm:$0x3] }
 0xe71   :  { %8538 = vst.msk [vmem:[#allocation3 + $0x8] sm:$0x3] %vm360_vm13, %v13751_v32  ;;  %11789 = vmatmul.mubr.msk.f32.vlgmr.msra.gmra.mxu0 %vm234_vm11, %v13751_v32  ;;  %11796 = vmatmul.mubr.msk.f32.vlgmr.msra.gmra.mxu1 %vm234_vm11, %v13751_v32 }
 0xe72   :  { %11799 = vmatpush3.msra.mxu0 %v13683_v33  ;;  %11806 = vmatpush3.msra.mxu1 %v13686_v35 }
 0xe73   :  { %v12196_v37 = vpop.eup %12195  ;;  %11800 = vmatprep.subr.mxu0 %v12400_v28  ;;  %11802 = vmatprep.mubr.msk.f32.mxu0 %vm12401_vm12, %v12400_v28 }
 0xe74   :  { %11801 = vmatpush3.msra.mxu0 %v13692_v58  ;;  %11807 = vmatprep.subr.mxu1 %v12400_v28  ;;  %v8773_v30 = vmul.f32 %v12196_v37, %v8772_v5 }
 0xe75   :  { %11803 = vmatmul.mubr.msk.f32.vlgmr.msra.gmra.mxu0 %vm234_vm11, %v13751_v32  ;;  %11808 = vmatpush3.msra.mxu1 %v13699_v59 }
 0xe76   :  { %11812 = vmatprep.subr.mxu0 %v12400_v28  ;;  %11809 = vmatprep.mubr.msk.f32.mxu1 %vm12401_vm12, %v12400_v28  ;;  %v13773_v39 = vadd.f32 %v8774_v38, %v8773_v30 }
 0xe77   :  { %11813 = vmatpush3.msra.mxu0 %v13707_v10  ;;  %11819 = vmatprep.subr.mxu1 %v12400_v28 }
 0xe78   :  { %8776 = vst.msk [vmem:[#allocation3 + $0x16] sm:$0x3] %vm360_vm13, %v13773_v39  ;;  %11810 = vmatmul.mubr.msk.f32.vlgmr.msra.gmra.mxu1 %vm234_vm11, %v13773_v39  ;;  %11814 = vmatprep.subr.mxu0 %v12400_v28 }
 0xe79   :  { %11815 = vmatpush3.msra.mxu0 %v13716_v2  ;;  %11816 = vmatprep.mubr.msk.f32.mxu0 %vm12401_vm12, %v12400_v28 }
 0xe7a   :  { %11820 = vmatpush3.msra.mxu1 %v13721_v36  ;;  %11817 = vmatmul.mubr.msk.f32.vlgmr.msra.gmra.mxu0 %vm234_vm11, %v13773_v39 }
 0xe7b   :  { %11821 = vmatprep.subr.mxu1 %v12400_v28  ;;  %11823 = vmatprep.mubr.msk.f32.mxu1 %vm12401_vm12, %v12400_v28 }
 0xe7c   :  { %11822 = vmatpush3.msra.mxu1 %v13729_v15  ;;  %11826 = vmatprep.subr.mxu0 %v12400_v28 }
 0xe7d   :  { %11824 = vmatmul.mubr.msk.f32.vlgmr.msra.gmra.mxu1 %vm234_vm11, %v13773_v39  ;;  %11833 = vmatprep.subr.mxu1 %v12400_v28 }
 0xe7e   :  { %11827 = vmatpush3.msra.mxu0 %v13652_v13  ;;  %11834 = vmatpush3.msra.mxu1 %v13655_v14 }
 0xe7f   :  { %11828 = vmatprep.subr.mxu0 %v12400_v28  ;;  %11835 = vmatprep.subr.mxu1 %v12400_v28 }
 0xe80   :  { %11829 = vmatpush3.msra.mxu0 %v13660_v50  ;;  %11830 = vmatprep.mubr.msk.f32.mxu0 %vm12401_vm12, %v12400_v28 }
 0xe81   :  { %11836 = vmatpush3.msra.mxu1 %v13665_v42  ;;  %11837 = vmatprep.mubr.msk.f32.mxu1 %vm12401_vm12, %v12400_v28 }
 0xe82   :  { %11840 = vmatprep.subr.mxu0 %v12400_v28  ;;  %11847 = vmatprep.subr.mxu1 %v12400_v28 }
 0xf31   :  { %v8846_v6 = vpop.f32.mrf.mxu0  ;;  %v8916_v1 = vpop.f32.mrf.mxu1 }
 0xf32   :  { %v8991_v41 = vadd.f32 %v8990_v40, %v8846_v6  ;;  %v8999_v48 = vadd.f32 %v8998_v46, %v8916_v1 }
 0xf33   :  { %v11790_v4 = vpop.f32.mrf.mxu0  ;;  %v11797_v44 = vpop.f32.mrf.mxu1 }
 0xf34   :  { %v10699_v55 = vmul.f32 -1.442695, %v8991_v41  ;;  %v10700_v31 = vmul.f32 -1.442695, %v8999_v48  ;;  %v9474_v48 = vld [vmem:[#allocation2 + $0x1c] sm:$0x3] }
 0xf35   :  { %v8986_v45 = vpop.f32.mrf.mxu0 }
 0xf36   :  { %12197 = vpow2.f32 %v10699_v55  ;;  %v8987_v60 = vadd.f32 %v13811_v19, %v8986_v45 }
 0xf37   :  { %v11804_v47 = vpop.f32.mrf.mxu0 }
 0xf38   :  { %v9084_v62 = vpop.f32.mrf.mxu1 }
 0xf39   :  { %v9229_v54 = vadd.f32 %v9228_v3, %v9084_v62 }
 0xf3a   :  { %v11811_v57 = vpop.f32.mrf.mxu1  ;;  %v9154_v20 = vpop.f32.mrf.mxu0 }
 0xf3b   :  { %v10704_v56 = vmul.f32 -1.442695, %v9229_v54  ;;  %v9237_v9 = vadd.f32 %v9236_v8, %v9154_v20  ;;  %v9704_v54 = vld [vmem:[#allocation2 + $0x32] sm:$0x3] }
 0xf3c   :  { %v11818_v21 = vpop.f32.mrf.mxu0 }
 0xf3d   :  { %12199 = vpow2.f32 %v10704_v56  ;;  %v9224_v7 = vpop.f32.mrf.mxu1  ;;  %v10705_v16 = vmul.f32 -1.442695, %v9237_v9  ;;  %v9712_v9 = vld [vmem:[#allocation2 + $0x42] sm:$0x3] }
 0xf3e   :  { %12201 = vpow2.f32 %v10700_v31  ;;  %v9225_v27 = vadd.f32 %v13817_v53, %v9224_v7 }
 0xf3f   :  { %v11825_v49 = vpop.f32.mrf.mxu1 }
 0xf43   :  { %v12198_v11 = vpop.eup %12197 }
 0xf44   :  { %v8995_v17 = vadd.f32 1.0, %v12198_v11 }
 0xf46   :  { %12203 = vrcp.f32 %v8995_v17 }
 0xf47   :  { %12205 = vpow2.f32 %v10705_v16 }
 0xf4a   :  { %v12200_v63 = vpop.eup %12199 }
 0xf4b   :  { %v9233_v52 = vadd.f32 1.0, %v12200_v63  ;;  %v12202_v61 = vpop.eup %12201 }
 0xf4c   :  { %v9003_v18 = vadd.f32 1.0, %v12202_v61 }
 0xf4d   :  { %12207 = vrcp.f32 %v9233_v52 }
 0xf4e   :  { %12209 = vrcp.f32 %v9003_v18 }
 0xf53   :  { %v12204_v22 = vpop.eup %12203 }
 0xf54   :  { %v12206_v51 = vpop.eup %12205  ;;  %v9007_v12 = vmul.f32 %v12204_v22, %v8987_v60 }
 0xf55   :  { %v9241_v26 = vadd.f32 1.0, %v12206_v51 }
 0xf56   :  { %v9008_v24 = vadd.f32 %v9007_v12, %v9006_v23 }
 0xf58   :  { %12211 = vtanh.f32 %v9008_v24  ;;  %v9482_v24 = vld [vmem:[#allocation2 + $0x2c] sm:$0x3] }
 0xf59   :  { %12213 = vrcp.f32 %v9241_v26 }
 0xf5a   :  { %v12208_v29 = vpop.eup %12207 }
 0xf5b   :  { %v9245_v25 = vmul.f32 %v12208_v29, %v9225_v27  ;;  %v12210_v0 = vpop.eup %12209 }
 0xf5c   :  { %v9010_v5 = vsub.f32 1.0, %v12210_v0  ;;  %v9012_v38 = vmul.f32 %v12210_v0, %v13751_v32 }
 0xf5d   :  { %v9246_v34 = vadd.f32 %v9245_v25, %v9244_v43 }
 0xf5f   :  { %12215 = vtanh.f32 %v9246_v34  ;;  %v9720_v34 = vld [vmem:[#allocation2 + $0x52] sm:$0x3] }
 0xf65   :  { %v12212_v37 = vpop.eup %12211 }
 0xf66   :  { %v9011_v30 = vmul.f32 %v12212_v37, %v9010_v5  ;;  %v12214_v6 = vpop.eup %12213 }
 0xf67   :  { %v9248_v1 = vsub.f32 1.0, %v12214_v6  ;;  %v9250_v4 = vmul.f32 %v12214_v6, %v13773_v39 }
 0xf68   :  { %v13821_v40 = vadd.f32 %v9012_v38, %v9011_v30 }
 0xf6a   :  { %9014 = vst.msk [vmem:[#allocation3 + $0xa] sm:$0x3] %vm360_vm13, %v13821_v40  ;;  %11831 = vmatmul.mubr.msk.f32.vlgmr.msra.gmra.mxu0 %vm234_vm11, %v13821_v40  ;;  %11838 = vmatmul.mubr.msk.f32.vlgmr.msra.gmra.mxu1 %vm234_vm11, %v13821_v40 }
 0xf6b   :  { %11841 = vmatpush3.msra.mxu0 %v13683_v33  ;;  %11848 = vmatpush3.msra.mxu1 %v13686_v35 }
 0xf6c   :  { %v12216_v41 = vpop.eup %12215  ;;  %11842 = vmatprep.subr.mxu0 %v12400_v28  ;;  %11844 = vmatprep.mubr.msk.f32.mxu0 %vm12401_vm12, %v12400_v28 }
 0xf6d   :  { %11843 = vmatpush3.msra.mxu0 %v13692_v58  ;;  %11849 = vmatprep.subr.mxu1 %v12400_v28  ;;  %v9249_v32 = vmul.f32 %v12216_v41, %v9248_v1 }
 0xf6e   :  { %11845 = vmatmul.mubr.msk.f32.vlgmr.msra.gmra.mxu0 %vm234_vm11, %v13821_v40  ;;  %11850 = vmatpush3.msra.mxu1 %v13699_v59 }
 0xf6f   :  { %11854 = vmatprep.subr.mxu0 %v12400_v28  ;;  %11851 = vmatprep.mubr.msk.f32.mxu1 %vm12401_vm12, %v12400_v28  ;;  %v13843_v44 = vadd.f32 %v9250_v4, %v9249_v32 }
 0xf70   :  { %11855 = vmatpush3.msra.mxu0 %v13707_v10  ;;  %11861 = vmatprep.subr.mxu1 %v12400_v28 }
 0xf71   :  { %9252 = vst.msk [vmem:[#allocation3 + $0x14] sm:$0x3] %vm360_vm13, %v13843_v44  ;;  %11852 = vmatmul.mubr.msk.f32.vlgmr.msra.gmra.mxu1 %vm234_vm11, %v13843_v44  ;;  %11856 = vmatprep.subr.mxu0 %v12400_v28 }
 0xf72   :  { %11857 = vmatpush3.msra.mxu0 %v13716_v2  ;;  %11858 = vmatprep.mubr.msk.f32.mxu0 %vm12401_vm12, %v12400_v28 }
 0xf73   :  { %11862 = vmatpush3.msra.mxu1 %v13721_v36  ;;  %11859 = vmatmul.mubr.msk.f32.vlgmr.msra.gmra.mxu0 %vm234_vm11, %v13843_v44 }
 0xf74   :  { %11863 = vmatprep.subr.mxu1 %v12400_v28  ;;  %11865 = vmatprep.mubr.msk.f32.mxu1 %vm12401_vm12, %v12400_v28 }
 0xf75   :  { %11864 = vmatpush3.msra.mxu1 %v13729_v15  ;;  %11868 = vmatprep.subr.mxu0 %v12400_v28 }
 0xf76   :  { %11866 = vmatmul.mubr.msk.f32.vlgmr.msra.gmra.mxu1 %vm234_vm11, %v13843_v44  ;;  %11875 = vmatprep.subr.mxu1 %v12400_v28 }
 0xf77   :  { %11869 = vmatpush3.msra.mxu0 %v13652_v13  ;;  %11876 = vmatpush3.msra.mxu1 %v13655_v14  ;;  %v9466_v14 = vld [vmem:[#allocation2 + $0xc] sm:$0x3] }
 0xf78   :  { %11870 = vmatprep.subr.mxu0 %v12400_v28  ;;  %11877 = vmatprep.subr.mxu1 %v12400_v28 }
 0xf79   :  { %11871 = vmatpush3.msra.mxu0 %v13660_v50  ;;  %11872 = vmatprep.mubr.msk.f32.mxu0 %vm12401_vm12, %v12400_v28 }
 0xf7a   :  { %11878 = vmatpush3.msra.mxu1 %v13665_v42  ;;  %11879 = vmatprep.mubr.msk.f32.mxu1 %vm12401_vm12, %v12400_v28 }
 0xf7b   :  { %11882 = vmatprep.subr.mxu0 %v12400_v28  ;;  %11889 = vmatprep.subr.mxu1 %v12400_v28 }
0x102a   :  { %v9322_v13 = vpop.f32.mrf.mxu0  ;;  %v9392_v39 = vpop.f32.mrf.mxu1 }
0x102b   :  { %v9467_v55 = vadd.f32 %v9466_v14, %v9322_v13  ;;  %v9475_v3 = vadd.f32 %v9474_v48, %v9392_v39 }
0x102c   :  { %v11832_v45 = vpop.f32.mrf.mxu0  ;;  %v11839_v46 = vpop.f32.mrf.mxu1 }
0x102d   :  { %v10709_v47 = vmul.f32 -1.442695, %v9467_v55  ;;  %v10710_v21 = vmul.f32 -1.442695, %v9475_v3  ;;  %v9950_v46 = vld [vmem:[#allocation2 + $0x1e] sm:$0x3] }
0x102e   :  { %v9462_v50 = vpop.f32.mrf.mxu0 }
0x102f   :  { %12217 = vpow2.f32 %v10709_v47  ;;  %v9463_v22 = vadd.f32 %v13811_v19, %v9462_v50 }
0x1030   :  { %v11846_v62 = vpop.f32.mrf.mxu0 }
0x1031   :  { %v9560_v42 = vpop.f32.mrf.mxu1  ;;  %v10180_v62 = vld [vmem:[#allocation2 + $0x30] sm:$0x3] }
0x1032   :  { %v9705_v57 = vadd.f32 %v9704_v54, %v9560_v42 }
0x1033   :  { %v11853_v20 = vpop.f32.mrf.mxu1  ;;  %v9630_v56 = vpop.f32.mrf.mxu0 }
0x1034   :  { %v10714_v31 = vmul.f32 -1.442695, %v9705_v57  ;;  %v9713_v49 = vadd.f32 %v9712_v9, %v9630_v56 }
0x1035   :  { %v11860_v7 = vpop.f32.mrf.mxu0 }
0x1036   :  { %12219 = vpow2.f32 %v10714_v31  ;;  %v9700_v8 = vpop.f32.mrf.mxu1  ;;  %v10715_v17 = vmul.f32 -1.442695, %v9713_v49  ;;  %v10188_v31 = vld [vmem:[#allocation2 + $0x40] sm:$0x3] }
0x1037   :  { %12221 = vpow2.f32 %v10710_v21  ;;  %v9701_v29 = vadd.f32 %v13817_v53, %v9700_v8 }
0x1038   :  { %v11867_v11 = vpop.f32.mrf.mxu1 }
0x103c   :  { %v12218_v16 = vpop.eup %12217 }
0x103d   :  { %v9471_v63 = vadd.f32 1.0, %v12218_v16 }
0x103f   :  { %12223 = vrcp.f32 %v9471_v63 }
0x1040   :  { %12225 = vpow2.f32 %v10715_v17 }
0x1043   :  { %v12220_v52 = vpop.eup %12219 }
0x1044   :  { %v9709_v61 = vadd.f32 1.0, %v12220_v52  ;;  %v12222_v18 = vpop.eup %12221 }
0x1045   :  { %v9479_v60 = vadd.f32 1.0, %v12222_v18 }
0x1046   :  { %12227 = vrcp.f32 %v9709_v61 }
0x1047   :  { %12229 = vrcp.f32 %v9479_v60 }
0x104c   :  { %v12224_v51 = vpop.eup %12223 }
0x104d   :  { %v12226_v12 = vpop.eup %12225  ;;  %v9483_v23 = vmul.f32 %v12224_v51, %v9463_v22  ;;  %v9958_v22 = vld [vmem:[#allocation2 + $0x2e] sm:$0x3] }
0x104e   :  { %v9717_v27 = vadd.f32 1.0, %v12226_v12 }
0x104f   :  { %v9484_v26 = vadd.f32 %v9483_v23, %v9482_v24  ;;  %v13945_v23 = vpop.permute.xlu0 %10238  ;;  %v13947_v24 = vpop.permute.xlu1 %10241 }
0x1050   :  { %vm10261_vm14 = vcmp.eq.s32.totalorder %v13945_v23, 1  ;;  %vm10262_vm0 = vcmp.eq.s32.totalorder %v13947_v24, 1 }
0x1051   :  { %12231 = vtanh.f32 %v9484_v26 }
0x1052   :  { %12233 = vrcp.f32 %v9717_v27 }
0x1053   :  { %v12228_v25 = vpop.eup %12227 }
0x1054   :  { %v9721_v43 = vmul.f32 %v12228_v25, %v9701_v29  ;;  %v12230_v5 = vpop.eup %12229  ;;  %v10196_v25 = vld [vmem:[#allocation2 + $0x50] sm:$0x3] }
0x1055   :  { %v9486_v37 = vsub.f32 1.0, %v12230_v5  ;;  %v9488_v6 = vmul.f32 %v12230_v5, %v13821_v40 }
0x1056   :  { %v9722_v0 = vadd.f32 %v9721_v43, %v9720_v34  ;;  %v13950_v34 = vpop.permute.xlu1 %10247 }
0x1057   :  { %vm10264_vm4 = vcmp.eq.s32.totalorder %v13950_v34, 1 }
0x1058   :  { %12235 = vtanh.f32 %v9722_v0 }
0x105e   :  { %v12232_v30 = vpop.eup %12231 }
0x105f   :  { %v9487_v38 = vmul.f32 %v12232_v30, %v9486_v37  ;;  %v12234_v1 = vpop.eup %12233 }
0x1060   :  { %v9724_v32 = vsub.f32 1.0, %v12234_v1  ;;  %v9726_v13 = vmul.f32 %v12234_v1, %v13843_v44 }
0x1061   :  { %v13881_v41 = vadd.f32 %v9488_v6, %v9487_v38  ;;  %v13954_v38 = vpop.permute.xlu1 %10253 }
0x1062   :  { %vm10266_vm1 = vcmp.eq.s32.totalorder %v13954_v38, 1 }
0x1063   :  { %9490 = vst.msk [vmem:[#allocation3 + $0xc] sm:$0x3] %vm360_vm13, %v13881_v41  ;;  %11873 = vmatmul.mubr.msk.f32.vlgmr.msra.gmra.mxu0 %vm234_vm11, %v13881_v41  ;;  %11880 = vmatmul.mubr.msk.f32.vlgmr.msra.gmra.mxu1 %vm234_vm11, %v13881_v41 }
0x1064   :  { %11883 = vmatpush3.msra.mxu0 %v13683_v33  ;;  %11890 = vmatpush3.msra.mxu1 %v13686_v35  ;;  %v10324_v35 = vld [vmem:[%s14028_s13 + $0x8] sm:$0xff] }
0x1065   :  { %v12236_v4 = vpop.eup %12235  ;;  %11884 = vmatprep.subr.mxu0 %v12400_v28  ;;  %11886 = vmatprep.mubr.msk.f32.mxu0 %vm12401_vm12, %v12400_v28 }
0x1066   :  { %v9725_v40 = vmul.f32 %v12236_v4, %v9724_v32  ;;  %11885 = vmatpush3.msra.mxu0 %v13692_v58  ;;  %11891 = vmatprep.subr.mxu1 %v12400_v28  ;;  %v10323_v58 = vld [vmem:[%s14028_s13] sm:$0xff] }
0x1067   :  { %11887 = vmatmul.mubr.msk.f32.vlgmr.msra.gmra.mxu0 %vm234_vm11, %v13881_v41  ;;  %11892 = vmatpush3.msra.mxu1 %v13699_v59  ;;  %v10326_v59 = vld [vmem:[%s14029_s14 + $0x8] sm:$0xff]  ;;  %v10221_v4 = vld [vmem:[#allocation3] sm:$0x3] }
0x1068   :  { %11896 = vmatprep.subr.mxu0 %v12400_v28  ;;  %11893 = vmatprep.mubr.msk.f32.mxu1 %vm12401_vm12, %v12400_v28  ;;  %v13903_v33 = vadd.f32 %v9726_v13, %v9725_v40  ;;  %v10222_v40 = vld [vmem:[#allocation3 + $0x2] sm:$0x3]  ;;  %v10226_v13 = vld [vmem:[#allocation3 + $0xa] sm:$0x3] }
0x1069   :  { %11897 = vmatpush3.msra.mxu0 %v13707_v10  ;;  %11903 = vmatprep.subr.mxu1 %v12400_v28  ;;  %v10325_v10 = vld [vmem:[%s14029_s14] sm:$0xff] }
0x106a   :  { %9728 = vst.msk [vmem:[#allocation3 + $0x12] sm:$0x3] %vm360_vm13, %v13903_v33  ;;  %11894 = vmatmul.mubr.msk.f32.vlgmr.msra.gmra.mxu1 %vm234_vm11, %v13903_v33  ;;  %11898 = vmatprep.subr.mxu0 %v12400_v28 }
0x106b   :  { %11899 = vmatpush3.msra.mxu0 %v13716_v2  ;;  %11900 = vmatprep.mubr.msk.f32.mxu0 %vm12401_vm12, %v12400_v28 }
0x106c   :  { %11904 = vmatpush3.msra.mxu1 %v13721_v36  ;;  %11901 = vmatmul.mubr.msk.f32.vlgmr.msra.gmra.mxu0 %vm234_vm11, %v13903_v33  ;;  %v9942_v36 = vld [vmem:[#allocation2 + $0xe] sm:$0x3] }
0x106d   :  { %11905 = vmatprep.subr.mxu1 %v12400_v28  ;;  %11907 = vmatprep.mubr.msk.f32.mxu1 %vm12401_vm12, %v12400_v28 }
0x106e   :  { %11906 = vmatpush3.msra.mxu1 %v13729_v15  ;;  %11910 = vmatprep.subr.mxu0 %v12400_v28 }
0x106f   :  { %11908 = vmatmul.mubr.msk.f32.vlgmr.msra.gmra.mxu1 %vm234_vm11, %v13903_v33  ;;  %11917 = vmatprep.subr.mxu1 %v12400_v28 }
0x1070   :  { %11921 = vmatprep.mubr.msk.f32.mxu1 %vm12401_vm12, %v12400_v28  ;;  %11914 = vmatprep.mubr.msk.f32.mxu0 %vm12401_vm12, %v12400_v28 }
0x1071   :  { %11918 = vmatpush3.msra.mxu1 %v10324_v35  ;;  %11911 = vmatpush3.msra.mxu0 %v10326_v59 }
0x1072   :  { %11919 = vmatprep.subr.mxu1 %v12400_v28  ;;  %11912 = vmatprep.subr.mxu0 %v12400_v28 }
0x1073   :  { %11920 = vmatpush3.msra.mxu1 %v10323_v58  ;;  %11913 = vmatpush3.msra.mxu0 %v10325_v10  ;;  %v10260_v58 = vpop.permute.xlu1 %10259  ;;  %v10225_v10 = vld [vmem:[#allocation3 + $0x8] sm:$0x3] }
0x1074   :  { %vm10268_vm5 = vcmp.eq.s32.totalorder %v10260_v58, 1 }
0x1123   :  { %v9798_v2 = vpop.f32.mrf.mxu0  ;;  %v9868_v15 = vpop.f32.mrf.mxu1 }
0x1124   :  { %v9943_v44 = vadd.f32 %v9942_v36, %v9798_v2  ;;  %v9951_v50 = vadd.f32 %v9950_v46, %v9868_v15  ;;  %v10269_v36 = vsel %vm10261_vm14, %v10221_v4, -1000000.0  ;;  %v10270_v15 = vsel %vm10262_vm0, %v10222_v40, -1000000.0 }
0x1125   :  { %v11874_v14 = vpop.f32.mrf.mxu0  ;;  %v11881_v39 = vpop.f32.mrf.mxu1 }
0x1126   :  { %v10719_v55 = vmul.f32 -1.442695, %v9943_v44  ;;  %v10720_v28 = vmul.f32 -1.442695, %v9951_v50  ;;  %v10274_v44 = vsel %vm10266_vm1, %v10226_v13, -1000000.0 }
0x1127   :  { %v9938_v45 = vpop.f32.mrf.mxu0 }
0x1128   :  { %12237 = vpow2.f32 %v10719_v55  ;;  %v9939_v52 = vadd.f32 %v13811_v19, %v9938_v45  ;;  %v10245_v19 = vpop.permute.xlu0 %10244  ;;  %v10223_v55 = vld [vmem:[#allocation3 + $0x4] sm:$0x3]  ;;  %v10224_v45 = vld [vmem:[#allocation3 + $0x6] sm:$0x3] }
0x1129   :  { %v11888_v47 = vpop.f32.mrf.mxu0  ;;  %vm10263_vm15 = vcmp.eq.s32.totalorder %v10245_v19, 1 }
0x112a   :  { %v10036_v48 = vpop.f32.mrf.mxu1 }
0x112b   :  { %v10181_v3 = vadd.f32 %v10180_v62, %v10036_v48  ;;  %v10277_v48 = vsel %vm360_vm13, %v10269_v36, -inf  ;;  %v10278_v62 = vsel %vm360_vm13, %v10270_v15, -inf }
0x112c   :  { %v11895_v42 = vpop.f32.mrf.mxu1  ;;  %v10106_v54 = vpop.f32.mrf.mxu0 }
0x112d   :  { %v10724_v57 = vmul.f32 -1.442695, %v10181_v3  ;;  %v10189_v21 = vadd.f32 %v10188_v31, %v10106_v54  ;;  %v13952_v5 = vpop.permute.xlu0 %10250  ;;  %v10283_v3 = vsel %vm360_vm13, %v10274_v44, -inf  ;;  %v10272_v42 = vsel %vm10264_vm4, %v10224_v45, -1000000.0 }
0x112e   :  { %v11902_v20 = vpop.f32.mrf.mxu0  ;;  %vm10265_vm2 = vcmp.eq.s32.totalorder %v13952_v5, 1  ;;  %v10294_v54 = vld [vmem:[#allocation3 + $0x14] sm:$0x3] }
0x112f   :  { %12239 = vpow2.f32 %v10724_v57  ;;  %v10176_v56 = vpop.f32.mrf.mxu1  ;;  %v10725_v9 = vmul.f32 -1.442695, %v10189_v21  ;;  %v10273_v46 = vsel %vm10265_vm2, %v10225_v10, -1000000.0  ;;  %v10284_v21 = vmax.f32 %v10278_v62, %v10283_v3 }
0x1130   :  { %12241 = vpow2.f32 %v10720_v28  ;;  %v10177_v26 = vadd.f32 %v13817_v53, %v10176_v56  ;;  %v10281_v28 = vsel %vm360_vm13, %v10273_v46, -inf  ;;  %v10298_v56 = vld [vmem:[#allocation3 + $0x1c] sm:$0x3] }
0x1131   :  { %v11909_v7 = vpop.f32.mrf.mxu1  ;;  %v10257_v35 = vpop.permute.xlu0 %10256 }
0x1132   :  { %vm10267_vm3 = vcmp.eq.s32.totalorder %v10257_v35, 1  ;;  %v10293_v7 = vld [vmem:[#allocation3 + $0x12] sm:$0x3] }
0x1135   :  { %v12238_v8 = vpop.eup %12237 }
0x1136   :  { %v9947_v49 = vadd.f32 1.0, %v12238_v8  ;;  %v10295_v8 = vld [vmem:[#allocation3 + $0x16] sm:$0x3] }
0x1138   :  { %12243 = vrcp.f32 %v9947_v49  ;;  %v10280_v49 = vsel %vm360_vm13, %v10272_v42, -inf }
0x1139   :  { %12245 = vpow2.f32 %v10725_v9 }
0x113c   :  { %v12240_v11 = vpop.eup %12239 }
0x113d   :  { %v10185_v16 = vadd.f32 1.0, %v12240_v11  ;;  %v12242_v17 = vpop.eup %12241 }
0x113e   :  { %v9955_v63 = vadd.f32 1.0, %v12242_v17  ;;  %v10282_v17 = vmax.f32 %v10277_v48, %v10281_v28 }
0x113f   :  { %12247 = vrcp.f32 %v10185_v16  ;;  %v10302_v16 = vsel %vm10263_vm15, %v10294_v54, -1000000.0 }
0x1140   :  { %12249 = vrcp.f32 %v9955_v63 }
0x1145   :  { %v12244_v61 = vpop.eup %12243 }
0x1146   :  { %v12246_v18 = vpop.eup %12245  ;;  %v9959_v60 = vmul.f32 %v12244_v61, %v9939_v52  ;;  %v10296_v61 = vld [vmem:[#allocation3 + $0x18] sm:$0x3] }
0x1147   :  { %v10193_v12 = vadd.f32 1.0, %v12246_v18  ;;  %v10297_v18 = vld [vmem:[#allocation3 + $0x1a] sm:$0x3] }
0x1148   :  { %v9960_v51 = vadd.f32 %v9959_v60, %v9958_v22  ;;  %v10299_v60 = vld [vmem:[#allocation3 + $0x1e] sm:$0x3]  ;;  %v10301_v22 = vsel %vm10262_vm0, %v10293_v7, -1000000.0 }
0x1149   :  { %v10307_v19 = vsel %vm10268_vm5, %v10299_v60, -1000000.0 }
0x114a   :  { %12251 = vtanh.f32 %v9960_v51  ;;  %v10303_v51 = vsel %vm10264_vm4, %v10295_v8, -1000000.0 }
0x114b   :  { %12253 = vrcp.f32 %v10193_v12  ;;  %v10306_v12 = vsel %vm10267_vm3, %v10298_v56, -1000000.0  ;;  %v10311_v34 = vsel %vm360_vm13, %v10303_v51, -inf }
0x114c   :  { %v12248_v27 = vpop.eup %12247 }
0x114d   :  { %v10197_v29 = vmul.f32 %v12248_v27, %v10177_v26  ;;  %v12250_v0 = vpop.eup %12249  ;;  %v10289_v26 = vmax.f32 %v10282_v17, %v10284_v21 }
0x114e   :  { %v9962_v37 = vsub.f32 1.0, %v12250_v0  ;;  %v9964_v6 = vmul.f32 %v12250_v0, %v13881_v41  ;;  %v10227_v41 = vld [vmem:[#allocation3 + $0xc] sm:$0x3] }
0x114f   :  { %v10198_v43 = vadd.f32 %v10197_v29, %v10196_v25  ;;  %v10275_v47 = vsel %vm10267_vm3, %v10227_v41, -1000000.0  ;;  %v10310_v29 = vsel %vm360_vm13, %v10302_v16, -inf  ;;  %v10304_v25 = vsel %vm10265_vm2, %v10296_v61, -1000000.0 }
0x1150   :  { %v10285_v20 = vsel %vm360_vm13, %v10275_v47, -inf  ;;  %v10312_v38 = vsel %vm360_vm13, %v10304_v25, -inf }
0x1151   :  { %12255 = vtanh.f32 %v10198_v43  ;;  %v10305_v43 = vsel %vm10266_vm1, %v10297_v18, -1000000.0 }
0x1157   :  { %v12252_v30 = vpop.eup %12251 }
0x1158   :  { %v9963_v1 = vmul.f32 %v12252_v30, %v9962_v37  ;;  %v12254_v53 = vpop.eup %12253  ;;  %v10309_v37 = vsel %vm360_vm13, %v10301_v22, -inf  ;;  %v10316_v30 = vsel %vm360_vm13, %v10306_v12, -inf }
0x1159   :  { %v10200_v59 = vsub.f32 1.0, %v12254_v53  ;;  %v10202_v14 = vmul.f32 %v12254_v53, %v13903_v33  ;;  %v10271_v33 = vsel %vm10263_vm15, %v10223_v55, -1000000.0  ;;  %v10314_v53 = vsel %vm360_vm13, %v10305_v43, -inf }
0x115a   :  { %v9965_v32 = vadd.f32 %v9964_v6, %v9963_v1  ;;  %v10279_v9 = vsel %vm360_vm13, %v10271_v33, -inf  ;;  %v10317_v1 = vmax.f32 %v10310_v29, %v10316_v30  ;;  %v10315_v40 = vmax.f32 %v10309_v37, %v10314_v53 }
0x115b   :  { %v10286_v63 = vmax.f32 %v10279_v9, %v10285_v20 }
0x115c   :  { %9966 = vst.msk [vmem:[#allocation3 + $0xe] sm:$0x3] %vm360_vm13, %v9965_v32  ;;  %v10318_v32 = vsel %vm360_vm13, %v10307_v19, -inf }
0x115d   :  { %v10319_v13 = vmax.f32 %v10311_v34, %v10318_v32 }
0x115e   :  { %v12256_v2 = vpop.eup %12255 }
0x115f   :  { %v10201_v39 = vmul.f32 %v12256_v2, %v10200_v59  ;;  %v10321_v58 = vmax.f32 %v10317_v1, %v10319_v13  ;;  %v10728_v2 = vld [vmem:[%s14030_s15] ss:$0 sm:$0xff] }
0x1161   :  { %v10203_v50 = vadd.f32 %v10202_v14, %v10201_v39 }
0x1163   :  { %10204 = vst.msk [vmem:[#allocation3 + $0x10] sm:$0x3] %vm360_vm13, %v10203_v50  ;;  %v10228_v57 = vld [vmem:[#allocation3 + $0xe] sm:$0x3] }
0x1164   :  { %v10276_v31 = vsel %vm10268_vm5, %v10228_v57, -1000000.0 }
0x1165   :  { %v10287_v11 = vsel %vm360_vm13, %v10276_v31, -inf }
0x1166   :  { %v10288_v52 = vmax.f32 %v10280_v49, %v10287_v11 }
0x1168   :  { %v10290_v27 = vmax.f32 %v10286_v63, %v10288_v52 }
0x116a   :  { %v10291_v0 = vmax.f32 %v10289_v26, %v10290_v27  ;;  %v10292_v24 = vld [vmem:[#allocation3 + $0x10] sm:$0x3] }
0x116b   :  { %v10300_v6 = vsel %vm10261_vm14, %v10292_v24, -1000000.0 }
0x116c   :  { %11922 = vmatmul.mubr.msk.f32.vlgmr.msra.gmra.mxu1 %vm234_vm11, %v10291_v0  ;;  %v10308_v5 = vsel %vm360_vm13, %v10300_v6, -inf }
0x116d   :  { %v10313_v4 = vmax.f32 %v10308_v5, %v10312_v38 }
0x116f   :  { %v10320_v35 = vmax.f32 %v10313_v4, %v10315_v40 }
0x1171   :  { %v10322_v59 = vmax.f32 %v10320_v35, %v10321_v58 }
0x1173   :  { %11915 = vmatmul.mubr.msk.f32.vlgmr.msra.gmra.mxu0 %vm234_vm11, %v10322_v59 }
0x122c   :  { %v10469_v23 = vpop.f32.mrf.mxu1 }
0x122e   :  { %v11923_v10 = vpop.f32.mrf.mxu1 }
0x1233   :  { %v10396_v41 = vpop.f32.mrf.mxu0 }
0x1234   :  { %v10470_v36 = vadd.f32 %v10469_v23, %v10396_v41 }
0x1235   :  { %v11916_v15 = vpop.f32.mrf.mxu0 }
0x1236   :  { %v10480_v44 = vadd.f32 %v10728_v2, %v10470_v36 }
0x1238   :  { %10482 = vst.msk [vmem:[#allocation12] sm:$0x3] %vm10481_vm6, %v10480_v44 }
0x1239   :  { %12376 = shalt.err (!%p12373_p10)
}
0x123a   :  { %10492 = dma.vmem_to_hbm [thread:$0]  %s10490_s21, 32, %s14031_s16, [#allocation6]  }
0x123b   :  { %12391 = dma.done.wait [#allocation6], 32  }
0x123c   :  { %12392 = vsyncadd [#allocation6], 4294967264 }
0x123d   :  { %10496 = vsyncpa [#allocation5], 1 }
0x123e   :  { %10497 = vsyncpa [#allocation8], 1 }
0x123f   :  { %10498 = vsyncpa [#allocation11], 1 }
0x1240   :  { %10499 = vsyncpa [#allocation6], 1 }

</bundles_post_ra>
